<compile_context>
chip_gen: v6e
topology: v6e:2x2x1
jax: 0.10.0
libtpu: 0.0.40
codegen_flags: <defaults>
</compile_context>

<pallas_src>
import functools
import math

import jax
import jax.numpy as jnp
from jax import lax
from jax.experimental import pallas as pl
from jax.experimental.pallas import tpu as pltpu

F32 = jnp.float32
BF16 = jnp.bfloat16
EPS = float(jnp.finfo(jnp.float32).eps)          # torch.finfo(float32).eps
TIKHONOV = 0.5 / math.pi
INF_PAD = 128                                    # lane pad for the inference head output


# ----------------------------------------------------------------------------
# small numerics helpers (usable inside and outside kernels)
# ----------------------------------------------------------------------------
def _stable_softplus(x):
    return jnp.maximum(x, 0.0) + jnp.log1p(jnp.exp(-jnp.abs(x)))


def _silu(x):
    return x * jax.nn.sigmoid(x)


def _layer_norm(x, gamma, beta, eps=1e-5):
    mu = jnp.mean(x, axis=-1, keepdims=True)
    var = jnp.mean((x - mu) ** 2, axis=-1, keepdims=True)
    return (x - mu) / jnp.sqrt(var + eps) * gamma + beta


def _lstm_cell_packed(gates, c, width):
    """LSTM cell update for gate-major lane-packed gates [B, 4*width]: each gate
    occupies a contiguous lane block; PyTorch gate order i,f,g,o.  f32 math."""
    i = jax.nn.sigmoid(gates[:, 0:width])
    f = jax.nn.sigmoid(gates[:, width:2 * width])
    g = jnp.tanh(gates[:, 2 * width:3 * width])
    o = jax.nn.sigmoid(gates[:, 3 * width:4 * width])
    c_new = f * c + i * g
    return o * jnp.tanh(c_new), c_new


# ----------------------------------------------------------------------------
# Wrapper-side gate-major packing helpers (run once, outside the jitted forward)
#   packed state lane  = k*H + h            (k = mixture / direction block)
#   packed gate lane   = g*(K*H) + k*H + h  (g in PyTorch order i,f,g,o)
# ----------------------------------------------------------------------------
def _gate_major_block_diag(w_stack):
    """[K, In, 4H] per-block weights -> [K*In, 4*K*H] block-diag, gate-major cols."""
    K, In, G4 = w_stack.shape
    Hh = G4 // 4
    bd = jax.scipy.linalg.block_diag(*[w_stack[k] for k in range(K)])   # [K*In, K*4H]
    return bd.reshape(K * In, K, 4, Hh).transpose(0, 2, 1, 3).reshape(K * In, 4 * K * Hh)


def _gate_major_concat(w_stack):
    """[K, D, 4H] shared-input weights -> [D, 4*K*H] gate-major concat."""
    K, Din, G4 = w_stack.shape
    Hh = G4 // 4
    w = jnp.concatenate([w_stack[k] for k in range(K)], axis=1)         # [D, K*4H]
    return w.reshape(Din, K, 4, Hh).transpose(0, 2, 1, 3).reshape(Din, 4 * K * Hh)


def _gate_major_bias(b_stack):
    """[K, 1, 4H] -> [1, 4*K*H] gate-major."""
    K, _, G4 = b_stack.shape
    Hh = G4 // 4
    return b_stack[:, 0, :].reshape(K, 4, Hh).transpose(1, 0, 2).reshape(1, 4 * K * Hh)


def _pad_cols(a, width):
    if a.shape[1] == width:
        return a
    return jnp.concatenate([a, jnp.zeros((a.shape[0], width - a.shape[1]), a.dtype)], axis=1)


# ----------------------------------------------------------------------------
# The single fused kernel
# ----------------------------------------------------------------------------
def _fused_kernel(inp2_ref, xdata_ref, w512_ref, w256_ref, bias_ref, state_ref,
                  out_ref, bufA, bufB, hin_buf, *, T, B, D, H, O, K):
    W = K * H                    # packed generative lane width (128 at defaults)
    Hd = 2 * H                   # packed inference lane width (fwd|bwd)
    C2 = 2 * (D + O)             # fwd|bwd-stacked inference input width
    P = INF_PAD

    # ---------------- weight / bias views (loaded once, bf16 weights) ----------------
    W1 = w512_ref[0:2 * W, :]                                  # [2W, 4W]  [mean-folded wih1_s ; whh1]
    W2 = w512_ref[2 * W:4 * W, :]                              # [2W, 4W]  [wih2 ; whh2]
    whead_gen = w256_ref[0:W, 0:2 * W]                         # [W, 2W]   [wm_bd | wv_bd]
    whh_inf = w256_ref[W:W + Hd, 0:4 * Hd]                     # [2H, 8H]
    whead_A = w256_ref[W + Hd:W + 2 * Hd, 0:P]                 # [2H, P]   fwd head rows, bwd rows = 0
    whead_B = w256_ref[W + 2 * Hd:W + 3 * Hd, 0:P]             # [2H, P]   bwd head rows, fwd rows = 0
    wg_inf = w256_ref[W + 3 * Hd:W + 3 * Hd + C2, 0:4 * Hd]    # [C2, 8H]

    bg_inf = bias_ref[0:1, 0:4 * Hd]                           # [1, 8H]
    b2c = bias_ref[1:2, 0:4 * W]                               # [1, 4W]
    bhead_gen = bias_ref[2:3, 0:2 * W]                         # [1, 2W]
    bhead_inf = bias_ref[3:4, 0:P]                             # [1, P]

    # ---------------- inference bilstm (fwd|bwd lane-packed, fully unrolled) ----------------
    # hoisted input->gate matmul, both directions at once (bwd half pre-reversed in time)
    xg_inf = jnp.dot(inp2_ref[...], wg_inf, preferred_element_type=F32) + bg_inf   # [T*B, 8H]

    h = jnp.broadcast_to(state_ref[0:1, 0:Hd], (B, Hd))
    c = jnp.broadcast_to(state_ref[1:2, 0:Hd], (B, Hd))
    for t in range(T):
        g = xg_inf[t * B:(t + 1) * B, :] + jnp.dot(
            h.astype(BF16), whh_inf, preferred_element_type=F32)
        h, c = _lstm_cell_packed(g, c, Hd)
        # double-store: bufA row t holds [hf_t | hb_{T-1-t}], bufB row t holds [hf_{T-1-t} | hb_t];
        # the time-misaligned halves are killed by zero weight rows in whead_A / whead_B.
        bufA[t * B:(t + 1) * B, :] = h
        bufB[(T - 1 - t) * B:(T - t) * B, :] = h

    mv_inf = (jnp.dot(bufA[...].astype(BF16), whead_A, preferred_element_type=F32)
              + jnp.dot(bufB[...].astype(BF16), whead_B, preferred_element_type=F32)
              + bhead_inf)                                                        # [T*B, P]
    lane_i = lax.broadcasted_iota(jnp.int32, (T * B, P), 1)
    vmask_i = (lane_i >= H) & (lane_i < 2 * H)
    out_inf = jnp.where(vmask_i, _stable_softplus(mv_inf) + EPS, mv_inf)

    # ---------------- generative rollout (K mixtures lane-packed, mean head folded) ----------------
    init_p = xdata_ref[:, 0:W]                                                    # [B, W]
    xg1 = xdata_ref[:, W:5 * W]                                                   # [B, 4W] (x-gates + all consts)
    h1 = jnp.broadcast_to(state_ref[2:3, :], (B, W))
    c1 = jnp.broadcast_to(state_ref[3:4, :], (B, W))
    h2 = jnp.broadcast_to(state_ref[4:5, :], (B, W))
    c2 = jnp.broadcast_to(state_ref[5:6, :], (B, W))
    b2b = jnp.broadcast_to(b2c, (B, 4 * W))                                       # hoisted broadcast

    hin_buf[0:B, :] = init_p
    hin_prev = init_p
    for t in range(1, T):
        lhs1 = jnp.concatenate([hin_prev, h1], axis=1).astype(BF16)               # [B, 2W]
        g1 = jnp.dot(lhs1, W1, preferred_element_type=F32) + xg1
        h1, c1 = _lstm_cell_packed(g1, c1, W)
        lhs2 = jnp.concatenate([h1, h2], axis=1).astype(BF16)
        g2 = jnp.dot(lhs2, W2, preferred_element_type=F32) + b2b
        h2, c2 = _lstm_cell_packed(g2, c2, W)
        hin_prev = h2
        hin_buf[t * B:(t + 1) * B, :] = h2

    # batched mean + vars heads (off the recurrent chain)
    mv_gen = (jnp.dot(hin_buf[...].astype(BF16), whead_gen, preferred_element_type=F32)
              + bhead_gen)                                                        # [T*B, 2W]
    lane_g = lax.broadcasted_iota(jnp.int32, (T * B, 2 * W), 1)
    out_gen = jnp.where(lane_g >= W, _stable_softplus(mv_gen) + EPS, mv_gen)

    # single lane-dense store: [inf mean|vars|pad (128) | gen mean (W) | gen vars (W)]
    out_ref[...] = jnp.concatenate([out_inf, out_gen], axis=1)


def fused_forward_call(inp2, xdata, w512, w256, bias_slab, state_slab, *, T, B, D, H, O, K):
    W = K * H
    kernel = functools.partial(_fused_kernel, T=T, B=B, D=D, H=H, O=O, K=K)
    return pl.pallas_call(
        kernel,
        out_shape=jax.ShapeDtypeStruct((T * B, INF_PAD + 2 * W), F32),
        scratch_shapes=[pltpu.VMEM((T * B, 2 * H), F32),   # bufA
                        pltpu.VMEM((T * B, 2 * H), F32),   # bufB
                        pltpu.VMEM((T * B, W), F32)],      # hin_buf
    )(inp2, xdata, w512, w256, bias_slab, state_slab)


# ----------------------------------------------------------------------------
# One-time parameter packing (run eagerly once, outside the jitted forward)
# ----------------------------------------------------------------------------
def prepare_params(p, *, D, H, O, K):
    W = K * H
    Hd = 2 * H
    P = INF_PAD
    assert Hd <= P, "inference head pad assumes 2*H <= 128"

    # ---- generative rollout ----
    wm, bm = p['w_mean_g'], p['b_mean_g']
    wv, bv = p['w_vars_g'], p['b_vars_g']
    wih1_s = p['wih1'][:, :H, :]                                   # [K, H, 4H]
    wih1_x = p['wih1'][:, H:, :]                                   # [K, D, 4H]
    # fold the shared mean head into the layer-1 s-weights / constants
    fold_w = jnp.einsum('hj,kjg->khg', wm, wih1_s)                 # hin @ (wm @ Wih1_s)
    fold_b = jnp.einsum('j,kjg->kg', bm[0], wih1_s)[:, None, :]    # bm @ Wih1_s
    W1 = jnp.concatenate([_gate_major_block_diag(fold_w),
                          _gate_major_block_diag(p['whh1'])], axis=0)     # [2W, 4W]
    W2 = jnp.concatenate([_gate_major_block_diag(p['wih2']),
                          _gate_major_block_diag(p['whh2'])], axis=0)     # [2W, 4W]
    w512 = jnp.concatenate([W1, W2], axis=0).astype(BF16)                 # [4W, 4W]

    wih1x_packed = _gate_major_concat(wih1_x).astype(F32)                 # [D, 4W]
    xg1_const = (_gate_major_bias(p['b1']) + _gate_major_bias(fold_b)).astype(F32)

    wm_bd = jax.scipy.linalg.block_diag(*([wm] * K))
    wv_bd = jax.scipy.linalg.block_diag(*([wv] * K))
    whead_gen = jnp.concatenate([wm_bd, wv_bd], axis=1)                   # [W, 2W]
    bhead_gen = jnp.concatenate([jnp.tile(bm, (1, K)), jnp.tile(bv, (1, K))], axis=1)

    # ---- inference bilstm (fwd|bwd packed) ----
    wg_inf = _gate_major_block_diag(jnp.stack([p['wih_f'], p['wih_b']]))  # [2(D+O), 8H]
    bg_inf = _gate_major_bias(jnp.stack([p['b_f'], p['b_b']]))            # [1, 8H]
    whh_inf = _gate_major_block_diag(jnp.stack([p['whh_f'], p['whh_b']])) # [2H, 8H]
    headf = jnp.concatenate([p['wm_f'], p['wv_f'], jnp.zeros((H, P - 2 * H), F32)], axis=1)
    headb = jnp.concatenate([p['wm_b'], p['wv_b'], jnp.zeros((H, P - 2 * H), F32)], axis=1)
    whead_A = jnp.concatenate([headf, jnp.zeros((H, P), F32)], axis=0)    # [2H, P]
    whead_B = jnp.concatenate([jnp.zeros((H, P), F32), headb], axis=0)    # [2H, P]
    bhead_inf = jnp.concatenate([p['bm'], p['bv'], jnp.zeros((1, P - 2 * H), F32)], axis=1)

    # ---- consolidated slabs ----
    LW = max(2 * W, 4 * Hd, P)
    w256 = jnp.concatenate([_pad_cols(whead_gen, LW),
                            _pad_cols(whh_inf, LW),
                            _pad_cols(whead_A, LW),
                            _pad_cols(whead_B, LW),
                            _pad_cols(wg_inf, LW)], axis=0).astype(BF16)

    b2c = _gate_major_bias(p['b2'])
    BL = max(4 * W, 4 * Hd, P)
    bias_slab = jnp.concatenate([_pad_cols(bg_inf, BL),
                                 _pad_cols(b2c, BL),
                                 _pad_cols(bhead_gen, BL),
                                 _pad_cols(bhead_inf, BL)], axis=0).astype(F32)

    ii = p['inf_init']                                                    # [2, 2H]
    h0i = jnp.concatenate([ii[0, :H], ii[1, :H]])
    c0i = jnp.concatenate([ii[0, H:], ii[1, H:]])
    gi = p['gen_init']                                                    # [2K, 2H]
    # NOTE: intentionally mirrors the reference: mixture k reads rows k and k+1
    # of _init_states (consecutive mixtures share a row), matching
    # `self._init_states[i:i+2].chunk(2, dim=-1)`.
    h1_0 = jnp.concatenate([gi[k, :H] for k in range(K)])
    h2_0 = jnp.concatenate([gi[k + 1, :H] for k in range(K)])
    c1_0 = jnp.concatenate([gi[k, H:] for k in range(K)])
    c2_0 = jnp.concatenate([gi[k + 1, H:] for k in range(K)])

    def pad_w(v):
        return v if v.shape[0] == W else jnp.concatenate([v, jnp.zeros((W - v.shape[0],), F32)])

    state_slab = jnp.stack([pad_w(h0i), pad_w(c0i), h1_0, c1_0, h2_0, c2_0]).astype(F32)

    return dict(w512=w512, w256=w256, bias_slab=bias_slab, state_slab=state_slab,
                wih1x_packed=wih1x_packed, xg1_const=xg1_const,
                w_in=p['w_in'], b_in=p['b_in'], ln_g=p['ln_g'], ln_b=p['ln_b'],
                w_em=p['w_em'], b_em=p['b_em'], em_vars=p['em_vars'])


# ----------------------------------------------------------------------------
# Plain-JAX glue reproducing the rest of InferenceNet.forward
# ----------------------------------------------------------------------------
def evaluate_z(prior_mean, prior_vars, posterior_mean, posterior_vars, num_mixtures):
    prior_logits = -math.log(num_mixtures)
    diff = prior_mean - posterior_mean
    logits = -0.5 * jnp.sum(
        jnp.sum(diff ** 2 / prior_vars, axis=-1)
        + jnp.sum(posterior_vars / prior_vars, axis=-1)
        + jnp.sum(jnp.log(prior_vars / posterior_vars), axis=-1),
        axis=-1)
    logits = logits - jnp.max(logits, axis=-1, keepdims=True)
    w = jnp.exp(logits + prior_logits)
    return w / jnp.sum(w, axis=-1, keepdims=True)


def kl_divergence_categorical(log_p, log_q):
    # TODO(synk): helper source not provided upstream; standard categorical KL assumed.
    return jnp.sum(jnp.exp(log_p) * (log_p - log_q), axis=-1)


def linear_gaussian_reconstruction_loss(y, x_vars, y_mean, y_vars, weight):
    # TODO(synk): exact upstream helper unavailable; implemented as the Gaussian NLL
    # of y under N(y_mean, W diag(x_vars) W^T + diag(noise)) per time step.
    O = y.shape[-1]
    cov = jnp.einsum('oh,bth,ph->btop', weight, x_vars, weight)
    if y_vars is None:
        cov = cov + jnp.eye(O, dtype=y.dtype) * TIKHONOV
    else:
        cov = cov + jnp.eye(O, dtype=y.dtype) * y_vars[..., None, :]
    diff = y - y_mean
    if O == 3:
        # closed-form 3x3 adjugate inverse / determinant (pure vectorized VPU math)
        a = cov[..., 0, 0]; b = cov[..., 0, 1]; c = cov[..., 0, 2]
        d = cov[..., 1, 0]; e = cov[..., 1, 1]; f = cov[..., 1, 2]
        g = cov[..., 2, 0]; h = cov[..., 2, 1]; i = cov[..., 2, 2]
        A00 = e * i - f * h; A01 = c * h - b * i; A02 = b * f - c * e
        A10 = f * g - d * i; A11 = a * i - c * g; A12 = c * d - a * f
        A20 = d * h - e * g; A21 = b * g - a * h; A22 = a * e - b * d
        det = a * A00 + b * A10 + c * A20
        d0 = diff[..., 0]; d1 = diff[..., 1]; d2 = diff[..., 2]
        quad = (d0 * (A00 * d0 + A01 * d1 + A02 * d2)
                + d1 * (A10 * d0 + A11 * d1 + A12 * d2)
                + d2 * (A20 * d0 + A21 * d1 + A22 * d2))
        maha = quad / det
        logdet = jnp.log(det)
    else:
        sol = jnp.linalg.solve(cov, diff[..., None])[..., 0]
        maha = jnp.sum(diff * sol, axis=-1)
        _, logdet = jnp.linalg.slogdet(cov)
    return 0.5 * (maha + logdet + O * math.log(2.0 * math.pi))   # [B, T]


def inference_net_forward(pp, x, y, *, D, H, O, K, train_variance=False):
    B = x.shape[0]
    T = y.shape[1]
    W = K * H
    P = INF_PAD

    y_diff = jnp.concatenate([y[:, :1, :], jnp.diff(y, axis=1)], axis=1)

    # ---------- data-dependent kernel inputs ----------
    inp = jnp.concatenate([jnp.broadcast_to(x[:, None, :], (B, T, D)), y], axis=-1)  # [B,T,D+O]
    inp_t = jnp.transpose(inp, (1, 0, 2))                                            # [T,B,D+O]
    inp2 = jnp.concatenate([inp_t, inp_t[::-1]], axis=-1).reshape(
        T * B, 2 * (D + O)).astype(BF16)                                             # [T*B, 2(D+O)]

    init_state = _silu(_layer_norm(x @ pp['w_in'] + pp['b_in'], pp['ln_g'], pp['ln_b']))
    init_packed = jnp.tile(init_state, (1, K)).astype(F32)                           # [B, W]
    xg1_total = (x @ pp['wih1x_packed'] + pp['xg1_const']).astype(F32)               # [B, 4W]
    xdata = jnp.concatenate([init_packed, xg1_total], axis=1)                        # [B, 5W]

    # ---------- fused Pallas kernel: q(s|x,y) and p(s|x,z) ----------
    out = fused_forward_call(inp2, xdata, pp['w512'], pp['w256'],
                             pp['bias_slab'], pp['state_slab'],
                             T=T, B=B, D=D, H=H, O=O, K=K)                           # [T*B, P+2W]

    q_s_mean = jnp.transpose(out[:, 0:H].reshape(T, B, H), (1, 0, 2))                # [B, T, H]
    q_s_vars = jnp.transpose(out[:, H:2 * H].reshape(T, B, H), (1, 0, 2))
    p_s_mean = jnp.transpose(out[:, P:P + W].reshape(T, B, K, H), (1, 2, 0, 3))      # [B, K, T, H]
    p_s_vars = jnp.transpose(out[:, P + W:P + 2 * W].reshape(T, B, K, H), (1, 2, 0, 3))

    # ---------- emission y | s ----------
    cat_sx = jnp.concatenate(
        [q_s_mean, jnp.broadcast_to(x[:, None, :], (B, T, D))], axis=-1)
    y_mean = cat_sx @ pp['w_em'].T + pp['b_em']                                      # [B, T, O]
    y_vars_vec = jnp.square(pp['em_vars']) + TIKHONOV                                # [O]
    y_vars_full = jnp.broadcast_to(y_vars_vec, y_mean.shape)

    if not train_variance:
        # matches the reference: p_s_vars replaced by ones before evaluate_z and
        # the Gaussian KL; y_vars dropped from the reconstruction term.
        p_s_vars = jnp.ones_like(p_s_vars)
        y_vars_used = None
    else:
        y_vars_used = y_vars_full

    rec = linear_gaussian_reconstruction_loss(
        y_diff, q_s_vars, y_mean, y_vars_used, pp['w_em'][:, :H]).sum(axis=-1)

    q_mean_e = jnp.broadcast_to(q_s_mean[:, None], (B, K, T, H))
    q_vars_e = jnp.broadcast_to(q_s_vars[:, None], (B, K, T, H))

    q_z = lax.stop_gradient(
        evaluate_z(p_s_mean, p_s_vars, q_mean_e, q_vars_e, K))                       # [B, K]
    kl_div_z = kl_divergence_categorical(
        jnp.log(q_z + 1e-10), jnp.zeros_like(q_z) - math.log(K))                     # [B]

    kl = 0.5 * (jnp.sum(q_vars_e / p_s_vars, axis=-1)
                + jnp.sum((p_s_mean - q_mean_e) ** 2 / p_s_vars, axis=-1)
                - H
                + jnp.sum(jnp.log(p_s_vars), axis=-1)
                - jnp.sum(jnp.log(q_vars_e), axis=-1))                               # [B, K, T]
    kl_div_s = jnp.sum(q_z * jnp.sum(kl, axis=-1), axis=-1)                          # [B]

    mean_diff = jnp.mean(jnp.linalg.norm(
        y[..., 0:2] - jnp.cumsum(y_mean, axis=-2)[..., 0:2], axis=-1), axis=-1)

    return {'mean_diff': mean_diff,
            'reconstruction_loss': rec,
            'kl_div_s': kl_div_s,
            'kl_div_z': kl_div_z,
            'z_logits': jnp.log(q_z + 1e-10)}


# ----------------------------------------------------------------------------
# Deterministic parameter construction (synthetic, no checkpoint load)
# ----------------------------------------------------------------------------
def init_params(key, *, D, H, O, K):
    ks = iter(jax.random.split(key, 40))

    def nrm(shape, scale):
        return (scale * jax.random.normal(next(ks), shape)).astype(F32)

    p = {}
    # GenerativeNet: input head + layernorm
    p['w_in'] = nrm((D, H), 1.0 / math.sqrt(D))
    p['b_in'] = jnp.zeros((H,), F32)
    p['ln_g'] = jnp.ones((H,), F32)
    p['ln_b'] = jnp.zeros((H,), F32)
    # GenerativeNet: per-mixture stacked 2-layer LSTMs.
    # NOTE: a single summed bias per gate (b_ih + b_hh) is used, as when loading
    # real PyTorch checkpoints (both zero here).
    p['wih1'] = nrm((K, H + D, 4 * H), 1.0 / math.sqrt(H + D))
    p['whh1'] = nrm((K, H, 4 * H), 1.0 / math.sqrt(H))
    p['b1'] = jnp.zeros((K, 1, 4 * H), F32)
    p['wih2'] = nrm((K, H, 4 * H), 1.0 / math.sqrt(H))
    p['whh2'] = nrm((K, H, 4 * H), 1.0 / math.sqrt(H))
    p['b2'] = jnp.zeros((K, 1, 4 * H), F32)
    # GenerativeNet: shared mean / vars heads
    p['w_mean_g'] = nrm((H, H), 0.05)
    p['b_mean_g'] = jnp.zeros((1, H), F32)
    p['w_vars_g'] = nrm((H, H), 0.05)
    p['b_vars_g'] = jnp.zeros((1, H), F32)
    # GenerativeNet: emission
    p['w_em'] = nrm((O, D + H), 0.05)       # torch layout [out, in]; cols 0:H -> s
    p['b_em'] = jnp.zeros((O,), F32)
    p['em_vars'] = jnp.zeros((O,), F32)
    p['gen_init'] = nrm((2 * K, 2 * H), 0.5)
    # InferenceNet: bidirectional LSTM
    p['wih_f'] = nrm((D + O, 4 * H), 1.0 / math.sqrt(D + O))
    p['whh_f'] = nrm((H, 4 * H), 1.0 / math.sqrt(H))
    p['b_f'] = jnp.zeros((1, 4 * H), F32)
    p['wih_b'] = nrm((D + O, 4 * H), 1.0 / math.sqrt(D + O))
    p['whh_b'] = nrm((H, 4 * H), 1.0 / math.sqrt(H))
    p['b_b'] = jnp.zeros((1, 4 * H), F32)
    # InferenceNet: heads over concat([fwd, bwd]) split into fwd/bwd halves
    p['wm_f'] = nrm((H, H), 0.05)
    p['wm_b'] = nrm((H, H), 0.05)
    p['bm'] = jnp.zeros((1, H), F32)
    p['wv_f'] = nrm((H, H), 0.05)
    p['wv_b'] = nrm((H, H), 0.05)
    p['bv'] = jnp.zeros((1, H), F32)
    p['inf_init'] = nrm((2, 2 * H), 0.5)
    # NOTE: _z_proxy is not used by InferenceNet.forward, so it is omitted.
    return p


if __name__ == "__main__":
    B, D, H, O, K, T = 2, 8, 32, 3, 4, 8   # batch, input_dim, hidden, output_dim, mixtures, horizon

    key = jax.random.PRNGKey(0)
    k_param, k_x, k_y = jax.random.split(key, 3)
    params = init_params(k_param, D=D, H=H, O=O, K=K)
    packed = prepare_params(params, D=D, H=H, O=O, K=K)   # one-time packing, outside jit
    x = jax.random.normal(k_x, (B, D), dtype=F32)
    y = jax.random.normal(k_y, (B, T, O), dtype=F32)

    fwd = jax.jit(functools.partial(inference_net_forward,
                                    D=D, H=H, O=O, K=K, train_variance=False))
    out = fwd(packed, x, y)
    out = jax.block_until_ready(out)

    expected_shapes = {
        'mean_diff': (B,),
        'reconstruction_loss': (B,),
        'kl_div_s': (B,),
        'kl_div_z': (B,),
        'z_logits': (B, K),
    }
    ok = True
    for name, shape in expected_shapes.items():
        v = out[name]
        if tuple(v.shape) != shape or not bool(jnp.all(jnp.isfinite(v))):
            ok = False
    # q_z normalization sanity (mirrors the torch assert)
    q_z = jnp.exp(out['z_logits'])
    if not bool(jnp.allclose(jnp.sum(q_z, axis=-1), 1.0, atol=1e-4)):
        ok = False

    if ok:
        print("KERNEL_OK")
    else:
        raise SystemExit("kernel output check failed")
</pallas_src>

<mosaic_0001>
module attributes {stable_mosaic.version = 11 : i64} {
  func.func @_fused_kernel(%arg0: memref<16x22xbf16, #tpu.memory_space<vmem>>, %arg1: memref<2x640xf32, #tpu.memory_space<vmem>>, %arg2: memref<512x512xbf16, #tpu.memory_space<vmem>>, %arg3: memref<342x256xbf16, #tpu.memory_space<vmem>>, %arg4: memref<4x512xf32, #tpu.memory_space<vmem>>, %arg5: memref<6x128xf32, #tpu.memory_space<vmem>>, %arg6: memref<16x384xf32, #tpu.memory_space<vmem>>, %arg7: memref<16x64xf32, #tpu.memory_space<vmem>>, %arg8: memref<16x64xf32, #tpu.memory_space<vmem>>, %arg9: memref<16x128xf32, #tpu.memory_space<vmem>>) attributes {dimension_semantics = [], scalar_prefetch = 0 : i64, scratch_operands = 3 : i64, tpu.core_type = #tpu.core_type<tc>} {
    %c0 = arith.constant 0 : index
    %c0_0 = arith.constant 0 : index
    %0 = vector.load %arg2[%c0, %c0_0] : memref<512x512xbf16, #tpu.memory_space<vmem>>, vector<256x512xbf16>
    %c256 = arith.constant 256 : index
    %c0_1 = arith.constant 0 : index
    %1 = vector.load %arg2[%c256, %c0_1] : memref<512x512xbf16, #tpu.memory_space<vmem>>, vector<256x512xbf16>
    %c0_2 = arith.constant 0 : index
    %c0_3 = arith.constant 0 : index
    %2 = vector.load %arg3[%c0_2, %c0_3] : memref<342x256xbf16, #tpu.memory_space<vmem>>, vector<128x256xbf16>
    %c128 = arith.constant 128 : index
    %c0_4 = arith.constant 0 : index
    %3 = vector.load %arg3[%c128, %c0_4] : memref<342x256xbf16, #tpu.memory_space<vmem>>, vector<64x256xbf16>
    %c192 = arith.constant 192 : index
    %c0_5 = arith.constant 0 : index
    %4 = vector.load %arg3[%c192, %c0_5] : memref<342x256xbf16, #tpu.memory_space<vmem>>, vector<64x128xbf16>
    %c256_6 = arith.constant 256 : index
    %c0_7 = arith.constant 0 : index
    %5 = vector.load %arg3[%c256_6, %c0_7] : memref<342x256xbf16, #tpu.memory_space<vmem>>, vector<64x128xbf16>
    %c320 = arith.constant 320 : index
    %c0_8 = arith.constant 0 : index
    %6 = vector.load %arg3[%c320, %c0_8] : memref<342x256xbf16, #tpu.memory_space<vmem>>, vector<22x256xbf16>
    %c0_9 = arith.constant 0 : index
    %c0_10 = arith.constant 0 : index
    %7 = vector.load %arg4[%c0_9, %c0_10] : memref<4x512xf32, #tpu.memory_space<vmem>>, vector<1x256xf32>
    %c1 = arith.constant 1 : index
    %c0_11 = arith.constant 0 : index
    %8 = vector.load %arg4[%c1, %c0_11] : memref<4x512xf32, #tpu.memory_space<vmem>>, vector<1x512xf32>
    %c2 = arith.constant 2 : index
    %c0_12 = arith.constant 0 : index
    %9 = vector.load %arg4[%c2, %c0_12] : memref<4x512xf32, #tpu.memory_space<vmem>>, vector<1x256xf32>
    %c3 = arith.constant 3 : index
    %c0_13 = arith.constant 0 : index
    %10 = vector.load %arg4[%c3, %c0_13] : memref<4x512xf32, #tpu.memory_space<vmem>>, vector<1x128xf32>
    %c0_14 = arith.constant 0 : index
    %c0_15 = arith.constant 0 : index
    %11 = vector.load %arg0[%c0_14, %c0_15] : memref<16x22xbf16, #tpu.memory_space<vmem>>, vector<16x22xbf16>
    %cst = arith.constant dense<0.000000e+00> : vector<16x256xf32>
    %12 = tpu.matmul %11, %6, %cst {dimension_numbers = #tpu.dot_dimension_numbers<[1], [0], [0], [1], [0, 0, 1, 1], [], []>} : vector<16x22xbf16>, vector<22x256xbf16>, vector<16x256xf32> -> vector<16x256xf32>
    %13 = vector.broadcast %7 : vector<1x256xf32> to vector<16x256xf32>
    %14 = arith.addf %12, %13 : vector<16x256xf32>
    %c0_16 = arith.constant 0 : index
    %c0_17 = arith.constant 0 : index
    %15 = vector.load %arg5[%c0_16, %c0_17] : memref<6x128xf32, #tpu.memory_space<vmem>>, vector<1x64xf32>
    %16 = vector.shape_cast %15 : vector<1x64xf32> to vector<1x64xf32>
    %17 = vector.broadcast %16 : vector<1x64xf32> to vector<2x64xf32>
    %c1_18 = arith.constant 1 : index
    %c0_19 = arith.constant 0 : index
    %18 = vector.load %arg5[%c1_18, %c0_19] : memref<6x128xf32, #tpu.memory_space<vmem>>, vector<1x64xf32>
    %19 = vector.shape_cast %18 : vector<1x64xf32> to vector<1x64xf32>
    %20 = vector.broadcast %19 : vector<1x64xf32> to vector<2x64xf32>
    %21 = vector.extract_strided_slice %14 {offsets = [0, 0], sizes = [2, 256], strides = [1, 1]} : vector<16x256xf32> to vector<2x256xf32>
    %22 = arith.truncf %17 : vector<2x64xf32> to vector<2x64xbf16>
    %cst_20 = arith.constant dense<0.000000e+00> : vector<2x256xf32>
    %23 = tpu.matmul %22, %3, %cst_20 {dimension_numbers = #tpu.dot_dimension_numbers<[1], [0], [0], [1], [0, 0, 1, 1], [], []>} : vector<2x64xbf16>, vector<64x256xbf16>, vector<2x256xf32> -> vector<2x256xf32>
    %24 = arith.addf %21, %23 : vector<2x256xf32>
    %25 = vector.extract_strided_slice %24 {offsets = [0, 0], sizes = [2, 64], strides = [1, 1]} : vector<2x256xf32> to vector<2x64xf32>
    %26 = arith.negf %25 : vector<2x64xf32>
    %27 = math.exp %26 : vector<2x64xf32>
    %cst_21 = arith.constant 1.000000e+00 : f32
    %28 = vector.broadcast %cst_21 : f32 to vector<2x64xf32>
    %29 = arith.addf %28, %27 : vector<2x64xf32>
    %30 = arith.divf %28, %29 : vector<2x64xf32>
    %31 = vector.extract_strided_slice %24 {offsets = [0, 64], sizes = [2, 64], strides = [1, 1]} : vector<2x256xf32> to vector<2x64xf32>
    %32 = arith.negf %31 : vector<2x64xf32>
    %33 = math.exp %32 : vector<2x64xf32>
    %cst_22 = arith.constant 1.000000e+00 : f32
    %34 = vector.broadcast %cst_22 : f32 to vector<2x64xf32>
    %35 = arith.addf %34, %33 : vector<2x64xf32>
    %36 = arith.divf %34, %35 : vector<2x64xf32>
    %37 = vector.extract_strided_slice %24 {offsets = [0, 128], sizes = [2, 64], strides = [1, 1]} : vector<2x256xf32> to vector<2x64xf32>
    %38 = math.tanh %37 : vector<2x64xf32>
    %39 = vector.extract_strided_slice %24 {offsets = [0, 192], sizes = [2, 64], strides = [1, 1]} : vector<2x256xf32> to vector<2x64xf32>
    %40 = arith.negf %39 : vector<2x64xf32>
    %41 = math.exp %40 : vector<2x64xf32>
    %cst_23 = arith.constant 1.000000e+00 : f32
    %42 = vector.broadcast %cst_23 : f32 to vector<2x64xf32>
    %43 = arith.addf %42, %41 : vector<2x64xf32>
    %44 = arith.divf %42, %43 : vector<2x64xf32>
    %45 = arith.mulf %36, %20 : vector<2x64xf32>
    %46 = arith.mulf %30, %38 : vector<2x64xf32>
    %47 = arith.addf %45, %46 : vector<2x64xf32>
    %48 = math.tanh %47 : vector<2x64xf32>
    %49 = arith.mulf %44, %48 : vector<2x64xf32>
    %c0_24 = arith.constant 0 : index
    %c0_25 = arith.constant 0 : index
    %50 = vector.load %arg7[%c0_24, %c0_25] : memref<16x64xf32, #tpu.memory_space<vmem>>, vector<2x64xf32>
    tpu.vector_store %arg7[%c0_24, %c0_25], %49 {strides = array<i32>} : memref<16x64xf32, #tpu.memory_space<vmem>>, vector<2x64xf32>,
    %c14 = arith.constant 14 : index
    %c0_26 = arith.constant 0 : index
    %51 = vector.load %arg8[%c14, %c0_26] : memref<16x64xf32, #tpu.memory_space<vmem>>, vector<2x64xf32>
    tpu.vector_store %arg8[%c14, %c0_26], %49 {strides = array<i32>} : memref<16x64xf32, #tpu.memory_space<vmem>>, vector<2x64xf32>,
    %52 = vector.extract_strided_slice %14 {offsets = [2, 0], sizes = [2, 256], strides = [1, 1]} : vector<16x256xf32> to vector<2x256xf32>
    %53 = arith.truncf %49 : vector<2x64xf32> to vector<2x64xbf16>
    %cst_27 = arith.constant dense<0.000000e+00> : vector<2x256xf32>
    %54 = tpu.matmul %53, %3, %cst_27 {dimension_numbers = #tpu.dot_dimension_numbers<[1], [0], [0], [1], [0, 0, 1, 1], [], []>} : vector<2x64xbf16>, vector<64x256xbf16>, vector<2x256xf32> -> vector<2x256xf32>
    %55 = arith.addf %52, %54 : vector<2x256xf32>
    %56 = vector.extract_strided_slice %55 {offsets = [0, 0], sizes = [2, 64], strides = [1, 1]} : vector<2x256xf32> to vector<2x64xf32>
    %57 = arith.negf %56 : vector<2x64xf32>
    %58 = math.exp %57 : vector<2x64xf32>
    %cst_28 = arith.constant 1.000000e+00 : f32
    %59 = vector.broadcast %cst_28 : f32 to vector<2x64xf32>
    %60 = arith.addf %59, %58 : vector<2x64xf32>
    %61 = arith.divf %59, %60 : vector<2x64xf32>
    %62 = vector.extract_strided_slice %55 {offsets = [0, 64], sizes = [2, 64], strides = [1, 1]} : vector<2x256xf32> to vector<2x64xf32>
    %63 = arith.negf %62 : vector<2x64xf32>
    %64 = math.exp %63 : vector<2x64xf32>
    %cst_29 = arith.constant 1.000000e+00 : f32
    %65 = vector.broadcast %cst_29 : f32 to vector<2x64xf32>
    %66 = arith.addf %65, %64 : vector<2x64xf32>
    %67 = arith.divf %65, %66 : vector<2x64xf32>
    %68 = vector.extract_strided_slice %55 {offsets = [0, 128], sizes = [2, 64], strides = [1, 1]} : vector<2x256xf32> to vector<2x64xf32>
    %69 = math.tanh %68 : vector<2x64xf32>
    %70 = vector.extract_strided_slice %55 {offsets = [0, 192], sizes = [2, 64], strides = [1, 1]} : vector<2x256xf32> to vector<2x64xf32>
    %71 = arith.negf %70 : vector<2x64xf32>
    %72 = math.exp %71 : vector<2x64xf32>
    %cst_30 = arith.constant 1.000000e+00 : f32
    %73 = vector.broadcast %cst_30 : f32 to vector<2x64xf32>
    %74 = arith.addf %73, %72 : vector<2x64xf32>
    %75 = arith.divf %73, %74 : vector<2x64xf32>
    %76 = arith.mulf %67, %47 : vector<2x64xf32>
    %77 = arith.mulf %61, %69 : vector<2x64xf32>
    %78 = arith.addf %76, %77 : vector<2x64xf32>
    %79 = math.tanh %78 : vector<2x64xf32>
    %80 = arith.mulf %75, %79 : vector<2x64xf32>
    %c2_31 = arith.constant 2 : index
    %c0_32 = arith.constant 0 : index
    %81 = vector.load %arg7[%c2_31, %c0_32] : memref<16x64xf32, #tpu.memory_space<vmem>>, vector<2x64xf32>
    tpu.vector_store %arg7[%c2_31, %c0_32], %80 {strides = array<i32>} : memref<16x64xf32, #tpu.memory_space<vmem>>, vector<2x64xf32>,
    %c12 = arith.constant 12 : index
    %c0_33 = arith.constant 0 : index
    %82 = vector.load %arg8[%c12, %c0_33] : memref<16x64xf32, #tpu.memory_space<vmem>>, vector<2x64xf32>
    tpu.vector_store %arg8[%c12, %c0_33], %80 {strides = array<i32>} : memref<16x64xf32, #tpu.memory_space<vmem>>, vector<2x64xf32>,
    %83 = vector.extract_strided_slice %14 {offsets = [4, 0], sizes = [2, 256], strides = [1, 1]} : vector<16x256xf32> to vector<2x256xf32>
    %84 = arith.truncf %80 : vector<2x64xf32> to vector<2x64xbf16>
    %cst_34 = arith.constant dense<0.000000e+00> : vector<2x256xf32>
    %85 = tpu.matmul %84, %3, %cst_34 {dimension_numbers = #tpu.dot_dimension_numbers<[1], [0], [0], [1], [0, 0, 1, 1], [], []>} : vector<2x64xbf16>, vector<64x256xbf16>, vector<2x256xf32> -> vector<2x256xf32>
    %86 = arith.addf %83, %85 : vector<2x256xf32>
    %87 = vector.extract_strided_slice %86 {offsets = [0, 0], sizes = [2, 64], strides = [1, 1]} : vector<2x256xf32> to vector<2x64xf32>
    %88 = arith.negf %87 : vector<2x64xf32>
    %89 = math.exp %88 : vector<2x64xf32>
    %cst_35 = arith.constant 1.000000e+00 : f32
    %90 = vector.broadcast %cst_35 : f32 to vector<2x64xf32>
    %91 = arith.addf %90, %89 : vector<2x64xf32>
    %92 = arith.divf %90, %91 : vector<2x64xf32>
    %93 = vector.extract_strided_slice %86 {offsets = [0, 64], sizes = [2, 64], strides = [1, 1]} : vector<2x256xf32> to vector<2x64xf32>
    %94 = arith.negf %93 : vector<2x64xf32>
    %95 = math.exp %94 : vector<2x64xf32>
    %cst_36 = arith.constant 1.000000e+00 : f32
    %96 = vector.broadcast %cst_36 : f32 to vector<2x64xf32>
    %97 = arith.addf %96, %95 : vector<2x64xf32>
    %98 = arith.divf %96, %97 : vector<2x64xf32>
    %99 = vector.extract_strided_slice %86 {offsets = [0, 128], sizes = [2, 64], strides = [1, 1]} : vector<2x256xf32> to vector<2x64xf32>
    %100 = math.tanh %99 : vector<2x64xf32>
    %101 = vector.extract_strided_slice %86 {offsets = [0, 192], sizes = [2, 64], strides = [1, 1]} : vector<2x256xf32> to vector<2x64xf32>
    %102 = arith.negf %101 : vector<2x64xf32>
    %103 = math.exp %102 : vector<2x64xf32>
    %cst_37 = arith.constant 1.000000e+00 : f32
    %104 = vector.broadcast %cst_37 : f32 to vector<2x64xf32>
    %105 = arith.addf %104, %103 : vector<2x64xf32>
    %106 = arith.divf %104, %105 : vector<2x64xf32>
    %107 = arith.mulf %98, %78 : vector<2x64xf32>
    %108 = arith.mulf %92, %100 : vector<2x64xf32>
    %109 = arith.addf %107, %108 : vector<2x64xf32>
    %110 = math.tanh %109 : vector<2x64xf32>
    %111 = arith.mulf %106, %110 : vector<2x64xf32>
    %c4 = arith.constant 4 : index
    %c0_38 = arith.constant 0 : index
    %112 = vector.load %arg7[%c4, %c0_38] : memref<16x64xf32, #tpu.memory_space<vmem>>, vector<2x64xf32>
    tpu.vector_store %arg7[%c4, %c0_38], %111 {strides = array<i32>} : memref<16x64xf32, #tpu.memory_space<vmem>>, vector<2x64xf32>,
    %c10 = arith.constant 10 : index
    %c0_39 = arith.constant 0 : index
    %113 = vector.load %arg8[%c10, %c0_39] : memref<16x64xf32, #tpu.memory_space<vmem>>, vector<2x64xf32>
    tpu.vector_store %arg8[%c10, %c0_39], %111 {strides = array<i32>} : memref<16x64xf32, #tpu.memory_space<vmem>>, vector<2x64xf32>,
    %114 = vector.extract_strided_slice %14 {offsets = [6, 0], sizes = [2, 256], strides = [1, 1]} : vector<16x256xf32> to vector<2x256xf32>
    %115 = arith.truncf %111 : vector<2x64xf32> to vector<2x64xbf16>
    %cst_40 = arith.constant dense<0.000000e+00> : vector<2x256xf32>
    %116 = tpu.matmul %115, %3, %cst_40 {dimension_numbers = #tpu.dot_dimension_numbers<[1], [0], [0], [1], [0, 0, 1, 1], [], []>} : vector<2x64xbf16>, vector<64x256xbf16>, vector<2x256xf32> -> vector<2x256xf32>
    %117 = arith.addf %114, %116 : vector<2x256xf32>
    %118 = vector.extract_strided_slice %117 {offsets = [0, 0], sizes = [2, 64], strides = [1, 1]} : vector<2x256xf32> to vector<2x64xf32>
    %119 = arith.negf %118 : vector<2x64xf32>
    %120 = math.exp %119 : vector<2x64xf32>
    %cst_41 = arith.constant 1.000000e+00 : f32
    %121 = vector.broadcast %cst_41 : f32 to vector<2x64xf32>
    %122 = arith.addf %121, %120 : vector<2x64xf32>
    %123 = arith.divf %121, %122 : vector<2x64xf32>
    %124 = vector.extract_strided_slice %117 {offsets = [0, 64], sizes = [2, 64], strides = [1, 1]} : vector<2x256xf32> to vector<2x64xf32>
    %125 = arith.negf %124 : vector<2x64xf32>
    %126 = math.exp %125 : vector<2x64xf32>
    %cst_42 = arith.constant 1.000000e+00 : f32
    %127 = vector.broadcast %cst_42 : f32 to vector<2x64xf32>
    %128 = arith.addf %127, %126 : vector<2x64xf32>
    %129 = arith.divf %127, %128 : vector<2x64xf32>
    %130 = vector.extract_strided_slice %117 {offsets = [0, 128], sizes = [2, 64], strides = [1, 1]} : vector<2x256xf32> to vector<2x64xf32>
    %131 = math.tanh %130 : vector<2x64xf32>
    %132 = vector.extract_strided_slice %117 {offsets = [0, 192], sizes = [2, 64], strides = [1, 1]} : vector<2x256xf32> to vector<2x64xf32>
    %133 = arith.negf %132 : vector<2x64xf32>
    %134 = math.exp %133 : vector<2x64xf32>
    %cst_43 = arith.constant 1.000000e+00 : f32
    %135 = vector.broadcast %cst_43 : f32 to vector<2x64xf32>
    %136 = arith.addf %135, %134 : vector<2x64xf32>
    %137 = arith.divf %135, %136 : vector<2x64xf32>
    %138 = arith.mulf %129, %109 : vector<2x64xf32>
    %139 = arith.mulf %123, %131 : vector<2x64xf32>
    %140 = arith.addf %138, %139 : vector<2x64xf32>
    %141 = math.tanh %140 : vector<2x64xf32>
    %142 = arith.mulf %137, %141 : vector<2x64xf32>
    %c6 = arith.constant 6 : index
    %c0_44 = arith.constant 0 : index
    %143 = vector.load %arg7[%c6, %c0_44] : memref<16x64xf32, #tpu.memory_space<vmem>>, vector<2x64xf32>
    tpu.vector_store %arg7[%c6, %c0_44], %142 {strides = array<i32>} : memref<16x64xf32, #tpu.memory_space<vmem>>, vector<2x64xf32>,
    %c8 = arith.constant 8 : index
    %c0_45 = arith.constant 0 : index
    %144 = vector.load %arg8[%c8, %c0_45] : memref<16x64xf32, #tpu.memory_space<vmem>>, vector<2x64xf32>
    tpu.vector_store %arg8[%c8, %c0_45], %142 {strides = array<i32>} : memref<16x64xf32, #tpu.memory_space<vmem>>, vector<2x64xf32>,
    %145 = vector.extract_strided_slice %14 {offsets = [8, 0], sizes = [2, 256], strides = [1, 1]} : vector<16x256xf32> to vector<2x256xf32>
    %146 = arith.truncf %142 : vector<2x64xf32> to vector<2x64xbf16>
    %cst_46 = arith.constant dense<0.000000e+00> : vector<2x256xf32>
    %147 = tpu.matmul %146, %3, %cst_46 {dimension_numbers = #tpu.dot_dimension_numbers<[1], [0], [0], [1], [0, 0, 1, 1], [], []>} : vector<2x64xbf16>, vector<64x256xbf16>, vector<2x256xf32> -> vector<2x256xf32>
    %148 = arith.addf %145, %147 : vector<2x256xf32>
    %149 = vector.extract_strided_slice %148 {offsets = [0, 0], sizes = [2, 64], strides = [1, 1]} : vector<2x256xf32> to vector<2x64xf32>
    %150 = arith.negf %149 : vector<2x64xf32>
    %151 = math.exp %150 : vector<2x64xf32>
    %cst_47 = arith.constant 1.000000e+00 : f32
    %152 = vector.broadcast %cst_47 : f32 to vector<2x64xf32>
    %153 = arith.addf %152, %151 : vector<2x64xf32>
    %154 = arith.divf %152, %153 : vector<2x64xf32>
    %155 = vector.extract_strided_slice %148 {offsets = [0, 64], sizes = [2, 64], strides = [1, 1]} : vector<2x256xf32> to vector<2x64xf32>
    %156 = arith.negf %155 : vector<2x64xf32>
    %157 = math.exp %156 : vector<2x64xf32>
    %cst_48 = arith.constant 1.000000e+00 : f32
    %158 = vector.broadcast %cst_48 : f32 to vector<2x64xf32>
    %159 = arith.addf %158, %157 : vector<2x64xf32>
    %160 = arith.divf %158, %159 : vector<2x64xf32>
    %161 = vector.extract_strided_slice %148 {offsets = [0, 128], sizes = [2, 64], strides = [1, 1]} : vector<2x256xf32> to vector<2x64xf32>
    %162 = math.tanh %161 : vector<2x64xf32>
    %163 = vector.extract_strided_slice %148 {offsets = [0, 192], sizes = [2, 64], strides = [1, 1]} : vector<2x256xf32> to vector<2x64xf32>
    %164 = arith.negf %163 : vector<2x64xf32>
    %165 = math.exp %164 : vector<2x64xf32>
    %cst_49 = arith.constant 1.000000e+00 : f32
    %166 = vector.broadcast %cst_49 : f32 to vector<2x64xf32>
    %167 = arith.addf %166, %165 : vector<2x64xf32>
    %168 = arith.divf %166, %167 : vector<2x64xf32>
    %169 = arith.mulf %160, %140 : vector<2x64xf32>
    %170 = arith.mulf %154, %162 : vector<2x64xf32>
    %171 = arith.addf %169, %170 : vector<2x64xf32>
    %172 = math.tanh %171 : vector<2x64xf32>
    %173 = arith.mulf %168, %172 : vector<2x64xf32>
    %c8_50 = arith.constant 8 : index
    %c0_51 = arith.constant 0 : index
    %174 = vector.load %arg7[%c8_50, %c0_51] : memref<16x64xf32, #tpu.memory_space<vmem>>, vector<2x64xf32>
    tpu.vector_store %arg7[%c8_50, %c0_51], %173 {strides = array<i32>} : memref<16x64xf32, #tpu.memory_space<vmem>>, vector<2x64xf32>,
    %c6_52 = arith.constant 6 : index
    %c0_53 = arith.constant 0 : index
    %175 = vector.load %arg8[%c6_52, %c0_53] : memref<16x64xf32, #tpu.memory_space<vmem>>, vector<2x64xf32>
    tpu.vector_store %arg8[%c6_52, %c0_53], %173 {strides = array<i32>} : memref<16x64xf32, #tpu.memory_space<vmem>>, vector<2x64xf32>,
    %176 = vector.extract_strided_slice %14 {offsets = [10, 0], sizes = [2, 256], strides = [1, 1]} : vector<16x256xf32> to vector<2x256xf32>
    %177 = arith.truncf %173 : vector<2x64xf32> to vector<2x64xbf16>
    %cst_54 = arith.constant dense<0.000000e+00> : vector<2x256xf32>
    %178 = tpu.matmul %177, %3, %cst_54 {dimension_numbers = #tpu.dot_dimension_numbers<[1], [0], [0], [1], [0, 0, 1, 1], [], []>} : vector<2x64xbf16>, vector<64x256xbf16>, vector<2x256xf32> -> vector<2x256xf32>
    %179 = arith.addf %176, %178 : vector<2x256xf32>
    %180 = vector.extract_strided_slice %179 {offsets = [0, 0], sizes = [2, 64], strides = [1, 1]} : vector<2x256xf32> to vector<2x64xf32>
    %181 = arith.negf %180 : vector<2x64xf32>
    %182 = math.exp %181 : vector<2x64xf32>
    %cst_55 = arith.constant 1.000000e+00 : f32
    %183 = vector.broadcast %cst_55 : f32 to vector<2x64xf32>
    %184 = arith.addf %183, %182 : vector<2x64xf32>
    %185 = arith.divf %183, %184 : vector<2x64xf32>
    %186 = vector.extract_strided_slice %179 {offsets = [0, 64], sizes = [2, 64], strides = [1, 1]} : vector<2x256xf32> to vector<2x64xf32>
    %187 = arith.negf %186 : vector<2x64xf32>
    %188 = math.exp %187 : vector<2x64xf32>
    %cst_56 = arith.constant 1.000000e+00 : f32
    %189 = vector.broadcast %cst_56 : f32 to vector<2x64xf32>
    %190 = arith.addf %189, %188 : vector<2x64xf32>
    %191 = arith.divf %189, %190 : vector<2x64xf32>
    %192 = vector.extract_strided_slice %179 {offsets = [0, 128], sizes = [2, 64], strides = [1, 1]} : vector<2x256xf32> to vector<2x64xf32>
    %193 = math.tanh %192 : vector<2x64xf32>
    %194 = vector.extract_strided_slice %179 {offsets = [0, 192], sizes = [2, 64], strides = [1, 1]} : vector<2x256xf32> to vector<2x64xf32>
    %195 = arith.negf %194 : vector<2x64xf32>
    %196 = math.exp %195 : vector<2x64xf32>
    %cst_57 = arith.constant 1.000000e+00 : f32
    %197 = vector.broadcast %cst_57 : f32 to vector<2x64xf32>
    %198 = arith.addf %197, %196 : vector<2x64xf32>
    %199 = arith.divf %197, %198 : vector<2x64xf32>
    %200 = arith.mulf %191, %171 : vector<2x64xf32>
    %201 = arith.mulf %185, %193 : vector<2x64xf32>
    %202 = arith.addf %200, %201 : vector<2x64xf32>
    %203 = math.tanh %202 : vector<2x64xf32>
    %204 = arith.mulf %199, %203 : vector<2x64xf32>
    %c10_58 = arith.constant 10 : index
    %c0_59 = arith.constant 0 : index
    %205 = vector.load %arg7[%c10_58, %c0_59] : memref<16x64xf32, #tpu.memory_space<vmem>>, vector<2x64xf32>
    tpu.vector_store %arg7[%c10_58, %c0_59], %204 {strides = array<i32>} : memref<16x64xf32, #tpu.memory_space<vmem>>, vector<2x64xf32>,
    %c4_60 = arith.constant 4 : index
    %c0_61 = arith.constant 0 : index
    %206 = vector.load %arg8[%c4_60, %c0_61] : memref<16x64xf32, #tpu.memory_space<vmem>>, vector<2x64xf32>
    tpu.vector_store %arg8[%c4_60, %c0_61], %204 {strides = array<i32>} : memref<16x64xf32, #tpu.memory_space<vmem>>, vector<2x64xf32>,
    %207 = vector.extract_strided_slice %14 {offsets = [12, 0], sizes = [2, 256], strides = [1, 1]} : vector<16x256xf32> to vector<2x256xf32>
    %208 = arith.truncf %204 : vector<2x64xf32> to vector<2x64xbf16>
    %cst_62 = arith.constant dense<0.000000e+00> : vector<2x256xf32>
    %209 = tpu.matmul %208, %3, %cst_62 {dimension_numbers = #tpu.dot_dimension_numbers<[1], [0], [0], [1], [0, 0, 1, 1], [], []>} : vector<2x64xbf16>, vector<64x256xbf16>, vector<2x256xf32> -> vector<2x256xf32>
    %210 = arith.addf %207, %209 : vector<2x256xf32>
    %211 = vector.extract_strided_slice %210 {offsets = [0, 0], sizes = [2, 64], strides = [1, 1]} : vector<2x256xf32> to vector<2x64xf32>
    %212 = arith.negf %211 : vector<2x64xf32>
    %213 = math.exp %212 : vector<2x64xf32>
    %cst_63 = arith.constant 1.000000e+00 : f32
    %214 = vector.broadcast %cst_63 : f32 to vector<2x64xf32>
    %215 = arith.addf %214, %213 : vector<2x64xf32>
    %216 = arith.divf %214, %215 : vector<2x64xf32>
    %217 = vector.extract_strided_slice %210 {offsets = [0, 64], sizes = [2, 64], strides = [1, 1]} : vector<2x256xf32> to vector<2x64xf32>
    %218 = arith.negf %217 : vector<2x64xf32>
    %219 = math.exp %218 : vector<2x64xf32>
    %cst_64 = arith.constant 1.000000e+00 : f32
    %220 = vector.broadcast %cst_64 : f32 to vector<2x64xf32>
    %221 = arith.addf %220, %219 : vector<2x64xf32>
    %222 = arith.divf %220, %221 : vector<2x64xf32>
    %223 = vector.extract_strided_slice %210 {offsets = [0, 128], sizes = [2, 64], strides = [1, 1]} : vector<2x256xf32> to vector<2x64xf32>
    %224 = math.tanh %223 : vector<2x64xf32>
    %225 = vector.extract_strided_slice %210 {offsets = [0, 192], sizes = [2, 64], strides = [1, 1]} : vector<2x256xf32> to vector<2x64xf32>
    %226 = arith.negf %225 : vector<2x64xf32>
    %227 = math.exp %226 : vector<2x64xf32>
    %cst_65 = arith.constant 1.000000e+00 : f32
    %228 = vector.broadcast %cst_65 : f32 to vector<2x64xf32>
    %229 = arith.addf %228, %227 : vector<2x64xf32>
    %230 = arith.divf %228, %229 : vector<2x64xf32>
    %231 = arith.mulf %222, %202 : vector<2x64xf32>
    %232 = arith.mulf %216, %224 : vector<2x64xf32>
    %233 = arith.addf %231, %232 : vector<2x64xf32>
    %234 = math.tanh %233 : vector<2x64xf32>
    %235 = arith.mulf %230, %234 : vector<2x64xf32>
    %c12_66 = arith.constant 12 : index
    %c0_67 = arith.constant 0 : index
    %236 = vector.load %arg7[%c12_66, %c0_67] : memref<16x64xf32, #tpu.memory_space<vmem>>, vector<2x64xf32>
    tpu.vector_store %arg7[%c12_66, %c0_67], %235 {strides = array<i32>} : memref<16x64xf32, #tpu.memory_space<vmem>>, vector<2x64xf32>,
    %c2_68 = arith.constant 2 : index
    %c0_69 = arith.constant 0 : index
    %237 = vector.load %arg8[%c2_68, %c0_69] : memref<16x64xf32, #tpu.memory_space<vmem>>, vector<2x64xf32>
    tpu.vector_store %arg8[%c2_68, %c0_69], %235 {strides = array<i32>} : memref<16x64xf32, #tpu.memory_space<vmem>>, vector<2x64xf32>,
    %238 = vector.extract_strided_slice %14 {offsets = [14, 0], sizes = [2, 256], strides = [1, 1]} : vector<16x256xf32> to vector<2x256xf32>
    %239 = arith.truncf %235 : vector<2x64xf32> to vector<2x64xbf16>
    %cst_70 = arith.constant dense<0.000000e+00> : vector<2x256xf32>
    %240 = tpu.matmul %239, %3, %cst_70 {dimension_numbers = #tpu.dot_dimension_numbers<[1], [0], [0], [1], [0, 0, 1, 1], [], []>} : vector<2x64xbf16>, vector<64x256xbf16>, vector<2x256xf32> -> vector<2x256xf32>
    %241 = arith.addf %238, %240 : vector<2x256xf32>
    %242 = vector.extract_strided_slice %241 {offsets = [0, 0], sizes = [2, 64], strides = [1, 1]} : vector<2x256xf32> to vector<2x64xf32>
    %243 = arith.negf %242 : vector<2x64xf32>
    %244 = math.exp %243 : vector<2x64xf32>
    %cst_71 = arith.constant 1.000000e+00 : f32
    %245 = vector.broadcast %cst_71 : f32 to vector<2x64xf32>
    %246 = arith.addf %245, %244 : vector<2x64xf32>
    %247 = arith.divf %245, %246 : vector<2x64xf32>
    %248 = vector.extract_strided_slice %241 {offsets = [0, 64], sizes = [2, 64], strides = [1, 1]} : vector<2x256xf32> to vector<2x64xf32>
    %249 = arith.negf %248 : vector<2x64xf32>
    %250 = math.exp %249 : vector<2x64xf32>
    %cst_72 = arith.constant 1.000000e+00 : f32
    %251 = vector.broadcast %cst_72 : f32 to vector<2x64xf32>
    %252 = arith.addf %251, %250 : vector<2x64xf32>
    %253 = arith.divf %251, %252 : vector<2x64xf32>
    %254 = vector.extract_strided_slice %241 {offsets = [0, 128], sizes = [2, 64], strides = [1, 1]} : vector<2x256xf32> to vector<2x64xf32>
    %255 = math.tanh %254 : vector<2x64xf32>
    %256 = vector.extract_strided_slice %241 {offsets = [0, 192], sizes = [2, 64], strides = [1, 1]} : vector<2x256xf32> to vector<2x64xf32>
    %257 = arith.negf %256 : vector<2x64xf32>
    %258 = math.exp %257 : vector<2x64xf32>
    %cst_73 = arith.constant 1.000000e+00 : f32
    %259 = vector.broadcast %cst_73 : f32 to vector<2x64xf32>
    %260 = arith.addf %259, %258 : vector<2x64xf32>
    %261 = arith.divf %259, %260 : vector<2x64xf32>
    %262 = arith.mulf %253, %233 : vector<2x64xf32>
    %263 = arith.mulf %247, %255 : vector<2x64xf32>
    %264 = arith.addf %262, %263 : vector<2x64xf32>
    %265 = math.tanh %264 : vector<2x64xf32>
    %266 = arith.mulf %261, %265 : vector<2x64xf32>
    %c14_74 = arith.constant 14 : index
    %c0_75 = arith.constant 0 : index
    %267 = vector.load %arg7[%c14_74, %c0_75] : memref<16x64xf32, #tpu.memory_space<vmem>>, vector<2x64xf32>
    tpu.vector_store %arg7[%c14_74, %c0_75], %266 {strides = array<i32>} : memref<16x64xf32, #tpu.memory_space<vmem>>, vector<2x64xf32>,
    %c0_76 = arith.constant 0 : index
    %c0_77 = arith.constant 0 : index
    %268 = vector.load %arg8[%c0_76, %c0_77] : memref<16x64xf32, #tpu.memory_space<vmem>>, vector<2x64xf32>
    tpu.vector_store %arg8[%c0_76, %c0_77], %266 {strides = array<i32>} : memref<16x64xf32, #tpu.memory_space<vmem>>, vector<2x64xf32>,
    %c0_78 = arith.constant 0 : index
    %c0_79 = arith.constant 0 : index
    %269 = vector.load %arg7[%c0_78, %c0_79] : memref<16x64xf32, #tpu.memory_space<vmem>>, vector<16x64xf32>
    %270 = arith.truncf %269 : vector<16x64xf32> to vector<16x64xbf16>
    %cst_80 = arith.constant dense<0.000000e+00> : vector<16x128xf32>
    %271 = tpu.matmul %270, %4, %cst_80 {dimension_numbers = #tpu.dot_dimension_numbers<[1], [0], [0], [1], [0, 0, 1, 1], [], []>} : vector<16x64xbf16>, vector<64x128xbf16>, vector<16x128xf32> -> vector<16x128xf32>
    %c0_81 = arith.constant 0 : index
    %c0_82 = arith.constant 0 : index
    %272 = vector.load %arg8[%c0_81, %c0_82] : memref<16x64xf32, #tpu.memory_space<vmem>>, vector<16x64xf32>
    %273 = arith.truncf %272 : vector<16x64xf32> to vector<16x64xbf16>
    %cst_83 = arith.constant dense<0.000000e+00> : vector<16x128xf32>
    %274 = tpu.matmul %273, %5, %cst_83 {dimension_numbers = #tpu.dot_dimension_numbers<[1], [0], [0], [1], [0, 0, 1, 1], [], []>} : vector<16x64xbf16>, vector<64x128xbf16>, vector<16x128xf32> -> vector<16x128xf32>
    %275 = arith.addf %271, %274 : vector<16x128xf32>
    %276 = vector.broadcast %10 : vector<1x128xf32> to vector<16x128xf32>
    %277 = arith.addf %275, %276 : vector<16x128xf32>
    %278 = tpu.iota {dimensions = array<i32: 1>} : vector<16x128xi32>
    %c32_i32 = arith.constant 32 : i32
    %279 = vector.broadcast %c32_i32 : i32 to vector<16x128xi32>
    %280 = arith.cmpi sge, %278, %279 : vector<16x128xi32>
    %c64_i32 = arith.constant 64 : i32
    %281 = vector.broadcast %c64_i32 : i32 to vector<16x128xi32>
    %282 = arith.cmpi slt, %278, %281 : vector<16x128xi32>
    %283 = arith.andi %280, %282 : vector<16x128xi1>
    %cst_84 = arith.constant 0.000000e+00 : f32
    %284 = vector.broadcast %cst_84 : f32 to vector<16x128xf32>
    %285 = arith.maximumf %277, %284 : vector<16x128xf32>
    %286 = math.absf %277 : vector<16x128xf32>
    %cst_85 = arith.constant 0.000000e+00 : f32
    %287 = vector.broadcast %cst_85 : f32 to vector<16x128xf32>
    %288 = arith.subf %287, %286 : vector<16x128xf32>
    %289 = math.exp %288 : vector<16x128xf32>
    %290 = math.log1p %289 : vector<16x128xf32>
    %291 = arith.addf %285, %290 : vector<16x128xf32>
    %cst_86 = arith.constant 1.1920929E-7 : f32
    %292 = vector.broadcast %cst_86 : f32 to vector<16x128xf32>
    %293 = arith.addf %291, %292 : vector<16x128xf32>
    %294 = arith.select %283, %293, %277 : vector<16x128xi1>, vector<16x128xf32>
    %c0_87 = arith.constant 0 : index
    %c0_88 = arith.constant 0 : index
    %295 = vector.load %arg1[%c0_87, %c0_88] : memref<2x640xf32, #tpu.memory_space<vmem>>, vector<2x128xf32>
    %c0_89 = arith.constant 0 : index
    %c128_90 = arith.constant 128 : index
    %296 = vector.load %arg1[%c0_89, %c128_90] : memref<2x640xf32, #tpu.memory_space<vmem>>, vector<2x512xf32>
    %c2_91 = arith.constant 2 : index
    %c0_92 = arith.constant 0 : index
    %297 = vector.load %arg5[%c2_91, %c0_92] : memref<6x128xf32, #tpu.memory_space<vmem>>, vector<1x128xf32>
    %298 = vector.shape_cast %297 : vector<1x128xf32> to vector<1x128xf32>
    %299 = vector.broadcast %298 : vector<1x128xf32> to vector<2x128xf32>
    %c3_93 = arith.constant 3 : index
    %c0_94 = arith.constant 0 : index
    %300 = vector.load %arg5[%c3_93, %c0_94] : memref<6x128xf32, #tpu.memory_space<vmem>>, vector<1x128xf32>
    %301 = vector.shape_cast %300 : vector<1x128xf32> to vector<1x128xf32>
    %302 = vector.broadcast %301 : vector<1x128xf32> to vector<2x128xf32>
    %c4_95 = arith.constant 4 : index
    %c0_96 = arith.constant 0 : index
    %303 = vector.load %arg5[%c4_95, %c0_96] : memref<6x128xf32, #tpu.memory_space<vmem>>, vector<1x128xf32>
    %304 = vector.shape_cast %303 : vector<1x128xf32> to vector<1x128xf32>
    %305 = vector.broadcast %304 : vector<1x128xf32> to vector<2x128xf32>
    %c5 = arith.constant 5 : index
    %c0_97 = arith.constant 0 : index
    %306 = vector.load %arg5[%c5, %c0_97] : memref<6x128xf32, #tpu.memory_space<vmem>>, vector<1x128xf32>
    %307 = vector.shape_cast %306 : vector<1x128xf32> to vector<1x128xf32>
    %308 = vector.broadcast %307 : vector<1x128xf32> to vector<2x128xf32>
    %309 = vector.shape_cast %8 : vector<1x512xf32> to vector<1x512xf32>
    %310 = vector.broadcast %309 : vector<1x512xf32> to vector<2x512xf32>
    %c0_98 = arith.constant 0 : index
    %c0_99 = arith.constant 0 : index
    %311 = vector.load %arg9[%c0_98, %c0_99] : memref<16x128xf32, #tpu.memory_space<vmem>>, vector<2x128xf32>
    tpu.vector_store %arg9[%c0_98, %c0_99], %295 {strides = array<i32>} : memref<16x128xf32, #tpu.memory_space<vmem>>, vector<2x128xf32>,
    %312 = tpu.concatenate %295, %299 in 1 : vector<2x128xf32>, vector<2x128xf32> -> vector<2x256xf32>
    %313 = arith.truncf %312 : vector<2x256xf32> to vector<2x256xbf16>
    %cst_100 = arith.constant dense<0.000000e+00> : vector<2x512xf32>
    %314 = tpu.matmul %313, %0, %cst_100 {dimension_numbers = #tpu.dot_dimension_numbers<[1], [0], [0], [1], [0, 0, 1, 1], [], []>} : vector<2x256xbf16>, vector<256x512xbf16>, vector<2x512xf32> -> vector<2x512xf32>
    %315 = arith.addf %314, %296 : vector<2x512xf32>
    %316 = vector.extract_strided_slice %315 {offsets = [0, 0], sizes = [2, 128], strides = [1, 1]} : vector<2x512xf32> to vector<2x128xf32>
    %317 = arith.negf %316 : vector<2x128xf32>
    %318 = math.exp %317 : vector<2x128xf32>
    %cst_101 = arith.constant 1.000000e+00 : f32
    %319 = vector.broadcast %cst_101 : f32 to vector<2x128xf32>
    %320 = arith.addf %319, %318 : vector<2x128xf32>
    %321 = arith.divf %319, %320 : vector<2x128xf32>
    %322 = vector.extract_strided_slice %315 {offsets = [0, 128], sizes = [2, 128], strides = [1, 1]} : vector<2x512xf32> to vector<2x128xf32>
    %323 = arith.negf %322 : vector<2x128xf32>
    %324 = math.exp %323 : vector<2x128xf32>
    %cst_102 = arith.constant 1.000000e+00 : f32
    %325 = vector.broadcast %cst_102 : f32 to vector<2x128xf32>
    %326 = arith.addf %325, %324 : vector<2x128xf32>
    %327 = arith.divf %325, %326 : vector<2x128xf32>
    %328 = vector.extract_strided_slice %315 {offsets = [0, 256], sizes = [2, 128], strides = [1, 1]} : vector<2x512xf32> to vector<2x128xf32>
    %329 = math.tanh %328 : vector<2x128xf32>
    %330 = vector.extract_strided_slice %315 {offsets = [0, 384], sizes = [2, 128], strides = [1, 1]} : vector<2x512xf32> to vector<2x128xf32>
    %331 = arith.negf %330 : vector<2x128xf32>
    %332 = math.exp %331 : vector<2x128xf32>
    %cst_103 = arith.constant 1.000000e+00 : f32
    %333 = vector.broadcast %cst_103 : f32 to vector<2x128xf32>
    %334 = arith.addf %333, %332 : vector<2x128xf32>
    %335 = arith.divf %333, %334 : vector<2x128xf32>
    %336 = arith.mulf %327, %302 : vector<2x128xf32>
    %337 = arith.mulf %321, %329 : vector<2x128xf32>
    %338 = arith.addf %336, %337 : vector<2x128xf32>
    %339 = math.tanh %338 : vector<2x128xf32>
    %340 = arith.mulf %335, %339 : vector<2x128xf32>
    %341 = tpu.concatenate %340, %305 in 1 : vector<2x128xf32>, vector<2x128xf32> -> vector<2x256xf32>
    %342 = arith.truncf %341 : vector<2x256xf32> to vector<2x256xbf16>
    %cst_104 = arith.constant dense<0.000000e+00> : vector<2x512xf32>
    %343 = tpu.matmul %342, %1, %cst_104 {dimension_numbers = #tpu.dot_dimension_numbers<[1], [0], [0], [1], [0, 0, 1, 1], [], []>} : vector<2x256xbf16>, vector<256x512xbf16>, vector<2x512xf32> -> vector<2x512xf32>
    %344 = arith.addf %343, %310 : vector<2x512xf32>
    %345 = vector.extract_strided_slice %344 {offsets = [0, 0], sizes = [2, 128], strides = [1, 1]} : vector<2x512xf32> to vector<2x128xf32>
    %346 = arith.negf %345 : vector<2x128xf32>
    %347 = math.exp %346 : vector<2x128xf32>
    %cst_105 = arith.constant 1.000000e+00 : f32
    %348 = vector.broadcast %cst_105 : f32 to vector<2x128xf32>
    %349 = arith.addf %348, %347 : vector<2x128xf32>
    %350 = arith.divf %348, %349 : vector<2x128xf32>
    %351 = vector.extract_strided_slice %344 {offsets = [0, 128], sizes = [2, 128], strides = [1, 1]} : vector<2x512xf32> to vector<2x128xf32>
    %352 = arith.negf %351 : vector<2x128xf32>
    %353 = math.exp %352 : vector<2x128xf32>
    %cst_106 = arith.constant 1.000000e+00 : f32
    %354 = vector.broadcast %cst_106 : f32 to vector<2x128xf32>
    %355 = arith.addf %354, %353 : vector<2x128xf32>
    %356 = arith.divf %354, %355 : vector<2x128xf32>
    %357 = vector.extract_strided_slice %344 {offsets = [0, 256], sizes = [2, 128], strides = [1, 1]} : vector<2x512xf32> to vector<2x128xf32>
    %358 = math.tanh %357 : vector<2x128xf32>
    %359 = vector.extract_strided_slice %344 {offsets = [0, 384], sizes = [2, 128], strides = [1, 1]} : vector<2x512xf32> to vector<2x128xf32>
    %360 = arith.negf %359 : vector<2x128xf32>
    %361 = math.exp %360 : vector<2x128xf32>
    %cst_107 = arith.constant 1.000000e+00 : f32
    %362 = vector.broadcast %cst_107 : f32 to vector<2x128xf32>
    %363 = arith.addf %362, %361 : vector<2x128xf32>
    %364 = arith.divf %362, %363 : vector<2x128xf32>
    %365 = arith.mulf %356, %308 : vector<2x128xf32>
    %366 = arith.mulf %350, %358 : vector<2x128xf32>
    %367 = arith.addf %365, %366 : vector<2x128xf32>
    %368 = math.tanh %367 : vector<2x128xf32>
    %369 = arith.mulf %364, %368 : vector<2x128xf32>
    %c2_108 = arith.constant 2 : index
    %c0_109 = arith.constant 0 : index
    %370 = vector.load %arg9[%c2_108, %c0_109] : memref<16x128xf32, #tpu.memory_space<vmem>>, vector<2x128xf32>
    tpu.vector_store %arg9[%c2_108, %c0_109], %369 {strides = array<i32>} : memref<16x128xf32, #tpu.memory_space<vmem>>, vector<2x128xf32>,
    %371 = tpu.concatenate %369, %340 in 1 : vector<2x128xf32>, vector<2x128xf32> -> vector<2x256xf32>
    %372 = arith.truncf %371 : vector<2x256xf32> to vector<2x256xbf16>
    %cst_110 = arith.constant dense<0.000000e+00> : vector<2x512xf32>
    %373 = tpu.matmul %372, %0, %cst_110 {dimension_numbers = #tpu.dot_dimension_numbers<[1], [0], [0], [1], [0, 0, 1, 1], [], []>} : vector<2x256xbf16>, vector<256x512xbf16>, vector<2x512xf32> -> vector<2x512xf32>
    %374 = arith.addf %373, %296 : vector<2x512xf32>
    %375 = vector.extract_strided_slice %374 {offsets = [0, 0], sizes = [2, 128], strides = [1, 1]} : vector<2x512xf32> to vector<2x128xf32>
    %376 = arith.negf %375 : vector<2x128xf32>
    %377 = math.exp %376 : vector<2x128xf32>
    %cst_111 = arith.constant 1.000000e+00 : f32
    %378 = vector.broadcast %cst_111 : f32 to vector<2x128xf32>
    %379 = arith.addf %378, %377 : vector<2x128xf32>
    %380 = arith.divf %378, %379 : vector<2x128xf32>
    %381 = vector.extract_strided_slice %374 {offsets = [0, 128], sizes = [2, 128], strides = [1, 1]} : vector<2x512xf32> to vector<2x128xf32>
    %382 = arith.negf %381 : vector<2x128xf32>
    %383 = math.exp %382 : vector<2x128xf32>
    %cst_112 = arith.constant 1.000000e+00 : f32
    %384 = vector.broadcast %cst_112 : f32 to vector<2x128xf32>
    %385 = arith.addf %384, %383 : vector<2x128xf32>
    %386 = arith.divf %384, %385 : vector<2x128xf32>
    %387 = vector.extract_strided_slice %374 {offsets = [0, 256], sizes = [2, 128], strides = [1, 1]} : vector<2x512xf32> to vector<2x128xf32>
    %388 = math.tanh %387 : vector<2x128xf32>
    %389 = vector.extract_strided_slice %374 {offsets = [0, 384], sizes = [2, 128], strides = [1, 1]} : vector<2x512xf32> to vector<2x128xf32>
    %390 = arith.negf %389 : vector<2x128xf32>
    %391 = math.exp %390 : vector<2x128xf32>
    %cst_113 = arith.constant 1.000000e+00 : f32
    %392 = vector.broadcast %cst_113 : f32 to vector<2x128xf32>
    %393 = arith.addf %392, %391 : vector<2x128xf32>
    %394 = arith.divf %392, %393 : vector<2x128xf32>
    %395 = arith.mulf %386, %338 : vector<2x128xf32>
    %396 = arith.mulf %380, %388 : vector<2x128xf32>
    %397 = arith.addf %395, %396 : vector<2x128xf32>
    %398 = math.tanh %397 : vector<2x128xf32>
    %399 = arith.mulf %394, %398 : vector<2x128xf32>
    %400 = tpu.concatenate %399, %369 in 1 : vector<2x128xf32>, vector<2x128xf32> -> vector<2x256xf32>
    %401 = arith.truncf %400 : vector<2x256xf32> to vector<2x256xbf16>
    %cst_114 = arith.constant dense<0.000000e+00> : vector<2x512xf32>
    %402 = tpu.matmul %401, %1, %cst_114 {dimension_numbers = #tpu.dot_dimension_numbers<[1], [0], [0], [1], [0, 0, 1, 1], [], []>} : vector<2x256xbf16>, vector<256x512xbf16>, vector<2x512xf32> -> vector<2x512xf32>
    %403 = arith.addf %402, %310 : vector<2x512xf32>
    %404 = vector.extract_strided_slice %403 {offsets = [0, 0], sizes = [2, 128], strides = [1, 1]} : vector<2x512xf32> to vector<2x128xf32>
    %405 = arith.negf %404 : vector<2x128xf32>
    %406 = math.exp %405 : vector<2x128xf32>
    %cst_115 = arith.constant 1.000000e+00 : f32
    %407 = vector.broadcast %cst_115 : f32 to vector<2x128xf32>
    %408 = arith.addf %407, %406 : vector<2x128xf32>
    %409 = arith.divf %407, %408 : vector<2x128xf32>
    %410 = vector.extract_strided_slice %403 {offsets = [0, 128], sizes = [2, 128], strides = [1, 1]} : vector<2x512xf32> to vector<2x128xf32>
    %411 = arith.negf %410 : vector<2x128xf32>
    %412 = math.exp %411 : vector<2x128xf32>
    %cst_116 = arith.constant 1.000000e+00 : f32
    %413 = vector.broadcast %cst_116 : f32 to vector<2x128xf32>
    %414 = arith.addf %413, %412 : vector<2x128xf32>
    %415 = arith.divf %413, %414 : vector<2x128xf32>
    %416 = vector.extract_strided_slice %403 {offsets = [0, 256], sizes = [2, 128], strides = [1, 1]} : vector<2x512xf32> to vector<2x128xf32>
    %417 = math.tanh %416 : vector<2x128xf32>
    %418 = vector.extract_strided_slice %403 {offsets = [0, 384], sizes = [2, 128], strides = [1, 1]} : vector<2x512xf32> to vector<2x128xf32>
    %419 = arith.negf %418 : vector<2x128xf32>
    %420 = math.exp %419 : vector<2x128xf32>
    %cst_117 = arith.constant 1.000000e+00 : f32
    %421 = vector.broadcast %cst_117 : f32 to vector<2x128xf32>
    %422 = arith.addf %421, %420 : vector<2x128xf32>
    %423 = arith.divf %421, %422 : vector<2x128xf32>
    %424 = arith.mulf %415, %367 : vector<2x128xf32>
    %425 = arith.mulf %409, %417 : vector<2x128xf32>
    %426 = arith.addf %424, %425 : vector<2x128xf32>
    %427 = math.tanh %426 : vector<2x128xf32>
    %428 = arith.mulf %423, %427 : vector<2x128xf32>
    %c4_118 = arith.constant 4 : index
    %c0_119 = arith.constant 0 : index
    %429 = vector.load %arg9[%c4_118, %c0_119] : memref<16x128xf32, #tpu.memory_space<vmem>>, vector<2x128xf32>
    tpu.vector_store %arg9[%c4_118, %c0_119], %428 {strides = array<i32>} : memref<16x128xf32, #tpu.memory_space<vmem>>, vector<2x128xf32>,
    %430 = tpu.concatenate %428, %399 in 1 : vector<2x128xf32>, vector<2x128xf32> -> vector<2x256xf32>
    %431 = arith.truncf %430 : vector<2x256xf32> to vector<2x256xbf16>
    %cst_120 = arith.constant dense<0.000000e+00> : vector<2x512xf32>
    %432 = tpu.matmul %431, %0, %cst_120 {dimension_numbers = #tpu.dot_dimension_numbers<[1], [0], [0], [1], [0, 0, 1, 1], [], []>} : vector<2x256xbf16>, vector<256x512xbf16>, vector<2x512xf32> -> vector<2x512xf32>
    %433 = arith.addf %432, %296 : vector<2x512xf32>
    %434 = vector.extract_strided_slice %433 {offsets = [0, 0], sizes = [2, 128], strides = [1, 1]} : vector<2x512xf32> to vector<2x128xf32>
    %435 = arith.negf %434 : vector<2x128xf32>
    %436 = math.exp %435 : vector<2x128xf32>
    %cst_121 = arith.constant 1.000000e+00 : f32
    %437 = vector.broadcast %cst_121 : f32 to vector<2x128xf32>
    %438 = arith.addf %437, %436 : vector<2x128xf32>
    %439 = arith.divf %437, %438 : vector<2x128xf32>
    %440 = vector.extract_strided_slice %433 {offsets = [0, 128], sizes = [2, 128], strides = [1, 1]} : vector<2x512xf32> to vector<2x128xf32>
    %441 = arith.negf %440 : vector<2x128xf32>
    %442 = math.exp %441 : vector<2x128xf32>
    %cst_122 = arith.constant 1.000000e+00 : f32
    %443 = vector.broadcast %cst_122 : f32 to vector<2x128xf32>
    %444 = arith.addf %443, %442 : vector<2x128xf32>
    %445 = arith.divf %443, %444 : vector<2x128xf32>
    %446 = vector.extract_strided_slice %433 {offsets = [0, 256], sizes = [2, 128], strides = [1, 1]} : vector<2x512xf32> to vector<2x128xf32>
    %447 = math.tanh %446 : vector<2x128xf32>
    %448 = vector.extract_strided_slice %433 {offsets = [0, 384], sizes = [2, 128], strides = [1, 1]} : vector<2x512xf32> to vector<2x128xf32>
    %449 = arith.negf %448 : vector<2x128xf32>
    %450 = math.exp %449 : vector<2x128xf32>
    %cst_123 = arith.constant 1.000000e+00 : f32
    %451 = vector.broadcast %cst_123 : f32 to vector<2x128xf32>
    %452 = arith.addf %451, %450 : vector<2x128xf32>
    %453 = arith.divf %451, %452 : vector<2x128xf32>
    %454 = arith.mulf %445, %397 : vector<2x128xf32>
    %455 = arith.mulf %439, %447 : vector<2x128xf32>
    %456 = arith.addf %454, %455 : vector<2x128xf32>
    %457 = math.tanh %456 : vector<2x128xf32>
    %458 = arith.mulf %453, %457 : vector<2x128xf32>
    %459 = tpu.concatenate %458, %428 in 1 : vector<2x128xf32>, vector<2x128xf32> -> vector<2x256xf32>
    %460 = arith.truncf %459 : vector<2x256xf32> to vector<2x256xbf16>
    %cst_124 = arith.constant dense<0.000000e+00> : vector<2x512xf32>
    %461 = tpu.matmul %460, %1, %cst_124 {dimension_numbers = #tpu.dot_dimension_numbers<[1], [0], [0], [1], [0, 0, 1, 1], [], []>} : vector<2x256xbf16>, vector<256x512xbf16>, vector<2x512xf32> -> vector<2x512xf32>
    %462 = arith.addf %461, %310 : vector<2x512xf32>
    %463 = vector.extract_strided_slice %462 {offsets = [0, 0], sizes = [2, 128], strides = [1, 1]} : vector<2x512xf32> to vector<2x128xf32>
    %464 = arith.negf %463 : vector<2x128xf32>
    %465 = math.exp %464 : vector<2x128xf32>
    %cst_125 = arith.constant 1.000000e+00 : f32
    %466 = vector.broadcast %cst_125 : f32 to vector<2x128xf32>
    %467 = arith.addf %466, %465 : vector<2x128xf32>
    %468 = arith.divf %466, %467 : vector<2x128xf32>
    %469 = vector.extract_strided_slice %462 {offsets = [0, 128], sizes = [2, 128], strides = [1, 1]} : vector<2x512xf32> to vector<2x128xf32>
    %470 = arith.negf %469 : vector<2x128xf32>
    %471 = math.exp %470 : vector<2x128xf32>
    %cst_126 = arith.constant 1.000000e+00 : f32
    %472 = vector.broadcast %cst_126 : f32 to vector<2x128xf32>
    %473 = arith.addf %472, %471 : vector<2x128xf32>
    %474 = arith.divf %472, %473 : vector<2x128xf32>
    %475 = vector.extract_strided_slice %462 {offsets = [0, 256], sizes = [2, 128], strides = [1, 1]} : vector<2x512xf32> to vector<2x128xf32>
    %476 = math.tanh %475 : vector<2x128xf32>
    %477 = vector.extract_strided_slice %462 {offsets = [0, 384], sizes = [2, 128], strides = [1, 1]} : vector<2x512xf32> to vector<2x128xf32>
    %478 = arith.negf %477 : vector<2x128xf32>
    %479 = math.exp %478 : vector<2x128xf32>
    %cst_127 = arith.constant 1.000000e+00 : f32
    %480 = vector.broadcast %cst_127 : f32 to vector<2x128xf32>
    %481 = arith.addf %480, %479 : vector<2x128xf32>
    %482 = arith.divf %480, %481 : vector<2x128xf32>
    %483 = arith.mulf %474, %426 : vector<2x128xf32>
    %484 = arith.mulf %468, %476 : vector<2x128xf32>
    %485 = arith.addf %483, %484 : vector<2x128xf32>
    %486 = math.tanh %485 : vector<2x128xf32>
    %487 = arith.mulf %482, %486 : vector<2x128xf32>
    %c6_128 = arith.constant 6 : index
    %c0_129 = arith.constant 0 : index
    %488 = vector.load %arg9[%c6_128, %c0_129] : memref<16x128xf32, #tpu.memory_space<vmem>>, vector<2x128xf32>
    tpu.vector_store %arg9[%c6_128, %c0_129], %487 {strides = array<i32>} : memref<16x128xf32, #tpu.memory_space<vmem>>, vector<2x128xf32>,
    %489 = tpu.concatenate %487, %458 in 1 : vector<2x128xf32>, vector<2x128xf32> -> vector<2x256xf32>
    %490 = arith.truncf %489 : vector<2x256xf32> to vector<2x256xbf16>
    %cst_130 = arith.constant dense<0.000000e+00> : vector<2x512xf32>
    %491 = tpu.matmul %490, %0, %cst_130 {dimension_numbers = #tpu.dot_dimension_numbers<[1], [0], [0], [1], [0, 0, 1, 1], [], []>} : vector<2x256xbf16>, vector<256x512xbf16>, vector<2x512xf32> -> vector<2x512xf32>
    %492 = arith.addf %491, %296 : vector<2x512xf32>
    %493 = vector.extract_strided_slice %492 {offsets = [0, 0], sizes = [2, 128], strides = [1, 1]} : vector<2x512xf32> to vector<2x128xf32>
    %494 = arith.negf %493 : vector<2x128xf32>
    %495 = math.exp %494 : vector<2x128xf32>
    %cst_131 = arith.constant 1.000000e+00 : f32
    %496 = vector.broadcast %cst_131 : f32 to vector<2x128xf32>
    %497 = arith.addf %496, %495 : vector<2x128xf32>
    %498 = arith.divf %496, %497 : vector<2x128xf32>
    %499 = vector.extract_strided_slice %492 {offsets = [0, 128], sizes = [2, 128], strides = [1, 1]} : vector<2x512xf32> to vector<2x128xf32>
    %500 = arith.negf %499 : vector<2x128xf32>
    %501 = math.exp %500 : vector<2x128xf32>
    %cst_132 = arith.constant 1.000000e+00 : f32
    %502 = vector.broadcast %cst_132 : f32 to vector<2x128xf32>
    %503 = arith.addf %502, %501 : vector<2x128xf32>
    %504 = arith.divf %502, %503 : vector<2x128xf32>
    %505 = vector.extract_strided_slice %492 {offsets = [0, 256], sizes = [2, 128], strides = [1, 1]} : vector<2x512xf32> to vector<2x128xf32>
    %506 = math.tanh %505 : vector<2x128xf32>
    %507 = vector.extract_strided_slice %492 {offsets = [0, 384], sizes = [2, 128], strides = [1, 1]} : vector<2x512xf32> to vector<2x128xf32>
    %508 = arith.negf %507 : vector<2x128xf32>
    %509 = math.exp %508 : vector<2x128xf32>
    %cst_133 = arith.constant 1.000000e+00 : f32
    %510 = vector.broadcast %cst_133 : f32 to vector<2x128xf32>
    %511 = arith.addf %510, %509 : vector<2x128xf32>
    %512 = arith.divf %510, %511 : vector<2x128xf32>
    %513 = arith.mulf %504, %456 : vector<2x128xf32>
    %514 = arith.mulf %498, %506 : vector<2x128xf32>
    %515 = arith.addf %513, %514 : vector<2x128xf32>
    %516 = math.tanh %515 : vector<2x128xf32>
    %517 = arith.mulf %512, %516 : vector<2x128xf32>
    %518 = tpu.concatenate %517, %487 in 1 : vector<2x128xf32>, vector<2x128xf32> -> vector<2x256xf32>
    %519 = arith.truncf %518 : vector<2x256xf32> to vector<2x256xbf16>
    %cst_134 = arith.constant dense<0.000000e+00> : vector<2x512xf32>
    %520 = tpu.matmul %519, %1, %cst_134 {dimension_numbers = #tpu.dot_dimension_numbers<[1], [0], [0], [1], [0, 0, 1, 1], [], []>} : vector<2x256xbf16>, vector<256x512xbf16>, vector<2x512xf32> -> vector<2x512xf32>
    %521 = arith.addf %520, %310 : vector<2x512xf32>
    %522 = vector.extract_strided_slice %521 {offsets = [0, 0], sizes = [2, 128], strides = [1, 1]} : vector<2x512xf32> to vector<2x128xf32>
    %523 = arith.negf %522 : vector<2x128xf32>
    %524 = math.exp %523 : vector<2x128xf32>
    %cst_135 = arith.constant 1.000000e+00 : f32
    %525 = vector.broadcast %cst_135 : f32 to vector<2x128xf32>
    %526 = arith.addf %525, %524 : vector<2x128xf32>
    %527 = arith.divf %525, %526 : vector<2x128xf32>
    %528 = vector.extract_strided_slice %521 {offsets = [0, 128], sizes = [2, 128], strides = [1, 1]} : vector<2x512xf32> to vector<2x128xf32>
    %529 = arith.negf %528 : vector<2x128xf32>
    %530 = math.exp %529 : vector<2x128xf32>
    %cst_136 = arith.constant 1.000000e+00 : f32
    %531 = vector.broadcast %cst_136 : f32 to vector<2x128xf32>
    %532 = arith.addf %531, %530 : vector<2x128xf32>
    %533 = arith.divf %531, %532 : vector<2x128xf32>
    %534 = vector.extract_strided_slice %521 {offsets = [0, 256], sizes = [2, 128], strides = [1, 1]} : vector<2x512xf32> to vector<2x128xf32>
    %535 = math.tanh %534 : vector<2x128xf32>
    %536 = vector.extract_strided_slice %521 {offsets = [0, 384], sizes = [2, 128], strides = [1, 1]} : vector<2x512xf32> to vector<2x128xf32>
    %537 = arith.negf %536 : vector<2x128xf32>
    %538 = math.exp %537 : vector<2x128xf32>
    %cst_137 = arith.constant 1.000000e+00 : f32
    %539 = vector.broadcast %cst_137 : f32 to vector<2x128xf32>
    %540 = arith.addf %539, %538 : vector<2x128xf32>
    %541 = arith.divf %539, %540 : vector<2x128xf32>
    %542 = arith.mulf %533, %485 : vector<2x128xf32>
    %543 = arith.mulf %527, %535 : vector<2x128xf32>
    %544 = arith.addf %542, %543 : vector<2x128xf32>
    %545 = math.tanh %544 : vector<2x128xf32>
    %546 = arith.mulf %541, %545 : vector<2x128xf32>
    %c8_138 = arith.constant 8 : index
    %c0_139 = arith.constant 0 : index
    %547 = vector.load %arg9[%c8_138, %c0_139] : memref<16x128xf32, #tpu.memory_space<vmem>>, vector<2x128xf32>
    tpu.vector_store %arg9[%c8_138, %c0_139], %546 {strides = array<i32>} : memref<16x128xf32, #tpu.memory_space<vmem>>, vector<2x128xf32>,
    %548 = tpu.concatenate %546, %517 in 1 : vector<2x128xf32>, vector<2x128xf32> -> vector<2x256xf32>
    %549 = arith.truncf %548 : vector<2x256xf32> to vector<2x256xbf16>
    %cst_140 = arith.constant dense<0.000000e+00> : vector<2x512xf32>
    %550 = tpu.matmul %549, %0, %cst_140 {dimension_numbers = #tpu.dot_dimension_numbers<[1], [0], [0], [1], [0, 0, 1, 1], [], []>} : vector<2x256xbf16>, vector<256x512xbf16>, vector<2x512xf32> -> vector<2x512xf32>
    %551 = arith.addf %550, %296 : vector<2x512xf32>
    %552 = vector.extract_strided_slice %551 {offsets = [0, 0], sizes = [2, 128], strides = [1, 1]} : vector<2x512xf32> to vector<2x128xf32>
    %553 = arith.negf %552 : vector<2x128xf32>
    %554 = math.exp %553 : vector<2x128xf32>
    %cst_141 = arith.constant 1.000000e+00 : f32
    %555 = vector.broadcast %cst_141 : f32 to vector<2x128xf32>
    %556 = arith.addf %555, %554 : vector<2x128xf32>
    %557 = arith.divf %555, %556 : vector<2x128xf32>
    %558 = vector.extract_strided_slice %551 {offsets = [0, 128], sizes = [2, 128], strides = [1, 1]} : vector<2x512xf32> to vector<2x128xf32>
    %559 = arith.negf %558 : vector<2x128xf32>
    %560 = math.exp %559 : vector<2x128xf32>
    %cst_142 = arith.constant 1.000000e+00 : f32
    %561 = vector.broadcast %cst_142 : f32 to vector<2x128xf32>
    %562 = arith.addf %561, %560 : vector<2x128xf32>
    %563 = arith.divf %561, %562 : vector<2x128xf32>
    %564 = vector.extract_strided_slice %551 {offsets = [0, 256], sizes = [2, 128], strides = [1, 1]} : vector<2x512xf32> to vector<2x128xf32>
    %565 = math.tanh %564 : vector<2x128xf32>
    %566 = vector.extract_strided_slice %551 {offsets = [0, 384], sizes = [2, 128], strides = [1, 1]} : vector<2x512xf32> to vector<2x128xf32>
    %567 = arith.negf %566 : vector<2x128xf32>
    %568 = math.exp %567 : vector<2x128xf32>
    %cst_143 = arith.constant 1.000000e+00 : f32
    %569 = vector.broadcast %cst_143 : f32 to vector<2x128xf32>
    %570 = arith.addf %569, %568 : vector<2x128xf32>
    %571 = arith.divf %569, %570 : vector<2x128xf32>
    %572 = arith.mulf %563, %515 : vector<2x128xf32>
    %573 = arith.mulf %557, %565 : vector<2x128xf32>
    %574 = arith.addf %572, %573 : vector<2x128xf32>
    %575 = math.tanh %574 : vector<2x128xf32>
    %576 = arith.mulf %571, %575 : vector<2x128xf32>
    %577 = tpu.concatenate %576, %546 in 1 : vector<2x128xf32>, vector<2x128xf32> -> vector<2x256xf32>
    %578 = arith.truncf %577 : vector<2x256xf32> to vector<2x256xbf16>
    %cst_144 = arith.constant dense<0.000000e+00> : vector<2x512xf32>
    %579 = tpu.matmul %578, %1, %cst_144 {dimension_numbers = #tpu.dot_dimension_numbers<[1], [0], [0], [1], [0, 0, 1, 1], [], []>} : vector<2x256xbf16>, vector<256x512xbf16>, vector<2x512xf32> -> vector<2x512xf32>
    %580 = arith.addf %579, %310 : vector<2x512xf32>
    %581 = vector.extract_strided_slice %580 {offsets = [0, 0], sizes = [2, 128], strides = [1, 1]} : vector<2x512xf32> to vector<2x128xf32>
    %582 = arith.negf %581 : vector<2x128xf32>
    %583 = math.exp %582 : vector<2x128xf32>
    %cst_145 = arith.constant 1.000000e+00 : f32
    %584 = vector.broadcast %cst_145 : f32 to vector<2x128xf32>
    %585 = arith.addf %584, %583 : vector<2x128xf32>
    %586 = arith.divf %584, %585 : vector<2x128xf32>
    %587 = vector.extract_strided_slice %580 {offsets = [0, 128], sizes = [2, 128], strides = [1, 1]} : vector<2x512xf32> to vector<2x128xf32>
    %588 = arith.negf %587 : vector<2x128xf32>
    %589 = math.exp %588 : vector<2x128xf32>
    %cst_146 = arith.constant 1.000000e+00 : f32
    %590 = vector.broadcast %cst_146 : f32 to vector<2x128xf32>
    %591 = arith.addf %590, %589 : vector<2x128xf32>
    %592 = arith.divf %590, %591 : vector<2x128xf32>
    %593 = vector.extract_strided_slice %580 {offsets = [0, 256], sizes = [2, 128], strides = [1, 1]} : vector<2x512xf32> to vector<2x128xf32>
    %594 = math.tanh %593 : vector<2x128xf32>
    %595 = vector.extract_strided_slice %580 {offsets = [0, 384], sizes = [2, 128], strides = [1, 1]} : vector<2x512xf32> to vector<2x128xf32>
    %596 = arith.negf %595 : vector<2x128xf32>
    %597 = math.exp %596 : vector<2x128xf32>
    %cst_147 = arith.constant 1.000000e+00 : f32
    %598 = vector.broadcast %cst_147 : f32 to vector<2x128xf32>
    %599 = arith.addf %598, %597 : vector<2x128xf32>
    %600 = arith.divf %598, %599 : vector<2x128xf32>
    %601 = arith.mulf %592, %544 : vector<2x128xf32>
    %602 = arith.mulf %586, %594 : vector<2x128xf32>
    %603 = arith.addf %601, %602 : vector<2x128xf32>
    %604 = math.tanh %603 : vector<2x128xf32>
    %605 = arith.mulf %600, %604 : vector<2x128xf32>
    %c10_148 = arith.constant 10 : index
    %c0_149 = arith.constant 0 : index
    %606 = vector.load %arg9[%c10_148, %c0_149] : memref<16x128xf32, #tpu.memory_space<vmem>>, vector<2x128xf32>
    tpu.vector_store %arg9[%c10_148, %c0_149], %605 {strides = array<i32>} : memref<16x128xf32, #tpu.memory_space<vmem>>, vector<2x128xf32>,
    %607 = tpu.concatenate %605, %576 in 1 : vector<2x128xf32>, vector<2x128xf32> -> vector<2x256xf32>
    %608 = arith.truncf %607 : vector<2x256xf32> to vector<2x256xbf16>
    %cst_150 = arith.constant dense<0.000000e+00> : vector<2x512xf32>
    %609 = tpu.matmul %608, %0, %cst_150 {dimension_numbers = #tpu.dot_dimension_numbers<[1], [0], [0], [1], [0, 0, 1, 1], [], []>} : vector<2x256xbf16>, vector<256x512xbf16>, vector<2x512xf32> -> vector<2x512xf32>
    %610 = arith.addf %609, %296 : vector<2x512xf32>
    %611 = vector.extract_strided_slice %610 {offsets = [0, 0], sizes = [2, 128], strides = [1, 1]} : vector<2x512xf32> to vector<2x128xf32>
    %612 = arith.negf %611 : vector<2x128xf32>
    %613 = math.exp %612 : vector<2x128xf32>
    %cst_151 = arith.constant 1.000000e+00 : f32
    %614 = vector.broadcast %cst_151 : f32 to vector<2x128xf32>
    %615 = arith.addf %614, %613 : vector<2x128xf32>
    %616 = arith.divf %614, %615 : vector<2x128xf32>
    %617 = vector.extract_strided_slice %610 {offsets = [0, 128], sizes = [2, 128], strides = [1, 1]} : vector<2x512xf32> to vector<2x128xf32>
    %618 = arith.negf %617 : vector<2x128xf32>
    %619 = math.exp %618 : vector<2x128xf32>
    %cst_152 = arith.constant 1.000000e+00 : f32
    %620 = vector.broadcast %cst_152 : f32 to vector<2x128xf32>
    %621 = arith.addf %620, %619 : vector<2x128xf32>
    %622 = arith.divf %620, %621 : vector<2x128xf32>
    %623 = vector.extract_strided_slice %610 {offsets = [0, 256], sizes = [2, 128], strides = [1, 1]} : vector<2x512xf32> to vector<2x128xf32>
    %624 = math.tanh %623 : vector<2x128xf32>
    %625 = vector.extract_strided_slice %610 {offsets = [0, 384], sizes = [2, 128], strides = [1, 1]} : vector<2x512xf32> to vector<2x128xf32>
    %626 = arith.negf %625 : vector<2x128xf32>
    %627 = math.exp %626 : vector<2x128xf32>
    %cst_153 = arith.constant 1.000000e+00 : f32
    %628 = vector.broadcast %cst_153 : f32 to vector<2x128xf32>
    %629 = arith.addf %628, %627 : vector<2x128xf32>
    %630 = arith.divf %628, %629 : vector<2x128xf32>
    %631 = arith.mulf %622, %574 : vector<2x128xf32>
    %632 = arith.mulf %616, %624 : vector<2x128xf32>
    %633 = arith.addf %631, %632 : vector<2x128xf32>
    %634 = math.tanh %633 : vector<2x128xf32>
    %635 = arith.mulf %630, %634 : vector<2x128xf32>
    %636 = tpu.concatenate %635, %605 in 1 : vector<2x128xf32>, vector<2x128xf32> -> vector<2x256xf32>
    %637 = arith.truncf %636 : vector<2x256xf32> to vector<2x256xbf16>
    %cst_154 = arith.constant dense<0.000000e+00> : vector<2x512xf32>
    %638 = tpu.matmul %637, %1, %cst_154 {dimension_numbers = #tpu.dot_dimension_numbers<[1], [0], [0], [1], [0, 0, 1, 1], [], []>} : vector<2x256xbf16>, vector<256x512xbf16>, vector<2x512xf32> -> vector<2x512xf32>
    %639 = arith.addf %638, %310 : vector<2x512xf32>
    %640 = vector.extract_strided_slice %639 {offsets = [0, 0], sizes = [2, 128], strides = [1, 1]} : vector<2x512xf32> to vector<2x128xf32>
    %641 = arith.negf %640 : vector<2x128xf32>
    %642 = math.exp %641 : vector<2x128xf32>
    %cst_155 = arith.constant 1.000000e+00 : f32
    %643 = vector.broadcast %cst_155 : f32 to vector<2x128xf32>
    %644 = arith.addf %643, %642 : vector<2x128xf32>
    %645 = arith.divf %643, %644 : vector<2x128xf32>
    %646 = vector.extract_strided_slice %639 {offsets = [0, 128], sizes = [2, 128], strides = [1, 1]} : vector<2x512xf32> to vector<2x128xf32>
    %647 = arith.negf %646 : vector<2x128xf32>
    %648 = math.exp %647 : vector<2x128xf32>
    %cst_156 = arith.constant 1.000000e+00 : f32
    %649 = vector.broadcast %cst_156 : f32 to vector<2x128xf32>
    %650 = arith.addf %649, %648 : vector<2x128xf32>
    %651 = arith.divf %649, %650 : vector<2x128xf32>
    %652 = vector.extract_strided_slice %639 {offsets = [0, 256], sizes = [2, 128], strides = [1, 1]} : vector<2x512xf32> to vector<2x128xf32>
    %653 = math.tanh %652 : vector<2x128xf32>
    %654 = vector.extract_strided_slice %639 {offsets = [0, 384], sizes = [2, 128], strides = [1, 1]} : vector<2x512xf32> to vector<2x128xf32>
    %655 = arith.negf %654 : vector<2x128xf32>
    %656 = math.exp %655 : vector<2x128xf32>
    %cst_157 = arith.constant 1.000000e+00 : f32
    %657 = vector.broadcast %cst_157 : f32 to vector<2x128xf32>
    %658 = arith.addf %657, %656 : vector<2x128xf32>
    %659 = arith.divf %657, %658 : vector<2x128xf32>
    %660 = arith.mulf %651, %603 : vector<2x128xf32>
    %661 = arith.mulf %645, %653 : vector<2x128xf32>
    %662 = arith.addf %660, %661 : vector<2x128xf32>
    %663 = math.tanh %662 : vector<2x128xf32>
    %664 = arith.mulf %659, %663 : vector<2x128xf32>
    %c12_158 = arith.constant 12 : index
    %c0_159 = arith.constant 0 : index
    %665 = vector.load %arg9[%c12_158, %c0_159] : memref<16x128xf32, #tpu.memory_space<vmem>>, vector<2x128xf32>
    tpu.vector_store %arg9[%c12_158, %c0_159], %664 {strides = array<i32>} : memref<16x128xf32, #tpu.memory_space<vmem>>, vector<2x128xf32>,
    %666 = tpu.concatenate %664, %635 in 1 : vector<2x128xf32>, vector<2x128xf32> -> vector<2x256xf32>
    %667 = arith.truncf %666 : vector<2x256xf32> to vector<2x256xbf16>
    %cst_160 = arith.constant dense<0.000000e+00> : vector<2x512xf32>
    %668 = tpu.matmul %667, %0, %cst_160 {dimension_numbers = #tpu.dot_dimension_numbers<[1], [0], [0], [1], [0, 0, 1, 1], [], []>} : vector<2x256xbf16>, vector<256x512xbf16>, vector<2x512xf32> -> vector<2x512xf32>
    %669 = arith.addf %668, %296 : vector<2x512xf32>
    %670 = vector.extract_strided_slice %669 {offsets = [0, 0], sizes = [2, 128], strides = [1, 1]} : vector<2x512xf32> to vector<2x128xf32>
    %671 = arith.negf %670 : vector<2x128xf32>
    %672 = math.exp %671 : vector<2x128xf32>
    %cst_161 = arith.constant 1.000000e+00 : f32
    %673 = vector.broadcast %cst_161 : f32 to vector<2x128xf32>
    %674 = arith.addf %673, %672 : vector<2x128xf32>
    %675 = arith.divf %673, %674 : vector<2x128xf32>
    %676 = vector.extract_strided_slice %669 {offsets = [0, 128], sizes = [2, 128], strides = [1, 1]} : vector<2x512xf32> to vector<2x128xf32>
    %677 = arith.negf %676 : vector<2x128xf32>
    %678 = math.exp %677 : vector<2x128xf32>
    %cst_162 = arith.constant 1.000000e+00 : f32
    %679 = vector.broadcast %cst_162 : f32 to vector<2x128xf32>
    %680 = arith.addf %679, %678 : vector<2x128xf32>
    %681 = arith.divf %679, %680 : vector<2x128xf32>
    %682 = vector.extract_strided_slice %669 {offsets = [0, 256], sizes = [2, 128], strides = [1, 1]} : vector<2x512xf32> to vector<2x128xf32>
    %683 = math.tanh %682 : vector<2x128xf32>
    %684 = vector.extract_strided_slice %669 {offsets = [0, 384], sizes = [2, 128], strides = [1, 1]} : vector<2x512xf32> to vector<2x128xf32>
    %685 = arith.negf %684 : vector<2x128xf32>
    %686 = math.exp %685 : vector<2x128xf32>
    %cst_163 = arith.constant 1.000000e+00 : f32
    %687 = vector.broadcast %cst_163 : f32 to vector<2x128xf32>
    %688 = arith.addf %687, %686 : vector<2x128xf32>
    %689 = arith.divf %687, %688 : vector<2x128xf32>
    %690 = arith.mulf %681, %633 : vector<2x128xf32>
    %691 = arith.mulf %675, %683 : vector<2x128xf32>
    %692 = arith.addf %690, %691 : vector<2x128xf32>
    %693 = math.tanh %692 : vector<2x128xf32>
    %694 = arith.mulf %689, %693 : vector<2x128xf32>
    %695 = tpu.concatenate %694, %664 in 1 : vector<2x128xf32>, vector<2x128xf32> -> vector<2x256xf32>
    %696 = arith.truncf %695 : vector<2x256xf32> to vector<2x256xbf16>
    %cst_164 = arith.constant dense<0.000000e+00> : vector<2x512xf32>
    %697 = tpu.matmul %696, %1, %cst_164 {dimension_numbers = #tpu.dot_dimension_numbers<[1], [0], [0], [1], [0, 0, 1, 1], [], []>} : vector<2x256xbf16>, vector<256x512xbf16>, vector<2x512xf32> -> vector<2x512xf32>
    %698 = arith.addf %697, %310 : vector<2x512xf32>
    %699 = vector.extract_strided_slice %698 {offsets = [0, 0], sizes = [2, 128], strides = [1, 1]} : vector<2x512xf32> to vector<2x128xf32>
    %700 = arith.negf %699 : vector<2x128xf32>
    %701 = math.exp %700 : vector<2x128xf32>
    %cst_165 = arith.constant 1.000000e+00 : f32
    %702 = vector.broadcast %cst_165 : f32 to vector<2x128xf32>
    %703 = arith.addf %702, %701 : vector<2x128xf32>
    %704 = arith.divf %702, %703 : vector<2x128xf32>
    %705 = vector.extract_strided_slice %698 {offsets = [0, 128], sizes = [2, 128], strides = [1, 1]} : vector<2x512xf32> to vector<2x128xf32>
    %706 = arith.negf %705 : vector<2x128xf32>
    %707 = math.exp %706 : vector<2x128xf32>
    %cst_166 = arith.constant 1.000000e+00 : f32
    %708 = vector.broadcast %cst_166 : f32 to vector<2x128xf32>
    %709 = arith.addf %708, %707 : vector<2x128xf32>
    %710 = arith.divf %708, %709 : vector<2x128xf32>
    %711 = vector.extract_strided_slice %698 {offsets = [0, 256], sizes = [2, 128], strides = [1, 1]} : vector<2x512xf32> to vector<2x128xf32>
    %712 = math.tanh %711 : vector<2x128xf32>
    %713 = vector.extract_strided_slice %698 {offsets = [0, 384], sizes = [2, 128], strides = [1, 1]} : vector<2x512xf32> to vector<2x128xf32>
    %714 = arith.negf %713 : vector<2x128xf32>
    %715 = math.exp %714 : vector<2x128xf32>
    %cst_167 = arith.constant 1.000000e+00 : f32
    %716 = vector.broadcast %cst_167 : f32 to vector<2x128xf32>
    %717 = arith.addf %716, %715 : vector<2x128xf32>
    %718 = arith.divf %716, %717 : vector<2x128xf32>
    %719 = arith.mulf %710, %662 : vector<2x128xf32>
    %720 = arith.mulf %704, %712 : vector<2x128xf32>
    %721 = arith.addf %719, %720 : vector<2x128xf32>
    %722 = math.tanh %721 : vector<2x128xf32>
    %723 = arith.mulf %718, %722 : vector<2x128xf32>
    %c14_168 = arith.constant 14 : index
    %c0_169 = arith.constant 0 : index
    %724 = vector.load %arg9[%c14_168, %c0_169] : memref<16x128xf32, #tpu.memory_space<vmem>>, vector<2x128xf32>
    tpu.vector_store %arg9[%c14_168, %c0_169], %723 {strides = array<i32>} : memref<16x128xf32, #tpu.memory_space<vmem>>, vector<2x128xf32>,
    %c0_170 = arith.constant 0 : index
    %c0_171 = arith.constant 0 : index
    %725 = vector.load %arg9[%c0_170, %c0_171] : memref<16x128xf32, #tpu.memory_space<vmem>>, vector<16x128xf32>
    %726 = arith.truncf %725 : vector<16x128xf32> to vector<16x128xbf16>
    %cst_172 = arith.constant dense<0.000000e+00> : vector<16x256xf32>
    %727 = tpu.matmul %726, %2, %cst_172 {dimension_numbers = #tpu.dot_dimension_numbers<[1], [0], [0], [1], [0, 0, 1, 1], [], []>} : vector<16x128xbf16>, vector<128x256xbf16>, vector<16x256xf32> -> vector<16x256xf32>
    %728 = vector.broadcast %9 : vector<1x256xf32> to vector<16x256xf32>
    %729 = arith.addf %727, %728 : vector<16x256xf32>
    %730 = tpu.iota {dimensions = array<i32: 1>} : vector<16x256xi32>
    %c128_i32 = arith.constant 128 : i32
    %731 = vector.broadcast %c128_i32 : i32 to vector<16x256xi32>
    %732 = arith.cmpi sge, %730, %731 : vector<16x256xi32>
    %cst_173 = arith.constant 0.000000e+00 : f32
    %733 = vector.broadcast %cst_173 : f32 to vector<16x256xf32>
    %734 = arith.maximumf %729, %733 : vector<16x256xf32>
    %735 = math.absf %729 : vector<16x256xf32>
    %cst_174 = arith.constant 0.000000e+00 : f32
    %736 = vector.broadcast %cst_174 : f32 to vector<16x256xf32>
    %737 = arith.subf %736, %735 : vector<16x256xf32>
    %738 = math.exp %737 : vector<16x256xf32>
    %739 = math.log1p %738 : vector<16x256xf32>
    %740 = arith.addf %734, %739 : vector<16x256xf32>
    %cst_175 = arith.constant 1.1920929E-7 : f32
    %741 = vector.broadcast %cst_175 : f32 to vector<16x256xf32>
    %742 = arith.addf %740, %741 : vector<16x256xf32>
    %743 = arith.select %732, %742, %729 : vector<16x256xi1>, vector<16x256xf32>
    %744 = tpu.concatenate %294, %743 in 1 : vector<16x128xf32>, vector<16x256xf32> -> vector<16x384xf32>
    %c0_176 = arith.constant 0 : index
    %c0_177 = arith.constant 0 : index
    %745 = vector.load %arg6[%c0_176, %c0_177] : memref<16x384xf32, #tpu.memory_space<vmem>>, vector<16x384xf32>
    tpu.vector_store %arg6[%c0_176, %c0_177], %744 {strides = array<i32>} : memref<16x384xf32, #tpu.memory_space<vmem>>, vector<16x384xf32>,
    return
  }
}

</mosaic_0001>

<bundles_post_ra>
// kernel: tile.9
= control target key start
LH: loop header
LB: loop body
LE: loop exit
PB: predicated region body
PF: predicated region fallthrough
CT: control target
= control target key end

     0   :  { %s30_s10 = smov 3  ;;  %s11_s11 = smov 3  ;;  %vm13_vm0 = vcmask 261120   ;;  %vm20_vm1 = vcmask 1048320   ;;  %vm27_vm2 = vcmask 785920   ;;  %vm34_vm3 = vcmask 523520   ;;  %s70_s0 = inlined_call_operand.vmem [shape: f32[2,4,32], index: 0, kind: input, shape index: {}]   ;;  %s71_s1 = inlined_call_operand.vmem [shape: f32[2,128], index: 1, kind: output, shape index: {}]  }
   0x1   :  { %v44_v0 = vld [vmem:[%s70_s0 + $0x4] sm:$0xf]  ;;  %v9_v1 = vld [vmem:[%s70_s0] sm:$0xf]  ;;  %s16_s0 = smov 3  ;;  %s23_s12 = smov 3 }
   0x2   :  { %8 = vst [vmem:[#allocation1 + $0x8] sm:$0xf] %v44_v0  ;;  %10 = vst [vmem:[#allocation1] sm:$0xf] %v9_v1  ;;  %s48_s13 = smov 96   ;;  %s49_s14 = smov 32  }
   0x3   :  { %s50_s15 = smov 64  }
   0x9   :  { %v17_v2 = vld [vmem:[#allocation1 + $0x3] ss:$8 sm:%s16_s0]   ;;  %v31_v3 = vld [vmem:[#allocation1 + $0x1] ss:$8 sm:%s30_s10]   ;;  %v12_v4 = vld [vmem:[#allocation1] ss:$8 sm:%s11_s11]  }
   0xa   :  { %18 = vrot.lane.b32.xlu0 %v17_v2, %s48_s13  ;;  %32 = vrot.lane.b32.xlu1 %v31_v3, %s49_s14  ;;  %v24_v5 = vld [vmem:[#allocation1 + $0x2] ss:$8 sm:%s23_s12]   ;;  %14 = vst.msk [vmem:[#allocation0] sm:$0x3] %vm13_vm0, %v12_v4  }
   0xe   :  { %25 = vrot.lane.b32.xlu0 %v24_v5, %s50_s15 }
  0x7c   :  { %v19_v6 = vpop.permute.xlu0 %18   ;;  %v33_v7 = vpop.permute.xlu1 %32  }
  0x7d   :  { %21 = vst.msk [vmem:[#allocation0] sm:$0x3] %vm20_vm1, %v19_v6  }
  0x80   :  { %v26_v8 = vpop.permute.xlu0 %25  }
  0x81   :  { %28 = vst.msk [vmem:[#allocation0] sm:$0x3] %vm27_vm2, %v26_v8  }
  0x82   :  { %35 = vst.msk [vmem:[#allocation0] sm:$0x3] %vm34_vm3, %v33_v7  }
  0x89   :  { %v40_v9 = vld [vmem:[#allocation0] sm:$0x3] }
  0x8a   :  { %43 = vst [vmem:[%s71_s1] sm:$0x3] %v40_v9 }

// kernel: inference_net_forward.1
= control target key start
LH: loop header
LB: loop body
LE: loop exit
PB: predicated region body
PF: predicated region fallthrough
CT: control target
= control target key end

     0   :  { %11 = vsyncpa [#allocation6], 0  ;;  %s6947_s0 = inlined_call_operand.vmem [shape: bf16[16,22], index: 0, kind: input, shape index: {}]   ;;  %s6948_s1 = inlined_call_operand.vmem [shape: f32[2,640], index: 1, kind: input, shape index: {}]   ;;  %s6949_s2 = inlined_call_operand.hbm [shape: bf16[512,512], index: 2, kind: input, shape index: {}]   ;;  %s6950_s3 = inlined_call_operand.hbm [shape: bf16[342,256], index: 3, kind: input, shape index: {}]   ;;  %s6951_s4 = inlined_call_operand.vmem [shape: f32[4,512], index: 4, kind: input, shape index: {}]   ;;  %s6952_s5 = inlined_call_operand.vmem [shape: f32[6,128], index: 5, kind: input, shape index: {}]   ;;  %s6953_s6 = inlined_call_operand.vmem [shape: f32[16,384], index: 6, kind: output, shape index: {}]  }
   0x1   :  { %12 = vsyncpa [#allocation8], 0  ;;  %s4846_s21 = smov [#allocation5]  }
   0x2   :  { %s22_s22 = sshll.u32 %s4846_s21, 4  ;;  %s23_s22 = int_to_ptr.vmem [resolvable:$true] %s22_s22 }
   0x3   :  { %s4810_s23 = scalar_lea.vmem %s23_s22, 16384  ;;  %p4815_p1 = scmp.lt.s32.totalorder %s23_s22, %s23_s22 }
   0x4   :  { %p4811_p0 = scmp.ne.s32.totalorder %s23_s22, %s4810_s23  ;;  %p4816_p2 = scmp.lt.s32.totalorder %s4810_s23, %s4810_s23 }
   0x6   :  { %p4817_p3 = por %p4816_p2, %p4815_p1 }
   0x8   :  { %p4818_p4 = pnand %p4817_p3, %p4811_p0 }
   0xa   :  { %4821 = shalt.err (!%p4818_p4)
}
   0xb   :  { %s4847_s24 = smov 256   ;;  %s4848_s25 = smov 16  }
   0xc   :  { %28 = dma.hbm_to_vmem [thread:$0]  %s6949_s2, 16384, %s23_s22, [#allocation6], %s4847_s24, %s4847_s24, %s4848_s25  }
   0xd   :  { %s4849_s28 = smov [#allocation7]  }
   0xe   :  { %s34_s29 = sshll.u32 %s4849_s28, 4  ;;  %s35_s29 = int_to_ptr.vmem [resolvable:$true] %s34_s29 }
   0xf   :  { %s4830_s30 = scalar_lea.vmem %s35_s29, 5504  ;;  %p4835_p6 = scmp.lt.s32.totalorder %s35_s29, %s35_s29 }
  0x10   :  { %p4831_p5 = scmp.ne.s32.totalorder %s35_s29, %s4830_s30  ;;  %p4836_p7 = scmp.lt.s32.totalorder %s4830_s30, %s4830_s30 }
  0x12   :  { %p4837_p8 = por %p4836_p7, %p4835_p6 }
  0x14   :  { %p4838_p9 = pnand %p4837_p8, %p4831_p5 }
  0x16   :  { %4841 = shalt.err (!%p4838_p9)
}
  0x17   :  { %s4850_s7 = smov 128   ;;  %s4851_s8 = smov 8  }
  0x18   :  { %40 = dma.hbm_to_vmem [thread:$0]  %s6950_s3, 5504, %s35_s29, [#allocation8], %s4850_s7, %s4850_s7, %s4851_s8  }
  0x19   :  { %4842 = dma.done.wait [#allocation6], 16384  }
  0x1a   :  { %4843 = vsyncadd [#allocation6], 4294950912 }
  0x1b   :  { %4844 = dma.done.wait [#allocation8], 5504  }
  0x1c   :  { %4845 = vsyncadd [#allocation8], 4294961792  ;;  %v6954_v0 = vmov 0   ;;  %v222_v1 = vld [vmem:[#allocation7 + $0x150] sm:$0x77]  ;;  %vm266_vm0 = vcmask 1042432   ;;  %v6955_v19 = vlaneseq }
  0x1d   :  { %305 = vmatprep.mubr.bf16.mxu0 %v6954_v0  ;;  %575 = vmatprep.mubr.bf16.mxu1 %v6954_v0  ;;  %v3684_v2 = vcombine.high %v222_v1, %v222_v1  ;;  %v3683_v3 = vcombine.low %v222_v1, %v222_v1  ;;  %v3969_v4 = vld [vmem:[#allocation7 + $0x144] ss:$8 sps:$4 sm:$0xff]   ;;  %v3971_v6 = vld [vmem:[#allocation7 + $0x140] ss:$8 sps:$4 sm:$0xff]   ;;  %v4900_v7 = vld [vmem:[#allocation7 + $0xb4] ss:$8 sps:$4 sm:$0xff]  }
  0x1e   :  { %v4902_v8 = vld [vmem:[#allocation7 + $0xb0] ss:$8 sps:$4 sm:$0xff]   ;;  %v4904_v9 = vld [vmem:[#allocation7 + $0xa4] ss:$8 sps:$4 sm:$0xff]   ;;  %551 = vmatprep.subr.bf16.mxu1 %v4900_v7  ;;  %vm262_vm1 = vcmask 179200   ;;  %s4853_s13 = smov 64  }
  0x1f   :  { %3685 = vmatprep.subr.msk.bf16.mxu0 %vm266_vm0, %v3684_v2  ;;  %v268_v5 = vsel %vm266_vm0, %v3683_v3, 0  ;;  %552 = vmatpush1.bf16.msra.mxu1 %v4902_v8  ;;  %v3972_v10 = vld [vmem:[%s6947_s0] sm:$0xff]   ;;  %v4912_v11 = vld [vmem:[#allocation7 + $0xa0] ss:$8 sps:$4 sm:$0xff]   ;;  %v4924_v15 = vld [vmem:[#allocation7 + $0x84] ss:$8 sps:$4 sm:$0xff]  }
  0x20   :  { %286 = vmatpush1.bf16.msra.mxu0 %v268_v5  ;;  %553 = vmatprep.subr.bf16.mxu1 %v4904_v9  ;;  %v3688_v12 = vld [vmem:[%s6952_s5 + $0x1] ss:$0 sm:$0xff]  ;;  %v4918_v13 = vld [vmem:[#allocation7 + $0x94] ss:$8 sps:$4 sm:$0xff]   ;;  %v4930_v16 = vld [vmem:[#allocation7 + $0x80] ss:$8 sps:$4 sm:$0xff]  }
  0x21   :  { %287 = vmatprep.subr.bf16.mxu0 %v3969_v4  ;;  %428 = vrot.lane.b32.xlu0 %v3688_v12, %s4853_s13  ;;  %v4921_v14 = vld [vmem:[#allocation7 + $0x90] ss:$8 sps:$4 sm:$0xff]   ;;  %vm367_vm2 = vcmask 523264   ;;  %v4956_v20 = vshrl.u32 %v6955_v19, 7  ;;  %vm444_vm3 = vcmask 517120   ;;  %vm621_vm4 = vcmask 521220  }
  0x22   :  { %v3687_v17 = vld [vmem:[%s6952_s5] ss:$0 sm:$0xff]  ;;  %vm532_vm5 = vcmask 519170   ;;  %vm710_vm6 = vcmask 523270   ;;  %vm4855_vm7 = vmmov 0  }
  0x23   :  { %554 = vmatpush1.bf16.msra.mxu1 %v4912_v11  ;;  %v326_v18 = vpack.c.bf16 %v3687_v17, %v3687_v17  ;;  %v4959_v21 = vsub.s32 0, %v4956_v20  ;;  %v223_v22 = vld [vmem:[%s6951_s4] ss:$4 sm:$0x3]  ;;  %v4965_v24 = vsub.s32 1, %v4956_v20 }
  0x24   :  { %288 = vmatpush1.bf16.msra.mxu0 %v3971_v6  ;;  %555 = vmatprep.subr.bf16.mxu1 %v4918_v13  ;;  %v5289_v19 = vld [vmem:[#allocation5 + $0x128] ss:$16 sps:$4 sm:$0xff]  }
  0x25   :  { %379 = vmatprep.subr.bf16.mxu0 %v4900_v7  ;;  %7317 = vst [vmem:[#allocation11_spill] sm:$0xff] %v4959_v21  ;;  %7318 = vst [vmem:[#allocation12_spill] sm:$0xff] %v4965_v24  ;;  %v235_v26 = vrot.slane %v223_v22, %v4959_v21  ;;  %v239_v28 = vrot.slane %v223_v22, %v4965_v24  ;;  %v5292_v24 = vld [vmem:[#allocation5 + $0x104] ss:$16 sps:$4 sm:$0xff]   ;;  %v5295_v21 = vld [vmem:[#allocation5 + $0x10c] ss:$16 sps:$4 sm:$0xff]  }
  0x26   :  { %7338 = vst [vmem:[#allocation32_spill] sm:$0xff] %v5289_v19  ;;  %7339 = vst [vmem:[#allocation33_spill] sm:$0xff] %v5292_v24 }
  0x27   :  { %3686 = vmatmul.mubr.msk.bf16.vlgmr.msra.gmra.mxu0 %vm262_vm1, %v3972_v10  ;;  %556 = vmatpush1.bf16.msra.mxu1 %v4921_v14  ;;  %7340 = vst [vmem:[#allocation34_spill] sm:$0xff] %v5295_v21 }
  0x28   :  { %380 = vmatpush1.bf16.msra.mxu0 %v4902_v8  ;;  %403 = vmatprep.mubr.bf16.mxu0 %v6954_v0 }
  0x29   :  { %381 = vmatprep.subr.bf16.mxu0 %v4904_v9  ;;  %557 = vmatprep.subr.bf16.mxu1 %v4924_v15 }
  0x2b   :  { %558 = vmatpush1.bf16.msra.mxu1 %v4930_v16 }
  0x2c   :  { %382 = vmatpush1.bf16.msra.mxu0 %v4912_v11  ;;  %729 = vmatprep.subr.bf16.mxu1 %v4900_v7 }
  0x2d   :  { %383 = vmatprep.subr.bf16.mxu0 %v4918_v13 }
  0x30   :  { %384 = vmatpush1.bf16.msra.mxu0 %v4921_v14 }
  0x31   :  { %385 = vmatprep.subr.bf16.mxu0 %v4924_v15 }
  0x34   :  { %386 = vmatpush1.bf16.msra.mxu0 %v4930_v16 }
  0x35   :  { %462 = vmatprep.subr.bf16.mxu0 %v4900_v7 }
  0x37   :  { %3697 = vmatmul.mubr.msk.bf16.vlgmr.msra.gmra.mxu0 %vm367_vm2, %v326_v18 }
  0x38   :  { %463 = vmatpush1.bf16.msra.mxu0 %v4902_v8  ;;  %486 = vmatprep.mubr.bf16.mxu0 %v6954_v0 }
  0x39   :  { %464 = vmatprep.subr.bf16.mxu0 %v4904_v9 }
  0x3c   :  { %465 = vmatpush1.bf16.msra.mxu0 %v4912_v11 }
  0x3d   :  { %466 = vmatprep.subr.bf16.mxu0 %v4918_v13 }
  0x40   :  { %467 = vmatpush1.bf16.msra.mxu0 %v4921_v14 }
  0x41   :  { %468 = vmatprep.subr.bf16.mxu0 %v4924_v15 }
  0x44   :  { %469 = vmatpush1.bf16.msra.mxu0 %v4930_v16 }
  0x45   :  { %640 = vmatprep.subr.bf16.mxu0 %v4900_v7 }
  0x93   :  { %v429_v48 = vpop.permute.xlu0 %428 }
  0xe7   :  { %v307_v23 = vpop.f32.mrf.mxu0 }
  0xe8   :  { %v4973_v32 = vadd.f32 %v307_v23, %v235_v26 }
  0xe9   :  { %v309_v25 = vpop.f32.mrf.mxu0 }
  0xea   :  { %v4976_v39 = vadd.f32 %v309_v25, %v239_v28 }
  0xeb   :  { %v311_v27 = vpop.f32.mrf.mxu0 }
  0xec   :  { %v4969_v29 = vadd.f32 %v311_v27, %v235_v26 }
  0xed   :  { %v313_v30 = vpop.f32.mrf.mxu0 }
  0xee   :  { %v4971_v31 = vadd.f32 %v313_v30, %v239_v28 }
  0xf7   :  { %v405_v33 = vpop.f32.mrf.mxu0 }
  0xf8   :  { %v412_v34 = vadd.f32 %v405_v33, %v4973_v32 }
  0xf9   :  { %v407_v35 = vpop.f32.mrf.mxu0 }
  0xfa   :  { %v3698_v36 = vmul.f32 -1.442695, %v412_v34  ;;  %v413_v40 = vadd.f32 %v407_v35, %v4976_v39 }
  0xfb   :  { %v409_v37 = vpop.f32.mrf.mxu0 }
  0xfc   :  { %4210 = vpow2.f32 %v3698_v36  ;;  %v3699_v46 = vmul.f32 -1.442695, %v413_v40 }
  0xfd   :  { %v410_v38 = vpop.f32.mrf.mxu0  ;;  %4212 = vtanh.f32 %v413_v40 }
 0x109   :  { %v4211_v41 = vpop.eup %4210 }
 0x10a   :  { %v417_v42 = vadd.f32 1.0, %v4211_v41  ;;  %v4213_v43 = vpop.eup %4212 }
 0x10c   :  { %4214 = vrcp.f32 %v417_v42 }
 0x10d   :  { %4216 = vpow2.f32 %v3699_v46 }
 0x119   :  { %v4215_v44 = vpop.eup %4214 }
 0x11a   :  { %v432_v45 = vmul.f32 %v4215_v44, %v4213_v43  ;;  %v4217_v47 = vpop.eup %4216  ;;  %v431_v50 = vmul.f32 %v4215_v44, %v429_v48 }
 0x11b   :  { %v424_v49 = vadd.f32 1.0, %v4217_v47 }
 0x11c   :  { %434 = vrot.lane.b32.xlu0 %v432_v45, %s4853_s13 }
 0x11d   :  { %4218 = vrcp.f32 %v424_v49 }
 0x12a   :  { %v4219_v53 = vpop.eup %4218 }
 0x18e   :  { %v435_v51 = vpop.permute.xlu0 %434 }
 0x18f   :  { %v437_v52 = vadd.f32 %v435_v51, %v431_v50 }
 0x191   :  { %4220 = vtanh.f32 %v437_v52  ;;  %v517_v10 = vrot.slane %v437_v52, 6 }
 0x19e   :  { %v4221_v54 = vpop.eup %4220 }
 0x19f   :  { %v4980_v55 = vmul.f32 %v4221_v54, %v4219_v53 }
 0x1a1   :  { %v447_v56 = vpack.c.bf16 %v4980_v55, %v4980_v55 }
 0x1a3   :  { %449 = vrot.lane.b32.xlu1 %v447_v56, %s4853_s13 }
 0x215   :  { %v450_v57 = vpop.permute.xlu1 %449 }
 0x216   :  { %3700 = vmatmul.mubr.msk.bf16.vlgmr.msra.gmra.mxu0 %vm367_vm2, %v450_v57 }
 0x217   :  { %641 = vmatpush1.bf16.msra.mxu0 %v4902_v8  ;;  %664 = vmatprep.mubr.bf16.mxu0 %v6954_v0 }
 0x218   :  { %642 = vmatprep.subr.bf16.mxu0 %v4904_v9 }
 0x21b   :  { %643 = vmatpush1.bf16.msra.mxu0 %v4912_v11 }
 0x21c   :  { %644 = vmatprep.subr.bf16.mxu0 %v4918_v13 }
 0x21f   :  { %645 = vmatpush1.bf16.msra.mxu0 %v4921_v14 }
 0x220   :  { %646 = vmatprep.subr.bf16.mxu0 %v4924_v15 }
 0x223   :  { %647 = vmatpush1.bf16.msra.mxu0 %v4930_v16 }
 0x224   :  { %810 = vmatprep.subr.bf16.mxu0 %v4900_v7 }
 0x2d6   :  { %v488_v58 = vpop.f32.mrf.mxu0 }
 0x2d7   :  { %v497_v59 = vrot.slane %v488_v58, 6 }
 0x2d8   :  { %v490_v60 = vpop.f32.mrf.mxu0 }
 0x2d9   :  { %v501_v61 = vadd.f32 %v497_v59, %v4973_v32  ;;  %v498_v2 = vrot.slane %v490_v60, 6 }
 0x2da   :  { %v492_v62 = vpop.f32.mrf.mxu0 }
 0x2db   :  { %v3701_v63 = vmul.f32 -1.442695, %v501_v61  ;;  %v502_v3 = vadd.f32 %v498_v2, %v4976_v39 }
 0x2dc   :  { %v493_v1 = vpop.f32.mrf.mxu0 }
 0x2dd   :  { %4222 = vpow2.f32 %v3701_v63  ;;  %v3702_v22 = vmul.f32 -1.442695, %v502_v3 }
 0x2de   :  { %4224 = vtanh.f32 %v502_v3 }
 0x2ea   :  { %v4223_v4 = vpop.eup %4222 }
 0x2eb   :  { %v506_v5 = vadd.f32 1.0, %v4223_v4  ;;  %v4225_v6 = vpop.eup %4224 }
 0x2ed   :  { %4226 = vrcp.f32 %v506_v5 }
 0x2ee   :  { %4228 = vpow2.f32 %v3702_v22 }
 0x2fa   :  { %v4227_v12 = vpop.eup %4226 }
 0x2fb   :  { %v520_v17 = vmul.f32 %v4227_v12, %v4225_v6  ;;  %v519_v18 = vmul.f32 %v4227_v12, %v517_v10  ;;  %v4229_v23 = vpop.eup %4228 }
 0x2fc   :  { %v513_v25 = vadd.f32 1.0, %v4229_v23 }
 0x2fd   :  { %522 = vrot.lane.b32.xlu1 %v520_v17, %s4853_s13 }
 0x2fe   :  { %4230 = vrcp.f32 %v513_v25 }
 0x30b   :  { %v4231_v28 = vpop.eup %4230 }
 0x36f   :  { %v523_v26 = vpop.permute.xlu1 %522 }
 0x370   :  { %v525_v27 = vadd.f32 %v523_v26, %v519_v18 }
 0x372   :  { %4232 = vtanh.f32 %v525_v27  ;;  %v606_v50 = vrot.slane %v525_v27, 6 }
 0x37f   :  { %v4233_v30 = vpop.eup %4232 }
 0x380   :  { %v4998_v33 = vmul.f32 %v4233_v30, %v4231_v28 }
 0x382   :  { %v535_v34 = vpack.c.bf16 %v4998_v33, %v4998_v33 }
 0x384   :  { %v537_v35 = vrot.slane %v535_v34, 1 }
 0x386   :  { %538 = vrot.lane.b32.xlu0 %v537_v35, %s4853_s13 }
 0x3f8   :  { %v539_v36 = vpop.permute.xlu0 %538 }
 0x3f9   :  { %3703 = vmatmul.mubr.msk.bf16.vlgmr.msra.gmra.mxu1 %vm367_vm2, %v539_v36 }
 0x3fa   :  { %730 = vmatpush1.bf16.msra.mxu1 %v4902_v8  ;;  %753 = vmatprep.mubr.bf16.mxu1 %v6954_v0 }
 0x3fb   :  { %731 = vmatprep.subr.bf16.mxu1 %v4904_v9 }
 0x3fe   :  { %732 = vmatpush1.bf16.msra.mxu1 %v4912_v11 }
 0x3ff   :  { %733 = vmatprep.subr.bf16.mxu1 %v4918_v13 }
 0x402   :  { %734 = vmatpush1.bf16.msra.mxu1 %v4921_v14 }
 0x403   :  { %735 = vmatprep.subr.bf16.mxu1 %v4924_v15 }
 0x406   :  { %736 = vmatpush1.bf16.msra.mxu1 %v4930_v16 }
 0x407   :  { %898 = vmatprep.subr.bf16.mxu1 %v4900_v7 }
 0x4b9   :  { %v577_v37 = vpop.f32.mrf.mxu1 }
 0x4ba   :  { %v586_v38 = vrot.slane %v577_v37, 4 }
 0x4bb   :  { %v579_v40 = vpop.f32.mrf.mxu1 }
 0x4bc   :  { %v590_v41 = vadd.f32 %v586_v38, %v4973_v32  ;;  %v587_v45 = vrot.slane %v579_v40, 4 }
 0x4bd   :  { %v581_v42 = vpop.f32.mrf.mxu1 }
 0x4be   :  { %v3704_v43 = vmul.f32 -1.442695, %v590_v41  ;;  %v591_v46 = vadd.f32 %v587_v45, %v4976_v39 }
 0x4bf   :  { %v582_v44 = vpop.f32.mrf.mxu1 }
 0x4c0   :  { %4234 = vpow2.f32 %v3704_v43  ;;  %v3705_v54 = vmul.f32 -1.442695, %v591_v46 }
 0x4c1   :  { %4236 = vtanh.f32 %v591_v46 }
 0x4cd   :  { %v4235_v47 = vpop.eup %4234 }
 0x4ce   :  { %v595_v48 = vadd.f32 1.0, %v4235_v47  ;;  %v4237_v49 = vpop.eup %4236 }
 0x4d0   :  { %4238 = vrcp.f32 %v595_v48 }
 0x4d1   :  { %4240 = vpow2.f32 %v3705_v54 }
 0x4dd   :  { %v4239_v51 = vpop.eup %4238 }
 0x4de   :  { %v609_v52 = vmul.f32 %v4239_v51, %v4237_v49  ;;  %v608_v53 = vmul.f32 %v4239_v51, %v606_v50  ;;  %v4241_v56 = vpop.eup %4240 }
 0x4df   :  { %v602_v57 = vadd.f32 1.0, %v4241_v56 }
 0x4e0   :  { %611 = vrot.lane.b32.xlu1 %v609_v52, %s4853_s13 }
 0x4e1   :  { %4242 = vrcp.f32 %v602_v57 }
 0x4ee   :  { %v4243_v60 = vpop.eup %4242 }
 0x552   :  { %v612_v58 = vpop.permute.xlu1 %611 }
 0x553   :  { %v614_v59 = vadd.f32 %v612_v58, %v608_v53 }
 0x555   :  { %4244 = vtanh.f32 %v614_v59  ;;  %v695_v27 = vrot.slane %v614_v59, 6 }
 0x562   :  { %v4245_v61 = vpop.eup %4244 }
 0x563   :  { %v5016_v62 = vmul.f32 %v4245_v61, %v4243_v60 }
 0x565   :  { %v624_v63 = vpack.c.bf16 %v5016_v62, %v5016_v62 }
 0x567   :  { %v626_v1 = vrot.slane %v624_v63, 2 }
 0x569   :  { %627 = vrot.lane.b32.xlu0 %v626_v1, %s4853_s13 }
 0x5db   :  { %v628_v2 = vpop.permute.xlu0 %627 }
 0x5dc   :  { %3706 = vmatmul.mubr.msk.bf16.vlgmr.msra.gmra.mxu0 %vm367_vm2, %v628_v2 }
 0x5dd   :  { %811 = vmatpush1.bf16.msra.mxu0 %v4902_v8  ;;  %834 = vmatprep.mubr.bf16.mxu0 %v6954_v0 }
 0x5de   :  { %812 = vmatprep.subr.bf16.mxu0 %v4904_v9 }
 0x5e1   :  { %813 = vmatpush1.bf16.msra.mxu0 %v4912_v11 }
 0x5e2   :  { %814 = vmatprep.subr.bf16.mxu0 %v4918_v13 }
 0x5e5   :  { %815 = vmatpush1.bf16.msra.mxu0 %v4921_v14 }
 0x5e6   :  { %816 = vmatprep.subr.bf16.mxu0 %v4924_v15 }
 0x5e9   :  { %817 = vmatpush1.bf16.msra.mxu0 %v4930_v16 }
 0x5ea   :  { %986 = vmatprep.subr.bf16.mxu0 %v4900_v7 }
 0x69c   :  { %v666_v3 = vpop.f32.mrf.mxu0 }
 0x69d   :  { %v675_v4 = vrot.slane %v666_v3, 2 }
 0x69e   :  { %v668_v5 = vpop.f32.mrf.mxu0 }
 0x69f   :  { %v679_v6 = vadd.f32 %v675_v4, %v4973_v32  ;;  %v676_v18 = vrot.slane %v668_v5, 2 }
 0x6a0   :  { %v670_v10 = vpop.f32.mrf.mxu0 }
 0x6a1   :  { %v3707_v12 = vmul.f32 -1.442695, %v679_v6  ;;  %v680_v22 = vadd.f32 %v676_v18, %v4976_v39 }
 0x6a2   :  { %v671_v17 = vpop.f32.mrf.mxu0 }
 0x6a3   :  { %4246 = vpow2.f32 %v3707_v12  ;;  %v3708_v34 = vmul.f32 -1.442695, %v680_v22 }
 0x6a4   :  { %4248 = vtanh.f32 %v680_v22 }
 0x6b0   :  { %v4247_v23 = vpop.eup %4246 }
 0x6b1   :  { %v684_v25 = vadd.f32 1.0, %v4247_v23  ;;  %v4249_v26 = vpop.eup %4248 }
 0x6b3   :  { %4250 = vrcp.f32 %v684_v25 }
 0x6b4   :  { %4252 = vpow2.f32 %v3708_v34 }
 0x6c0   :  { %v4251_v28 = vpop.eup %4250 }
 0x6c1   :  { %v698_v7 = vmul.f32 %v4251_v28, %v4249_v26  ;;  %v697_v30 = vmul.f32 %v4251_v28, %v695_v27  ;;  %v4253_v32 = vpop.eup %4252 }
 0x6c2   :  { %v691_v35 = vadd.f32 1.0, %v4253_v32 }
 0x6c3   :  { %700 = vrot.lane.b32.xlu1 %v698_v7, %s4853_s13 }
 0x6c4   :  { %4254 = vrcp.f32 %v691_v35 }
 0x6d1   :  { %v4255_v39 = vpop.eup %4254 }
 0x735   :  { %v701_v36 = vpop.permute.xlu1 %700 }
 0x736   :  { %v703_v37 = vadd.f32 %v701_v36, %v697_v30 }
 0x738   :  { %4256 = vtanh.f32 %v703_v37  ;;  %v778_v54 = vrot.slane %v703_v37, 6 }
 0x745   :  { %v4257_v38 = vpop.eup %4256 }
 0x746   :  { %v5034_v40 = vmul.f32 %v4257_v38, %v4255_v39 }
 0x748   :  { %v713_v41 = vpack.c.bf16 %v5034_v40, %v5034_v40 }
 0x74a   :  { %v715_v42 = vrot.slane %v713_v41, 3 }
 0x74c   :  { %716 = vrot.lane.b32.xlu0 %v715_v42, %s4853_s13 }
 0x7be   :  { %v717_v43 = vpop.permute.xlu0 %716 }
 0x7bf   :  { %3709 = vmatmul.mubr.msk.bf16.vlgmr.msra.gmra.mxu1 %vm367_vm2, %v717_v43 }
 0x7c0   :  { %899 = vmatpush1.bf16.msra.mxu1 %v4902_v8  ;;  %922 = vmatprep.mubr.bf16.mxu1 %v6954_v0 }
 0x7c1   :  { %900 = vmatprep.subr.bf16.mxu1 %v4904_v9 }
 0x7c4   :  { %901 = vmatpush1.bf16.msra.mxu1 %v4912_v11 }
 0x7c5   :  { %902 = vmatprep.subr.bf16.mxu1 %v4918_v13 }
 0x7c8   :  { %903 = vmatpush1.bf16.msra.mxu1 %v4921_v14 }
 0x7c9   :  { %904 = vmatprep.subr.bf16.mxu1 %v4924_v15 }
 0x7cc   :  { %905 = vmatpush1.bf16.msra.mxu1 %v4930_v16 }
 0x87f   :  { %v755_v44 = vpop.f32.mrf.mxu1 }
 0x880   :  { %v762_v45 = vadd.f32 %v755_v44, %v4969_v29 }
 0x881   :  { %v757_v46 = vpop.f32.mrf.mxu1 }
 0x882   :  { %v3710_v47 = vmul.f32 -1.442695, %v762_v45  ;;  %v763_v50 = vadd.f32 %v757_v46, %v4971_v31 }
 0x883   :  { %v759_v48 = vpop.f32.mrf.mxu1 }
 0x884   :  { %4258 = vpow2.f32 %v3710_v47  ;;  %v3711_v59 = vmul.f32 -1.442695, %v763_v50 }
 0x885   :  { %v760_v49 = vpop.f32.mrf.mxu1  ;;  %4260 = vtanh.f32 %v763_v50 }
 0x891   :  { %v4259_v51 = vpop.eup %4258 }
 0x892   :  { %v767_v52 = vadd.f32 1.0, %v4259_v51  ;;  %v4261_v53 = vpop.eup %4260 }
 0x894   :  { %4262 = vrcp.f32 %v767_v52 }
 0x895   :  { %4264 = vpow2.f32 %v3711_v59 }
 0x8a1   :  { %v4263_v56 = vpop.eup %4262 }
 0x8a2   :  { %v781_v57 = vmul.f32 %v4263_v56, %v4261_v53  ;;  %v780_v58 = vmul.f32 %v4263_v56, %v778_v54  ;;  %v4265_v60 = vpop.eup %4264 }
 0x8a3   :  { %v774_v61 = vadd.f32 1.0, %v4265_v60 }
 0x8a4   :  { %783 = vrot.lane.b32.xlu1 %v781_v57, %s4853_s13 }
 0x8a5   :  { %4266 = vrcp.f32 %v774_v61 }
 0x8b2   :  { %v4267_v2 = vpop.eup %4266 }
 0x916   :  { %v784_v63 = vpop.permute.xlu1 %783 }
 0x917   :  { %v786_v1 = vadd.f32 %v784_v63, %v780_v58 }
 0x919   :  { %4268 = vtanh.f32 %v786_v1 }
 0x926   :  { %v4269_v3 = vpop.eup %4268 }
 0x927   :  { %v5051_v4 = vmul.f32 %v4269_v3, %v4267_v2 }
 0x929   :  { %v795_v5 = vpack.c.bf16 %v5051_v4, %v5051_v4 }
 0x92b   :  { %797 = vrot.lane.b32.xlu0 %v795_v5, %s4853_s13 }
 0x99d   :  { %v798_v6 = vpop.permute.xlu0 %797 }
 0x99e   :  { %3712 = vmatmul.mubr.msk.bf16.vlgmr.msra.gmra.mxu0 %vm367_vm2, %v798_v6 }
 0x99f   :  { %987 = vmatpush1.bf16.msra.mxu0 %v4902_v8  ;;  %1010 = vmatprep.mubr.bf16.mxu0 %v6954_v0  ;;  %v5286_v0 = vld [vmem:[#allocation5 + $0x120] ss:$16 sps:$4 sm:$0xff]  }
 0x9a0   :  { %988 = vmatprep.subr.bf16.mxu0 %v4904_v9  ;;  %7337 = vst [vmem:[#allocation31_spill] sm:$0xff] %v5286_v0 }
 0x9a3   :  { %989 = vmatpush1.bf16.msra.mxu0 %v4912_v11 }
 0x9a4   :  { %990 = vmatprep.subr.bf16.mxu0 %v4918_v13 }
 0x9a7   :  { %991 = vmatpush1.bf16.msra.mxu0 %v4921_v14 }
 0x9a8   :  { %992 = vmatprep.subr.bf16.mxu0 %v4924_v15  ;;  %v865_v15 = vrot.slane %v786_v1, 6 }
 0x9ab   :  { %993 = vmatpush1.bf16.msra.mxu0 %v4930_v16 }
 0xa5e   :  { %v836_v10 = vpop.f32.mrf.mxu0 }
 0xa5f   :  { %v845_v12 = vrot.slane %v836_v10, 6 }
 0xa60   :  { %v838_v17 = vpop.f32.mrf.mxu0 }
 0xa61   :  { %v849_v18 = vadd.f32 %v845_v12, %v4969_v29  ;;  %v846_v9 = vrot.slane %v838_v17, 6 }
 0xa62   :  { %v840_v8 = vpop.f32.mrf.mxu0 }
 0xa63   :  { %v3713_v22 = vmul.f32 -1.442695, %v849_v18  ;;  %v850_v11 = vadd.f32 %v846_v9, %v4971_v31 }
 0xa64   :  { %v841_v23 = vpop.f32.mrf.mxu0 }
 0xa65   :  { %4270 = vpow2.f32 %v3713_v22  ;;  %v3714_v28 = vmul.f32 -1.442695, %v850_v11 }
 0xa66   :  { %4272 = vtanh.f32 %v850_v11 }
 0xa72   :  { %v4271_v25 = vpop.eup %4270 }
 0xa73   :  { %v854_v13 = vadd.f32 1.0, %v4271_v25  ;;  %v4273_v14 = vpop.eup %4272 }
 0xa75   :  { %4274 = vrcp.f32 %v854_v13 }
 0xa76   :  { %4276 = vpow2.f32 %v3714_v28 }
 0xa82   :  { %v4275_v26 = vpop.eup %4274 }
 0xa83   :  { %v868_v16 = vmul.f32 %v4275_v26, %v4273_v14  ;;  %v867_v27 = vmul.f32 %v4275_v26, %v865_v15  ;;  %v4277_v7 = vpop.eup %4276 }
 0xa84   :  { %v861_v30 = vadd.f32 1.0, %v4277_v7 }
 0xa85   :  { %870 = vrot.lane.b32.xlu1 %v868_v16, %s4853_s13 }
 0xa86   :  { %4278 = vrcp.f32 %v861_v30 }
 0xa93   :  { %v4279_v35 = vpop.eup %4278 }
 0xaf7   :  { %v871_v34 = vpop.permute.xlu1 %870 }
 0xaf8   :  { %v873_v32 = vadd.f32 %v871_v34, %v867_v27  ;;  %v3986_v34 = vld [vmem:[#allocation7 + $0xf0] ss:$8 sps:$4 sm:$0xff]  }
 0xafa   :  { %4280 = vtanh.f32 %v873_v32  ;;  %v953_v54 = vrot.slane %v873_v32, 6  ;;  %v4854_v32 = vmov 0.0  }
 0xafb   :  { %3932 = vmatprep.subr.bf16.mxu1 %v4854_v32  ;;  %3944 = vmatprep.subr.bf16.mxu0 %v4854_v32 }
 0xb07   :  { %v4281_v36 = vpop.eup %4280 }
 0xb08   :  { %v5068_v37 = vmul.f32 %v4281_v36, %v4279_v35  ;;  %v3988_v35 = vld [vmem:[#allocation7 + $0xe0] ss:$8 sps:$4 sm:$0xff]  }
 0xb0a   :  { %v882_v39 = vpack.c.bf16 %v5068_v37, %v5068_v37 }
 0xb0c   :  { %v884_v38 = vrot.slane %v882_v39, 1 }
 0xb0e   :  { %885 = vrot.lane.b32.xlu0 %v884_v38, %s4853_s13 }
 0xb80   :  { %v886_v41 = vpop.permute.xlu0 %885 }
 0xb81   :  { %3715 = vmatmul.mubr.msk.bf16.vlgmr.msra.gmra.mxu1 %vm367_vm2, %v886_v41 }
 0xb82   :  { %3940 = vmatprep.mubr.msk.bf16.mxu1 %vm4855_vm7, %v4854_v32 }
 0xc41   :  { %v924_v42 = vpop.f32.mrf.mxu1 }
 0xc42   :  { %v933_v43 = vrot.slane %v924_v42, 4 }
 0xc43   :  { %v926_v44 = vpop.f32.mrf.mxu1 }
 0xc44   :  { %v937_v45 = vadd.f32 %v933_v43, %v4969_v29  ;;  %v934_v49 = vrot.slane %v926_v44, 4  ;;  %v3990_v43 = vld [vmem:[#allocation7 + $0xd0] ss:$8 sps:$4 sm:$0xff]   ;;  %v3991_v44 = vld [vmem:[#allocation7 + $0x100] ss:$8 sps:$4 sm:$0xff]  }
 0xc45   :  { %v928_v46 = vpop.f32.mrf.mxu1 }
 0xc46   :  { %v3716_v47 = vmul.f32 -1.442695, %v937_v45  ;;  %v938_v50 = vadd.f32 %v934_v49, %v4971_v31  ;;  %v3992_v45 = vld [vmem:[#allocation7 + $0xc0] ss:$8 sps:$4 sm:$0xff]   ;;  %v5099_v46 = vld [vmem:[#allocation5 + $0xe4] ss:$16 sps:$4 sm:$0xff]  }
 0xc47   :  { %v929_v48 = vpop.f32.mrf.mxu1 }
 0xc48   :  { %4282 = vpow2.f32 %v3716_v47  ;;  %v3717_v59 = vmul.f32 -1.442695, %v938_v50 }
 0xc49   :  { %4284 = vtanh.f32 %v938_v50 }
 0xc55   :  { %v4283_v51 = vpop.eup %4282 }
 0xc56   :  { %v942_v52 = vadd.f32 1.0, %v4283_v51  ;;  %v4285_v53 = vpop.eup %4284  ;;  %v5105_v51 = vld [vmem:[#allocation5 + $0xec] ss:$16 sps:$4 sm:$0xff]  }
 0xc58   :  { %4286 = vrcp.f32 %v942_v52  ;;  %v5111_v52 = vld [vmem:[%s6948_s1] sm:$0x3] }
 0xc59   :  { %4288 = vpow2.f32 %v3717_v59  ;;  %1288 = vst [vmem:[#allocation4] sm:$0x3] %v5111_v52 }
 0xc65   :  { %v4287_v56 = vpop.eup %4286 }
 0xc66   :  { %v956_v57 = vmul.f32 %v4287_v56, %v4285_v53  ;;  %v955_v58 = vmul.f32 %v4287_v56, %v953_v54  ;;  %v4289_v60 = vpop.eup %4288  ;;  %v5116_v54 = vld [vmem:[#allocation5 + $0xe0] ss:$16 sps:$4 sm:$0xff]  }
 0xc67   :  { %v949_v61 = vadd.f32 1.0, %v4289_v60 }
 0xc68   :  { %958 = vrot.lane.b32.xlu1 %v956_v57, %s4853_s13 }
 0xc69   :  { %4290 = vrcp.f32 %v949_v61  ;;  %v5121_v61 = vld [vmem:[#allocation5 + $0xe8] ss:$16 sps:$4 sm:$0xff]  }
 0xc76   :  { %v4291_v2 = vpop.eup %4290 }
 0xcda   :  { %v959_v63 = vpop.permute.xlu1 %958 }
 0xcdb   :  { %v961_v1 = vadd.f32 %v959_v63, %v955_v58  ;;  %v3732_v58 = vld [vmem:[%s6952_s5 + $0x2] ss:$0 sm:$0xff] }
 0xcdd   :  { %4292 = vtanh.f32 %v961_v1  ;;  %v1041_v27 = vrot.slane %v961_v1, 6 }
 0xcea   :  { %v4293_v3 = vpop.eup %4292 }
 0xceb   :  { %v963_v5 = vmul.f32 %v4293_v3, %v4291_v2  ;;  %v5123_v2 = vld [vmem:[#allocation5 + $0xc4] ss:$16 sps:$4 sm:$0xff]   ;;  %v5125_v3 = vld [vmem:[#allocation5 + $0xcc] ss:$16 sps:$4 sm:$0xff]  }
 0xced   :  { %v970_v6 = vpack.c.bf16 %v963_v5, %v963_v5 }
 0xcef   :  { %v972_v10 = vrot.slane %v970_v6, 2  ;;  %v5130_v6 = vld [vmem:[#allocation5 + $0xc0] ss:$16 sps:$4 sm:$0xff]  }
 0xcf1   :  { %973 = vrot.lane.b32.xlu0 %v972_v10, %s4853_s13  ;;  %v5133_v10 = vld [vmem:[#allocation5 + $0xc8] ss:$16 sps:$4 sm:$0xff]  }
 0xcf5   :  { %441 = vrot.lane.b32.xlu0 %v4980_v55, %s4853_s13 }
 0xcf9   :  { %618 = vrot.lane.b32.xlu0 %v5016_v62, %s4853_s13 }
 0xcfd   :  { %790 = vrot.lane.b32.xlu0 %v5051_v4, %s4853_s13 }
 0xd01   :  { %965 = vrot.lane.b32.xlu0 %v963_v5, %s4853_s13  ;;  %v1290_v5 = vpack.c.bf16 %v3732_v58, %v3732_v58  ;;  %v5268_v58 = vld [vmem:[#allocation5 + $0x144] ss:$16 sps:$4 sm:$0xff]  }
 0xd02   :  { %7331 = vst [vmem:[#allocation25_spill] sm:$0xff] %v5268_v58 }
 0xd63   :  { %v974_v12 = vpop.permute.xlu0 %973 }
 0xd64   :  { %3718 = vmatmul.mubr.msk.bf16.vlgmr.msra.gmra.mxu0 %vm367_vm2, %v974_v12  ;;  %v5136_v12 = vld [vmem:[#allocation5 + $0xa4] ss:$16 sps:$4 sm:$0xff]  }
 0xd65   :  { %3945 = vmatpush3.bf16.msra.mxu0 %v3986_v34  ;;  %3952 = vmatprep.mubr.msk.bf16.mxu0 %vm4855_vm7, %v4854_v32  ;;  %v5202_v34 = vld [vmem:[#allocation5] ss:$16 sps:$4 sm:$0xff]  }
 0xd66   :  { %3946 = vmatprep.subr.bf16.mxu0 %v4854_v32 }
 0xd67   :  { %v442_v17 = vpop.permute.xlu0 %441 }
 0xd68   :  { %445 = vst.msk [vmem:[#allocation2] sm:$0x3] %vm444_vm3, %v442_v17  ;;  %446 = vst.msk [vmem:[#allocation3 + $0xe] sm:$0x3] %vm444_vm3, %v442_v17  ;;  %v5139_v17 = vld [vmem:[#allocation5 + $0xac] ss:$16 sps:$4 sm:$0xff]  }
 0xd69   :  { %3947 = vmatpush3.bf16.msra.mxu0 %v3988_v35  ;;  %v5211_v35 = vld [vmem:[#allocation5 + $0x1ec] ss:$16 sps:$4 sm:$0xff]  }
 0xd6a   :  { %3948 = vmatprep.subr.bf16.mxu0 %v4854_v32 }
 0xd6b   :  { %v619_v18 = vpop.permute.xlu0 %618 }
 0xd6c   :  { %622 = vst.msk [vmem:[#allocation2] sm:$0x30] %vm621_vm4, %v619_v18  ;;  %623 = vst.msk [vmem:[#allocation3 + $0x6] sm:$0x30] %vm621_vm4, %v619_v18  ;;  %v5142_v18 = vld [vmem:[#allocation5 + $0xa0] ss:$16 sps:$4 sm:$0xff]  }
 0xd6d   :  { %3949 = vmatpush3.bf16.msra.mxu0 %v3990_v43  ;;  %v5235_v43 = vld [vmem:[#allocation5 + $0x1ac] ss:$16 sps:$4 sm:$0xff]  }
 0xd6e   :  { %3950 = vmatprep.subr.bf16.mxu0 %v4854_v32  ;;  %7320 = vst [vmem:[#allocation14_spill] sm:$0xff] %v5235_v43 }
 0xd6f   :  { %v791_v55 = vpop.permute.xlu0 %790 }
 0xd70   :  { %793 = vst.msk [vmem:[#allocation2 + $0x8] sm:$0x3] %vm444_vm3, %v791_v55  ;;  %794 = vst.msk [vmem:[#allocation3 + $0x6] sm:$0x3] %vm444_vm3, %v791_v55  ;;  %v5145_v55 = vld [vmem:[#allocation5 + $0xa8] ss:$16 sps:$4 sm:$0xff]  }
 0xd71   :  { %3951 = vmatpush3.bf16.msra.mxu0 %v3992_v45  ;;  %v5244_v45 = vld [vmem:[#allocation5 + $0x184] ss:$16 sps:$4 sm:$0xff]  }
 0xd72   :  { %1674 = vmatprep.subr.bf16.mxu0 %v5105_v51  ;;  %7323 = vst [vmem:[#allocation17_spill] sm:$0xff] %v5244_v45 }
 0xd73   :  { %v966_v62 = vpop.permute.xlu0 %965 }
 0xd74   :  { %968 = vst.msk [vmem:[#allocation2 + $0x8] sm:$0x30] %vm621_vm4, %v966_v62  ;;  %969 = vst.msk [vmem:[#allocation3 - $0x2] sm:$0x30] %vm621_vm4, %v966_v62  ;;  %v5148_v62 = vld [vmem:[#allocation5 + $0x84] ss:$16 sps:$4 sm:$0xff]  }
 0xe24   :  { %v1012_v4 = vpop.f32.mrf.mxu0 }
 0xe25   :  { %v1021_v8 = vrot.slane %v1012_v4, 2  ;;  %v5151_v4 = vld [vmem:[#allocation5 + $0x8c] ss:$16 sps:$4 sm:$0xff]  }
 0xe26   :  { %v1014_v22 = vpop.f32.mrf.mxu0 }
 0xe27   :  { %v1025_v23 = vadd.f32 %v1021_v8, %v4969_v29  ;;  %v1022_v13 = vrot.slane %v1014_v22, 2  ;;  %v3985_v29 = vld [vmem:[#allocation7 + $0x130] ss:$8 sps:$4 sm:$0xff]  }
 0xe28   :  { %v1016_v9 = vpop.f32.mrf.mxu0  ;;  %3933 = vmatpush3.bf16.msra.mxu1 %v3985_v29  ;;  %v5154_v8 = vld [vmem:[#allocation5 + $0x80] ss:$16 sps:$4 sm:$0xff]   ;;  %v5157_v22 = vld [vmem:[#allocation5 + $0x88] ss:$16 sps:$4 sm:$0xff]   ;;  %v5199_v29 = vld [vmem:[#allocation5 + $0xc] ss:$16 sps:$4 sm:$0xff]  }
 0xe29   :  { %v3719_v11 = vmul.f32 -1.442695, %v1025_v23  ;;  %v1026_v14 = vadd.f32 %v1022_v13, %v4971_v31  ;;  %v3987_v31 = vld [vmem:[#allocation7 + $0x120] ss:$8 sps:$4 sm:$0xff]   ;;  %3934 = vmatprep.subr.bf16.mxu1 %v4854_v32  ;;  %v5160_v23 = vld [vmem:[#allocation5 + $0x64] ss:$16 sps:$4 sm:$0xff]  }
 0xe2a   :  { %v1017_v25 = vpop.f32.mrf.mxu0  ;;  %v5163_v9 = vld [vmem:[#allocation5 + $0x6c] ss:$16 sps:$4 sm:$0xff]   ;;  %v5172_v13 = vld [vmem:[#allocation5 + $0x44] ss:$16 sps:$4 sm:$0xff]  }
 0xe2b   :  { %4294 = vpow2.f32 %v3719_v11  ;;  %v5166_v11 = vld [vmem:[#allocation5 + $0x60] ss:$16 sps:$4 sm:$0xff]   ;;  %v5169_v25 = vld [vmem:[#allocation5 + $0x68] ss:$16 sps:$4 sm:$0xff]  }
 0xe2c   :  { %4296 = vtanh.f32 %v1026_v14  ;;  %3935 = vmatpush3.bf16.msra.mxu1 %v3987_v31  ;;  %v5208_v31 = vld [vmem:[#allocation5 + $0x1e4] ss:$16 sps:$4 sm:$0xff]  }
 0xe2d   :  { %3936 = vmatprep.subr.bf16.mxu1 %v4854_v32 }
 0xe38   :  { %v4295_v15 = vpop.eup %4294 }
 0xe39   :  { %v1030_v26 = vadd.f32 1.0, %v4295_v15  ;;  %v4297_v16 = vpop.eup %4296  ;;  %v5178_v15 = vld [vmem:[#allocation5 + $0x40] ss:$16 sps:$4 sm:$0xff]  }
 0xe3b   :  { %4298 = vrcp.f32 %v1030_v26  ;;  %v5181_v26 = vld [vmem:[#allocation5 + $0x48] ss:$16 sps:$4 sm:$0xff]  }
 0xe48   :  { %v4299_v28 = vpop.eup %4298 }
 0xe49   :  { %v1044_v7 = vmul.f32 %v4299_v28, %v4297_v16  ;;  %v1043_v30 = vmul.f32 %v4299_v28, %v1041_v27  ;;  %v5184_v16 = vld [vmem:[#allocation5 + $0x24] ss:$16 sps:$4 sm:$0xff]   ;;  %v5187_v27 = vld [vmem:[#allocation5 + $0x2c] ss:$16 sps:$4 sm:$0xff]   ;;  %v5190_v28 = vld [vmem:[#allocation5 + $0x20] ss:$16 sps:$4 sm:$0xff]  }
 0xe4b   :  { %1046 = vrot.lane.b32.xlu1 %v1044_v7, %s4853_s13  ;;  %v5193_v7 = vld [vmem:[#allocation5 + $0x28] ss:$16 sps:$4 sm:$0xff]  }
 0xe4f   :  { %529 = vrot.lane.b32.xlu1 %v4998_v33, %s4853_s13  ;;  %v3720_v33 = vmul.f32 -1.442695, %v1026_v14  ;;  %v5175_v14 = vld [vmem:[#allocation5 + $0x4c] ss:$16 sps:$4 sm:$0xff]  }
 0xe51   :  { %4300 = vpow2.f32 %v3720_v33  ;;  %v5214_v33 = vld [vmem:[#allocation5 + $0x1e0] ss:$16 sps:$4 sm:$0xff]  }
 0xe53   :  { %707 = vrot.lane.b32.xlu1 %v5034_v40, %s4853_s13  ;;  %v3989_v40 = vld [vmem:[#allocation7 + $0x110] ss:$8 sps:$4 sm:$0xff]  }
 0xe54   :  { %3937 = vmatpush3.bf16.msra.mxu1 %v3989_v40  ;;  %v5232_v40 = vld [vmem:[#allocation5 + $0x1a4] ss:$16 sps:$4 sm:$0xff]  }
 0xe55   :  { %3938 = vmatprep.subr.bf16.mxu1 %v4854_v32  ;;  %v5205_v32 = vld [vmem:[#allocation5 + $0x8] ss:$16 sps:$4 sm:$0xff]   ;;  %7319 = vst [vmem:[#allocation13_spill] sm:$0xff] %v5232_v40 }
 0xe57   :  { %877 = vrot.lane.b32.xlu1 %v5068_v37, %s4853_s13 }
 0xe58   :  { %3939 = vmatpush3.bf16.msra.mxu1 %v3991_v44  ;;  %v5241_v44 = vld [vmem:[#allocation5 + $0x1a8] ss:$16 sps:$4 sm:$0xff]  }
 0xe59   :  { %1633 = vmatprep.subr.bf16.mxu1 %v5099_v46  ;;  %7322 = vst [vmem:[#allocation16_spill] sm:$0xff] %v5241_v44 }
 0xe5e   :  { %v4301_v36 = vpop.eup %4300 }
 0xe5f   :  { %v1037_v39 = vadd.f32 1.0, %v4301_v36  ;;  %v5217_v36 = vld [vmem:[#allocation5 + $0x1e8] ss:$16 sps:$4 sm:$0xff]  }
 0xe61   :  { %4302 = vrcp.f32 %v1037_v39  ;;  %v5220_v39 = vld [vmem:[#allocation5 + $0x1c4] ss:$16 sps:$4 sm:$0xff]  }
 0xe6e   :  { %v4303_v48 = vpop.eup %4302 }
 0xebd   :  { %v1047_v38 = vpop.permute.xlu1 %1046 }
 0xebe   :  { %v1049_v41 = vadd.f32 %v1047_v38, %v1043_v30  ;;  %v5196_v30 = vld [vmem:[#allocation5 + $0x4] ss:$16 sps:$4 sm:$0xff]   ;;  %v5223_v38 = vld [vmem:[#allocation5 + $0x1cc] ss:$16 sps:$4 sm:$0xff]  }
 0xec0   :  { %4304 = vtanh.f32 %v1049_v41  ;;  %v5226_v41 = vld [vmem:[#allocation5 + $0x1c0] ss:$16 sps:$4 sm:$0xff]  }
 0xec1   :  { %v530_v42 = vpop.permute.xlu1 %529 }
 0xec2   :  { %533 = vst.msk [vmem:[#allocation2] sm:$0xc] %vm532_vm5, %v530_v42  ;;  %534 = vst.msk [vmem:[#allocation3 + $0xa] sm:$0xc] %vm532_vm5, %v530_v42  ;;  %v5229_v42 = vld [vmem:[#allocation5 + $0x1c8] ss:$16 sps:$4 sm:$0xff]  }
 0xec5   :  { %v708_v37 = vpop.permute.xlu1 %707 }
 0xec6   :  { %711 = vst.msk [vmem:[#allocation2] sm:$0xc0] %vm710_vm6, %v708_v37  ;;  %712 = vst.msk [vmem:[#allocation3 + $0x2] sm:$0xc0] %vm710_vm6, %v708_v37  ;;  %v5238_v37 = vld [vmem:[#allocation5 + $0x1a0] ss:$16 sps:$4 sm:$0xff]  }
 0xec7   :  { %7321 = vst [vmem:[#allocation15_spill] sm:$0xff] %v5238_v37 }
 0xec9   :  { %v878_v47 = vpop.permute.xlu1 %877 }
 0xeca   :  { %880 = vst.msk [vmem:[#allocation2 + $0x8] sm:$0xc] %vm532_vm5, %v878_v47  ;;  %881 = vst.msk [vmem:[#allocation3 + $0x2] sm:$0xc] %vm532_vm5, %v878_v47  ;;  %v5247_v47 = vld [vmem:[#allocation5 + $0x18c] ss:$16 sps:$4 sm:$0xff]  }
 0xecb   :  { %7324 = vst [vmem:[#allocation18_spill] sm:$0xff] %v5247_v47 }
 0xecd   :  { %v4305_v49 = vpop.eup %4304  ;;  %v1062_v56 = vld [vmem:[#allocation3 + $0x8] sm:$0xff]  ;;  %v1058_v57 = vld [vmem:[#allocation2] sm:$0xff] }
 0xece   :  { %v1051_v50 = vmul.f32 %v4305_v49, %v4303_v48  ;;  %v5250_v48 = vld [vmem:[#allocation5 + $0x180] ss:$16 sps:$4 sm:$0xff]   ;;  %v5253_v49 = vld [vmem:[#allocation5 + $0x188] ss:$16 sps:$4 sm:$0xff]  }
 0xecf   :  { %7325 = vst [vmem:[#allocation19_spill] sm:$0xff] %v5250_v48  ;;  %7326 = vst [vmem:[#allocation20_spill] sm:$0xff] %v5253_v49 }
 0xed0   :  { %1053 = vrot.lane.b32.xlu1 %v1051_v50, %s4853_s13  ;;  %v5256_v50 = vld [vmem:[#allocation5 + $0x164] ss:$16 sps:$4 sm:$0xff]  }
 0xed1   :  { %7327 = vst [vmem:[#allocation21_spill] sm:$0xff] %v5256_v50 }
 0xf42   :  { %v1054_v53 = vpop.permute.xlu1 %1053 }
 0xf43   :  { %1056 = vst.msk [vmem:[#allocation2 + $0x8] sm:$0xc0] %vm710_vm6, %v1054_v53  ;;  %1057 = vst.msk [vmem:[#allocation3 - $0x6] sm:$0xc0] %vm710_vm6, %v1054_v53  ;;  %v5259_v53 = vld [vmem:[#allocation5 + $0x16c] ss:$16 sps:$4 sm:$0xff]  }
 0xf44   :  { %7328 = vst [vmem:[#allocation22_spill] sm:$0xff] %v5259_v53 }
 0xf4a   :  { %v1061_v59 = vld [vmem:[#allocation3] sm:$0xff]  ;;  %v1059_v60 = vld [vmem:[#allocation2 + $0x8] sm:$0xff] }
 0xf4b   :  { %v1063_v63 = vpack.c.bf16 %v1062_v56, %v1061_v59  ;;  %v1060_v1 = vpack.c.bf16 %v1059_v60, %v1058_v57  ;;  %v5262_v56 = vld [vmem:[#allocation5 + $0x160] ss:$16 sps:$4 sm:$0xff]   ;;  %v5265_v57 = vld [vmem:[#allocation5 + $0x168] ss:$16 sps:$4 sm:$0xff]   ;;  %v5271_v59 = vld [vmem:[#allocation5 + $0x14c] ss:$16 sps:$4 sm:$0xff]  }
 0xf4c   :  { %7329 = vst [vmem:[#allocation23_spill] sm:$0xff] %v5262_v56  ;;  %7330 = vst [vmem:[#allocation24_spill] sm:$0xff] %v5265_v57  ;;  %v5274_v60 = vld [vmem:[#allocation5 + $0x140] ss:$16 sps:$4 sm:$0xff]  }
 0xf4d   :  { %3941 = vmatmul.mubr.msk.bf16.vlgmr.msra.gmra.mxu1 %vm367_vm2, %v1063_v63  ;;  %3953 = vmatmul.mubr.msk.bf16.vlgmr.msra.gmra.mxu0 %vm367_vm2, %v1060_v1  ;;  %7332 = vst [vmem:[#allocation26_spill] sm:$0xff] %v5271_v59  ;;  %7333 = vst [vmem:[#allocation27_spill] sm:$0xff] %v5274_v60  ;;  %v5277_v63 = vld [vmem:[#allocation5 + $0x148] ss:$16 sps:$4 sm:$0xff]   ;;  %v5280_v1 = vld [vmem:[#allocation5 + $0x124] ss:$16 sps:$4 sm:$0xff]  }
 0xf4e   :  { %1634 = vmatpush1.bf16.msra.mxu1 %v5116_v54  ;;  %1675 = vmatpush1.bf16.msra.mxu0 %v5121_v61  ;;  %7334 = vst [vmem:[#allocation28_spill] sm:$0xff] %v5277_v63  ;;  %7335 = vst [vmem:[#allocation29_spill] sm:$0xff] %v5280_v1 }
 0xf4f   :  { %1635 = vmatprep.subr.bf16.mxu1 %v5123_v2  ;;  %1676 = vmatprep.subr.bf16.mxu0 %v5125_v3 }
 0xf50   :  { %1665 = vmatprep.mubr.bf16.mxu1 %v1290_v5  ;;  %1706 = vmatprep.mubr.bf16.mxu0 %v1290_v5  ;;  %v5283_v5 = vld [vmem:[#allocation5 + $0x12c] ss:$16 sps:$4 sm:$0xff]  }
 0xf51   :  { %7336 = vst [vmem:[#allocation30_spill] sm:$0xff] %v5283_v5 }
 0xf52   :  { %1636 = vmatpush1.bf16.msra.mxu1 %v5130_v6  ;;  %1677 = vmatpush1.bf16.msra.mxu0 %v5133_v10 }
 0xf53   :  { %1637 = vmatprep.subr.bf16.mxu1 %v5136_v12  ;;  %1678 = vmatprep.subr.bf16.mxu0 %v5139_v17 }
 0xf56   :  { %1638 = vmatpush1.bf16.msra.mxu1 %v5142_v18  ;;  %1679 = vmatpush1.bf16.msra.mxu0 %v5145_v55 }
 0xf57   :  { %1639 = vmatprep.subr.bf16.mxu1 %v5148_v62  ;;  %1680 = vmatprep.subr.bf16.mxu0 %v5151_v4 }
 0xf5a   :  { %1640 = vmatpush1.bf16.msra.mxu1 %v5154_v8  ;;  %1681 = vmatpush1.bf16.msra.mxu0 %v5157_v22 }
 0xf5b   :  { %1641 = vmatprep.subr.bf16.mxu1 %v5160_v23  ;;  %1682 = vmatprep.subr.bf16.mxu0 %v5163_v9 }
 0xf5e   :  { %1642 = vmatpush1.bf16.msra.mxu1 %v5166_v11  ;;  %1683 = vmatpush1.bf16.msra.mxu0 %v5169_v25 }
 0xf5f   :  { %1643 = vmatprep.subr.bf16.mxu1 %v5172_v13  ;;  %1684 = vmatprep.subr.bf16.mxu0 %v5175_v14 }
 0xf62   :  { %1644 = vmatpush1.bf16.msra.mxu1 %v5178_v15  ;;  %1685 = vmatpush1.bf16.msra.mxu0 %v5181_v26 }
 0xf63   :  { %1645 = vmatprep.subr.bf16.mxu1 %v5184_v16  ;;  %1686 = vmatprep.subr.bf16.mxu0 %v5187_v27 }
 0xf66   :  { %1646 = vmatpush1.bf16.msra.mxu1 %v5190_v28  ;;  %1687 = vmatpush1.bf16.msra.mxu0 %v5193_v7 }
 0xf67   :  { %1647 = vmatprep.subr.bf16.mxu1 %v5196_v30  ;;  %1688 = vmatprep.subr.bf16.mxu0 %v5199_v29 }
 0xf6a   :  { %1648 = vmatpush1.bf16.msra.mxu1 %v5202_v34  ;;  %1689 = vmatpush1.bf16.msra.mxu0 %v5205_v32 }
 0xf6b   :  { %1649 = vmatprep.subr.bf16.mxu1 %v5208_v31  ;;  %1690 = vmatprep.subr.bf16.mxu0 %v5211_v35 }
 0xf6e   :  { %1650 = vmatpush2.bf16.msra.mxu1 %v5214_v33  ;;  %1691 = vmatpush2.bf16.msra.mxu0 %v5217_v36 }
 0xf6f   :  { %1651 = vmatprep.subr.bf16.mxu1 %v5220_v39  ;;  %1692 = vmatprep.subr.bf16.mxu0 %v5223_v38 }
 0xf72   :  { %1652 = vmatpush2.bf16.msra.mxu1 %v5226_v41  ;;  %1693 = vmatpush2.bf16.msra.mxu0 %v5229_v42 }
 0xf73   :  { %1653 = vmatprep.subr.bf16.mxu1 %v5232_v40  ;;  %1694 = vmatprep.subr.bf16.mxu0 %v5235_v43 }
 0xf76   :  { %1654 = vmatpush2.bf16.msra.mxu1 %v5238_v37  ;;  %1695 = vmatpush2.bf16.msra.mxu0 %v5241_v44 }
 0xf77   :  { %1655 = vmatprep.subr.bf16.mxu1 %v5244_v45  ;;  %1696 = vmatprep.subr.bf16.mxu0 %v5247_v47 }
 0xf7a   :  { %1656 = vmatpush2.bf16.msra.mxu1 %v5250_v48  ;;  %1697 = vmatpush2.bf16.msra.mxu0 %v5253_v49 }
 0xf7b   :  { %1657 = vmatprep.subr.bf16.mxu1 %v5256_v50  ;;  %1698 = vmatprep.subr.bf16.mxu0 %v5259_v53 }
 0xf7e   :  { %1658 = vmatpush2.bf16.msra.mxu1 %v5262_v56  ;;  %1699 = vmatpush2.bf16.msra.mxu0 %v5265_v57 }
 0xf7f   :  { %1659 = vmatprep.subr.bf16.mxu1 %v5268_v58  ;;  %1700 = vmatprep.subr.bf16.mxu0 %v5271_v59  ;;  %v5298_v59 = vld [vmem:[#allocation5 + $0x100] ss:$16 sps:$4 sm:$0xff]  }
 0xf80   :  { %7341 = vst [vmem:[#allocation35_spill] sm:$0xff] %v5298_v59 }
 0xf82   :  { %1660 = vmatpush2.bf16.msra.mxu1 %v5274_v60  ;;  %1701 = vmatpush2.bf16.msra.mxu0 %v5277_v63  ;;  %v5301_v60 = vld [vmem:[#allocation5 + $0x108] ss:$16 sps:$4 sm:$0xff]  }
 0xf83   :  { %1661 = vmatprep.subr.bf16.mxu1 %v5280_v1  ;;  %1702 = vmatprep.subr.bf16.mxu0 %v5283_v5  ;;  %7342 = vst [vmem:[#allocation36_spill] sm:$0xff] %v5301_v60  ;;  %v1289_v1 = vpack.c.bf16 %v5111_v52, %v5111_v52  ;;  %v5311_v5 = vld [vmem:[#allocation5 + $0x2ec] ss:$16 sps:$4 sm:$0xff]   ;;  %v5315_v63 = vld [vmem:[#allocation5 + $0x2e8] ss:$16 sps:$4 sm:$0xff]  }
 0xf84   :  { %7344 = vst [vmem:[#allocation38_spill] sm:$0xff] %v5311_v5  ;;  %7346 = vst [vmem:[#allocation40_spill] sm:$0xff] %v5315_v63  ;;  %v5327_v52 = vld [vmem:[#allocation5 + $0x2c0] ss:$16 sps:$4 sm:$0xff]  }
 0xf85   :  { %7349 = vst [vmem:[#allocation43_spill] sm:$0xff] %v5327_v52 }
 0xf86   :  { %1662 = vmatpush2.bf16.msra.mxu1 %v5286_v0  ;;  %1703 = vmatpush2.bf16.msra.mxu0 %v5289_v19  ;;  %v5309_v0 = vld [vmem:[#allocation5 + $0x2e4] ss:$16 sps:$4 sm:$0xff]   ;;  %v5313_v19 = vld [vmem:[#allocation5 + $0x2e0] ss:$16 sps:$4 sm:$0xff]  }
 0xf87   :  { %1663 = vmatprep.subr.bf16.mxu1 %v5292_v24  ;;  %1704 = vmatprep.subr.bf16.mxu0 %v5295_v21  ;;  %7343 = vst [vmem:[#allocation37_spill] sm:$0xff] %v5309_v0  ;;  %7345 = vst [vmem:[#allocation39_spill] sm:$0xff] %v5313_v19  ;;  %v5317_v24 = vld [vmem:[#allocation5 + $0x2c4] ss:$16 sps:$4 sm:$0xff]   ;;  %v5319_v21 = vld [vmem:[#allocation5 + $0x2cc] ss:$16 sps:$4 sm:$0xff]  }
 0xf88   :  { %7347 = vst [vmem:[#allocation41_spill] sm:$0xff] %v5317_v24  ;;  %7348 = vst [vmem:[#allocation42_spill] sm:$0xff] %v5319_v21 }
 0xf8a   :  { %1664 = vmatpush2.bf16.msra.mxu1 %v5298_v59  ;;  %1705 = vmatpush2.bf16.msra.mxu0 %v5301_v60  ;;  %v5333_v60 = vld [vmem:[#allocation5 + $0x2a4] ss:$16 sps:$4 sm:$0xff]   ;;  %v5463_v59 = vld [vmem:[#allocation5 + $0x34c] ss:$16 sps:$4 sm:$0xff]  }
 0xf8b   :  { %2061 = vmatprep.subr.bf16.mxu1 %v5309_v0  ;;  %2102 = vmatprep.subr.bf16.mxu0 %v5311_v5  ;;  %7351 = vst [vmem:[#allocation45_spill] sm:$0xff] %v5333_v60  ;;  %v5335_v0 = vld [vmem:[#allocation5 + $0x2ac] ss:$16 sps:$4 sm:$0xff]   ;;  %v5337_v5 = vld [vmem:[#allocation5 + $0x2a0] ss:$16 sps:$4 sm:$0xff]   ;;  %7396 = vst [vmem:[#allocation90_spill] sm:$0xff] %v5463_v59 }
 0xf8c   :  { %7352 = vst [vmem:[#allocation46_spill] sm:$0xff] %v5335_v0  ;;  %7353 = vst [vmem:[#allocation47_spill] sm:$0xff] %v5337_v5 }
 0xf8d   :  { %1666 = vmatmul.mubr.bf16.vlgmr.msra.gmra.mxu1 %v1289_v1  ;;  %1707 = vmatmul.mubr.bf16.vlgmr.msra.gmra.mxu0 %v1289_v1  ;;  %v5329_v1 = vld [vmem:[#allocation5 + $0x2c8] ss:$16 sps:$4 sm:$0xff]  }
 0xf8e   :  { %2062 = vmatpush1.bf16.msra.mxu1 %v5313_v19  ;;  %2103 = vmatpush1.bf16.msra.mxu0 %v5315_v63  ;;  %7350 = vst [vmem:[#allocation44_spill] sm:$0xff] %v5329_v1  ;;  %v5339_v19 = vld [vmem:[#allocation5 + $0x2a8] ss:$16 sps:$4 sm:$0xff]   ;;  %v5461_v63 = vld [vmem:[#allocation5 + $0x344] ss:$16 sps:$4 sm:$0xff]  }
 0xf8f   :  { %2063 = vmatprep.subr.bf16.mxu1 %v5317_v24  ;;  %2104 = vmatprep.subr.bf16.mxu0 %v5319_v21  ;;  %7354 = vst [vmem:[#allocation48_spill] sm:$0xff] %v5339_v19  ;;  %v5345_v21 = vld [vmem:[#allocation5 + $0x284] ss:$16 sps:$4 sm:$0xff]   ;;  %v5351_v24 = vld [vmem:[#allocation5 + $0x288] ss:$16 sps:$4 sm:$0xff]   ;;  %7395 = vst [vmem:[#allocation89_spill] sm:$0xff] %v5461_v63 }
 0xf90   :  { %7355 = vst [vmem:[#allocation49_spill] sm:$0xff] %v5345_v21  ;;  %7358 = vst [vmem:[#allocation52_spill] sm:$0xff] %v5351_v24 }
 0xf92   :  { %2064 = vmatpush1.bf16.msra.mxu1 %v5327_v52  ;;  %2105 = vmatpush1.bf16.msra.mxu0 %v5329_v1  ;;  %v5347_v52 = vld [vmem:[#allocation5 + $0x28c] ss:$16 sps:$4 sm:$0xff]   ;;  %v5349_v1 = vld [vmem:[#allocation5 + $0x280] ss:$16 sps:$4 sm:$0xff]  }
 0xf93   :  { %2065 = vmatprep.subr.bf16.mxu1 %v5333_v60  ;;  %2106 = vmatprep.subr.bf16.mxu0 %v5335_v0  ;;  %7356 = vst [vmem:[#allocation50_spill] sm:$0xff] %v5347_v52  ;;  %7357 = vst [vmem:[#allocation51_spill] sm:$0xff] %v5349_v1  ;;  %v5357_v0 = vld [vmem:[#allocation5 + $0x264] ss:$16 sps:$4 sm:$0xff]   ;;  %v5363_v60 = vld [vmem:[#allocation5 + $0x268] ss:$16 sps:$4 sm:$0xff]  }
 0xf94   :  { %7359 = vst [vmem:[#allocation53_spill] sm:$0xff] %v5357_v0  ;;  %7362 = vst [vmem:[#allocation56_spill] sm:$0xff] %v5363_v60 }
 0xf96   :  { %2066 = vmatpush1.bf16.msra.mxu1 %v5337_v5  ;;  %2107 = vmatpush1.bf16.msra.mxu0 %v5339_v19  ;;  %v5359_v5 = vld [vmem:[#allocation5 + $0x26c] ss:$16 sps:$4 sm:$0xff]   ;;  %v5361_v19 = vld [vmem:[#allocation5 + $0x260] ss:$16 sps:$4 sm:$0xff]  }
 0xf97   :  { %2067 = vmatprep.subr.bf16.mxu1 %v5345_v21  ;;  %2108 = vmatprep.subr.bf16.mxu0 %v5347_v52  ;;  %7360 = vst [vmem:[#allocation54_spill] sm:$0xff] %v5359_v5  ;;  %7361 = vst [vmem:[#allocation55_spill] sm:$0xff] %v5361_v19  ;;  %v5369_v52 = vld [vmem:[#allocation5 + $0x244] ss:$16 sps:$4 sm:$0xff]   ;;  %v5375_v21 = vld [vmem:[#allocation5 + $0x248] ss:$16 sps:$4 sm:$0xff]  }
 0xf98   :  { %7363 = vst [vmem:[#allocation57_spill] sm:$0xff] %v5369_v52  ;;  %7366 = vst [vmem:[#allocation60_spill] sm:$0xff] %v5375_v21 }
 0xf9a   :  { %2068 = vmatpush1.bf16.msra.mxu1 %v5349_v1  ;;  %2109 = vmatpush1.bf16.msra.mxu0 %v5351_v24  ;;  %v5371_v1 = vld [vmem:[#allocation5 + $0x24c] ss:$16 sps:$4 sm:$0xff]   ;;  %v5373_v24 = vld [vmem:[#allocation5 + $0x240] ss:$16 sps:$4 sm:$0xff]  }
 0xf9b   :  { %2069 = vmatprep.subr.bf16.mxu1 %v5357_v0  ;;  %2110 = vmatprep.subr.bf16.mxu0 %v5359_v5  ;;  %7364 = vst [vmem:[#allocation58_spill] sm:$0xff] %v5371_v1  ;;  %7365 = vst [vmem:[#allocation59_spill] sm:$0xff] %v5373_v24  ;;  %v5381_v5 = vld [vmem:[#allocation5 + $0x224] ss:$16 sps:$4 sm:$0xff]   ;;  %v5387_v0 = vld [vmem:[#allocation5 + $0x228] ss:$16 sps:$4 sm:$0xff]  }
 0xf9c   :  { %7367 = vst [vmem:[#allocation61_spill] sm:$0xff] %v5381_v5  ;;  %7370 = vst [vmem:[#allocation64_spill] sm:$0xff] %v5387_v0 }
 0xf9e   :  { %2070 = vmatpush1.bf16.msra.mxu1 %v5361_v19  ;;  %2111 = vmatpush1.bf16.msra.mxu0 %v5363_v60  ;;  %v5383_v19 = vld [vmem:[#allocation5 + $0x22c] ss:$16 sps:$4 sm:$0xff]   ;;  %v5385_v60 = vld [vmem:[#allocation5 + $0x220] ss:$16 sps:$4 sm:$0xff]  }
 0xf9f   :  { %2071 = vmatprep.subr.bf16.mxu1 %v5369_v52  ;;  %2112 = vmatprep.subr.bf16.mxu0 %v5371_v1  ;;  %7368 = vst [vmem:[#allocation62_spill] sm:$0xff] %v5383_v19  ;;  %7369 = vst [vmem:[#allocation63_spill] sm:$0xff] %v5385_v60  ;;  %v5393_v1 = vld [vmem:[#allocation5 + $0x204] ss:$16 sps:$4 sm:$0xff]   ;;  %v5399_v52 = vld [vmem:[#allocation5 + $0x208] ss:$16 sps:$4 sm:$0xff]  }
 0xfa0   :  { %7371 = vst [vmem:[#allocation65_spill] sm:$0xff] %v5393_v1  ;;  %7374 = vst [vmem:[#allocation68_spill] sm:$0xff] %v5399_v52 }
 0xfa2   :  { %2072 = vmatpush1.bf16.msra.mxu1 %v5373_v24  ;;  %2113 = vmatpush1.bf16.msra.mxu0 %v5375_v21  ;;  %v5395_v24 = vld [vmem:[#allocation5 + $0x20c] ss:$16 sps:$4 sm:$0xff]   ;;  %v5397_v21 = vld [vmem:[#allocation5 + $0x200] ss:$16 sps:$4 sm:$0xff]  }
 0xfa3   :  { %2073 = vmatprep.subr.bf16.mxu1 %v5381_v5  ;;  %2114 = vmatprep.subr.bf16.mxu0 %v5383_v19  ;;  %7372 = vst [vmem:[#allocation66_spill] sm:$0xff] %v5395_v24  ;;  %7373 = vst [vmem:[#allocation67_spill] sm:$0xff] %v5397_v21  ;;  %v5405_v19 = vld [vmem:[#allocation5 + $0x3e4] ss:$16 sps:$4 sm:$0xff]   ;;  %v5411_v5 = vld [vmem:[#allocation5 + $0x3e8] ss:$16 sps:$4 sm:$0xff]  }
 0xfa4   :  { %7375 = vst [vmem:[#allocation69_spill] sm:$0xff] %v5405_v19  ;;  %7378 = vst [vmem:[#allocation72_spill] sm:$0xff] %v5411_v5 }
 0xfa6   :  { %2074 = vmatpush1.bf16.msra.mxu1 %v5385_v60  ;;  %2115 = vmatpush1.bf16.msra.mxu0 %v5387_v0  ;;  %v5407_v60 = vld [vmem:[#allocation5 + $0x3ec] ss:$16 sps:$4 sm:$0xff]   ;;  %v5409_v0 = vld [vmem:[#allocation5 + $0x3e0] ss:$16 sps:$4 sm:$0xff]  }
 0xfa7   :  { %2075 = vmatprep.subr.bf16.mxu1 %v5393_v1  ;;  %2116 = vmatprep.subr.bf16.mxu0 %v5395_v24  ;;  %7376 = vst [vmem:[#allocation70_spill] sm:$0xff] %v5407_v60  ;;  %7377 = vst [vmem:[#allocation71_spill] sm:$0xff] %v5409_v0  ;;  %v5417_v24 = vld [vmem:[#allocation5 + $0x3c4] ss:$16 sps:$4 sm:$0xff]   ;;  %v5423_v1 = vld [vmem:[#allocation5 + $0x3c8] ss:$16 sps:$4 sm:$0xff]  }
 0xfa8   :  { %7379 = vst [vmem:[#allocation73_spill] sm:$0xff] %v5417_v24  ;;  %7382 = vst [vmem:[#allocation76_spill] sm:$0xff] %v5423_v1 }
 0xfaa   :  { %2076 = vmatpush1.bf16.msra.mxu1 %v5397_v21  ;;  %2117 = vmatpush1.bf16.msra.mxu0 %v5399_v52  ;;  %v5419_v21 = vld [vmem:[#allocation5 + $0x3cc] ss:$16 sps:$4 sm:$0xff]   ;;  %v5421_v52 = vld [vmem:[#allocation5 + $0x3c0] ss:$16 sps:$4 sm:$0xff]  }
 0xfab   :  { %2077 = vmatprep.subr.bf16.mxu1 %v5405_v19  ;;  %2118 = vmatprep.subr.bf16.mxu0 %v5407_v60  ;;  %7380 = vst [vmem:[#allocation74_spill] sm:$0xff] %v5419_v21  ;;  %7381 = vst [vmem:[#allocation75_spill] sm:$0xff] %v5421_v52  ;;  %v5429_v60 = vld [vmem:[#allocation5 + $0x3a4] ss:$16 sps:$4 sm:$0xff]   ;;  %v5435_v19 = vld [vmem:[#allocation5 + $0x3a8] ss:$16 sps:$4 sm:$0xff]  }
 0xfac   :  { %7383 = vst [vmem:[#allocation77_spill] sm:$0xff] %v5429_v60  ;;  %7386 = vst [vmem:[#allocation80_spill] sm:$0xff] %v5435_v19 }
 0xfae   :  { %2078 = vmatpush2.bf16.msra.mxu1 %v5409_v0  ;;  %2119 = vmatpush2.bf16.msra.mxu0 %v5411_v5  ;;  %v5431_v0 = vld [vmem:[#allocation5 + $0x3ac] ss:$16 sps:$4 sm:$0xff]   ;;  %v5433_v5 = vld [vmem:[#allocation5 + $0x3a0] ss:$16 sps:$4 sm:$0xff]  }
 0xfaf   :  { %2079 = vmatprep.subr.bf16.mxu1 %v5417_v24  ;;  %2120 = vmatprep.subr.bf16.mxu0 %v5419_v21  ;;  %7384 = vst [vmem:[#allocation78_spill] sm:$0xff] %v5431_v0  ;;  %7385 = vst [vmem:[#allocation79_spill] sm:$0xff] %v5433_v5  ;;  %v5441_v21 = vld [vmem:[#allocation5 + $0x384] ss:$16 sps:$4 sm:$0xff]   ;;  %v5447_v24 = vld [vmem:[#allocation5 + $0x388] ss:$16 sps:$4 sm:$0xff]  }
 0xfb0   :  { %7387 = vst [vmem:[#allocation81_spill] sm:$0xff] %v5441_v21  ;;  %7390 = vst [vmem:[#allocation84_spill] sm:$0xff] %v5447_v24 }
 0xfb2   :  { %2080 = vmatpush2.bf16.msra.mxu1 %v5421_v52  ;;  %2121 = vmatpush2.bf16.msra.mxu0 %v5423_v1  ;;  %v5443_v52 = vld [vmem:[#allocation5 + $0x38c] ss:$16 sps:$4 sm:$0xff]   ;;  %v5445_v1 = vld [vmem:[#allocation5 + $0x380] ss:$16 sps:$4 sm:$0xff]  }
 0xfb3   :  { %2081 = vmatprep.subr.bf16.mxu1 %v5429_v60  ;;  %2122 = vmatprep.subr.bf16.mxu0 %v5431_v0  ;;  %7388 = vst [vmem:[#allocation82_spill] sm:$0xff] %v5443_v52  ;;  %7389 = vst [vmem:[#allocation83_spill] sm:$0xff] %v5445_v1  ;;  %v5453_v0 = vld [vmem:[#allocation5 + $0x364] ss:$16 sps:$4 sm:$0xff]   ;;  %v5459_v60 = vld [vmem:[#allocation5 + $0x368] ss:$16 sps:$4 sm:$0xff]  }
 0xfb4   :  { %7391 = vst [vmem:[#allocation85_spill] sm:$0xff] %v5453_v0  ;;  %7394 = vst [vmem:[#allocation88_spill] sm:$0xff] %v5459_v60 }
 0xfb6   :  { %2082 = vmatpush2.bf16.msra.mxu1 %v5433_v5  ;;  %2123 = vmatpush2.bf16.msra.mxu0 %v5435_v19  ;;  %v5455_v5 = vld [vmem:[#allocation5 + $0x36c] ss:$16 sps:$4 sm:$0xff]   ;;  %v5457_v19 = vld [vmem:[#allocation5 + $0x360] ss:$16 sps:$4 sm:$0xff]  }
 0xfb7   :  { %2083 = vmatprep.subr.bf16.mxu1 %v5441_v21  ;;  %2124 = vmatprep.subr.bf16.mxu0 %v5443_v52  ;;  %7392 = vst [vmem:[#allocation86_spill] sm:$0xff] %v5455_v5  ;;  %7393 = vst [vmem:[#allocation87_spill] sm:$0xff] %v5457_v19  ;;  %v5475_v52 = vld [vmem:[#allocation5 + $0x324] ss:$16 sps:$4 sm:$0xff]   ;;  %v5477_v21 = vld [vmem:[#allocation5 + $0x32c] ss:$16 sps:$4 sm:$0xff]  }
 0xfb8   :  { %7399 = vst [vmem:[#allocation93_spill] sm:$0xff] %v5475_v52  ;;  %7400 = vst [vmem:[#allocation94_spill] sm:$0xff] %v5477_v21 }
 0xfba   :  { %2084 = vmatpush2.bf16.msra.mxu1 %v5445_v1  ;;  %2125 = vmatpush2.bf16.msra.mxu0 %v5447_v24  ;;  %v5469_v24 = vld [vmem:[#allocation5 + $0x340] ss:$16 sps:$4 sm:$0xff]   ;;  %v5471_v1 = vld [vmem:[#allocation5 + $0x348] ss:$16 sps:$4 sm:$0xff]  }
 0xfbb   :  { %2085 = vmatprep.subr.bf16.mxu1 %v5453_v0  ;;  %2126 = vmatprep.subr.bf16.mxu0 %v5455_v5  ;;  %7397 = vst [vmem:[#allocation91_spill] sm:$0xff] %v5469_v24  ;;  %7398 = vst [vmem:[#allocation92_spill] sm:$0xff] %v5471_v1  ;;  %v3734_v5 = vld [vmem:[%s6952_s5 + $0x4] ss:$0 sm:$0xff] }
 0xfbc   :  { %v1740_v0 = vpack.c.bf16 %v3734_v5, %v3734_v5  ;;  %v5496_v5 = vld [vmem:[#allocation5 + $0x300] ss:$16 sps:$4 sm:$0xff]  }
 0xfbd   :  { %7405 = vst [vmem:[#allocation99_spill] sm:$0xff] %v5496_v5 }
 0xfbe   :  { %2086 = vmatpush2.bf16.msra.mxu1 %v5457_v19  ;;  %2127 = vmatpush2.bf16.msra.mxu0 %v5459_v60  ;;  %v5484_v60 = vld [vmem:[#allocation5 + $0x320] ss:$16 sps:$4 sm:$0xff]   ;;  %v5486_v19 = vld [vmem:[#allocation5 + $0x328] ss:$16 sps:$4 sm:$0xff]  }
 0xfbf   :  { %2087 = vmatprep.subr.bf16.mxu1 %v5461_v63  ;;  %2128 = vmatprep.subr.bf16.mxu0 %v5463_v59  ;;  %7401 = vst [vmem:[#allocation95_spill] sm:$0xff] %v5484_v60  ;;  %7402 = vst [vmem:[#allocation96_spill] sm:$0xff] %v5486_v19  ;;  %v5490_v59 = vld [vmem:[#allocation5 + $0x304] ss:$16 sps:$4 sm:$0xff]   ;;  %v5492_v63 = vld [vmem:[#allocation5 + $0x30c] ss:$16 sps:$4 sm:$0xff]  }
 0xfc0   :  { %7403 = vst [vmem:[#allocation97_spill] sm:$0xff] %v5490_v59  ;;  %7404 = vst [vmem:[#allocation98_spill] sm:$0xff] %v5492_v63  ;;  %2093 = vmatprep.mubr.bf16.mxu1 %v1740_v0  ;;  %2134 = vmatprep.mubr.bf16.mxu0 %v1740_v0 }
 0xfc2   :  { %2088 = vmatpush2.bf16.msra.mxu1 %v5469_v24  ;;  %2129 = vmatpush2.bf16.msra.mxu0 %v5471_v1  ;;  %v5498_v1 = vld [vmem:[#allocation5 + $0x308] ss:$16 sps:$4 sm:$0xff]  }
 0xfc3   :  { %2089 = vmatprep.subr.bf16.mxu1 %v5475_v52  ;;  %2130 = vmatprep.subr.bf16.mxu0 %v5477_v21  ;;  %7406 = vst [vmem:[#allocation100_spill] sm:$0xff] %v5498_v1 }
 0xfc6   :  { %2090 = vmatpush2.bf16.msra.mxu1 %v5484_v60  ;;  %2131 = vmatpush2.bf16.msra.mxu0 %v5486_v19  ;;  %v3731_v19 = vld [vmem:[%s6951_s4 + $0x3] ss:$0 sm:$0xff] }
 0xfc7   :  { %2091 = vmatprep.subr.bf16.mxu1 %v5490_v59  ;;  %2132 = vmatprep.subr.bf16.mxu0 %v5492_v63 }
 0xfca   :  { %2092 = vmatpush2.bf16.msra.mxu1 %v5496_v5  ;;  %2133 = vmatpush2.bf16.msra.mxu0 %v5498_v1 }
 0xfcb   :  { %2169 = vmatprep.subr.bf16.mxu1 %v5099_v46  ;;  %2210 = vmatprep.subr.bf16.mxu0 %v5105_v51 }
0x100d   :  { %v1125_v0 = vpop.f32.mrf.mxu1  ;;  %v1193_v60 = vpop.f32.mrf.mxu0 }
0x100e   :  { %v1194_v21 = vadd.f32 %v1193_v60, %v1125_v0 }
0x100f   :  { %v3942_v52 = vpop.f32.mrf.mxu1  ;;  %v3954_v24 = vpop.f32.mrf.mxu0 }
0x1010   :  { %v1204_v59 = vadd.f32 %v3731_v19, %v1194_v21  ;;  %v7407_v52 = vlaneseq }
0x1011   :  { %v1128_v58 = vpop.f32.mrf.mxu1  ;;  %v1196_v63 = vpop.f32.mrf.mxu0 }
0x1012   :  { %v1213_v57 = vand.u32 2147483647, %v1204_v59  ;;  %v1197_v5 = vadd.f32 %v1196_v63, %v1128_v58  ;;  %v1207_v0 = vand.u32 127, %v7407_v52 }
0x1013   :  { %v3943_v56 = vpop.f32.mrf.mxu1  ;;  %v3955_v1 = vpop.f32.mrf.mxu0 }
0x1014   :  { %v1215_v53 = vsub.f32 0.0, %v1213_v57  ;;  %v1205_v46 = vadd.f32 %v3731_v19, %v1197_v5  ;;  %vm1208_vm8 = vcmp.ge.s32.totalorder %v1207_v0, 32  ;;  %vm1209_vm9 = vcmp.lt.s32.totalorder %v1207_v0, 64 }
0x1015   :  { %vm1210_vm11 = vmand %vm1208_vm8, %vm1209_vm9 }
0x1016   :  { %v1217_v50 = vmul.f32 1.442695, %v1215_v53  ;;  %v1214_v51 = vand.u32 2147483647, %v1205_v46  ;;  %v1212_v52 = vmax.f32 %v1205_v46, 0.0 }
0x1018   :  { %4306 = vpow2.f32 %v1217_v50  ;;  %v1216_v49 = vsub.f32 0.0, %v1214_v51 }
0x101a   :  { %v1219_v48 = vmul.f32 1.442695, %v1216_v49  ;;  %v1211_v49 = vmax.f32 %v1204_v59, 0.0 }
0x101c   :  { %4308 = vpow2.f32 %v1219_v48 }
0x1025   :  { %v4307_v47 = vpop.eup %4306 }
0x1026   :  { %v1221_v45 = vadd.f32 1.0, %v4307_v47  ;;  %v1224_v21 = vmul.f32 -0.5, %v4307_v47  ;;  %v1227_v63 = vand.u32 2147483647, %v4307_v47 }
0x1028   :  { %4310 = vlog2.f32 %v1221_v45  ;;  %v1225_v58 = vadd.f32 1.0, %v1224_v21  ;;  %vm1228_vm10 = vcmp.lt.f32.partialorder %v1227_v63, 0.0004427343  ;;  %v4856_v21 = vmov 1983009808  }
0x1029   :  { %v4309_v60 = vpop.eup %4308  ;;  %v1614_v37 = vunpack.c.l.s4 %v4856_v21 }
0x102a   :  { %v1230_v24 = vadd.f32 1.0, %v4309_v60  ;;  %v1233_v56 = vmul.f32 -0.5, %v4309_v60  ;;  %v1226_v53 = vmul.f32 %v4307_v47, %v1225_v58  ;;  %v1236_v48 = vand.u32 2147483647, %v4309_v60 }
0x102b   :  { %v1615_v0 = vunpack.c.0.s8 %v1614_v37 }
0x102c   :  { %4312 = vlog2.f32 %v1230_v24  ;;  %v1234_v50 = vadd.f32 1.0, %v1233_v56  ;;  %vm1237_vm12 = vcmp.lt.f32.partialorder %v1236_v48, 0.0004427343  ;;  %v1246_v56 = vld [vmem:[%s6948_s1 + $0x2] sm:$0xff] }
0x102e   :  { %v1235_v24 = vmul.f32 %v4309_v60, %v1234_v50  ;;  %v1618_v60 = vsub.s32 %v1615_v0, %v4956_v20 }
0x1030   :  { %v5520_v63 = vrot.slane %v1246_v56, %v1618_v60 }
0x1035   :  { %v4311_v57 = vpop.eup %4310 }
0x1036   :  { %v1223_v19 = vmul.f32 0.6931472, %v4311_v57 }
0x1038   :  { %v1229_v1 = vsel %vm1228_vm10, %v1226_v53, %v1223_v19 }
0x1039   :  { %v4313_v45 = vpop.eup %4312  ;;  %v1239_v5 = vadd.f32 %v1229_v1, %v1211_v49 }
0x103a   :  { %v1232_v51 = vmul.f32 0.6931472, %v4313_v45 }
0x103b   :  { %v1241_v44 = vadd.f32 1.1920929e-07, %v1239_v5 }
0x103c   :  { %v1238_v43 = vsel %vm1237_vm12, %v1235_v24, %v1232_v51 }
0x103d   :  { %v1243_v40 = vsel %vm1210_vm11, %v1241_v44, %v1204_v59  ;;  %v1240_v57 = vadd.f32 %v1238_v43, %v1212_v52  ;;  %v5524_v43 = vcombine.high %v5520_v63, %v5520_v63  ;;  %v1612_v44 = vcombine.high %v1246_v56, %v1246_v56 }
0x103e   :  { %3666 = vst [vmem:[%s6953_s6] sm:$0xff] %v1243_v40 }
0x103f   :  { %v1242_v47 = vadd.f32 1.1920929e-07, %v1240_v57  ;;  %v5528_v48 = vrot.slane %v1612_v44, %v1618_v60 }
0x1041   :  { %v1244_v58 = vsel %vm1210_vm11, %v1242_v47, %v1205_v46  ;;  %v5532_v24 = vcombine.high %v5528_v48, %v5528_v48 }
0x1042   :  { %3669 = vst [vmem:[%s6953_s6 + $0x18] sm:$0xff] %v1244_v58 }
0x104d   :  { %v1667_v40 = vpop.f32.mrf.mxu1  ;;  %v1708_v37 = vpop.f32.mrf.mxu0 }
0x104e   :  { %v1668_v59 = vadd.f32 %v1667_v40, %v5520_v63  ;;  %v1709_v21 = vadd.f32 %v1708_v37, %v5528_v48 }
0x104f   :  { %v1669_v46 = vpop.f32.mrf.mxu1  ;;  %v1710_v19 = vpop.f32.mrf.mxu0 }
0x1050   :  { %v3800_v53 = vmul.f32 -1.442695, %v1668_v59  ;;  %v1670_v50 = vadd.f32 %v1669_v46, %v5524_v43  ;;  %v1711_v52 = vadd.f32 %v1710_v19, %v5532_v24  ;;  %v3733_v59 = vld [vmem:[%s6952_s5 + $0x3] ss:$0 sm:$0xff] }
0x1051   :  { %v1671_v49 = vpop.f32.mrf.mxu1  ;;  %v1712_v1 = vpop.f32.mrf.mxu0 }
0x1052   :  { %4314 = vpow2.f32 %v3800_v53  ;;  %v3801_v45 = vmul.f32 -1.442695, %v1670_v50  ;;  %v3802_v57 = vmul.f32 -1.442695, %v1711_v52 }
0x1053   :  { %v1672_v5 = vpop.f32.mrf.mxu1  ;;  %v1713_v51 = vpop.f32.mrf.mxu0 }
0x1054   :  { %4316 = vpow2.f32 %v3801_v45  ;;  %v1282_v51 = vsub.s32 3, %v4956_v20 }
0x1055   :  { %4318 = vtanh.f32 %v1709_v21 }
0x1056   :  { %4320 = vpow2.f32 %v3802_v57 }
0x105f   :  { %v4315_v47 = vpop.eup %4314 }
0x1060   :  { %v1718_v0 = vadd.f32 1.0, %v4315_v47 }
0x1061   :  { %v4317_v58 = vpop.eup %4316 }
0x1062   :  { %4322 = vrcp.f32 %v1718_v0  ;;  %v1724_v60 = vadd.f32 1.0, %v4317_v58  ;;  %v4319_v56 = vpop.eup %4318 }
0x1063   :  { %v4321_v40 = vpop.eup %4320 }
0x1064   :  { %4324 = vrcp.f32 %v1724_v60  ;;  %v1731_v19 = vadd.f32 1.0, %v4321_v40  ;;  %v1278_v60 = vsub.s32 2, %v4956_v20  ;;  %v3735_v20 = vld [vmem:[%s6952_s5 + $0x5] ss:$0 sm:$0xff] }
0x1066   :  { %4326 = vrcp.f32 %v1731_v19 }
0x106f   :  { %v4323_v44 = vpop.eup %4322 }
0x1070   :  { %v1735_v37 = vmul.f32 %v4323_v44, %v4319_v56 }
0x1071   :  { %v4325_v46 = vpop.eup %4324 }
0x1072   :  { %v1734_v53 = vmul.f32 %v4325_v46, %v3733_v59 }
0x1073   :  { %v4327_v49 = vpop.eup %4326 }
0x1074   :  { %v5539_v50 = vadd.f32 %v1735_v37, %v1734_v53 }
0x1076   :  { %4328 = vtanh.f32 %v5539_v50 }
0x1083   :  { %v4329_v1 = vpop.eup %4328 }
0x1084   :  { %v1738_v45 = vmul.f32 %v4329_v1, %v4327_v49 }
0x1086   :  { %v1739_v5 = vpack.c.bf16 %v1738_v45, %v1738_v45 }
0x1088   :  { %2094 = vmatmul.mubr.bf16.vlgmr.msra.gmra.mxu1 %v1739_v5  ;;  %2135 = vmatmul.mubr.bf16.vlgmr.msra.gmra.mxu0 %v1739_v5 }
0x1089   :  { %2201 = vmatprep.mubr.bf16.mxu1 %v1739_v5  ;;  %2242 = vmatprep.mubr.bf16.mxu0 %v1739_v5 }
0x108a   :  { %2170 = vmatpush1.bf16.msra.mxu1 %v5116_v54  ;;  %2211 = vmatpush1.bf16.msra.mxu0 %v5121_v61  ;;  %v7408_v54 = vld [vmem:[#allocation13_spill] sm:$0xff]  ;;  %v7409_v61 = vld [vmem:[#allocation14_spill] sm:$0xff] }
0x108b   :  { %2171 = vmatprep.subr.bf16.mxu1 %v5123_v2  ;;  %2212 = vmatprep.subr.bf16.mxu0 %v5125_v3  ;;  %v7410_v2 = vld [vmem:[#allocation15_spill] sm:$0xff]  ;;  %v7411_v3 = vld [vmem:[#allocation16_spill] sm:$0xff] }
0x108e   :  { %2172 = vmatpush1.bf16.msra.mxu1 %v5130_v6  ;;  %2213 = vmatpush1.bf16.msra.mxu0 %v5133_v10  ;;  %v7412_v6 = vld [vmem:[#allocation17_spill] sm:$0xff]  ;;  %v7413_v10 = vld [vmem:[#allocation18_spill] sm:$0xff] }
0x108f   :  { %2173 = vmatprep.subr.bf16.mxu1 %v5136_v12  ;;  %2214 = vmatprep.subr.bf16.mxu0 %v5139_v17  ;;  %v7414_v12 = vld [vmem:[#allocation19_spill] sm:$0xff]  ;;  %v7415_v17 = vld [vmem:[#allocation20_spill] sm:$0xff] }
0x1092   :  { %2174 = vmatpush1.bf16.msra.mxu1 %v5142_v18  ;;  %2215 = vmatpush1.bf16.msra.mxu0 %v5145_v55  ;;  %v7416_v18 = vld [vmem:[#allocation21_spill] sm:$0xff]  ;;  %v7417_v55 = vld [vmem:[#allocation22_spill] sm:$0xff] }
0x1093   :  { %2175 = vmatprep.subr.bf16.mxu1 %v5148_v62  ;;  %2216 = vmatprep.subr.bf16.mxu0 %v5151_v4  ;;  %v7418_v62 = vld [vmem:[#allocation23_spill] sm:$0xff]  ;;  %v7419_v4 = vld [vmem:[#allocation24_spill] sm:$0xff] }
0x1096   :  { %2176 = vmatpush1.bf16.msra.mxu1 %v5154_v8  ;;  %2217 = vmatpush1.bf16.msra.mxu0 %v5157_v22  ;;  %v7420_v8 = vld [vmem:[#allocation25_spill] sm:$0xff]  ;;  %v7421_v22 = vld [vmem:[#allocation26_spill] sm:$0xff] }
0x1097   :  { %2177 = vmatprep.subr.bf16.mxu1 %v5160_v23  ;;  %2218 = vmatprep.subr.bf16.mxu0 %v5163_v9  ;;  %v7422_v23 = vld [vmem:[#allocation27_spill] sm:$0xff]  ;;  %v7423_v9 = vld [vmem:[#allocation28_spill] sm:$0xff] }
0x109a   :  { %2178 = vmatpush1.bf16.msra.mxu1 %v5166_v11  ;;  %2219 = vmatpush1.bf16.msra.mxu0 %v5169_v25  ;;  %v7424_v11 = vld [vmem:[#allocation29_spill] sm:$0xff]  ;;  %v7425_v25 = vld [vmem:[#allocation30_spill] sm:$0xff] }
0x109b   :  { %2179 = vmatprep.subr.bf16.mxu1 %v5172_v13  ;;  %2220 = vmatprep.subr.bf16.mxu0 %v5175_v14  ;;  %v7426_v13 = vld [vmem:[#allocation31_spill] sm:$0xff]  ;;  %v7427_v14 = vld [vmem:[#allocation32_spill] sm:$0xff] }
0x109e   :  { %2180 = vmatpush1.bf16.msra.mxu1 %v5178_v15  ;;  %2221 = vmatpush1.bf16.msra.mxu0 %v5181_v26  ;;  %v7428_v15 = vld [vmem:[#allocation33_spill] sm:$0xff]  ;;  %v7429_v26 = vld [vmem:[#allocation34_spill] sm:$0xff] }
0x109f   :  { %2181 = vmatprep.subr.bf16.mxu1 %v5184_v16  ;;  %2222 = vmatprep.subr.bf16.mxu0 %v5187_v27  ;;  %v7430_v16 = vld [vmem:[#allocation35_spill] sm:$0xff]  ;;  %v7431_v27 = vld [vmem:[#allocation36_spill] sm:$0xff] }
0x10a2   :  { %2182 = vmatpush1.bf16.msra.mxu1 %v5190_v28  ;;  %2223 = vmatpush1.bf16.msra.mxu0 %v5193_v7  ;;  %v7432_v28 = vld [vmem:[#allocation37_spill] sm:$0xff]  ;;  %v7433_v7 = vld [vmem:[#allocation38_spill] sm:$0xff] }
0x10a3   :  { %2183 = vmatprep.subr.bf16.mxu1 %v5196_v30  ;;  %2224 = vmatprep.subr.bf16.mxu0 %v5199_v29  ;;  %v3678_v30 = vld [vmem:[%s6951_s4 + $0x1] ss:$4 sm:$0xf] }
0x10a4   :  { %v7434_v29 = vld [vmem:[#allocation11_spill] sm:$0xff]  ;;  %v5618_v58 = vrot.slane %v3678_v30, %v1282_v51  ;;  %v5622_v40 = vrot.slane %v3678_v30, %v1278_v60  ;;  %v7462_v51 = vld [vmem:[#allocation65_spill] sm:$0xff] }
0x10a5   :  { %v7468_v60 = vld [vmem:[#allocation71_spill] sm:$0xff] }
0x10a6   :  { %2184 = vmatpush1.bf16.msra.mxu1 %v5202_v34  ;;  %2225 = vmatpush1.bf16.msra.mxu0 %v5205_v32  ;;  %v5610_v34 = vrot.slane %v3678_v30, %v7434_v29  ;;  %v7435_v32 = vld [vmem:[#allocation12_spill] sm:$0xff]  ;;  %v5854_v29 = vld [vmem:[#allocation5 + $0x168] ss:$16 sps:$4 sm:$0xff]  }
0x10a7   :  { %2185 = vmatprep.subr.bf16.mxu1 %v5208_v31  ;;  %2226 = vmatprep.subr.bf16.mxu0 %v5211_v35  ;;  %v5613_v31 = vrot.slane %v3678_v30, %v7435_v32  ;;  %v7454_v30 = vld [vmem:[#allocation57_spill] sm:$0xff]  ;;  %v5851_v32 = vld [vmem:[#allocation5 + $0x160] ss:$16 sps:$4 sm:$0xff]   ;;  %7516 = vst [vmem:[#allocation31_spill] sm:$0xff] %v5854_v29 }
0x10a8   :  { %7515 = vst [vmem:[#allocation30_spill] sm:$0xff] %v5851_v32 }
0x10aa   :  { %2186 = vmatpush2.bf16.msra.mxu1 %v5214_v33  ;;  %2227 = vmatpush2.bf16.msra.mxu0 %v5217_v36 }
0x10ab   :  { %2187 = vmatprep.subr.bf16.mxu1 %v5220_v39  ;;  %2228 = vmatprep.subr.bf16.mxu0 %v5223_v38 }
0x10ae   :  { %2188 = vmatpush2.bf16.msra.mxu1 %v5226_v41  ;;  %2229 = vmatpush2.bf16.msra.mxu0 %v5229_v42 }
0x10af   :  { %2189 = vmatprep.subr.bf16.mxu1 %v7408_v54  ;;  %2230 = vmatprep.subr.bf16.mxu0 %v7409_v61 }
0x10b2   :  { %2190 = vmatpush2.bf16.msra.mxu1 %v7410_v2  ;;  %2231 = vmatpush2.bf16.msra.mxu0 %v7411_v3 }
0x10b3   :  { %2191 = vmatprep.subr.bf16.mxu1 %v7412_v6  ;;  %2232 = vmatprep.subr.bf16.mxu0 %v7413_v10 }
0x10b6   :  { %2192 = vmatpush2.bf16.msra.mxu1 %v7414_v12  ;;  %2233 = vmatpush2.bf16.msra.mxu0 %v7415_v17 }
0x10b7   :  { %2193 = vmatprep.subr.bf16.mxu1 %v7416_v18  ;;  %2234 = vmatprep.subr.bf16.mxu0 %v7417_v55  ;;  %v7436_v18 = vld [vmem:[#allocation39_spill] sm:$0xff]  ;;  %v7437_v55 = vld [vmem:[#allocation40_spill] sm:$0xff] }
0x10ba   :  { %2194 = vmatpush2.bf16.msra.mxu1 %v7418_v62  ;;  %2235 = vmatpush2.bf16.msra.mxu0 %v7419_v4  ;;  %v7438_v62 = vld [vmem:[#allocation41_spill] sm:$0xff]  ;;  %v7439_v4 = vld [vmem:[#allocation42_spill] sm:$0xff] }
0x10bb   :  { %2195 = vmatprep.subr.bf16.mxu1 %v7420_v8  ;;  %2236 = vmatprep.subr.bf16.mxu0 %v7421_v22  ;;  %v7440_v8 = vld [vmem:[#allocation43_spill] sm:$0xff]  ;;  %v7441_v22 = vld [vmem:[#allocation44_spill] sm:$0xff] }
0x10be   :  { %2196 = vmatpush2.bf16.msra.mxu1 %v7422_v23  ;;  %2237 = vmatpush2.bf16.msra.mxu0 %v7423_v9  ;;  %v7442_v23 = vld [vmem:[#allocation45_spill] sm:$0xff]  ;;  %v7443_v9 = vld [vmem:[#allocation46_spill] sm:$0xff] }
0x10bf   :  { %2197 = vmatprep.subr.bf16.mxu1 %v7424_v11  ;;  %2238 = vmatprep.subr.bf16.mxu0 %v7425_v25  ;;  %v7444_v11 = vld [vmem:[#allocation47_spill] sm:$0xff]  ;;  %v7445_v25 = vld [vmem:[#allocation48_spill] sm:$0xff] }
0x10c2   :  { %2198 = vmatpush2.bf16.msra.mxu1 %v7426_v13  ;;  %2239 = vmatpush2.bf16.msra.mxu0 %v7427_v14  ;;  %v7446_v13 = vld [vmem:[#allocation49_spill] sm:$0xff]  ;;  %v7447_v14 = vld [vmem:[#allocation50_spill] sm:$0xff] }
0x10c3   :  { %2199 = vmatprep.subr.bf16.mxu1 %v7428_v15  ;;  %2240 = vmatprep.subr.bf16.mxu0 %v7429_v26  ;;  %v7448_v15 = vld [vmem:[#allocation51_spill] sm:$0xff]  ;;  %v7449_v26 = vld [vmem:[#allocation52_spill] sm:$0xff] }
0x10c6   :  { %2200 = vmatpush2.bf16.msra.mxu1 %v7430_v16  ;;  %2241 = vmatpush2.bf16.msra.mxu0 %v7431_v27  ;;  %v7450_v16 = vld [vmem:[#allocation53_spill] sm:$0xff]  ;;  %v7451_v27 = vld [vmem:[#allocation54_spill] sm:$0xff] }
0x10c7   :  { %2276 = vmatprep.subr.bf16.mxu1 %v7432_v28  ;;  %2317 = vmatprep.subr.bf16.mxu0 %v7433_v7  ;;  %v7452_v28 = vld [vmem:[#allocation55_spill] sm:$0xff]  ;;  %v7453_v7 = vld [vmem:[#allocation56_spill] sm:$0xff] }
0x1148   :  { %v2095_v35 = vpop.f32.mrf.mxu1  ;;  %v2136_v33 = vpop.f32.mrf.mxu0 }
0x1149   :  { %v2096_v36 = vadd.f32 %v2095_v35, %v5610_v34  ;;  %v2137_v46 = vadd.f32 %v2136_v33, %v5622_v40  ;;  %v7455_v35 = vld [vmem:[#allocation58_spill] sm:$0xff]  ;;  %v7456_v33 = vld [vmem:[#allocation59_spill] sm:$0xff] }
0x114a   :  { %v2097_v39 = vpop.f32.mrf.mxu1  ;;  %v2138_v38 = vpop.f32.mrf.mxu0 }
0x114b   :  { %v3867_v41 = vmul.f32 -1.442695, %v2096_v36  ;;  %v2098_v42 = vadd.f32 %v2097_v39, %v5613_v31  ;;  %v2139_v56 = vadd.f32 %v2138_v38, %v5618_v58  ;;  %v7457_v36 = vld [vmem:[#allocation60_spill] sm:$0xff]  ;;  %v7458_v39 = vld [vmem:[#allocation61_spill] sm:$0xff]  ;;  %v7459_v38 = vld [vmem:[#allocation62_spill] sm:$0xff] }
0x114c   :  { %v2099_v52 = vpop.f32.mrf.mxu1  ;;  %v2140_v21 = vpop.f32.mrf.mxu0 }
0x114d   :  { %4330 = vpow2.f32 %v3867_v41  ;;  %v3868_v57 = vmul.f32 -1.442695, %v2098_v42  ;;  %v3869_v44 = vmul.f32 -1.442695, %v2139_v56  ;;  %v7460_v41 = vld [vmem:[#allocation63_spill] sm:$0xff]  ;;  %v7461_v42 = vld [vmem:[#allocation64_spill] sm:$0xff] }
0x114e   :  { %v2100_v47 = vpop.f32.mrf.mxu1  ;;  %v2141_v0 = vpop.f32.mrf.mxu0  ;;  %v7463_v52 = vld [vmem:[#allocation66_spill] sm:$0xff]  ;;  %v7464_v21 = vld [vmem:[#allocation67_spill] sm:$0xff]  ;;  %v7469_v56 = vld [vmem:[#allocation72_spill] sm:$0xff] }
0x114f   :  { %4332 = vpow2.f32 %v3868_v57  ;;  %v7465_v57 = vld [vmem:[#allocation68_spill] sm:$0xff]  ;;  %v7466_v47 = vld [vmem:[#allocation69_spill] sm:$0xff]  ;;  %v7467_v0 = vld [vmem:[#allocation70_spill] sm:$0xff] }
0x1150   :  { %4334 = vpow2.f32 %v3869_v44  ;;  %v7470_v44 = vld [vmem:[#allocation73_spill] sm:$0xff] }
0x115a   :  { %v4331_v59 = vpop.eup %4330 }
0x115b   :  { %v2146_v19 = vadd.f32 1.0, %v4331_v59  ;;  %v7471_v59 = vld [vmem:[#allocation74_spill] sm:$0xff] }
0x115c   :  { %v4333_v53 = vpop.eup %4332 }
0x115d   :  { %4336 = vrcp.f32 %v2146_v19  ;;  %v2152_v37 = vadd.f32 1.0, %v4333_v53  ;;  %v4335_v49 = vpop.eup %4334  ;;  %v7473_v19 = vld [vmem:[#allocation76_spill] sm:$0xff]  ;;  %v7474_v53 = vld [vmem:[#allocation77_spill] sm:$0xff] }
0x115e   :  { %4338 = vtanh.f32 %v2137_v46  ;;  %v2159_v54 = vadd.f32 1.0, %v4335_v49  ;;  %v7472_v46 = vld [vmem:[#allocation75_spill] sm:$0xff] }
0x115f   :  { %4340 = vrcp.f32 %v2152_v37  ;;  %v7475_v37 = vld [vmem:[#allocation78_spill] sm:$0xff]  ;;  %v7476_v49 = vld [vmem:[#allocation79_spill] sm:$0xff] }
0x1160   :  { %4342 = vrcp.f32 %v2159_v54  ;;  %v7481_v54 = vld [vmem:[#allocation84_spill] sm:$0xff] }
0x116a   :  { %v4337_v1 = vpop.eup %4336 }
0x116b   :  { %v4339_v45 = vpop.eup %4338 }
0x116c   :  { %v4341_v5 = vpop.eup %4340  ;;  %v2163_v61 = vmul.f32 %v4339_v45, %v4337_v1  ;;  %v7477_v1 = vld [vmem:[#allocation80_spill] sm:$0xff]  ;;  %v7479_v45 = vld [vmem:[#allocation82_spill] sm:$0xff] }
0x116d   :  { %v2162_v2 = vmul.f32 %v4341_v5, %v3735_v20  ;;  %v4343_v6 = vpop.eup %4342  ;;  %v7478_v20 = vld [vmem:[#allocation81_spill] sm:$0xff]  ;;  %v7480_v5 = vld [vmem:[#allocation83_spill] sm:$0xff] }
0x116f   :  { %v5628_v3 = vadd.f32 %v2163_v61, %v2162_v2  ;;  %v7482_v61 = vld [vmem:[#allocation85_spill] sm:$0xff]  ;;  %v7483_v2 = vld [vmem:[#allocation86_spill] sm:$0xff] }
0x1171   :  { %4344 = vtanh.f32 %v5628_v3 }
0x117e   :  { %v4345_v10 = vpop.eup %4344 }
0x117f   :  { %v2166_v12 = vmul.f32 %v4345_v10, %v4343_v6  ;;  %v7484_v6 = vld [vmem:[#allocation87_spill] sm:$0xff]  ;;  %v7485_v10 = vld [vmem:[#allocation88_spill] sm:$0xff] }
0x1181   :  { %2167 = vst [vmem:[#allocation4 + $0x2] sm:$0x3] %v2166_v12  ;;  %v2168_v17 = vpack.c.bf16 %v2166_v12, %v2166_v12  ;;  %v7486_v12 = vld [vmem:[#allocation89_spill] sm:$0xff] }
0x1183   :  { %2202 = vmatmul.mubr.bf16.vlgmr.msra.gmra.mxu1 %v2168_v17  ;;  %2243 = vmatmul.mubr.bf16.vlgmr.msra.gmra.mxu0 %v2168_v17 }
0x1184   :  { %2308 = vmatprep.mubr.bf16.mxu1 %v2168_v17  ;;  %2349 = vmatprep.mubr.bf16.mxu0 %v2168_v17  ;;  %v7487_v17 = vld [vmem:[#allocation90_spill] sm:$0xff] }
0x1185   :  { %2277 = vmatpush1.bf16.msra.mxu1 %v7436_v18  ;;  %2318 = vmatpush1.bf16.msra.mxu0 %v7437_v55  ;;  %v7488_v18 = vld [vmem:[#allocation91_spill] sm:$0xff]  ;;  %v7489_v55 = vld [vmem:[#allocation92_spill] sm:$0xff] }
0x1186   :  { %2278 = vmatprep.subr.bf16.mxu1 %v7438_v62  ;;  %2319 = vmatprep.subr.bf16.mxu0 %v7439_v4  ;;  %v7490_v62 = vld [vmem:[#allocation93_spill] sm:$0xff]  ;;  %v7491_v4 = vld [vmem:[#allocation94_spill] sm:$0xff] }
0x1189   :  { %2279 = vmatpush1.bf16.msra.mxu1 %v7440_v8  ;;  %2320 = vmatpush1.bf16.msra.mxu0 %v7441_v22  ;;  %v7492_v8 = vld [vmem:[#allocation95_spill] sm:$0xff]  ;;  %v7493_v22 = vld [vmem:[#allocation96_spill] sm:$0xff] }
0x118a   :  { %2280 = vmatprep.subr.bf16.mxu1 %v7442_v23  ;;  %2321 = vmatprep.subr.bf16.mxu0 %v7443_v9  ;;  %v7494_v23 = vld [vmem:[#allocation97_spill] sm:$0xff]  ;;  %v7495_v9 = vld [vmem:[#allocation98_spill] sm:$0xff] }
0x118d   :  { %2281 = vmatpush1.bf16.msra.mxu1 %v7444_v11  ;;  %2322 = vmatpush1.bf16.msra.mxu0 %v7445_v25  ;;  %v7496_v11 = vld [vmem:[#allocation99_spill] sm:$0xff]  ;;  %v7497_v25 = vld [vmem:[#allocation100_spill] sm:$0xff] }
0x118e   :  { %2282 = vmatprep.subr.bf16.mxu1 %v7446_v13  ;;  %2323 = vmatprep.subr.bf16.mxu0 %v7447_v14  ;;  %v5693_v13 = vld [vmem:[#allocation5 + $0xe4] ss:$16 sps:$4 sm:$0xff]   ;;  %v5696_v14 = vld [vmem:[#allocation5 + $0xec] ss:$16 sps:$4 sm:$0xff]  }
0x118f   :  { %7498 = vst [vmem:[#allocation13_spill] sm:$0xff] %v5693_v13  ;;  %7499 = vst [vmem:[#allocation14_spill] sm:$0xff] %v5696_v14 }
0x1191   :  { %2283 = vmatpush1.bf16.msra.mxu1 %v7448_v15  ;;  %2324 = vmatpush1.bf16.msra.mxu0 %v7449_v26 }
0x1192   :  { %2284 = vmatprep.subr.bf16.mxu1 %v7450_v16  ;;  %2325 = vmatprep.subr.bf16.mxu0 %v7451_v27 }
0x1195   :  { %2285 = vmatpush1.bf16.msra.mxu1 %v7452_v28  ;;  %2326 = vmatpush1.bf16.msra.mxu0 %v7453_v7 }
0x1196   :  { %2286 = vmatprep.subr.bf16.mxu1 %v7454_v30  ;;  %2327 = vmatprep.subr.bf16.mxu0 %v7455_v35 }
0x1199   :  { %2287 = vmatpush1.bf16.msra.mxu1 %v7456_v33  ;;  %2328 = vmatpush1.bf16.msra.mxu0 %v7457_v36 }
0x119a   :  { %2288 = vmatprep.subr.bf16.mxu1 %v7458_v39  ;;  %2329 = vmatprep.subr.bf16.mxu0 %v7459_v38 }
0x119d   :  { %2289 = vmatpush1.bf16.msra.mxu1 %v7460_v41  ;;  %2330 = vmatpush1.bf16.msra.mxu0 %v7461_v42 }
0x119e   :  { %2290 = vmatprep.subr.bf16.mxu1 %v7462_v51  ;;  %2331 = vmatprep.subr.bf16.mxu0 %v7463_v52 }
0x11a1   :  { %2291 = vmatpush1.bf16.msra.mxu1 %v7464_v21  ;;  %2332 = vmatpush1.bf16.msra.mxu0 %v7465_v57 }
0x11a2   :  { %2292 = vmatprep.subr.bf16.mxu1 %v7466_v47  ;;  %2333 = vmatprep.subr.bf16.mxu0 %v7467_v0 }
0x11a5   :  { %2293 = vmatpush2.bf16.msra.mxu1 %v7468_v60  ;;  %2334 = vmatpush2.bf16.msra.mxu0 %v7469_v56 }
0x11a6   :  { %2294 = vmatprep.subr.bf16.mxu1 %v7470_v44  ;;  %2335 = vmatprep.subr.bf16.mxu0 %v7471_v59 }
0x11a9   :  { %2295 = vmatpush2.bf16.msra.mxu1 %v7472_v46  ;;  %2336 = vmatpush2.bf16.msra.mxu0 %v7473_v19 }
0x11aa   :  { %2296 = vmatprep.subr.bf16.mxu1 %v7474_v53  ;;  %2337 = vmatprep.subr.bf16.mxu0 %v7475_v37 }
0x11ad   :  { %2297 = vmatpush2.bf16.msra.mxu1 %v7476_v49  ;;  %2338 = vmatpush2.bf16.msra.mxu0 %v7477_v1 }
0x11ae   :  { %2298 = vmatprep.subr.bf16.mxu1 %v7478_v20  ;;  %2339 = vmatprep.subr.bf16.mxu0 %v7479_v45  ;;  %v5707_v45 = vld [vmem:[#allocation5 + $0xe0] ss:$16 sps:$4 sm:$0xff]  }
0x11b1   :  { %2299 = vmatpush2.bf16.msra.mxu1 %v7480_v5  ;;  %2340 = vmatpush2.bf16.msra.mxu0 %v7481_v54  ;;  %v5710_v5 = vld [vmem:[#allocation5 + $0xe8] ss:$16 sps:$4 sm:$0xff]   ;;  %v5716_v54 = vld [vmem:[#allocation5 + $0xcc] ss:$16 sps:$4 sm:$0xff]  }
0x11b2   :  { %2300 = vmatprep.subr.bf16.mxu1 %v7482_v61  ;;  %2341 = vmatprep.subr.bf16.mxu0 %v7483_v2  ;;  %v5719_v61 = vld [vmem:[#allocation5 + $0xc0] ss:$16 sps:$4 sm:$0xff]   ;;  %v5722_v2 = vld [vmem:[#allocation5 + $0xc8] ss:$16 sps:$4 sm:$0xff]  }
0x11b5   :  { %2301 = vmatpush2.bf16.msra.mxu1 %v7484_v6  ;;  %2342 = vmatpush2.bf16.msra.mxu0 %v7485_v10  ;;  %v5725_v6 = vld [vmem:[#allocation5 + $0xa4] ss:$16 sps:$4 sm:$0xff]   ;;  %v5728_v10 = vld [vmem:[#allocation5 + $0xac] ss:$16 sps:$4 sm:$0xff]  }
0x11b6   :  { %2302 = vmatprep.subr.bf16.mxu1 %v7486_v12  ;;  %2343 = vmatprep.subr.bf16.mxu0 %v7487_v17  ;;  %v5731_v12 = vld [vmem:[#allocation5 + $0xa0] ss:$16 sps:$4 sm:$0xff]   ;;  %v5734_v17 = vld [vmem:[#allocation5 + $0xa8] ss:$16 sps:$4 sm:$0xff]  }
0x11b9   :  { %2303 = vmatpush2.bf16.msra.mxu1 %v7488_v18  ;;  %2344 = vmatpush2.bf16.msra.mxu0 %v7489_v55  ;;  %v5737_v18 = vld [vmem:[#allocation5 + $0x84] ss:$16 sps:$4 sm:$0xff]   ;;  %v5740_v55 = vld [vmem:[#allocation5 + $0x8c] ss:$16 sps:$4 sm:$0xff]  }
0x11ba   :  { %2304 = vmatprep.subr.bf16.mxu1 %v7490_v62  ;;  %2345 = vmatprep.subr.bf16.mxu0 %v7491_v4  ;;  %v5743_v62 = vld [vmem:[#allocation5 + $0x80] ss:$16 sps:$4 sm:$0xff]   ;;  %v5746_v4 = vld [vmem:[#allocation5 + $0x88] ss:$16 sps:$4 sm:$0xff]  }
0x11bd   :  { %2305 = vmatpush2.bf16.msra.mxu1 %v7492_v8  ;;  %2346 = vmatpush2.bf16.msra.mxu0 %v7493_v22  ;;  %v5749_v8 = vld [vmem:[#allocation5 + $0x64] ss:$16 sps:$4 sm:$0xff]   ;;  %v5752_v22 = vld [vmem:[#allocation5 + $0x6c] ss:$16 sps:$4 sm:$0xff]  }
0x11be   :  { %2306 = vmatprep.subr.bf16.mxu1 %v7494_v23  ;;  %2347 = vmatprep.subr.bf16.mxu0 %v7495_v9  ;;  %v5755_v23 = vld [vmem:[#allocation5 + $0x60] ss:$16 sps:$4 sm:$0xff]   ;;  %v5758_v9 = vld [vmem:[#allocation5 + $0x68] ss:$16 sps:$4 sm:$0xff]  }
0x11c1   :  { %2307 = vmatpush2.bf16.msra.mxu1 %v7496_v11  ;;  %2348 = vmatpush2.bf16.msra.mxu0 %v7497_v25 }
0x11c2   :  { %2384 = vmatprep.subr.bf16.mxu1 %v5693_v13  ;;  %2425 = vmatprep.subr.bf16.mxu0 %v5696_v14 }
0x1243   :  { %v2203_v15 = vpop.f32.mrf.mxu1  ;;  %v2244_v26 = vpop.f32.mrf.mxu0 }
0x1244   :  { %v2204_v16 = vadd.f32 %v2203_v15, %v5520_v63  ;;  %v2245_v52 = vadd.f32 %v2244_v26, %v5528_v48  ;;  %v5761_v15 = vld [vmem:[#allocation5 + $0x44] ss:$16 sps:$4 sm:$0xff]   ;;  %v5764_v26 = vld [vmem:[#allocation5 + $0x4c] ss:$16 sps:$4 sm:$0xff]  }
0x1245   :  { %v2205_v27 = vpop.f32.mrf.mxu1  ;;  %v2246_v28 = vpop.f32.mrf.mxu0 }
0x1246   :  { %v3870_v7 = vmul.f32 -1.442695, %v2204_v16  ;;  %v2206_v30 = vadd.f32 %v2205_v27, %v5524_v43  ;;  %v2247_v41 = vadd.f32 %v2246_v28, %v5532_v24  ;;  %v5767_v16 = vld [vmem:[#allocation5 + $0x40] ss:$16 sps:$4 sm:$0xff]   ;;  %v5770_v27 = vld [vmem:[#allocation5 + $0x48] ss:$16 sps:$4 sm:$0xff]  }
0x1247   :  { %v2207_v35 = vpop.f32.mrf.mxu1  ;;  %v2248_v33 = vpop.f32.mrf.mxu0  ;;  %v5773_v28 = vld [vmem:[#allocation5 + $0x24] ss:$16 sps:$4 sm:$0xff]  }
0x1248   :  { %4346 = vpow2.f32 %v3870_v7  ;;  %v3871_v36 = vmul.f32 -1.442695, %v2206_v30  ;;  %v3872_v42 = vmul.f32 -1.442695, %v2247_v41  ;;  %v5776_v7 = vld [vmem:[#allocation5 + $0x2c] ss:$16 sps:$4 sm:$0xff]  }
0x1249   :  { %v2208_v39 = vpop.f32.mrf.mxu1  ;;  %v2249_v38 = vpop.f32.mrf.mxu0  ;;  %v5779_v30 = vld [vmem:[#allocation5 + $0x20] ss:$16 sps:$4 sm:$0xff]   ;;  %v5782_v35 = vld [vmem:[#allocation5 + $0x28] ss:$16 sps:$4 sm:$0xff]   ;;  %v5785_v33 = vld [vmem:[#allocation5 + $0x4] ss:$16 sps:$4 sm:$0xff]  }
0x124a   :  { %4348 = vpow2.f32 %v3871_v36  ;;  %v5788_v36 = vld [vmem:[#allocation5 + $0xc] ss:$16 sps:$4 sm:$0xff]   ;;  %v5791_v39 = vld [vmem:[#allocation5] ss:$16 sps:$4 sm:$0xff]   ;;  %v5794_v38 = vld [vmem:[#allocation5 + $0x8] ss:$16 sps:$4 sm:$0xff]  }
0x124b   :  { %4350 = vpow2.f32 %v3872_v42  ;;  %v5797_v41 = vld [vmem:[#allocation5 + $0x1e4] ss:$16 sps:$4 sm:$0xff]   ;;  %v5800_v42 = vld [vmem:[#allocation5 + $0x1ec] ss:$16 sps:$4 sm:$0xff]  }
0x1255   :  { %v4347_v51 = vpop.eup %4346 }
0x1256   :  { %v2254_v21 = vadd.f32 1.0, %v4347_v51  ;;  %v5803_v51 = vld [vmem:[#allocation5 + $0x1e0] ss:$16 sps:$4 sm:$0xff]  }
0x1257   :  { %v4349_v57 = vpop.eup %4348 }
0x1258   :  { %4352 = vrcp.f32 %v2254_v21  ;;  %v2260_v47 = vadd.f32 1.0, %v4349_v57  ;;  %v4351_v0 = vpop.eup %4350  ;;  %v5809_v21 = vld [vmem:[#allocation5 + $0x1c4] ss:$16 sps:$4 sm:$0xff]   ;;  %v5812_v57 = vld [vmem:[#allocation5 + $0x1cc] ss:$16 sps:$4 sm:$0xff]  }
0x1259   :  { %4354 = vtanh.f32 %v2245_v52  ;;  %v2267_v59 = vadd.f32 1.0, %v4351_v0  ;;  %v5806_v52 = vld [vmem:[#allocation5 + $0x1e8] ss:$16 sps:$4 sm:$0xff]   ;;  %7501 = vst [vmem:[#allocation16_spill] sm:$0xff] %v5809_v21  ;;  %7502 = vst [vmem:[#allocation17_spill] sm:$0xff] %v5812_v57 }
0x125a   :  { %4356 = vrcp.f32 %v2260_v47  ;;  %7500 = vst [vmem:[#allocation15_spill] sm:$0xff] %v5806_v52  ;;  %v5815_v47 = vld [vmem:[#allocation5 + $0x1c0] ss:$16 sps:$4 sm:$0xff]   ;;  %v5818_v0 = vld [vmem:[#allocation5 + $0x1c8] ss:$16 sps:$4 sm:$0xff]  }
0x125b   :  { %4358 = vrcp.f32 %v2267_v59  ;;  %7503 = vst [vmem:[#allocation18_spill] sm:$0xff] %v5815_v47  ;;  %7504 = vst [vmem:[#allocation19_spill] sm:$0xff] %v5818_v0  ;;  %v5830_v59 = vld [vmem:[#allocation5 + $0x1a8] ss:$16 sps:$4 sm:$0xff]  }
0x125c   :  { %7508 = vst [vmem:[#allocation23_spill] sm:$0xff] %v5830_v59 }
0x1265   :  { %v4353_v60 = vpop.eup %4352 }
0x1266   :  { %v4355_v56 = vpop.eup %4354 }
0x1267   :  { %v4357_v44 = vpop.eup %4356  ;;  %v2271_v46 = vmul.f32 %v4355_v56, %v4353_v60  ;;  %v5821_v60 = vld [vmem:[#allocation5 + $0x1a4] ss:$16 sps:$4 sm:$0xff]   ;;  %v5824_v56 = vld [vmem:[#allocation5 + $0x1ac] ss:$16 sps:$4 sm:$0xff]  }
0x1268   :  { %v2270_v19 = vmul.f32 %v4357_v44, %v5539_v50  ;;  %v4359_v37 = vpop.eup %4358  ;;  %v5713_v50 = vld [vmem:[#allocation5 + $0xc4] ss:$16 sps:$4 sm:$0xff]   ;;  %7505 = vst [vmem:[#allocation20_spill] sm:$0xff] %v5821_v60  ;;  %7506 = vst [vmem:[#allocation21_spill] sm:$0xff] %v5824_v56  ;;  %v5827_v44 = vld [vmem:[#allocation5 + $0x1a0] ss:$16 sps:$4 sm:$0xff]  }
0x1269   :  { %7507 = vst [vmem:[#allocation22_spill] sm:$0xff] %v5827_v44 }
0x126a   :  { %v5704_v53 = vadd.f32 %v2271_v46, %v2270_v19  ;;  %v5833_v46 = vld [vmem:[#allocation5 + $0x184] ss:$16 sps:$4 sm:$0xff]   ;;  %v5836_v19 = vld [vmem:[#allocation5 + $0x18c] ss:$16 sps:$4 sm:$0xff]  }
0x126b   :  { %7509 = vst [vmem:[#allocation24_spill] sm:$0xff] %v5833_v46  ;;  %7510 = vst [vmem:[#allocation25_spill] sm:$0xff] %v5836_v19 }
0x126c   :  { %4360 = vtanh.f32 %v5704_v53 }
0x1279   :  { %v4361_v49 = vpop.eup %4360 }
0x127a   :  { %v2274_v1 = vmul.f32 %v4361_v49, %v4359_v37  ;;  %v5839_v37 = vld [vmem:[#allocation5 + $0x180] ss:$16 sps:$4 sm:$0xff]   ;;  %v5842_v49 = vld [vmem:[#allocation5 + $0x188] ss:$16 sps:$4 sm:$0xff]  }
0x127b   :  { %7511 = vst [vmem:[#allocation26_spill] sm:$0xff] %v5839_v37  ;;  %7512 = vst [vmem:[#allocation27_spill] sm:$0xff] %v5842_v49 }
0x127c   :  { %v2275_v20 = vpack.c.bf16 %v2274_v1, %v2274_v1  ;;  %v5845_v1 = vld [vmem:[#allocation5 + $0x164] ss:$16 sps:$4 sm:$0xff]  }
0x127d   :  { %7513 = vst [vmem:[#allocation28_spill] sm:$0xff] %v5845_v1 }
0x127e   :  { %2309 = vmatmul.mubr.bf16.vlgmr.msra.gmra.mxu1 %v2275_v20  ;;  %2350 = vmatmul.mubr.bf16.vlgmr.msra.gmra.mxu0 %v2275_v20 }
0x127f   :  { %2416 = vmatprep.mubr.bf16.mxu1 %v2275_v20  ;;  %2457 = vmatprep.mubr.bf16.mxu0 %v2275_v20  ;;  %v5848_v20 = vld [vmem:[#allocation5 + $0x16c] ss:$16 sps:$4 sm:$0xff]  }
0x1280   :  { %2385 = vmatpush1.bf16.msra.mxu1 %v5707_v45  ;;  %2426 = vmatpush1.bf16.msra.mxu0 %v5710_v5  ;;  %7514 = vst [vmem:[#allocation29_spill] sm:$0xff] %v5848_v20 }
0x1281   :  { %2386 = vmatprep.subr.bf16.mxu1 %v5713_v50  ;;  %2427 = vmatprep.subr.bf16.mxu0 %v5716_v54 }
0x1284   :  { %2387 = vmatpush1.bf16.msra.mxu1 %v5719_v61  ;;  %2428 = vmatpush1.bf16.msra.mxu0 %v5722_v2 }
0x1285   :  { %2388 = vmatprep.subr.bf16.mxu1 %v5725_v6  ;;  %2429 = vmatprep.subr.bf16.mxu0 %v5728_v10 }
0x1288   :  { %2389 = vmatpush1.bf16.msra.mxu1 %v5731_v12  ;;  %2430 = vmatpush1.bf16.msra.mxu0 %v5734_v17 }
0x1289   :  { %2390 = vmatprep.subr.bf16.mxu1 %v5737_v18  ;;  %2431 = vmatprep.subr.bf16.mxu0 %v5740_v55 }
0x128c   :  { %2391 = vmatpush1.bf16.msra.mxu1 %v5743_v62  ;;  %2432 = vmatpush1.bf16.msra.mxu0 %v5746_v4 }
0x128d   :  { %2392 = vmatprep.subr.bf16.mxu1 %v5749_v8  ;;  %2433 = vmatprep.subr.bf16.mxu0 %v5752_v22 }
0x1290   :  { %2393 = vmatpush1.bf16.msra.mxu1 %v5755_v23  ;;  %2434 = vmatpush1.bf16.msra.mxu0 %v5758_v9 }
0x1291   :  { %2394 = vmatprep.subr.bf16.mxu1 %v5761_v15  ;;  %2435 = vmatprep.subr.bf16.mxu0 %v5764_v26 }
0x1294   :  { %2395 = vmatpush1.bf16.msra.mxu1 %v5767_v16  ;;  %2436 = vmatpush1.bf16.msra.mxu0 %v5770_v27 }
0x1295   :  { %2396 = vmatprep.subr.bf16.mxu1 %v5773_v28  ;;  %2437 = vmatprep.subr.bf16.mxu0 %v5776_v7 }
0x1298   :  { %2397 = vmatpush1.bf16.msra.mxu1 %v5779_v30  ;;  %2438 = vmatpush1.bf16.msra.mxu0 %v5782_v35 }
0x1299   :  { %2398 = vmatprep.subr.bf16.mxu1 %v5785_v33  ;;  %2439 = vmatprep.subr.bf16.mxu0 %v5788_v36 }
0x129c   :  { %2399 = vmatpush1.bf16.msra.mxu1 %v5791_v39  ;;  %2440 = vmatpush1.bf16.msra.mxu0 %v5794_v38 }
0x129d   :  { %2400 = vmatprep.subr.bf16.mxu1 %v5797_v41  ;;  %2441 = vmatprep.subr.bf16.mxu0 %v5800_v42 }
0x12a0   :  { %2401 = vmatpush2.bf16.msra.mxu1 %v5803_v51  ;;  %2442 = vmatpush2.bf16.msra.mxu0 %v5806_v52 }
0x12a1   :  { %2402 = vmatprep.subr.bf16.mxu1 %v5809_v21  ;;  %2443 = vmatprep.subr.bf16.mxu0 %v5812_v57 }
0x12a4   :  { %2403 = vmatpush2.bf16.msra.mxu1 %v5815_v47  ;;  %2444 = vmatpush2.bf16.msra.mxu0 %v5818_v0 }
0x12a5   :  { %2404 = vmatprep.subr.bf16.mxu1 %v5821_v60  ;;  %2445 = vmatprep.subr.bf16.mxu0 %v5824_v56 }
0x12a8   :  { %2405 = vmatpush2.bf16.msra.mxu1 %v5827_v44  ;;  %2446 = vmatpush2.bf16.msra.mxu0 %v5830_v59 }
0x12a9   :  { %2406 = vmatprep.subr.bf16.mxu1 %v5833_v46  ;;  %2447 = vmatprep.subr.bf16.mxu0 %v5836_v19 }
0x12ac   :  { %2407 = vmatpush2.bf16.msra.mxu1 %v5839_v37  ;;  %2448 = vmatpush2.bf16.msra.mxu0 %v5842_v49  ;;  %v5857_v37 = vld [vmem:[#allocation5 + $0x144] ss:$16 sps:$4 sm:$0xff]   ;;  %v5860_v49 = vld [vmem:[#allocation5 + $0x14c] ss:$16 sps:$4 sm:$0xff]  }
0x12ad   :  { %2408 = vmatprep.subr.bf16.mxu1 %v5845_v1  ;;  %2449 = vmatprep.subr.bf16.mxu0 %v5848_v20  ;;  %7517 = vst [vmem:[#allocation32_spill] sm:$0xff] %v5857_v37  ;;  %7518 = vst [vmem:[#allocation33_spill] sm:$0xff] %v5860_v49  ;;  %v5863_v1 = vld [vmem:[#allocation5 + $0x140] ss:$16 sps:$4 sm:$0xff]   ;;  %v5866_v20 = vld [vmem:[#allocation5 + $0x148] ss:$16 sps:$4 sm:$0xff]  }
0x12ae   :  { %7519 = vst [vmem:[#allocation34_spill] sm:$0xff] %v5863_v1  ;;  %7520 = vst [vmem:[#allocation35_spill] sm:$0xff] %v5866_v20 }
0x12b0   :  { %2409 = vmatpush2.bf16.msra.mxu1 %v5851_v32  ;;  %2450 = vmatpush2.bf16.msra.mxu0 %v5854_v29  ;;  %v5869_v32 = vld [vmem:[#allocation5 + $0x124] ss:$16 sps:$4 sm:$0xff]   ;;  %v5872_v29 = vld [vmem:[#allocation5 + $0x12c] ss:$16 sps:$4 sm:$0xff]  }
0x12b1   :  { %2410 = vmatprep.subr.bf16.mxu1 %v5857_v37  ;;  %2451 = vmatprep.subr.bf16.mxu0 %v5860_v49  ;;  %7521 = vst [vmem:[#allocation36_spill] sm:$0xff] %v5869_v32  ;;  %7522 = vst [vmem:[#allocation37_spill] sm:$0xff] %v5872_v29  ;;  %v5875_v37 = vld [vmem:[#allocation5 + $0x120] ss:$16 sps:$4 sm:$0xff]   ;;  %v5878_v49 = vld [vmem:[#allocation5 + $0x128] ss:$16 sps:$4 sm:$0xff]  }
0x12b2   :  { %7523 = vst [vmem:[#allocation38_spill] sm:$0xff] %v5875_v37  ;;  %7524 = vst [vmem:[#allocation39_spill] sm:$0xff] %v5878_v49 }
0x12b4   :  { %2411 = vmatpush2.bf16.msra.mxu1 %v5863_v1  ;;  %2452 = vmatpush2.bf16.msra.mxu0 %v5866_v20  ;;  %v5881_v1 = vld [vmem:[#allocation5 + $0x104] ss:$16 sps:$4 sm:$0xff]   ;;  %v5884_v20 = vld [vmem:[#allocation5 + $0x10c] ss:$16 sps:$4 sm:$0xff]  }
0x12b5   :  { %2412 = vmatprep.subr.bf16.mxu1 %v5869_v32  ;;  %2453 = vmatprep.subr.bf16.mxu0 %v5872_v29  ;;  %7525 = vst [vmem:[#allocation40_spill] sm:$0xff] %v5881_v1  ;;  %7526 = vst [vmem:[#allocation41_spill] sm:$0xff] %v5884_v20  ;;  %v5887_v32 = vld [vmem:[#allocation5 + $0x100] ss:$16 sps:$4 sm:$0xff]   ;;  %v5890_v29 = vld [vmem:[#allocation5 + $0x108] ss:$16 sps:$4 sm:$0xff]  }
0x12b6   :  { %7527 = vst [vmem:[#allocation42_spill] sm:$0xff] %v5887_v32  ;;  %7528 = vst [vmem:[#allocation43_spill] sm:$0xff] %v5890_v29 }
0x12b8   :  { %2413 = vmatpush2.bf16.msra.mxu1 %v5875_v37  ;;  %2454 = vmatpush2.bf16.msra.mxu0 %v5878_v49  ;;  %v5893_v37 = vld [vmem:[#allocation5 + $0x2e4] ss:$16 sps:$4 sm:$0xff]   ;;  %v5896_v49 = vld [vmem:[#allocation5 + $0x2ec] ss:$16 sps:$4 sm:$0xff]  }
0x12b9   :  { %2414 = vmatprep.subr.bf16.mxu1 %v5881_v1  ;;  %2455 = vmatprep.subr.bf16.mxu0 %v5884_v20  ;;  %7529 = vst [vmem:[#allocation44_spill] sm:$0xff] %v5893_v37  ;;  %7530 = vst [vmem:[#allocation45_spill] sm:$0xff] %v5896_v49 }
0x12bc   :  { %2415 = vmatpush2.bf16.msra.mxu1 %v5887_v32  ;;  %2456 = vmatpush2.bf16.msra.mxu0 %v5890_v29 }
0x12bd   :  { %2491 = vmatprep.subr.bf16.mxu1 %v5893_v37  ;;  %2532 = vmatprep.subr.bf16.mxu0 %v5896_v49 }
0x133e   :  { %v2310_v1 = vpop.f32.mrf.mxu1  ;;  %v2351_v19 = vpop.f32.mrf.mxu0 }
0x133f   :  { %v2311_v20 = vadd.f32 %v2310_v1, %v5610_v34  ;;  %v2352_v21 = vadd.f32 %v2351_v19, %v5622_v40 }
0x1340   :  { %v2312_v46 = vpop.f32.mrf.mxu1  ;;  %v2353_v59 = vpop.f32.mrf.mxu0 }
0x1341   :  { %v3873_v44 = vmul.f32 -1.442695, %v2311_v20  ;;  %v2313_v32 = vadd.f32 %v2312_v46, %v5613_v31  ;;  %v2354_v37 = vadd.f32 %v2353_v59, %v5618_v58 }
0x1342   :  { %v2314_v56 = vpop.f32.mrf.mxu1  ;;  %v2355_v60 = vpop.f32.mrf.mxu0 }
0x1343   :  { %4362 = vpow2.f32 %v3873_v44  ;;  %v3874_v29 = vmul.f32 -1.442695, %v2313_v32  ;;  %v3875_v57 = vmul.f32 -1.442695, %v2354_v37  ;;  %v5910_v37 = vld [vmem:[#allocation5 + $0x2e8] ss:$16 sps:$4 sm:$0xff]  }
0x1344   :  { %v2315_v0 = vpop.f32.mrf.mxu1  ;;  %v2356_v47 = vpop.f32.mrf.mxu0 }
0x1345   :  { %4364 = vpow2.f32 %v3874_v29 }
0x1346   :  { %4366 = vpow2.f32 %v3875_v57 }
0x1350   :  { %v4363_v49 = vpop.eup %4362 }
0x1351   :  { %v2361_v52 = vadd.f32 1.0, %v4363_v49  ;;  %v5916_v49 = vld [vmem:[#allocation5 + $0x2cc] ss:$16 sps:$4 sm:$0xff]  }
0x1352   :  { %v4365_v1 = vpop.eup %4364 }
0x1353   :  { %4368 = vrcp.f32 %v2361_v52  ;;  %v2367_v20 = vadd.f32 1.0, %v4365_v1  ;;  %v4367_v56 = vpop.eup %4366  ;;  %v5919_v1 = vld [vmem:[#allocation5 + $0x2c0] ss:$16 sps:$4 sm:$0xff]  }
0x1354   :  { %4370 = vtanh.f32 %v2352_v21  ;;  %v2374_v0 = vadd.f32 1.0, %v4367_v56  ;;  %v5907_v21 = vld [vmem:[#allocation5 + $0x2e0] ss:$16 sps:$4 sm:$0xff]   ;;  %7531 = vst [vmem:[#allocation46_spill] sm:$0xff] %v5919_v1  ;;  %v5925_v56 = vld [vmem:[#allocation5 + $0x2a4] ss:$16 sps:$4 sm:$0xff]  }
0x1355   :  { %4372 = vrcp.f32 %v2367_v20  ;;  %v5922_v20 = vld [vmem:[#allocation5 + $0x2c8] ss:$16 sps:$4 sm:$0xff]   ;;  %7533 = vst [vmem:[#allocation48_spill] sm:$0xff] %v5925_v56 }
0x1356   :  { %4374 = vrcp.f32 %v2374_v0  ;;  %7532 = vst [vmem:[#allocation47_spill] sm:$0xff] %v5922_v20  ;;  %v5937_v0 = vld [vmem:[#allocation5 + $0x284] ss:$16 sps:$4 sm:$0xff]  }
0x1357   :  { %7537 = vst [vmem:[#allocation52_spill] sm:$0xff] %v5937_v0 }
0x1360   :  { %v4369_v60 = vpop.eup %4368 }
0x1361   :  { %v4371_v44 = vpop.eup %4370 }
0x1362   :  { %v4373_v32 = vpop.eup %4372  ;;  %v2378_v47 = vmul.f32 %v4371_v44, %v4369_v60  ;;  %v5928_v60 = vld [vmem:[#allocation5 + $0x2ac] ss:$16 sps:$4 sm:$0xff]   ;;  %v5931_v44 = vld [vmem:[#allocation5 + $0x2a0] ss:$16 sps:$4 sm:$0xff]  }
0x1363   :  { %v2377_v29 = vmul.f32 %v4373_v32, %v5628_v3  ;;  %v4375_v46 = vpop.eup %4374  ;;  %v5913_v3 = vld [vmem:[#allocation5 + $0x2c4] ss:$16 sps:$4 sm:$0xff]   ;;  %7534 = vst [vmem:[#allocation49_spill] sm:$0xff] %v5928_v60  ;;  %7535 = vst [vmem:[#allocation50_spill] sm:$0xff] %v5931_v44  ;;  %v5934_v32 = vld [vmem:[#allocation5 + $0x2a8] ss:$16 sps:$4 sm:$0xff]  }
0x1364   :  { %7536 = vst [vmem:[#allocation51_spill] sm:$0xff] %v5934_v32 }
0x1365   :  { %v5904_v59 = vadd.f32 %v2378_v47, %v2377_v29  ;;  %v5940_v47 = vld [vmem:[#allocation5 + $0x28c] ss:$16 sps:$4 sm:$0xff]   ;;  %v5943_v29 = vld [vmem:[#allocation5 + $0x280] ss:$16 sps:$4 sm:$0xff]  }
0x1366   :  { %7538 = vst [vmem:[#allocation53_spill] sm:$0xff] %v5940_v47  ;;  %7539 = vst [vmem:[#allocation54_spill] sm:$0xff] %v5943_v29 }
0x1367   :  { %4376 = vtanh.f32 %v5904_v59 }
0x1374   :  { %v4377_v19 = vpop.eup %4376 }
0x1375   :  { %v2381_v57 = vmul.f32 %v4377_v19, %v4375_v46  ;;  %v5946_v46 = vld [vmem:[#allocation5 + $0x288] ss:$16 sps:$4 sm:$0xff]   ;;  %v5949_v19 = vld [vmem:[#allocation5 + $0x264] ss:$16 sps:$4 sm:$0xff]  }
0x1376   :  { %7540 = vst [vmem:[#allocation55_spill] sm:$0xff] %v5946_v46  ;;  %7541 = vst [vmem:[#allocation56_spill] sm:$0xff] %v5949_v19 }
0x1377   :  { %2382 = vst [vmem:[#allocation4 + $0x4] sm:$0x3] %v2381_v57  ;;  %v2383_v52 = vpack.c.bf16 %v2381_v57, %v2381_v57  ;;  %v5952_v57 = vld [vmem:[#allocation5 + $0x26c] ss:$16 sps:$4 sm:$0xff]  }
0x1378   :  { %7542 = vst [vmem:[#allocation57_spill] sm:$0xff] %v5952_v57 }
0x1379   :  { %2417 = vmatmul.mubr.bf16.vlgmr.msra.gmra.mxu1 %v2383_v52  ;;  %2458 = vmatmul.mubr.bf16.vlgmr.msra.gmra.mxu0 %v2383_v52 }
0x137a   :  { %2523 = vmatprep.mubr.bf16.mxu1 %v2383_v52  ;;  %2564 = vmatprep.mubr.bf16.mxu0 %v2383_v52  ;;  %v5955_v52 = vld [vmem:[#allocation5 + $0x260] ss:$16 sps:$4 sm:$0xff]  }
0x137b   :  { %2492 = vmatpush1.bf16.msra.mxu1 %v5907_v21  ;;  %2533 = vmatpush1.bf16.msra.mxu0 %v5910_v37  ;;  %7543 = vst [vmem:[#allocation58_spill] sm:$0xff] %v5955_v52 }
0x137c   :  { %2493 = vmatprep.subr.bf16.mxu1 %v5913_v3  ;;  %2534 = vmatprep.subr.bf16.mxu0 %v5916_v49 }
0x137f   :  { %2494 = vmatpush1.bf16.msra.mxu1 %v5919_v1  ;;  %2535 = vmatpush1.bf16.msra.mxu0 %v5922_v20 }
0x1380   :  { %2495 = vmatprep.subr.bf16.mxu1 %v5925_v56  ;;  %2536 = vmatprep.subr.bf16.mxu0 %v5928_v60 }
0x1383   :  { %2496 = vmatpush1.bf16.msra.mxu1 %v5931_v44  ;;  %2537 = vmatpush1.bf16.msra.mxu0 %v5934_v32 }
0x1384   :  { %2497 = vmatprep.subr.bf16.mxu1 %v5937_v0  ;;  %2538 = vmatprep.subr.bf16.mxu0 %v5940_v47  ;;  %v5958_v47 = vld [vmem:[#allocation5 + $0x268] ss:$16 sps:$4 sm:$0xff]  }
0x1385   :  { %7544 = vst [vmem:[#allocation59_spill] sm:$0xff] %v5958_v47 }
0x1387   :  { %2498 = vmatpush1.bf16.msra.mxu1 %v5943_v29  ;;  %2539 = vmatpush1.bf16.msra.mxu0 %v5946_v46  ;;  %v5961_v29 = vld [vmem:[#allocation5 + $0x244] ss:$16 sps:$4 sm:$0xff]   ;;  %v5964_v46 = vld [vmem:[#allocation5 + $0x24c] ss:$16 sps:$4 sm:$0xff]  }
0x1388   :  { %2499 = vmatprep.subr.bf16.mxu1 %v5949_v19  ;;  %2540 = vmatprep.subr.bf16.mxu0 %v5952_v57  ;;  %7545 = vst [vmem:[#allocation60_spill] sm:$0xff] %v5961_v29  ;;  %7546 = vst [vmem:[#allocation61_spill] sm:$0xff] %v5964_v46  ;;  %v5967_v19 = vld [vmem:[#allocation5 + $0x240] ss:$16 sps:$4 sm:$0xff]   ;;  %v5970_v57 = vld [vmem:[#allocation5 + $0x248] ss:$16 sps:$4 sm:$0xff]  }
0x1389   :  { %7547 = vst [vmem:[#allocation62_spill] sm:$0xff] %v5967_v19  ;;  %7548 = vst [vmem:[#allocation63_spill] sm:$0xff] %v5970_v57 }
0x138b   :  { %2500 = vmatpush1.bf16.msra.mxu1 %v5955_v52  ;;  %2541 = vmatpush1.bf16.msra.mxu0 %v5958_v47  ;;  %v5973_v52 = vld [vmem:[#allocation5 + $0x224] ss:$16 sps:$4 sm:$0xff]   ;;  %v5976_v47 = vld [vmem:[#allocation5 + $0x22c] ss:$16 sps:$4 sm:$0xff]  }
0x138c   :  { %2501 = vmatprep.subr.bf16.mxu1 %v5961_v29  ;;  %2542 = vmatprep.subr.bf16.mxu0 %v5964_v46  ;;  %7549 = vst [vmem:[#allocation64_spill] sm:$0xff] %v5973_v52  ;;  %7550 = vst [vmem:[#allocation65_spill] sm:$0xff] %v5976_v47  ;;  %v5979_v29 = vld [vmem:[#allocation5 + $0x220] ss:$16 sps:$4 sm:$0xff]   ;;  %v5982_v46 = vld [vmem:[#allocation5 + $0x228] ss:$16 sps:$4 sm:$0xff]  }
0x138d   :  { %7551 = vst [vmem:[#allocation66_spill] sm:$0xff] %v5979_v29  ;;  %7552 = vst [vmem:[#allocation67_spill] sm:$0xff] %v5982_v46 }
0x138f   :  { %2502 = vmatpush1.bf16.msra.mxu1 %v5967_v19  ;;  %2543 = vmatpush1.bf16.msra.mxu0 %v5970_v57  ;;  %v5985_v19 = vld [vmem:[#allocation5 + $0x204] ss:$16 sps:$4 sm:$0xff]   ;;  %v5988_v57 = vld [vmem:[#allocation5 + $0x20c] ss:$16 sps:$4 sm:$0xff]  }
0x1390   :  { %2503 = vmatprep.subr.bf16.mxu1 %v5973_v52  ;;  %2544 = vmatprep.subr.bf16.mxu0 %v5976_v47  ;;  %7553 = vst [vmem:[#allocation68_spill] sm:$0xff] %v5985_v19  ;;  %7554 = vst [vmem:[#allocation69_spill] sm:$0xff] %v5988_v57  ;;  %v5991_v52 = vld [vmem:[#allocation5 + $0x200] ss:$16 sps:$4 sm:$0xff]   ;;  %v5994_v47 = vld [vmem:[#allocation5 + $0x208] ss:$16 sps:$4 sm:$0xff]  }
0x1391   :  { %7555 = vst [vmem:[#allocation70_spill] sm:$0xff] %v5991_v52  ;;  %7556 = vst [vmem:[#allocation71_spill] sm:$0xff] %v5994_v47 }
0x1393   :  { %2504 = vmatpush1.bf16.msra.mxu1 %v5979_v29  ;;  %2545 = vmatpush1.bf16.msra.mxu0 %v5982_v46  ;;  %v5997_v29 = vld [vmem:[#allocation5 + $0x3e4] ss:$16 sps:$4 sm:$0xff]   ;;  %v6000_v46 = vld [vmem:[#allocation5 + $0x3ec] ss:$16 sps:$4 sm:$0xff]  }
0x1394   :  { %2505 = vmatprep.subr.bf16.mxu1 %v5985_v19  ;;  %2546 = vmatprep.subr.bf16.mxu0 %v5988_v57  ;;  %7557 = vst [vmem:[#allocation72_spill] sm:$0xff] %v5997_v29  ;;  %7558 = vst [vmem:[#allocation73_spill] sm:$0xff] %v6000_v46  ;;  %v6003_v19 = vld [vmem:[#allocation5 + $0x3e0] ss:$16 sps:$4 sm:$0xff]   ;;  %v6006_v57 = vld [vmem:[#allocation5 + $0x3e8] ss:$16 sps:$4 sm:$0xff]  }
0x1395   :  { %7559 = vst [vmem:[#allocation74_spill] sm:$0xff] %v6003_v19  ;;  %7560 = vst [vmem:[#allocation75_spill] sm:$0xff] %v6006_v57 }
0x1397   :  { %2506 = vmatpush1.bf16.msra.mxu1 %v5991_v52  ;;  %2547 = vmatpush1.bf16.msra.mxu0 %v5994_v47  ;;  %v6009_v52 = vld [vmem:[#allocation5 + $0x3c4] ss:$16 sps:$4 sm:$0xff]   ;;  %v6012_v47 = vld [vmem:[#allocation5 + $0x3cc] ss:$16 sps:$4 sm:$0xff]  }
0x1398   :  { %2507 = vmatprep.subr.bf16.mxu1 %v5997_v29  ;;  %2548 = vmatprep.subr.bf16.mxu0 %v6000_v46  ;;  %7561 = vst [vmem:[#allocation76_spill] sm:$0xff] %v6009_v52  ;;  %7562 = vst [vmem:[#allocation77_spill] sm:$0xff] %v6012_v47  ;;  %v6015_v29 = vld [vmem:[#allocation5 + $0x3c0] ss:$16 sps:$4 sm:$0xff]   ;;  %v6018_v46 = vld [vmem:[#allocation5 + $0x3c8] ss:$16 sps:$4 sm:$0xff]  }
0x1399   :  { %7563 = vst [vmem:[#allocation78_spill] sm:$0xff] %v6015_v29  ;;  %7564 = vst [vmem:[#allocation79_spill] sm:$0xff] %v6018_v46 }
0x139b   :  { %2508 = vmatpush2.bf16.msra.mxu1 %v6003_v19  ;;  %2549 = vmatpush2.bf16.msra.mxu0 %v6006_v57  ;;  %v6021_v19 = vld [vmem:[#allocation5 + $0x3a4] ss:$16 sps:$4 sm:$0xff]   ;;  %v6024_v57 = vld [vmem:[#allocation5 + $0x3ac] ss:$16 sps:$4 sm:$0xff]  }
0x139c   :  { %2509 = vmatprep.subr.bf16.mxu1 %v6009_v52  ;;  %2550 = vmatprep.subr.bf16.mxu0 %v6012_v47  ;;  %7565 = vst [vmem:[#allocation80_spill] sm:$0xff] %v6021_v19  ;;  %7566 = vst [vmem:[#allocation81_spill] sm:$0xff] %v6024_v57  ;;  %v6027_v52 = vld [vmem:[#allocation5 + $0x3a0] ss:$16 sps:$4 sm:$0xff]   ;;  %v6030_v47 = vld [vmem:[#allocation5 + $0x3a8] ss:$16 sps:$4 sm:$0xff]  }
0x139d   :  { %7567 = vst [vmem:[#allocation82_spill] sm:$0xff] %v6027_v52  ;;  %7568 = vst [vmem:[#allocation83_spill] sm:$0xff] %v6030_v47 }
0x139f   :  { %2510 = vmatpush2.bf16.msra.mxu1 %v6015_v29  ;;  %2551 = vmatpush2.bf16.msra.mxu0 %v6018_v46  ;;  %v6033_v29 = vld [vmem:[#allocation5 + $0x384] ss:$16 sps:$4 sm:$0xff]   ;;  %v6036_v46 = vld [vmem:[#allocation5 + $0x38c] ss:$16 sps:$4 sm:$0xff]  }
0x13a0   :  { %2511 = vmatprep.subr.bf16.mxu1 %v6021_v19  ;;  %2552 = vmatprep.subr.bf16.mxu0 %v6024_v57  ;;  %7569 = vst [vmem:[#allocation84_spill] sm:$0xff] %v6033_v29  ;;  %7570 = vst [vmem:[#allocation85_spill] sm:$0xff] %v6036_v46  ;;  %v6039_v19 = vld [vmem:[#allocation5 + $0x380] ss:$16 sps:$4 sm:$0xff]   ;;  %v6042_v57 = vld [vmem:[#allocation5 + $0x388] ss:$16 sps:$4 sm:$0xff]  }
0x13a1   :  { %7571 = vst [vmem:[#allocation86_spill] sm:$0xff] %v6039_v19  ;;  %7572 = vst [vmem:[#allocation87_spill] sm:$0xff] %v6042_v57 }
0x13a3   :  { %2512 = vmatpush2.bf16.msra.mxu1 %v6027_v52  ;;  %2553 = vmatpush2.bf16.msra.mxu0 %v6030_v47  ;;  %v6045_v52 = vld [vmem:[#allocation5 + $0x364] ss:$16 sps:$4 sm:$0xff]   ;;  %v6048_v47 = vld [vmem:[#allocation5 + $0x36c] ss:$16 sps:$4 sm:$0xff]  }
0x13a4   :  { %2513 = vmatprep.subr.bf16.mxu1 %v6033_v29  ;;  %2554 = vmatprep.subr.bf16.mxu0 %v6036_v46  ;;  %7573 = vst [vmem:[#allocation88_spill] sm:$0xff] %v6045_v52  ;;  %7574 = vst [vmem:[#allocation89_spill] sm:$0xff] %v6048_v47  ;;  %v6051_v29 = vld [vmem:[#allocation5 + $0x360] ss:$16 sps:$4 sm:$0xff]   ;;  %v6054_v46 = vld [vmem:[#allocation5 + $0x368] ss:$16 sps:$4 sm:$0xff]  }
0x13a5   :  { %7575 = vst [vmem:[#allocation90_spill] sm:$0xff] %v6051_v29  ;;  %7576 = vst [vmem:[#allocation91_spill] sm:$0xff] %v6054_v46 }
0x13a7   :  { %2514 = vmatpush2.bf16.msra.mxu1 %v6039_v19  ;;  %2555 = vmatpush2.bf16.msra.mxu0 %v6042_v57  ;;  %v6057_v19 = vld [vmem:[#allocation5 + $0x344] ss:$16 sps:$4 sm:$0xff]   ;;  %v6060_v57 = vld [vmem:[#allocation5 + $0x34c] ss:$16 sps:$4 sm:$0xff]  }
0x13a8   :  { %2515 = vmatprep.subr.bf16.mxu1 %v6045_v52  ;;  %2556 = vmatprep.subr.bf16.mxu0 %v6048_v47  ;;  %7577 = vst [vmem:[#allocation92_spill] sm:$0xff] %v6057_v19  ;;  %7578 = vst [vmem:[#allocation93_spill] sm:$0xff] %v6060_v57  ;;  %v6063_v52 = vld [vmem:[#allocation5 + $0x340] ss:$16 sps:$4 sm:$0xff]   ;;  %v6066_v47 = vld [vmem:[#allocation5 + $0x348] ss:$16 sps:$4 sm:$0xff]  }
0x13a9   :  { %7579 = vst [vmem:[#allocation94_spill] sm:$0xff] %v6063_v52  ;;  %7580 = vst [vmem:[#allocation95_spill] sm:$0xff] %v6066_v47 }
0x13ab   :  { %2516 = vmatpush2.bf16.msra.mxu1 %v6051_v29  ;;  %2557 = vmatpush2.bf16.msra.mxu0 %v6054_v46  ;;  %v6069_v29 = vld [vmem:[#allocation5 + $0x324] ss:$16 sps:$4 sm:$0xff]   ;;  %v6072_v46 = vld [vmem:[#allocation5 + $0x32c] ss:$16 sps:$4 sm:$0xff]  }
0x13ac   :  { %2517 = vmatprep.subr.bf16.mxu1 %v6057_v19  ;;  %2558 = vmatprep.subr.bf16.mxu0 %v6060_v57  ;;  %7581 = vst [vmem:[#allocation96_spill] sm:$0xff] %v6069_v29  ;;  %7582 = vst [vmem:[#allocation97_spill] sm:$0xff] %v6072_v46  ;;  %v6075_v19 = vld [vmem:[#allocation5 + $0x320] ss:$16 sps:$4 sm:$0xff]   ;;  %v6078_v57 = vld [vmem:[#allocation5 + $0x328] ss:$16 sps:$4 sm:$0xff]  }
0x13ad   :  { %7583 = vst [vmem:[#allocation98_spill] sm:$0xff] %v6075_v19  ;;  %7584 = vst [vmem:[#allocation99_spill] sm:$0xff] %v6078_v57 }
0x13af   :  { %2518 = vmatpush2.bf16.msra.mxu1 %v6063_v52  ;;  %2559 = vmatpush2.bf16.msra.mxu0 %v6066_v47  ;;  %v6081_v52 = vld [vmem:[#allocation5 + $0x304] ss:$16 sps:$4 sm:$0xff]   ;;  %v6084_v47 = vld [vmem:[#allocation5 + $0x30c] ss:$16 sps:$4 sm:$0xff]  }
0x13b0   :  { %2519 = vmatprep.subr.bf16.mxu1 %v6069_v29  ;;  %2560 = vmatprep.subr.bf16.mxu0 %v6072_v46  ;;  %7585 = vst [vmem:[#allocation100_spill] sm:$0xff] %v6081_v52  ;;  %7586 = vst [vmem:[#allocation101_spill] sm:$0xff] %v6084_v47 }
0x13b3   :  { %2520 = vmatpush2.bf16.msra.mxu1 %v6075_v19  ;;  %2561 = vmatpush2.bf16.msra.mxu0 %v6078_v57 }
0x13b4   :  { %2521 = vmatprep.subr.bf16.mxu1 %v6081_v52  ;;  %2562 = vmatprep.subr.bf16.mxu0 %v6084_v47 }
0x13b7   :  { %2522 = vmatpush2.bf16.msra.mxu1 %v7496_v11  ;;  %2563 = vmatpush2.bf16.msra.mxu0 %v7497_v25 }
0x13b8   :  { %2599 = vmatprep.subr.bf16.mxu1 %v5693_v13  ;;  %2640 = vmatprep.subr.bf16.mxu0 %v5696_v14 }
0x1439   :  { %v2418_v19 = vpop.f32.mrf.mxu1  ;;  %v2459_v46 = vpop.f32.mrf.mxu0 }
0x143a   :  { %v2419_v57 = vadd.f32 %v2418_v19, %v5520_v63  ;;  %v2460_v20 = vadd.f32 %v2459_v46, %v5528_v48 }
0x143b   :  { %v2420_v29 = vpop.f32.mrf.mxu1  ;;  %v2461_v0 = vpop.f32.mrf.mxu0 }
0x143c   :  { %v3876_v32 = vmul.f32 -1.442695, %v2419_v57  ;;  %v2421_v52 = vadd.f32 %v2420_v29, %v5524_v43  ;;  %v2462_v25 = vadd.f32 %v2461_v0, %v5532_v24 }
0x143d   :  { %v2422_v44 = vpop.f32.mrf.mxu1  ;;  %v2463_v60 = vpop.f32.mrf.mxu0 }
0x143e   :  { %4378 = vpow2.f32 %v3876_v32  ;;  %v3877_v47 = vmul.f32 -1.442695, %v2421_v52  ;;  %v3878_v13 = vmul.f32 -1.442695, %v2462_v25  ;;  %v7590_v25 = vld [vmem:[#allocation18_spill] sm:$0xff] }
0x143f   :  { %v2423_v11 = vpop.f32.mrf.mxu1  ;;  %v2464_v56 = vpop.f32.mrf.mxu0 }
0x1440   :  { %4380 = vpow2.f32 %v3877_v47  ;;  %v7589_v11 = vld [vmem:[#allocation17_spill] sm:$0xff] }
0x1441   :  { %4382 = vpow2.f32 %v3878_v13 }
0x144b   :  { %v4379_v14 = vpop.eup %4378 }
0x144c   :  { %v2469_v1 = vadd.f32 1.0, %v4379_v14 }
0x144d   :  { %v4381_v19 = vpop.eup %4380 }
0x144e   :  { %4384 = vrcp.f32 %v2469_v1  ;;  %v2475_v57 = vadd.f32 1.0, %v4381_v19  ;;  %v4383_v44 = vpop.eup %4382  ;;  %v7591_v19 = vld [vmem:[#allocation19_spill] sm:$0xff] }
0x144f   :  { %4386 = vtanh.f32 %v2460_v20  ;;  %v2482_v52 = vadd.f32 1.0, %v4383_v44  ;;  %v7588_v20 = vld [vmem:[#allocation16_spill] sm:$0xff]  ;;  %v7593_v44 = vld [vmem:[#allocation21_spill] sm:$0xff] }
0x1450   :  { %4388 = vrcp.f32 %v2475_v57  ;;  %v7592_v57 = vld [vmem:[#allocation20_spill] sm:$0xff] }
0x1451   :  { %4390 = vrcp.f32 %v2482_v52  ;;  %v7597_v52 = vld [vmem:[#allocation25_spill] sm:$0xff] }
0x145b   :  { %v4385_v60 = vpop.eup %4384 }
0x145c   :  { %v4387_v32 = vpop.eup %4386 }
0x145d   :  { %v4389_v29 = vpop.eup %4388  ;;  %v2486_v56 = vmul.f32 %v4387_v32, %v4385_v60  ;;  %v7594_v60 = vld [vmem:[#allocation22_spill] sm:$0xff]  ;;  %v7595_v32 = vld [vmem:[#allocation23_spill] sm:$0xff] }
0x145e   :  { %v2485_v47 = vmul.f32 %v4389_v29, %v5704_v53  ;;  %v4391_v14 = vpop.eup %4390  ;;  %v7587_v53 = vld [vmem:[#allocation15_spill] sm:$0xff]  ;;  %v7596_v29 = vld [vmem:[#allocation24_spill] sm:$0xff] }
0x1460   :  { %v6096_v0 = vadd.f32 %v2486_v56, %v2485_v47  ;;  %v7598_v56 = vld [vmem:[#allocation26_spill] sm:$0xff]  ;;  %v7599_v47 = vld [vmem:[#allocation27_spill] sm:$0xff] }
0x1462   :  { %4392 = vtanh.f32 %v6096_v0 }
0x146f   :  { %v4393_v46 = vpop.eup %4392 }
0x1470   :  { %v2489_v13 = vmul.f32 %v4393_v46, %v4391_v14  ;;  %v7600_v14 = vld [vmem:[#allocation28_spill] sm:$0xff]  ;;  %v7601_v46 = vld [vmem:[#allocation29_spill] sm:$0xff] }
0x1472   :  { %v2490_v1 = vpack.c.bf16 %v2489_v13, %v2489_v13  ;;  %v7602_v13 = vld [vmem:[#allocation30_spill] sm:$0xff] }
0x1474   :  { %2524 = vmatmul.mubr.bf16.vlgmr.msra.gmra.mxu1 %v2490_v1  ;;  %2565 = vmatmul.mubr.bf16.vlgmr.msra.gmra.mxu0 %v2490_v1 }
0x1475   :  { %2631 = vmatprep.mubr.bf16.mxu1 %v2490_v1  ;;  %2672 = vmatprep.mubr.bf16.mxu0 %v2490_v1  ;;  %v7603_v1 = vld [vmem:[#allocation31_spill] sm:$0xff] }
0x1476   :  { %2600 = vmatpush1.bf16.msra.mxu1 %v5707_v45  ;;  %2641 = vmatpush1.bf16.msra.mxu0 %v5710_v5 }
0x1477   :  { %2601 = vmatprep.subr.bf16.mxu1 %v5713_v50  ;;  %2642 = vmatprep.subr.bf16.mxu0 %v5716_v54 }
0x147a   :  { %2602 = vmatpush1.bf16.msra.mxu1 %v5719_v61  ;;  %2643 = vmatpush1.bf16.msra.mxu0 %v5722_v2 }
0x147b   :  { %2603 = vmatprep.subr.bf16.mxu1 %v5725_v6  ;;  %2644 = vmatprep.subr.bf16.mxu0 %v5728_v10 }
0x147e   :  { %2604 = vmatpush1.bf16.msra.mxu1 %v5731_v12  ;;  %2645 = vmatpush1.bf16.msra.mxu0 %v5734_v17 }
0x147f   :  { %2605 = vmatprep.subr.bf16.mxu1 %v5737_v18  ;;  %2646 = vmatprep.subr.bf16.mxu0 %v5740_v55 }
0x1482   :  { %2606 = vmatpush1.bf16.msra.mxu1 %v5743_v62  ;;  %2647 = vmatpush1.bf16.msra.mxu0 %v5746_v4 }
0x1483   :  { %2607 = vmatprep.subr.bf16.mxu1 %v5749_v8  ;;  %2648 = vmatprep.subr.bf16.mxu0 %v5752_v22 }
0x1486   :  { %2608 = vmatpush1.bf16.msra.mxu1 %v5755_v23  ;;  %2649 = vmatpush1.bf16.msra.mxu0 %v5758_v9 }
0x1487   :  { %2609 = vmatprep.subr.bf16.mxu1 %v5761_v15  ;;  %2650 = vmatprep.subr.bf16.mxu0 %v5764_v26 }
0x148a   :  { %2610 = vmatpush1.bf16.msra.mxu1 %v5767_v16  ;;  %2651 = vmatpush1.bf16.msra.mxu0 %v5770_v27 }
0x148b   :  { %2611 = vmatprep.subr.bf16.mxu1 %v5773_v28  ;;  %2652 = vmatprep.subr.bf16.mxu0 %v5776_v7 }
0x148e   :  { %2612 = vmatpush1.bf16.msra.mxu1 %v5779_v30  ;;  %2653 = vmatpush1.bf16.msra.mxu0 %v5782_v35 }
0x148f   :  { %2613 = vmatprep.subr.bf16.mxu1 %v5785_v33  ;;  %2654 = vmatprep.subr.bf16.mxu0 %v5788_v36 }
0x1492   :  { %2614 = vmatpush1.bf16.msra.mxu1 %v5791_v39  ;;  %2655 = vmatpush1.bf16.msra.mxu0 %v5794_v38 }
0x1493   :  { %2615 = vmatprep.subr.bf16.mxu1 %v5797_v41  ;;  %2656 = vmatprep.subr.bf16.mxu0 %v5800_v42 }
0x1496   :  { %2616 = vmatpush2.bf16.msra.mxu1 %v5803_v51  ;;  %2657 = vmatpush2.bf16.msra.mxu0 %v7587_v53 }
0x1497   :  { %2617 = vmatprep.subr.bf16.mxu1 %v7588_v20  ;;  %2658 = vmatprep.subr.bf16.mxu0 %v7589_v11 }
0x149a   :  { %2618 = vmatpush2.bf16.msra.mxu1 %v7590_v25  ;;  %2659 = vmatpush2.bf16.msra.mxu0 %v7591_v19 }
0x149b   :  { %2619 = vmatprep.subr.bf16.mxu1 %v7592_v57  ;;  %2660 = vmatprep.subr.bf16.mxu0 %v7593_v44  ;;  %v7604_v44 = vld [vmem:[#allocation32_spill] sm:$0xff] }
0x149e   :  { %2620 = vmatpush2.bf16.msra.mxu1 %v7594_v60  ;;  %2661 = vmatpush2.bf16.msra.mxu0 %v7595_v32  ;;  %v7605_v60 = vld [vmem:[#allocation33_spill] sm:$0xff]  ;;  %v7606_v32 = vld [vmem:[#allocation34_spill] sm:$0xff] }
0x149f   :  { %2621 = vmatprep.subr.bf16.mxu1 %v7596_v29  ;;  %2662 = vmatprep.subr.bf16.mxu0 %v7597_v52  ;;  %v7607_v29 = vld [vmem:[#allocation35_spill] sm:$0xff]  ;;  %v7608_v52 = vld [vmem:[#allocation36_spill] sm:$0xff] }
0x14a2   :  { %2622 = vmatpush2.bf16.msra.mxu1 %v7598_v56  ;;  %2663 = vmatpush2.bf16.msra.mxu0 %v7599_v47  ;;  %v7609_v56 = vld [vmem:[#allocation37_spill] sm:$0xff]  ;;  %v7610_v47 = vld [vmem:[#allocation38_spill] sm:$0xff] }
0x14a3   :  { %2623 = vmatprep.subr.bf16.mxu1 %v7600_v14  ;;  %2664 = vmatprep.subr.bf16.mxu0 %v7601_v46  ;;  %v7611_v14 = vld [vmem:[#allocation39_spill] sm:$0xff]  ;;  %v7612_v46 = vld [vmem:[#allocation40_spill] sm:$0xff] }
0x14a6   :  { %2624 = vmatpush2.bf16.msra.mxu1 %v7602_v13  ;;  %2665 = vmatpush2.bf16.msra.mxu0 %v7603_v1  ;;  %v7613_v13 = vld [vmem:[#allocation41_spill] sm:$0xff]  ;;  %v7614_v1 = vld [vmem:[#allocation42_spill] sm:$0xff] }
0x14a7   :  { %2625 = vmatprep.subr.bf16.mxu1 %v7604_v44  ;;  %2666 = vmatprep.subr.bf16.mxu0 %v7605_v60  ;;  %v7615_v44 = vld [vmem:[#allocation43_spill] sm:$0xff]  ;;  %v7616_v60 = vld [vmem:[#allocation44_spill] sm:$0xff] }
0x14aa   :  { %2626 = vmatpush2.bf16.msra.mxu1 %v7606_v32  ;;  %2667 = vmatpush2.bf16.msra.mxu0 %v7607_v29  ;;  %v7617_v32 = vld [vmem:[#allocation45_spill] sm:$0xff] }
0x14ab   :  { %2627 = vmatprep.subr.bf16.mxu1 %v7608_v52  ;;  %2668 = vmatprep.subr.bf16.mxu0 %v7609_v56 }
0x14ae   :  { %2628 = vmatpush2.bf16.msra.mxu1 %v7610_v47  ;;  %2669 = vmatpush2.bf16.msra.mxu0 %v7611_v14 }
0x14af   :  { %2629 = vmatprep.subr.bf16.mxu1 %v7612_v46  ;;  %2670 = vmatprep.subr.bf16.mxu0 %v7613_v13 }
0x14b2   :  { %2630 = vmatpush2.bf16.msra.mxu1 %v7614_v1  ;;  %2671 = vmatpush2.bf16.msra.mxu0 %v7615_v44 }
0x14b3   :  { %2706 = vmatprep.subr.bf16.mxu1 %v7616_v60  ;;  %2747 = vmatprep.subr.bf16.mxu0 %v7617_v32 }
0x1534   :  { %v2525_v29 = vpop.f32.mrf.mxu1  ;;  %v2566_v52 = vpop.f32.mrf.mxu0 }
0x1535   :  { %v2526_v56 = vadd.f32 %v2525_v29, %v5610_v34  ;;  %v2567_v20 = vadd.f32 %v2566_v52, %v5622_v40  ;;  %v7620_v52 = vld [vmem:[#allocation48_spill] sm:$0xff] }
0x1536   :  { %v2527_v57 = vpop.f32.mrf.mxu1  ;;  %v2568_v47 = vpop.f32.mrf.mxu0 }
0x1537   :  { %v3879_v19 = vmul.f32 -1.442695, %v2526_v56  ;;  %v2528_v14 = vadd.f32 %v2527_v57, %v5613_v31  ;;  %v2569_v60 = vadd.f32 %v2568_v47, %v5618_v58 }
0x1538   :  { %v2529_v46 = vpop.f32.mrf.mxu1  ;;  %v2570_v25 = vpop.f32.mrf.mxu0 }
0x1539   :  { %4394 = vpow2.f32 %v3879_v19  ;;  %v3880_v13 = vmul.f32 -1.442695, %v2528_v14  ;;  %v3881_v44 = vmul.f32 -1.442695, %v2569_v60 }
0x153a   :  { %v2530_v1 = vpop.f32.mrf.mxu1  ;;  %v2571_v11 = vpop.f32.mrf.mxu0 }
0x153b   :  { %4396 = vpow2.f32 %v3880_v13  ;;  %v7621_v1 = vld [vmem:[#allocation49_spill] sm:$0xff] }
0x153c   :  { %4398 = vpow2.f32 %v3881_v44 }
0x1546   :  { %v4395_v32 = vpop.eup %4394 }
0x1547   :  { %v2576_v53 = vadd.f32 1.0, %v4395_v32 }
0x1548   :  { %v4397_v29 = vpop.eup %4396 }
0x1549   :  { %4400 = vrcp.f32 %v2576_v53  ;;  %v2582_v56 = vadd.f32 1.0, %v4397_v29  ;;  %v4399_v57 = vpop.eup %4398  ;;  %v7622_v29 = vld [vmem:[#allocation50_spill] sm:$0xff] }
0x154a   :  { %4402 = vtanh.f32 %v2567_v20  ;;  %v2589_v46 = vadd.f32 1.0, %v4399_v57  ;;  %v7619_v20 = vld [vmem:[#allocation47_spill] sm:$0xff]  ;;  %v7624_v57 = vld [vmem:[#allocation52_spill] sm:$0xff] }
0x154b   :  { %4404 = vrcp.f32 %v2582_v56  ;;  %v7623_v56 = vld [vmem:[#allocation51_spill] sm:$0xff] }
0x154c   :  { %4406 = vrcp.f32 %v2589_v46  ;;  %v7628_v46 = vld [vmem:[#allocation56_spill] sm:$0xff] }
0x1556   :  { %v4401_v25 = vpop.eup %4400 }
0x1557   :  { %v4403_v19 = vpop.eup %4402 }
0x1558   :  { %v4405_v14 = vpop.eup %4404  ;;  %v2593_v11 = vmul.f32 %v4403_v19, %v4401_v25  ;;  %v7625_v25 = vld [vmem:[#allocation53_spill] sm:$0xff]  ;;  %v7626_v19 = vld [vmem:[#allocation54_spill] sm:$0xff] }
0x1559   :  { %v2592_v13 = vmul.f32 %v4405_v14, %v5904_v59  ;;  %v4407_v60 = vpop.eup %4406  ;;  %v7618_v59 = vld [vmem:[#allocation46_spill] sm:$0xff]  ;;  %v7627_v14 = vld [vmem:[#allocation55_spill] sm:$0xff] }
0x155b   :  { %v6168_v47 = vadd.f32 %v2593_v11, %v2592_v13  ;;  %v7629_v11 = vld [vmem:[#allocation57_spill] sm:$0xff]  ;;  %v7630_v13 = vld [vmem:[#allocation58_spill] sm:$0xff] }
0x155d   :  { %4408 = vtanh.f32 %v6168_v47 }
0x156a   :  { %v4409_v32 = vpop.eup %4408 }
0x156b   :  { %v2596_v44 = vmul.f32 %v4409_v32, %v4407_v60  ;;  %v7631_v60 = vld [vmem:[#allocation59_spill] sm:$0xff]  ;;  %v7632_v32 = vld [vmem:[#allocation60_spill] sm:$0xff] }
0x156d   :  { %2597 = vst [vmem:[#allocation4 + $0x6] sm:$0x3] %v2596_v44  ;;  %v2598_v53 = vpack.c.bf16 %v2596_v44, %v2596_v44  ;;  %v7633_v44 = vld [vmem:[#allocation61_spill] sm:$0xff] }
0x156f   :  { %2632 = vmatmul.mubr.bf16.vlgmr.msra.gmra.mxu1 %v2598_v53  ;;  %2673 = vmatmul.mubr.bf16.vlgmr.msra.gmra.mxu0 %v2598_v53 }
0x1570   :  { %2738 = vmatprep.mubr.bf16.mxu1 %v2598_v53  ;;  %2779 = vmatprep.mubr.bf16.mxu0 %v2598_v53  ;;  %v7634_v53 = vld [vmem:[#allocation62_spill] sm:$0xff] }
0x1571   :  { %2707 = vmatpush1.bf16.msra.mxu1 %v5907_v21  ;;  %2748 = vmatpush1.bf16.msra.mxu0 %v5910_v37 }
0x1572   :  { %2708 = vmatprep.subr.bf16.mxu1 %v5913_v3  ;;  %2749 = vmatprep.subr.bf16.mxu0 %v5916_v49 }
0x1575   :  { %2709 = vmatpush1.bf16.msra.mxu1 %v7618_v59  ;;  %2750 = vmatpush1.bf16.msra.mxu0 %v7619_v20 }
0x1576   :  { %2710 = vmatprep.subr.bf16.mxu1 %v7620_v52  ;;  %2751 = vmatprep.subr.bf16.mxu0 %v7621_v1 }
0x1579   :  { %2711 = vmatpush1.bf16.msra.mxu1 %v7622_v29  ;;  %2752 = vmatpush1.bf16.msra.mxu0 %v7623_v56 }
0x157a   :  { %2712 = vmatprep.subr.bf16.mxu1 %v7624_v57  ;;  %2753 = vmatprep.subr.bf16.mxu0 %v7625_v25  ;;  %v7635_v57 = vld [vmem:[#allocation63_spill] sm:$0xff]  ;;  %v7636_v25 = vld [vmem:[#allocation64_spill] sm:$0xff] }
0x157d   :  { %2713 = vmatpush1.bf16.msra.mxu1 %v7626_v19  ;;  %2754 = vmatpush1.bf16.msra.mxu0 %v7627_v14  ;;  %v7637_v19 = vld [vmem:[#allocation65_spill] sm:$0xff]  ;;  %v7638_v14 = vld [vmem:[#allocation66_spill] sm:$0xff] }
0x157e   :  { %2714 = vmatprep.subr.bf16.mxu1 %v7628_v46  ;;  %2755 = vmatprep.subr.bf16.mxu0 %v7629_v11  ;;  %v7639_v46 = vld [vmem:[#allocation67_spill] sm:$0xff]  ;;  %v7640_v11 = vld [vmem:[#allocation68_spill] sm:$0xff] }
0x1581   :  { %2715 = vmatpush1.bf16.msra.mxu1 %v7630_v13  ;;  %2756 = vmatpush1.bf16.msra.mxu0 %v7631_v60  ;;  %v7641_v13 = vld [vmem:[#allocation69_spill] sm:$0xff]  ;;  %v7642_v60 = vld [vmem:[#allocation70_spill] sm:$0xff] }
0x1582   :  { %2716 = vmatprep.subr.bf16.mxu1 %v7632_v32  ;;  %2757 = vmatprep.subr.bf16.mxu0 %v7633_v44  ;;  %v7643_v32 = vld [vmem:[#allocation71_spill] sm:$0xff]  ;;  %v7644_v44 = vld [vmem:[#allocation72_spill] sm:$0xff] }
0x1585   :  { %2717 = vmatpush1.bf16.msra.mxu1 %v7634_v53  ;;  %2758 = vmatpush1.bf16.msra.mxu0 %v7635_v57  ;;  %v7645_v53 = vld [vmem:[#allocation73_spill] sm:$0xff]  ;;  %v7646_v57 = vld [vmem:[#allocation74_spill] sm:$0xff] }
0x1586   :  { %2718 = vmatprep.subr.bf16.mxu1 %v7636_v25  ;;  %2759 = vmatprep.subr.bf16.mxu0 %v7637_v19  ;;  %v7647_v25 = vld [vmem:[#allocation75_spill] sm:$0xff]  ;;  %v7648_v19 = vld [vmem:[#allocation76_spill] sm:$0xff] }
0x1589   :  { %2719 = vmatpush1.bf16.msra.mxu1 %v7638_v14  ;;  %2760 = vmatpush1.bf16.msra.mxu0 %v7639_v46  ;;  %v7649_v14 = vld [vmem:[#allocation77_spill] sm:$0xff]  ;;  %v7650_v46 = vld [vmem:[#allocation78_spill] sm:$0xff] }
0x158a   :  { %2720 = vmatprep.subr.bf16.mxu1 %v7640_v11  ;;  %2761 = vmatprep.subr.bf16.mxu0 %v7641_v13  ;;  %v7651_v11 = vld [vmem:[#allocation79_spill] sm:$0xff]  ;;  %v7652_v13 = vld [vmem:[#allocation80_spill] sm:$0xff] }
0x158d   :  { %2721 = vmatpush1.bf16.msra.mxu1 %v7642_v60  ;;  %2762 = vmatpush1.bf16.msra.mxu0 %v7643_v32  ;;  %v7653_v60 = vld [vmem:[#allocation81_spill] sm:$0xff]  ;;  %v7654_v32 = vld [vmem:[#allocation82_spill] sm:$0xff] }
0x158e   :  { %2722 = vmatprep.subr.bf16.mxu1 %v7644_v44  ;;  %2763 = vmatprep.subr.bf16.mxu0 %v7645_v53  ;;  %v7655_v44 = vld [vmem:[#allocation83_spill] sm:$0xff]  ;;  %v7656_v53 = vld [vmem:[#allocation84_spill] sm:$0xff] }
0x1591   :  { %2723 = vmatpush2.bf16.msra.mxu1 %v7646_v57  ;;  %2764 = vmatpush2.bf16.msra.mxu0 %v7647_v25  ;;  %v7657_v57 = vld [vmem:[#allocation85_spill] sm:$0xff]  ;;  %v7658_v25 = vld [vmem:[#allocation86_spill] sm:$0xff] }
0x1592   :  { %2724 = vmatprep.subr.bf16.mxu1 %v7648_v19  ;;  %2765 = vmatprep.subr.bf16.mxu0 %v7649_v14  ;;  %v7659_v19 = vld [vmem:[#allocation87_spill] sm:$0xff]  ;;  %v7660_v14 = vld [vmem:[#allocation88_spill] sm:$0xff] }
0x1595   :  { %2725 = vmatpush2.bf16.msra.mxu1 %v7650_v46  ;;  %2766 = vmatpush2.bf16.msra.mxu0 %v7651_v11  ;;  %v7661_v46 = vld [vmem:[#allocation89_spill] sm:$0xff]  ;;  %v7662_v11 = vld [vmem:[#allocation90_spill] sm:$0xff] }
0x1596   :  { %2726 = vmatprep.subr.bf16.mxu1 %v7652_v13  ;;  %2767 = vmatprep.subr.bf16.mxu0 %v7653_v60  ;;  %v7663_v13 = vld [vmem:[#allocation91_spill] sm:$0xff]  ;;  %v7664_v60 = vld [vmem:[#allocation92_spill] sm:$0xff] }
0x1599   :  { %2727 = vmatpush2.bf16.msra.mxu1 %v7654_v32  ;;  %2768 = vmatpush2.bf16.msra.mxu0 %v7655_v44  ;;  %v7665_v32 = vld [vmem:[#allocation93_spill] sm:$0xff]  ;;  %v7666_v44 = vld [vmem:[#allocation94_spill] sm:$0xff] }
0x159a   :  { %2728 = vmatprep.subr.bf16.mxu1 %v7656_v53  ;;  %2769 = vmatprep.subr.bf16.mxu0 %v7657_v57  ;;  %v7667_v53 = vld [vmem:[#allocation95_spill] sm:$0xff]  ;;  %v7668_v57 = vld [vmem:[#allocation96_spill] sm:$0xff] }
0x159d   :  { %2729 = vmatpush2.bf16.msra.mxu1 %v7658_v25  ;;  %2770 = vmatpush2.bf16.msra.mxu0 %v7659_v19  ;;  %v7669_v25 = vld [vmem:[#allocation97_spill] sm:$0xff]  ;;  %v7670_v19 = vld [vmem:[#allocation98_spill] sm:$0xff] }
0x159e   :  { %2730 = vmatprep.subr.bf16.mxu1 %v7660_v14  ;;  %2771 = vmatprep.subr.bf16.mxu0 %v7661_v46  ;;  %v7671_v14 = vld [vmem:[#allocation99_spill] sm:$0xff]  ;;  %v7672_v46 = vld [vmem:[#allocation100_spill] sm:$0xff] }
0x15a1   :  { %2731 = vmatpush2.bf16.msra.mxu1 %v7662_v11  ;;  %2772 = vmatpush2.bf16.msra.mxu0 %v7663_v13  ;;  %v7673_v11 = vld [vmem:[#allocation101_spill] sm:$0xff]  ;;  %v6231_v13 = vld [vmem:[#allocation5 + $0x300] ss:$16 sps:$4 sm:$0xff]  }
0x15a2   :  { %2732 = vmatprep.subr.bf16.mxu1 %v7664_v60  ;;  %2773 = vmatprep.subr.bf16.mxu0 %v7665_v32  ;;  %7674 = vst [vmem:[#allocation102_spill] sm:$0xff] %v6231_v13  ;;  %v6234_v32 = vld [vmem:[#allocation5 + $0x308] ss:$16 sps:$4 sm:$0xff]  }
0x15a3   :  { %7675 = vst [vmem:[#allocation103_spill] sm:$0xff] %v6234_v32 }
0x15a5   :  { %2733 = vmatpush2.bf16.msra.mxu1 %v7666_v44  ;;  %2774 = vmatpush2.bf16.msra.mxu0 %v7667_v53  ;;  %v7676_v53 = vld [vmem:[#allocation13_spill] sm:$0xff] }
0x15a6   :  { %2734 = vmatprep.subr.bf16.mxu1 %v7668_v57  ;;  %2775 = vmatprep.subr.bf16.mxu0 %v7669_v25  ;;  %v7677_v57 = vld [vmem:[#allocation14_spill] sm:$0xff] }
0x15a9   :  { %2735 = vmatpush2.bf16.msra.mxu1 %v7670_v19  ;;  %2776 = vmatpush2.bf16.msra.mxu0 %v7671_v14 }
0x15aa   :  { %2736 = vmatprep.subr.bf16.mxu1 %v7672_v46  ;;  %2777 = vmatprep.subr.bf16.mxu0 %v7673_v11 }
0x15ad   :  { %2737 = vmatpush2.bf16.msra.mxu1 %v6231_v13  ;;  %2778 = vmatpush2.bf16.msra.mxu0 %v6234_v32 }
0x15ae   :  { %2814 = vmatprep.subr.bf16.mxu1 %v7676_v53  ;;  %2855 = vmatprep.subr.bf16.mxu0 %v7677_v57 }
0x162f   :  { %v2633_v25 = vpop.f32.mrf.mxu1  ;;  %v2674_v19 = vpop.f32.mrf.mxu0 }
0x1630   :  { %v2634_v14 = vadd.f32 %v2633_v25, %v5520_v63  ;;  %v2675_v20 = vadd.f32 %v2674_v19, %v5528_v48 }
0x1631   :  { %v2635_v44 = vpop.f32.mrf.mxu1  ;;  %v2676_v46 = vpop.f32.mrf.mxu0 }
0x1632   :  { %v3882_v60 = vmul.f32 -1.442695, %v2634_v14  ;;  %v2636_v11 = vadd.f32 %v2635_v44, %v5524_v43  ;;  %v2677_v53 = vadd.f32 %v2676_v46, %v5532_v24 }
0x1633   :  { %v2637_v56 = vpop.f32.mrf.mxu1  ;;  %v2678_v29 = vpop.f32.mrf.mxu0 }
0x1634   :  { %4410 = vpow2.f32 %v3882_v60  ;;  %v3883_v13 = vmul.f32 -1.442695, %v2636_v11  ;;  %v3884_v32 = vmul.f32 -1.442695, %v2677_v53 }
0x1635   :  { %v2638_v1 = vpop.f32.mrf.mxu1  ;;  %v2679_v52 = vpop.f32.mrf.mxu0 }
0x1636   :  { %4412 = vpow2.f32 %v3883_v13 }
0x1637   :  { %4414 = vpow2.f32 %v3884_v32 }
0x1641   :  { %v4411_v57 = vpop.eup %4410 }
0x1642   :  { %v2684_v59 = vadd.f32 1.0, %v4411_v57 }
0x1643   :  { %v4413_v25 = vpop.eup %4412 }
0x1644   :  { %4416 = vrcp.f32 %v2684_v59  ;;  %v2690_v14 = vadd.f32 1.0, %v4413_v25  ;;  %v4415_v56 = vpop.eup %4414 }
0x1645   :  { %4418 = vtanh.f32 %v2675_v20  ;;  %v2697_v1 = vadd.f32 1.0, %v4415_v56 }
0x1646   :  { %4420 = vrcp.f32 %v2690_v14 }
0x1647   :  { %4422 = vrcp.f32 %v2697_v1 }
0x1651   :  { %v4417_v29 = vpop.eup %4416 }
0x1652   :  { %v4419_v60 = vpop.eup %4418 }
0x1653   :  { %v4421_v11 = vpop.eup %4420  ;;  %v2701_v52 = vmul.f32 %v4419_v60, %v4417_v29 }
0x1654   :  { %v2700_v13 = vmul.f32 %v4421_v11, %v6096_v0  ;;  %v4423_v19 = vpop.eup %4422 }
0x1656   :  { %v6244_v46 = vadd.f32 %v2701_v52, %v2700_v13 }
0x1658   :  { %4424 = vtanh.f32 %v6244_v46 }
0x1665   :  { %v4425_v44 = vpop.eup %4424 }
0x1666   :  { %v2704_v32 = vmul.f32 %v4425_v44, %v4423_v19 }
0x1668   :  { %v2705_v59 = vpack.c.bf16 %v2704_v32, %v2704_v32 }
0x166a   :  { %2739 = vmatmul.mubr.bf16.vlgmr.msra.gmra.mxu1 %v2705_v59  ;;  %2780 = vmatmul.mubr.bf16.vlgmr.msra.gmra.mxu0 %v2705_v59 }
0x166b   :  { %2846 = vmatprep.mubr.bf16.mxu1 %v2705_v59  ;;  %2887 = vmatprep.mubr.bf16.mxu0 %v2705_v59 }
0x166c   :  { %2815 = vmatpush1.bf16.msra.mxu1 %v5707_v45  ;;  %2856 = vmatpush1.bf16.msra.mxu0 %v5710_v5  ;;  %v7678_v45 = vld [vmem:[#allocation15_spill] sm:$0xff]  ;;  %v7679_v5 = vld [vmem:[#allocation16_spill] sm:$0xff] }
0x166d   :  { %2816 = vmatprep.subr.bf16.mxu1 %v5713_v50  ;;  %2857 = vmatprep.subr.bf16.mxu0 %v5716_v54  ;;  %v7680_v50 = vld [vmem:[#allocation17_spill] sm:$0xff]  ;;  %v7681_v54 = vld [vmem:[#allocation18_spill] sm:$0xff] }
0x1670   :  { %2817 = vmatpush1.bf16.msra.mxu1 %v5719_v61  ;;  %2858 = vmatpush1.bf16.msra.mxu0 %v5722_v2  ;;  %v7682_v61 = vld [vmem:[#allocation19_spill] sm:$0xff]  ;;  %v7683_v2 = vld [vmem:[#allocation20_spill] sm:$0xff] }
0x1671   :  { %2818 = vmatprep.subr.bf16.mxu1 %v5725_v6  ;;  %2859 = vmatprep.subr.bf16.mxu0 %v5728_v10  ;;  %v7684_v6 = vld [vmem:[#allocation21_spill] sm:$0xff]  ;;  %v7685_v10 = vld [vmem:[#allocation22_spill] sm:$0xff] }
0x1674   :  { %2819 = vmatpush1.bf16.msra.mxu1 %v5731_v12  ;;  %2860 = vmatpush1.bf16.msra.mxu0 %v5734_v17  ;;  %v7686_v12 = vld [vmem:[#allocation23_spill] sm:$0xff]  ;;  %v7687_v17 = vld [vmem:[#allocation24_spill] sm:$0xff] }
0x1675   :  { %2820 = vmatprep.subr.bf16.mxu1 %v5737_v18  ;;  %2861 = vmatprep.subr.bf16.mxu0 %v5740_v55  ;;  %v7688_v18 = vld [vmem:[#allocation25_spill] sm:$0xff]  ;;  %v7689_v55 = vld [vmem:[#allocation26_spill] sm:$0xff] }
0x1678   :  { %2821 = vmatpush1.bf16.msra.mxu1 %v5743_v62  ;;  %2862 = vmatpush1.bf16.msra.mxu0 %v5746_v4  ;;  %v7690_v62 = vld [vmem:[#allocation27_spill] sm:$0xff]  ;;  %v7691_v4 = vld [vmem:[#allocation28_spill] sm:$0xff] }
0x1679   :  { %2822 = vmatprep.subr.bf16.mxu1 %v5749_v8  ;;  %2863 = vmatprep.subr.bf16.mxu0 %v5752_v22  ;;  %v7692_v8 = vld [vmem:[#allocation29_spill] sm:$0xff]  ;;  %v7693_v22 = vld [vmem:[#allocation30_spill] sm:$0xff] }
0x167c   :  { %2823 = vmatpush1.bf16.msra.mxu1 %v5755_v23  ;;  %2864 = vmatpush1.bf16.msra.mxu0 %v5758_v9  ;;  %v7694_v23 = vld [vmem:[#allocation31_spill] sm:$0xff]  ;;  %v7695_v9 = vld [vmem:[#allocation32_spill] sm:$0xff] }
0x167d   :  { %2824 = vmatprep.subr.bf16.mxu1 %v5761_v15  ;;  %2865 = vmatprep.subr.bf16.mxu0 %v5764_v26  ;;  %v7696_v15 = vld [vmem:[#allocation33_spill] sm:$0xff]  ;;  %v7697_v26 = vld [vmem:[#allocation34_spill] sm:$0xff] }
0x1680   :  { %2825 = vmatpush1.bf16.msra.mxu1 %v5767_v16  ;;  %2866 = vmatpush1.bf16.msra.mxu0 %v5770_v27  ;;  %v7698_v16 = vld [vmem:[#allocation35_spill] sm:$0xff]  ;;  %v7699_v27 = vld [vmem:[#allocation36_spill] sm:$0xff] }
0x1681   :  { %2826 = vmatprep.subr.bf16.mxu1 %v5773_v28  ;;  %2867 = vmatprep.subr.bf16.mxu0 %v5776_v7  ;;  %v7700_v28 = vld [vmem:[#allocation37_spill] sm:$0xff]  ;;  %v7701_v7 = vld [vmem:[#allocation38_spill] sm:$0xff] }
0x1684   :  { %2827 = vmatpush1.bf16.msra.mxu1 %v5779_v30  ;;  %2868 = vmatpush1.bf16.msra.mxu0 %v5782_v35  ;;  %v7702_v30 = vld [vmem:[#allocation39_spill] sm:$0xff]  ;;  %v7703_v35 = vld [vmem:[#allocation40_spill] sm:$0xff] }
0x1685   :  { %2828 = vmatprep.subr.bf16.mxu1 %v5785_v33  ;;  %2869 = vmatprep.subr.bf16.mxu0 %v5788_v36  ;;  %v7704_v33 = vld [vmem:[#allocation41_spill] sm:$0xff]  ;;  %v7705_v36 = vld [vmem:[#allocation42_spill] sm:$0xff] }
0x1688   :  { %2829 = vmatpush1.bf16.msra.mxu1 %v5791_v39  ;;  %2870 = vmatpush1.bf16.msra.mxu0 %v5794_v38  ;;  %v7706_v39 = vld [vmem:[#allocation43_spill] sm:$0xff]  ;;  %v7707_v38 = vld [vmem:[#allocation44_spill] sm:$0xff] }
0x1689   :  { %2830 = vmatprep.subr.bf16.mxu1 %v5797_v41  ;;  %2871 = vmatprep.subr.bf16.mxu0 %v5800_v42  ;;  %v7708_v41 = vld [vmem:[#allocation45_spill] sm:$0xff] }
0x168c   :  { %2831 = vmatpush2.bf16.msra.mxu1 %v5803_v51  ;;  %2872 = vmatpush2.bf16.msra.mxu0 %v7678_v45 }
0x168d   :  { %2832 = vmatprep.subr.bf16.mxu1 %v7679_v5  ;;  %2873 = vmatprep.subr.bf16.mxu0 %v7680_v50 }
0x1690   :  { %2833 = vmatpush2.bf16.msra.mxu1 %v7681_v54  ;;  %2874 = vmatpush2.bf16.msra.mxu0 %v7682_v61 }
0x1691   :  { %2834 = vmatprep.subr.bf16.mxu1 %v7683_v2  ;;  %2875 = vmatprep.subr.bf16.mxu0 %v7684_v6 }
0x1694   :  { %2835 = vmatpush2.bf16.msra.mxu1 %v7685_v10  ;;  %2876 = vmatpush2.bf16.msra.mxu0 %v7686_v12 }
0x1695   :  { %2836 = vmatprep.subr.bf16.mxu1 %v7687_v17  ;;  %2877 = vmatprep.subr.bf16.mxu0 %v7688_v18 }
0x1698   :  { %2837 = vmatpush2.bf16.msra.mxu1 %v7689_v55  ;;  %2878 = vmatpush2.bf16.msra.mxu0 %v7690_v62  ;;  %v7710_v62 = vld [vmem:[#allocation47_spill] sm:$0xff] }
0x1699   :  { %2838 = vmatprep.subr.bf16.mxu1 %v7691_v4  ;;  %2879 = vmatprep.subr.bf16.mxu0 %v7692_v8  ;;  %v7711_v4 = vld [vmem:[#allocation48_spill] sm:$0xff]  ;;  %v7712_v8 = vld [vmem:[#allocation49_spill] sm:$0xff] }
0x169c   :  { %2839 = vmatpush2.bf16.msra.mxu1 %v7693_v22  ;;  %2880 = vmatpush2.bf16.msra.mxu0 %v7694_v23  ;;  %v7713_v22 = vld [vmem:[#allocation50_spill] sm:$0xff]  ;;  %v7714_v23 = vld [vmem:[#allocation51_spill] sm:$0xff] }
0x169d   :  { %2840 = vmatprep.subr.bf16.mxu1 %v7695_v9  ;;  %2881 = vmatprep.subr.bf16.mxu0 %v7696_v15  ;;  %v7715_v9 = vld [vmem:[#allocation52_spill] sm:$0xff]  ;;  %v7720_v15 = vld [vmem:[#allocation57_spill] sm:$0xff] }
0x16a0   :  { %2841 = vmatpush2.bf16.msra.mxu1 %v7697_v26  ;;  %2882 = vmatpush2.bf16.msra.mxu0 %v7698_v16  ;;  %v7721_v26 = vld [vmem:[#allocation58_spill] sm:$0xff]  ;;  %v7722_v16 = vld [vmem:[#allocation59_spill] sm:$0xff] }
0x16a1   :  { %2842 = vmatprep.subr.bf16.mxu1 %v7699_v27  ;;  %2883 = vmatprep.subr.bf16.mxu0 %v7700_v28  ;;  %v7723_v27 = vld [vmem:[#allocation60_spill] sm:$0xff]  ;;  %v7724_v28 = vld [vmem:[#allocation61_spill] sm:$0xff] }
0x16a4   :  { %2843 = vmatpush2.bf16.msra.mxu1 %v7701_v7  ;;  %2884 = vmatpush2.bf16.msra.mxu0 %v7702_v30  ;;  %v7725_v7 = vld [vmem:[#allocation62_spill] sm:$0xff]  ;;  %v7726_v30 = vld [vmem:[#allocation63_spill] sm:$0xff] }
0x16a5   :  { %2844 = vmatprep.subr.bf16.mxu1 %v7703_v35  ;;  %2885 = vmatprep.subr.bf16.mxu0 %v7704_v33  ;;  %v7727_v35 = vld [vmem:[#allocation64_spill] sm:$0xff]  ;;  %v7728_v33 = vld [vmem:[#allocation65_spill] sm:$0xff] }
0x16a8   :  { %2845 = vmatpush2.bf16.msra.mxu1 %v7705_v36  ;;  %2886 = vmatpush2.bf16.msra.mxu0 %v7706_v39  ;;  %v7729_v36 = vld [vmem:[#allocation66_spill] sm:$0xff]  ;;  %v7730_v39 = vld [vmem:[#allocation67_spill] sm:$0xff] }
0x16a9   :  { %2921 = vmatprep.subr.bf16.mxu1 %v7707_v38  ;;  %2962 = vmatprep.subr.bf16.mxu0 %v7708_v41  ;;  %v7731_v38 = vld [vmem:[#allocation68_spill] sm:$0xff]  ;;  %v7732_v41 = vld [vmem:[#allocation69_spill] sm:$0xff] }
0x172a   :  { %v2740_v42 = vpop.f32.mrf.mxu1  ;;  %v2781_v51 = vpop.f32.mrf.mxu0 }
0x172b   :  { %v2741_v0 = vadd.f32 %v2740_v42, %v5610_v34  ;;  %v2782_v19 = vadd.f32 %v2781_v51, %v5622_v40  ;;  %v7733_v42 = vld [vmem:[#allocation70_spill] sm:$0xff]  ;;  %v7734_v51 = vld [vmem:[#allocation71_spill] sm:$0xff] }
0x172c   :  { %v2742_v20 = vpop.f32.mrf.mxu1  ;;  %v2783_v53 = vpop.f32.mrf.mxu0 }
0x172d   :  { %v3885_v57 = vmul.f32 -1.442695, %v2741_v0  ;;  %v2743_v25 = vadd.f32 %v2742_v20, %v5613_v31  ;;  %v2784_v1 = vadd.f32 %v2783_v53, %v5618_v58  ;;  %v7735_v0 = vld [vmem:[#allocation72_spill] sm:$0xff]  ;;  %v7736_v20 = vld [vmem:[#allocation73_spill] sm:$0xff]  ;;  %v7737_v53 = vld [vmem:[#allocation74_spill] sm:$0xff] }
0x172e   :  { %v2744_v14 = vpop.f32.mrf.mxu1  ;;  %v2785_v56 = vpop.f32.mrf.mxu0 }
0x172f   :  { %4426 = vpow2.f32 %v3885_v57  ;;  %v3886_v29 = vmul.f32 -1.442695, %v2743_v25  ;;  %v3887_v52 = vmul.f32 -1.442695, %v2784_v1  ;;  %v7738_v57 = vld [vmem:[#allocation75_spill] sm:$0xff]  ;;  %v7739_v25 = vld [vmem:[#allocation76_spill] sm:$0xff] }
0x1730   :  { %v2745_v60 = vpop.f32.mrf.mxu1  ;;  %v2786_v11 = vpop.f32.mrf.mxu0  ;;  %v7740_v14 = vld [vmem:[#allocation77_spill] sm:$0xff]  ;;  %v7741_v56 = vld [vmem:[#allocation78_spill] sm:$0xff] }
0x1731   :  { %4428 = vpow2.f32 %v3886_v29  ;;  %v7742_v29 = vld [vmem:[#allocation79_spill] sm:$0xff]  ;;  %v7743_v60 = vld [vmem:[#allocation80_spill] sm:$0xff]  ;;  %v7744_v11 = vld [vmem:[#allocation81_spill] sm:$0xff] }
0x1732   :  { %4430 = vpow2.f32 %v3887_v52  ;;  %v7745_v1 = vld [vmem:[#allocation82_spill] sm:$0xff]  ;;  %v7746_v52 = vld [vmem:[#allocation83_spill] sm:$0xff] }
0x173c   :  { %v4427_v13 = vpop.eup %4426 }
0x173d   :  { %v2791_v44 = vadd.f32 1.0, %v4427_v13  ;;  %v7747_v13 = vld [vmem:[#allocation84_spill] sm:$0xff] }
0x173e   :  { %v4429_v32 = vpop.eup %4428 }
0x173f   :  { %4432 = vrcp.f32 %v2791_v44  ;;  %v2797_v59 = vadd.f32 1.0, %v4429_v32  ;;  %v4431_v45 = vpop.eup %4430  ;;  %v7749_v44 = vld [vmem:[#allocation86_spill] sm:$0xff]  ;;  %v7750_v32 = vld [vmem:[#allocation87_spill] sm:$0xff] }
0x1740   :  { %4434 = vtanh.f32 %v2782_v19  ;;  %v2804_v61 = vadd.f32 1.0, %v4431_v45  ;;  %v7748_v19 = vld [vmem:[#allocation85_spill] sm:$0xff] }
0x1741   :  { %4436 = vrcp.f32 %v2797_v59  ;;  %v7751_v59 = vld [vmem:[#allocation88_spill] sm:$0xff]  ;;  %v7752_v45 = vld [vmem:[#allocation89_spill] sm:$0xff] }
0x1742   :  { %4438 = vrcp.f32 %v2804_v61  ;;  %v7756_v61 = vld [vmem:[#allocation93_spill] sm:$0xff] }
0x174c   :  { %v4433_v5 = vpop.eup %4432 }
0x174d   :  { %v4435_v50 = vpop.eup %4434 }
0x174e   :  { %v4437_v54 = vpop.eup %4436  ;;  %v2808_v2 = vmul.f32 %v4435_v50, %v4433_v5  ;;  %v7753_v5 = vld [vmem:[#allocation90_spill] sm:$0xff]  ;;  %v7754_v50 = vld [vmem:[#allocation91_spill] sm:$0xff] }
0x174f   :  { %v2807_v6 = vmul.f32 %v4437_v54, %v6168_v47  ;;  %v4439_v12 = vpop.eup %4438  ;;  %v7709_v47 = vld [vmem:[#allocation46_spill] sm:$0xff]  ;;  %v7755_v54 = vld [vmem:[#allocation92_spill] sm:$0xff] }
0x1751   :  { %v6316_v10 = vadd.f32 %v2808_v2, %v2807_v6  ;;  %v7757_v2 = vld [vmem:[#allocation94_spill] sm:$0xff]  ;;  %v7758_v6 = vld [vmem:[#allocation95_spill] sm:$0xff] }
0x1753   :  { %4440 = vtanh.f32 %v6316_v10 }
0x1760   :  { %v4441_v17 = vpop.eup %4440 }
0x1761   :  { %v2811_v18 = vmul.f32 %v4441_v17, %v4439_v12  ;;  %v7759_v12 = vld [vmem:[#allocation96_spill] sm:$0xff]  ;;  %v7760_v17 = vld [vmem:[#allocation97_spill] sm:$0xff] }
0x1763   :  { %2812 = vst [vmem:[#allocation4 + $0x8] sm:$0x3] %v2811_v18  ;;  %v2813_v55 = vpack.c.bf16 %v2811_v18, %v2811_v18  ;;  %v7761_v18 = vld [vmem:[#allocation98_spill] sm:$0xff] }
0x1765   :  { %2847 = vmatmul.mubr.bf16.vlgmr.msra.gmra.mxu1 %v2813_v55  ;;  %2888 = vmatmul.mubr.bf16.vlgmr.msra.gmra.mxu0 %v2813_v55 }
0x1766   :  { %2953 = vmatprep.mubr.bf16.mxu1 %v2813_v55  ;;  %2994 = vmatprep.mubr.bf16.mxu0 %v2813_v55  ;;  %v7762_v55 = vld [vmem:[#allocation99_spill] sm:$0xff] }
0x1767   :  { %2922 = vmatpush1.bf16.msra.mxu1 %v5907_v21  ;;  %2963 = vmatpush1.bf16.msra.mxu0 %v5910_v37  ;;  %v7716_v21 = vld [vmem:[#allocation53_spill] sm:$0xff]  ;;  %v7717_v37 = vld [vmem:[#allocation54_spill] sm:$0xff] }
0x1768   :  { %2923 = vmatprep.subr.bf16.mxu1 %v5913_v3  ;;  %2964 = vmatprep.subr.bf16.mxu0 %v5916_v49  ;;  %v7718_v3 = vld [vmem:[#allocation55_spill] sm:$0xff]  ;;  %v7719_v49 = vld [vmem:[#allocation56_spill] sm:$0xff] }
0x176b   :  { %2924 = vmatpush1.bf16.msra.mxu1 %v7709_v47  ;;  %2965 = vmatpush1.bf16.msra.mxu0 %v7710_v62  ;;  %v7763_v47 = vld [vmem:[#allocation100_spill] sm:$0xff]  ;;  %v7764_v62 = vld [vmem:[#allocation101_spill] sm:$0xff] }
0x176c   :  { %2925 = vmatprep.subr.bf16.mxu1 %v7711_v4  ;;  %2966 = vmatprep.subr.bf16.mxu0 %v7712_v8  ;;  %v7765_v4 = vld [vmem:[#allocation102_spill] sm:$0xff]  ;;  %v7766_v8 = vld [vmem:[#allocation103_spill] sm:$0xff] }
0x176f   :  { %2926 = vmatpush1.bf16.msra.mxu1 %v7713_v22  ;;  %2967 = vmatpush1.bf16.msra.mxu0 %v7714_v23  ;;  %v6381_v22 = vld [vmem:[#allocation5 + $0xe4] ss:$16 sps:$4 sm:$0xff]   ;;  %v6384_v23 = vld [vmem:[#allocation5 + $0xec] ss:$16 sps:$4 sm:$0xff]  }
0x1770   :  { %2927 = vmatprep.subr.bf16.mxu1 %v7715_v9  ;;  %2968 = vmatprep.subr.bf16.mxu0 %v7716_v21 }
0x1773   :  { %2928 = vmatpush1.bf16.msra.mxu1 %v7717_v37  ;;  %2969 = vmatpush1.bf16.msra.mxu0 %v7718_v3 }
0x1774   :  { %2929 = vmatprep.subr.bf16.mxu1 %v7719_v49  ;;  %2970 = vmatprep.subr.bf16.mxu0 %v7720_v15 }
0x1777   :  { %2930 = vmatpush1.bf16.msra.mxu1 %v7721_v26  ;;  %2971 = vmatpush1.bf16.msra.mxu0 %v7722_v16 }
0x1778   :  { %2931 = vmatprep.subr.bf16.mxu1 %v7723_v27  ;;  %2972 = vmatprep.subr.bf16.mxu0 %v7724_v28 }
0x177b   :  { %2932 = vmatpush1.bf16.msra.mxu1 %v7725_v7  ;;  %2973 = vmatpush1.bf16.msra.mxu0 %v7726_v30 }
0x177c   :  { %2933 = vmatprep.subr.bf16.mxu1 %v7727_v35  ;;  %2974 = vmatprep.subr.bf16.mxu0 %v7728_v33 }
0x177f   :  { %2934 = vmatpush1.bf16.msra.mxu1 %v7729_v36  ;;  %2975 = vmatpush1.bf16.msra.mxu0 %v7730_v39 }
0x1780   :  { %2935 = vmatprep.subr.bf16.mxu1 %v7731_v38  ;;  %2976 = vmatprep.subr.bf16.mxu0 %v7732_v41 }
0x1783   :  { %2936 = vmatpush1.bf16.msra.mxu1 %v7733_v42  ;;  %2977 = vmatpush1.bf16.msra.mxu0 %v7734_v51 }
0x1784   :  { %2937 = vmatprep.subr.bf16.mxu1 %v7735_v0  ;;  %2978 = vmatprep.subr.bf16.mxu0 %v7736_v20 }
0x1787   :  { %2938 = vmatpush2.bf16.msra.mxu1 %v7737_v53  ;;  %2979 = vmatpush2.bf16.msra.mxu0 %v7738_v57 }
0x1788   :  { %2939 = vmatprep.subr.bf16.mxu1 %v7739_v25  ;;  %2980 = vmatprep.subr.bf16.mxu0 %v7740_v14 }
0x178b   :  { %2940 = vmatpush2.bf16.msra.mxu1 %v7741_v56  ;;  %2981 = vmatpush2.bf16.msra.mxu0 %v7742_v29 }
0x178c   :  { %2941 = vmatprep.subr.bf16.mxu1 %v7743_v60  ;;  %2982 = vmatprep.subr.bf16.mxu0 %v7744_v11 }
0x178f   :  { %2942 = vmatpush2.bf16.msra.mxu1 %v7745_v1  ;;  %2983 = vmatpush2.bf16.msra.mxu0 %v7746_v52  ;;  %v6395_v52 = vld [vmem:[#allocation5 + $0xe0] ss:$16 sps:$4 sm:$0xff]  }
0x1790   :  { %2943 = vmatprep.subr.bf16.mxu1 %v7747_v13  ;;  %2984 = vmatprep.subr.bf16.mxu0 %v7748_v19  ;;  %v6398_v13 = vld [vmem:[#allocation5 + $0xe8] ss:$16 sps:$4 sm:$0xff]   ;;  %v6404_v19 = vld [vmem:[#allocation5 + $0xcc] ss:$16 sps:$4 sm:$0xff]  }
0x1793   :  { %2944 = vmatpush2.bf16.msra.mxu1 %v7749_v44  ;;  %2985 = vmatpush2.bf16.msra.mxu0 %v7750_v32  ;;  %v6407_v44 = vld [vmem:[#allocation5 + $0xc0] ss:$16 sps:$4 sm:$0xff]   ;;  %v6410_v32 = vld [vmem:[#allocation5 + $0xc8] ss:$16 sps:$4 sm:$0xff]  }
0x1794   :  { %2945 = vmatprep.subr.bf16.mxu1 %v7751_v59  ;;  %2986 = vmatprep.subr.bf16.mxu0 %v7752_v45  ;;  %v6413_v59 = vld [vmem:[#allocation5 + $0xa4] ss:$16 sps:$4 sm:$0xff]   ;;  %v6416_v45 = vld [vmem:[#allocation5 + $0xac] ss:$16 sps:$4 sm:$0xff]  }
0x1797   :  { %2946 = vmatpush2.bf16.msra.mxu1 %v7753_v5  ;;  %2987 = vmatpush2.bf16.msra.mxu0 %v7754_v50  ;;  %v6419_v5 = vld [vmem:[#allocation5 + $0xa0] ss:$16 sps:$4 sm:$0xff]   ;;  %v6422_v50 = vld [vmem:[#allocation5 + $0xa8] ss:$16 sps:$4 sm:$0xff]  }
0x1798   :  { %2947 = vmatprep.subr.bf16.mxu1 %v7755_v54  ;;  %2988 = vmatprep.subr.bf16.mxu0 %v7756_v61  ;;  %v6425_v54 = vld [vmem:[#allocation5 + $0x84] ss:$16 sps:$4 sm:$0xff]   ;;  %v6428_v61 = vld [vmem:[#allocation5 + $0x8c] ss:$16 sps:$4 sm:$0xff]  }
0x179b   :  { %2948 = vmatpush2.bf16.msra.mxu1 %v7757_v2  ;;  %2989 = vmatpush2.bf16.msra.mxu0 %v7758_v6  ;;  %v6431_v2 = vld [vmem:[#allocation5 + $0x80] ss:$16 sps:$4 sm:$0xff]   ;;  %v6434_v6 = vld [vmem:[#allocation5 + $0x88] ss:$16 sps:$4 sm:$0xff]  }
0x179c   :  { %2949 = vmatprep.subr.bf16.mxu1 %v7759_v12  ;;  %2990 = vmatprep.subr.bf16.mxu0 %v7760_v17  ;;  %v6437_v12 = vld [vmem:[#allocation5 + $0x64] ss:$16 sps:$4 sm:$0xff]   ;;  %v6440_v17 = vld [vmem:[#allocation5 + $0x6c] ss:$16 sps:$4 sm:$0xff]  }
0x179f   :  { %2950 = vmatpush2.bf16.msra.mxu1 %v7761_v18  ;;  %2991 = vmatpush2.bf16.msra.mxu0 %v7762_v55  ;;  %v6443_v18 = vld [vmem:[#allocation5 + $0x60] ss:$16 sps:$4 sm:$0xff]   ;;  %v6446_v55 = vld [vmem:[#allocation5 + $0x68] ss:$16 sps:$4 sm:$0xff]  }
0x17a0   :  { %2951 = vmatprep.subr.bf16.mxu1 %v7763_v47  ;;  %2992 = vmatprep.subr.bf16.mxu0 %v7764_v62  ;;  %v6449_v47 = vld [vmem:[#allocation5 + $0x44] ss:$16 sps:$4 sm:$0xff]   ;;  %v6452_v62 = vld [vmem:[#allocation5 + $0x4c] ss:$16 sps:$4 sm:$0xff]  }
0x17a3   :  { %2952 = vmatpush2.bf16.msra.mxu1 %v7765_v4  ;;  %2993 = vmatpush2.bf16.msra.mxu0 %v7766_v8 }
0x17a4   :  { %3029 = vmatprep.subr.bf16.mxu1 %v6381_v22  ;;  %3070 = vmatprep.subr.bf16.mxu0 %v6384_v23 }
0x1825   :  { %v2848_v9 = vpop.f32.mrf.mxu1  ;;  %v2889_v21 = vpop.f32.mrf.mxu0 }
0x1826   :  { %v2849_v37 = vadd.f32 %v2848_v9, %v5520_v63  ;;  %v2890_v39 = vadd.f32 %v2889_v21, %v5528_v48  ;;  %v6455_v9 = vld [vmem:[#allocation5 + $0x40] ss:$16 sps:$4 sm:$0xff]   ;;  %v6458_v21 = vld [vmem:[#allocation5 + $0x48] ss:$16 sps:$4 sm:$0xff]  }
0x1827   :  { %v2850_v3 = vpop.f32.mrf.mxu1  ;;  %v2891_v49 = vpop.f32.mrf.mxu0 }
0x1828   :  { %v3888_v15 = vmul.f32 -1.442695, %v2849_v37  ;;  %v2851_v26 = vadd.f32 %v2850_v3, %v5524_v43  ;;  %v2892_v35 = vadd.f32 %v2891_v49, %v5532_v24  ;;  %v6461_v37 = vld [vmem:[#allocation5 + $0x24] ss:$16 sps:$4 sm:$0xff]   ;;  %v6464_v3 = vld [vmem:[#allocation5 + $0x2c] ss:$16 sps:$4 sm:$0xff]  }
0x1829   :  { %v2852_v16 = vpop.f32.mrf.mxu1  ;;  %v2893_v27 = vpop.f32.mrf.mxu0  ;;  %v6467_v49 = vld [vmem:[#allocation5 + $0x20] ss:$16 sps:$4 sm:$0xff]  }
0x182a   :  { %4442 = vpow2.f32 %v3888_v15  ;;  %v3889_v28 = vmul.f32 -1.442695, %v2851_v26  ;;  %v3890_v33 = vmul.f32 -1.442695, %v2892_v35  ;;  %v6470_v15 = vld [vmem:[#allocation5 + $0x28] ss:$16 sps:$4 sm:$0xff]  }
0x182b   :  { %v2853_v7 = vpop.f32.mrf.mxu1  ;;  %v2894_v30 = vpop.f32.mrf.mxu0  ;;  %v6473_v26 = vld [vmem:[#allocation5 + $0x4] ss:$16 sps:$4 sm:$0xff]   ;;  %v6476_v16 = vld [vmem:[#allocation5 + $0xc] ss:$16 sps:$4 sm:$0xff]   ;;  %v6479_v27 = vld [vmem:[#allocation5] ss:$16 sps:$4 sm:$0xff]  }
0x182c   :  { %4444 = vpow2.f32 %v3889_v28  ;;  %v6482_v28 = vld [vmem:[#allocation5 + $0x8] ss:$16 sps:$4 sm:$0xff]   ;;  %v6485_v7 = vld [vmem:[#allocation5 + $0x1e4] ss:$16 sps:$4 sm:$0xff]   ;;  %v6488_v30 = vld [vmem:[#allocation5 + $0x1ec] ss:$16 sps:$4 sm:$0xff]  }
0x182d   :  { %4446 = vpow2.f32 %v3890_v33  ;;  %v6491_v35 = vld [vmem:[#allocation5 + $0x1e0] ss:$16 sps:$4 sm:$0xff]   ;;  %v6494_v33 = vld [vmem:[#allocation5 + $0x1e8] ss:$16 sps:$4 sm:$0xff]  }
0x182e   :  { %7767 = vst [vmem:[#allocation13_spill] sm:$0xff] %v6494_v33 }
0x1837   :  { %v4443_v36 = vpop.eup %4442 }
0x1838   :  { %v2899_v38 = vadd.f32 1.0, %v4443_v36  ;;  %v6497_v36 = vld [vmem:[#allocation5 + $0x1c4] ss:$16 sps:$4 sm:$0xff]  }
0x1839   :  { %v4445_v41 = vpop.eup %4444  ;;  %7768 = vst [vmem:[#allocation14_spill] sm:$0xff] %v6497_v36 }
0x183a   :  { %4448 = vrcp.f32 %v2899_v38  ;;  %v2905_v42 = vadd.f32 1.0, %v4445_v41  ;;  %v4447_v51 = vpop.eup %4446  ;;  %v6503_v38 = vld [vmem:[#allocation5 + $0x1c0] ss:$16 sps:$4 sm:$0xff]   ;;  %v6506_v41 = vld [vmem:[#allocation5 + $0x1c8] ss:$16 sps:$4 sm:$0xff]  }
0x183b   :  { %4450 = vtanh.f32 %v2890_v39  ;;  %v2912_v57 = vadd.f32 1.0, %v4447_v51  ;;  %v6500_v39 = vld [vmem:[#allocation5 + $0x1cc] ss:$16 sps:$4 sm:$0xff]   ;;  %7770 = vst [vmem:[#allocation16_spill] sm:$0xff] %v6503_v38  ;;  %7771 = vst [vmem:[#allocation17_spill] sm:$0xff] %v6506_v41 }
0x183c   :  { %4452 = vrcp.f32 %v2905_v42  ;;  %7769 = vst [vmem:[#allocation15_spill] sm:$0xff] %v6500_v39  ;;  %v6509_v42 = vld [vmem:[#allocation5 + $0x1a4] ss:$16 sps:$4 sm:$0xff]   ;;  %v6512_v51 = vld [vmem:[#allocation5 + $0x1ac] ss:$16 sps:$4 sm:$0xff]  }
0x183d   :  { %4454 = vrcp.f32 %v2912_v57  ;;  %7772 = vst [vmem:[#allocation18_spill] sm:$0xff] %v6509_v42  ;;  %7773 = vst [vmem:[#allocation19_spill] sm:$0xff] %v6512_v51  ;;  %v6524_v57 = vld [vmem:[#allocation5 + $0x18c] ss:$16 sps:$4 sm:$0xff]  }
0x183e   :  { %7777 = vst [vmem:[#allocation23_spill] sm:$0xff] %v6524_v57 }
0x1847   :  { %v4449_v0 = vpop.eup %4448 }
0x1848   :  { %v4451_v20 = vpop.eup %4450 }
0x1849   :  { %v4453_v53 = vpop.eup %4452  ;;  %v2916_v25 = vmul.f32 %v4451_v20, %v4449_v0  ;;  %v6515_v0 = vld [vmem:[#allocation5 + $0x1a0] ss:$16 sps:$4 sm:$0xff]   ;;  %v6518_v20 = vld [vmem:[#allocation5 + $0x1a8] ss:$16 sps:$4 sm:$0xff]  }
0x184a   :  { %v2915_v14 = vmul.f32 %v4453_v53, %v6244_v46  ;;  %v4455_v29 = vpop.eup %4454  ;;  %v6401_v46 = vld [vmem:[#allocation5 + $0xc4] ss:$16 sps:$4 sm:$0xff]   ;;  %7774 = vst [vmem:[#allocation20_spill] sm:$0xff] %v6515_v0  ;;  %7775 = vst [vmem:[#allocation21_spill] sm:$0xff] %v6518_v20 }
0x184b   :  { %v6521_v53 = vld [vmem:[#allocation5 + $0x184] ss:$16 sps:$4 sm:$0xff]  }
0x184c   :  { %v6392_v56 = vadd.f32 %v2916_v25, %v2915_v14  ;;  %7776 = vst [vmem:[#allocation22_spill] sm:$0xff] %v6521_v53  ;;  %v6527_v25 = vld [vmem:[#allocation5 + $0x180] ss:$16 sps:$4 sm:$0xff]   ;;  %v6530_v14 = vld [vmem:[#allocation5 + $0x188] ss:$16 sps:$4 sm:$0xff]  }
0x184d   :  { %7778 = vst [vmem:[#allocation24_spill] sm:$0xff] %v6527_v25  ;;  %7779 = vst [vmem:[#allocation25_spill] sm:$0xff] %v6530_v14 }
0x184e   :  { %4456 = vtanh.f32 %v6392_v56 }
0x185b   :  { %v4457_v60 = vpop.eup %4456 }
0x185c   :  { %v2919_v11 = vmul.f32 %v4457_v60, %v4455_v29  ;;  %v6533_v29 = vld [vmem:[#allocation5 + $0x164] ss:$16 sps:$4 sm:$0xff]   ;;  %v6536_v60 = vld [vmem:[#allocation5 + $0x16c] ss:$16 sps:$4 sm:$0xff]  }
0x185d   :  { %7780 = vst [vmem:[#allocation26_spill] sm:$0xff] %v6533_v29  ;;  %7781 = vst [vmem:[#allocation27_spill] sm:$0xff] %v6536_v60 }
0x185e   :  { %v2920_v1 = vpack.c.bf16 %v2919_v11, %v2919_v11  ;;  %v6539_v11 = vld [vmem:[#allocation5 + $0x160] ss:$16 sps:$4 sm:$0xff]  }
0x185f   :  { %7782 = vst [vmem:[#allocation28_spill] sm:$0xff] %v6539_v11 }
0x1860   :  { %2954 = vmatmul.mubr.bf16.vlgmr.msra.gmra.mxu1 %v2920_v1  ;;  %2995 = vmatmul.mubr.bf16.vlgmr.msra.gmra.mxu0 %v2920_v1 }
0x1861   :  { %3061 = vmatprep.mubr.bf16.mxu1 %v2920_v1  ;;  %3102 = vmatprep.mubr.bf16.mxu0 %v2920_v1  ;;  %v6542_v1 = vld [vmem:[#allocation5 + $0x168] ss:$16 sps:$4 sm:$0xff]  }
0x1862   :  { %3030 = vmatpush1.bf16.msra.mxu1 %v6395_v52  ;;  %3071 = vmatpush1.bf16.msra.mxu0 %v6398_v13  ;;  %7783 = vst [vmem:[#allocation29_spill] sm:$0xff] %v6542_v1 }
0x1863   :  { %3031 = vmatprep.subr.bf16.mxu1 %v6401_v46  ;;  %3072 = vmatprep.subr.bf16.mxu0 %v6404_v19 }
0x1866   :  { %3032 = vmatpush1.bf16.msra.mxu1 %v6407_v44  ;;  %3073 = vmatpush1.bf16.msra.mxu0 %v6410_v32 }
0x1867   :  { %3033 = vmatprep.subr.bf16.mxu1 %v6413_v59  ;;  %3074 = vmatprep.subr.bf16.mxu0 %v6416_v45 }
0x186a   :  { %3034 = vmatpush1.bf16.msra.mxu1 %v6419_v5  ;;  %3075 = vmatpush1.bf16.msra.mxu0 %v6422_v50 }
0x186b   :  { %3035 = vmatprep.subr.bf16.mxu1 %v6425_v54  ;;  %3076 = vmatprep.subr.bf16.mxu0 %v6428_v61 }
0x186e   :  { %3036 = vmatpush1.bf16.msra.mxu1 %v6431_v2  ;;  %3077 = vmatpush1.bf16.msra.mxu0 %v6434_v6 }
0x186f   :  { %3037 = vmatprep.subr.bf16.mxu1 %v6437_v12  ;;  %3078 = vmatprep.subr.bf16.mxu0 %v6440_v17 }
0x1872   :  { %3038 = vmatpush1.bf16.msra.mxu1 %v6443_v18  ;;  %3079 = vmatpush1.bf16.msra.mxu0 %v6446_v55 }
0x1873   :  { %3039 = vmatprep.subr.bf16.mxu1 %v6449_v47  ;;  %3080 = vmatprep.subr.bf16.mxu0 %v6452_v62 }
0x1876   :  { %3040 = vmatpush1.bf16.msra.mxu1 %v6455_v9  ;;  %3081 = vmatpush1.bf16.msra.mxu0 %v6458_v21 }
0x1877   :  { %3041 = vmatprep.subr.bf16.mxu1 %v6461_v37  ;;  %3082 = vmatprep.subr.bf16.mxu0 %v6464_v3 }
0x187a   :  { %3042 = vmatpush1.bf16.msra.mxu1 %v6467_v49  ;;  %3083 = vmatpush1.bf16.msra.mxu0 %v6470_v15 }
0x187b   :  { %3043 = vmatprep.subr.bf16.mxu1 %v6473_v26  ;;  %3084 = vmatprep.subr.bf16.mxu0 %v6476_v16 }
0x187e   :  { %3044 = vmatpush1.bf16.msra.mxu1 %v6479_v27  ;;  %3085 = vmatpush1.bf16.msra.mxu0 %v6482_v28 }
0x187f   :  { %3045 = vmatprep.subr.bf16.mxu1 %v6485_v7  ;;  %3086 = vmatprep.subr.bf16.mxu0 %v6488_v30 }
0x1882   :  { %3046 = vmatpush2.bf16.msra.mxu1 %v6491_v35  ;;  %3087 = vmatpush2.bf16.msra.mxu0 %v6494_v33 }
0x1883   :  { %3047 = vmatprep.subr.bf16.mxu1 %v6497_v36  ;;  %3088 = vmatprep.subr.bf16.mxu0 %v6500_v39 }
0x1886   :  { %3048 = vmatpush2.bf16.msra.mxu1 %v6503_v38  ;;  %3089 = vmatpush2.bf16.msra.mxu0 %v6506_v41 }
0x1887   :  { %3049 = vmatprep.subr.bf16.mxu1 %v6509_v42  ;;  %3090 = vmatprep.subr.bf16.mxu0 %v6512_v51 }
0x188a   :  { %3050 = vmatpush2.bf16.msra.mxu1 %v6515_v0  ;;  %3091 = vmatpush2.bf16.msra.mxu0 %v6518_v20 }
0x188b   :  { %3051 = vmatprep.subr.bf16.mxu1 %v6521_v53  ;;  %3092 = vmatprep.subr.bf16.mxu0 %v6524_v57 }
0x188e   :  { %3052 = vmatpush2.bf16.msra.mxu1 %v6527_v25  ;;  %3093 = vmatpush2.bf16.msra.mxu0 %v6530_v14  ;;  %v6545_v25 = vld [vmem:[#allocation5 + $0x144] ss:$16 sps:$4 sm:$0xff]   ;;  %v6548_v14 = vld [vmem:[#allocation5 + $0x14c] ss:$16 sps:$4 sm:$0xff]  }
0x188f   :  { %3053 = vmatprep.subr.bf16.mxu1 %v6533_v29  ;;  %3094 = vmatprep.subr.bf16.mxu0 %v6536_v60  ;;  %7784 = vst [vmem:[#allocation30_spill] sm:$0xff] %v6545_v25  ;;  %7785 = vst [vmem:[#allocation31_spill] sm:$0xff] %v6548_v14  ;;  %v6551_v29 = vld [vmem:[#allocation5 + $0x140] ss:$16 sps:$4 sm:$0xff]   ;;  %v6554_v60 = vld [vmem:[#allocation5 + $0x148] ss:$16 sps:$4 sm:$0xff]  }
0x1890   :  { %7786 = vst [vmem:[#allocation32_spill] sm:$0xff] %v6551_v29  ;;  %7787 = vst [vmem:[#allocation33_spill] sm:$0xff] %v6554_v60 }
0x1892   :  { %3054 = vmatpush2.bf16.msra.mxu1 %v6539_v11  ;;  %3095 = vmatpush2.bf16.msra.mxu0 %v6542_v1  ;;  %v6557_v11 = vld [vmem:[#allocation5 + $0x124] ss:$16 sps:$4 sm:$0xff]   ;;  %v6560_v1 = vld [vmem:[#allocation5 + $0x12c] ss:$16 sps:$4 sm:$0xff]  }
0x1893   :  { %3055 = vmatprep.subr.bf16.mxu1 %v6545_v25  ;;  %3096 = vmatprep.subr.bf16.mxu0 %v6548_v14  ;;  %7788 = vst [vmem:[#allocation34_spill] sm:$0xff] %v6557_v11  ;;  %7789 = vst [vmem:[#allocation35_spill] sm:$0xff] %v6560_v1  ;;  %v6563_v25 = vld [vmem:[#allocation5 + $0x120] ss:$16 sps:$4 sm:$0xff]   ;;  %v6566_v14 = vld [vmem:[#allocation5 + $0x128] ss:$16 sps:$4 sm:$0xff]  }
0x1894   :  { %7790 = vst [vmem:[#allocation36_spill] sm:$0xff] %v6563_v25  ;;  %7791 = vst [vmem:[#allocation37_spill] sm:$0xff] %v6566_v14 }
0x1896   :  { %3056 = vmatpush2.bf16.msra.mxu1 %v6551_v29  ;;  %3097 = vmatpush2.bf16.msra.mxu0 %v6554_v60  ;;  %v6569_v29 = vld [vmem:[#allocation5 + $0x104] ss:$16 sps:$4 sm:$0xff]   ;;  %v6572_v60 = vld [vmem:[#allocation5 + $0x10c] ss:$16 sps:$4 sm:$0xff]  }
0x1897   :  { %3057 = vmatprep.subr.bf16.mxu1 %v6557_v11  ;;  %3098 = vmatprep.subr.bf16.mxu0 %v6560_v1  ;;  %7792 = vst [vmem:[#allocation38_spill] sm:$0xff] %v6569_v29  ;;  %7793 = vst [vmem:[#allocation39_spill] sm:$0xff] %v6572_v60  ;;  %v6575_v11 = vld [vmem:[#allocation5 + $0x100] ss:$16 sps:$4 sm:$0xff]   ;;  %v6578_v1 = vld [vmem:[#allocation5 + $0x108] ss:$16 sps:$4 sm:$0xff]  }
0x1898   :  { %7794 = vst [vmem:[#allocation40_spill] sm:$0xff] %v6575_v11  ;;  %7795 = vst [vmem:[#allocation41_spill] sm:$0xff] %v6578_v1 }
0x189a   :  { %3058 = vmatpush2.bf16.msra.mxu1 %v6563_v25  ;;  %3099 = vmatpush2.bf16.msra.mxu0 %v6566_v14  ;;  %v6581_v25 = vld [vmem:[#allocation5 + $0x2e4] ss:$16 sps:$4 sm:$0xff]   ;;  %v6584_v14 = vld [vmem:[#allocation5 + $0x2ec] ss:$16 sps:$4 sm:$0xff]  }
0x189b   :  { %3059 = vmatprep.subr.bf16.mxu1 %v6569_v29  ;;  %3100 = vmatprep.subr.bf16.mxu0 %v6572_v60  ;;  %7796 = vst [vmem:[#allocation42_spill] sm:$0xff] %v6581_v25  ;;  %7797 = vst [vmem:[#allocation43_spill] sm:$0xff] %v6584_v14 }
0x189e   :  { %3060 = vmatpush2.bf16.msra.mxu1 %v6575_v11  ;;  %3101 = vmatpush2.bf16.msra.mxu0 %v6578_v1 }
0x189f   :  { %3136 = vmatprep.subr.bf16.mxu1 %v6581_v25  ;;  %3177 = vmatprep.subr.bf16.mxu0 %v6584_v14 }
0x1920   :  { %v2955_v29 = vpop.f32.mrf.mxu1  ;;  %v2996_v57 = vpop.f32.mrf.mxu0 }
0x1921   :  { %v2956_v60 = vadd.f32 %v2955_v29, %v5610_v34  ;;  %v2997_v36 = vadd.f32 %v2996_v57, %v5622_v40 }
0x1922   :  { %v2957_v53 = vpop.f32.mrf.mxu1  ;;  %v2998_v20 = vpop.f32.mrf.mxu0 }
0x1923   :  { %v3891_v0 = vmul.f32 -1.442695, %v2956_v60  ;;  %v2958_v11 = vadd.f32 %v2957_v53, %v5613_v31  ;;  %v2999_v25 = vadd.f32 %v2998_v20, %v5618_v58 }
0x1924   :  { %v2959_v51 = vpop.f32.mrf.mxu1  ;;  %v3000_v42 = vpop.f32.mrf.mxu0 }
0x1925   :  { %4458 = vpow2.f32 %v3891_v0  ;;  %v3892_v1 = vmul.f32 -1.442695, %v2958_v11  ;;  %v3893_v39 = vmul.f32 -1.442695, %v2999_v25 }
0x1926   :  { %v2960_v41 = vpop.f32.mrf.mxu1  ;;  %v3001_v38 = vpop.f32.mrf.mxu0 }
0x1927   :  { %4460 = vpow2.f32 %v3892_v1  ;;  %v6604_v1 = vld [vmem:[#allocation5 + $0x2cc] ss:$16 sps:$4 sm:$0xff]  }
0x1928   :  { %4462 = vpow2.f32 %v3893_v39 }
0x1932   :  { %v4459_v14 = vpop.eup %4458 }
0x1933   :  { %v3006_v33 = vadd.f32 1.0, %v4459_v14  ;;  %v6598_v14 = vld [vmem:[#allocation5 + $0x2e8] ss:$16 sps:$4 sm:$0xff]  }
0x1934   :  { %v4461_v29 = vpop.eup %4460 }
0x1935   :  { %4464 = vrcp.f32 %v3006_v33  ;;  %v3012_v60 = vadd.f32 1.0, %v4461_v29  ;;  %v4463_v51 = vpop.eup %4462  ;;  %v6607_v29 = vld [vmem:[#allocation5 + $0x2c0] ss:$16 sps:$4 sm:$0xff]  }
0x1936   :  { %4466 = vtanh.f32 %v2997_v36  ;;  %v3019_v41 = vadd.f32 1.0, %v4463_v51  ;;  %v6595_v36 = vld [vmem:[#allocation5 + $0x2e0] ss:$16 sps:$4 sm:$0xff]   ;;  %7798 = vst [vmem:[#allocation44_spill] sm:$0xff] %v6607_v29  ;;  %v6613_v51 = vld [vmem:[#allocation5 + $0x2a4] ss:$16 sps:$4 sm:$0xff]  }
0x1937   :  { %4468 = vrcp.f32 %v3012_v60  ;;  %v6610_v60 = vld [vmem:[#allocation5 + $0x2c8] ss:$16 sps:$4 sm:$0xff]   ;;  %7800 = vst [vmem:[#allocation46_spill] sm:$0xff] %v6613_v51 }
0x1938   :  { %4470 = vrcp.f32 %v3019_v41  ;;  %7799 = vst [vmem:[#allocation45_spill] sm:$0xff] %v6610_v60  ;;  %v6625_v41 = vld [vmem:[#allocation5 + $0x284] ss:$16 sps:$4 sm:$0xff]  }
0x1939   :  { %7804 = vst [vmem:[#allocation50_spill] sm:$0xff] %v6625_v41 }
0x1942   :  { %v4465_v42 = vpop.eup %4464 }
0x1943   :  { %v4467_v0 = vpop.eup %4466 }
0x1944   :  { %v4469_v53 = vpop.eup %4468  ;;  %v3023_v38 = vmul.f32 %v4467_v0, %v4465_v42  ;;  %v6616_v42 = vld [vmem:[#allocation5 + $0x2ac] ss:$16 sps:$4 sm:$0xff]   ;;  %v6619_v0 = vld [vmem:[#allocation5 + $0x2a0] ss:$16 sps:$4 sm:$0xff]  }
0x1945   :  { %v3022_v11 = vmul.f32 %v4469_v53, %v6316_v10  ;;  %v4471_v57 = vpop.eup %4470  ;;  %v6601_v10 = vld [vmem:[#allocation5 + $0x2c4] ss:$16 sps:$4 sm:$0xff]   ;;  %7801 = vst [vmem:[#allocation47_spill] sm:$0xff] %v6616_v42  ;;  %7802 = vst [vmem:[#allocation48_spill] sm:$0xff] %v6619_v0  ;;  %v6622_v53 = vld [vmem:[#allocation5 + $0x2a8] ss:$16 sps:$4 sm:$0xff]  }
0x1946   :  { %7803 = vst [vmem:[#allocation49_spill] sm:$0xff] %v6622_v53 }
0x1947   :  { %v6592_v20 = vadd.f32 %v3023_v38, %v3022_v11  ;;  %v6628_v38 = vld [vmem:[#allocation5 + $0x28c] ss:$16 sps:$4 sm:$0xff]   ;;  %v6631_v11 = vld [vmem:[#allocation5 + $0x280] ss:$16 sps:$4 sm:$0xff]  }
0x1948   :  { %7805 = vst [vmem:[#allocation51_spill] sm:$0xff] %v6628_v38  ;;  %7806 = vst [vmem:[#allocation52_spill] sm:$0xff] %v6631_v11 }
0x1949   :  { %4472 = vtanh.f32 %v6592_v20 }
0x1956   :  { %v4473_v25 = vpop.eup %4472 }
0x1957   :  { %v3026_v39 = vmul.f32 %v4473_v25, %v4471_v57  ;;  %v6634_v57 = vld [vmem:[#allocation5 + $0x288] ss:$16 sps:$4 sm:$0xff]   ;;  %v6637_v25 = vld [vmem:[#allocation5 + $0x264] ss:$16 sps:$4 sm:$0xff]  }
0x1958   :  { %7807 = vst [vmem:[#allocation53_spill] sm:$0xff] %v6634_v57  ;;  %7808 = vst [vmem:[#allocation54_spill] sm:$0xff] %v6637_v25 }
0x1959   :  { %3027 = vst [vmem:[#allocation4 + $0xa] sm:$0x3] %v3026_v39  ;;  %v3028_v33 = vpack.c.bf16 %v3026_v39, %v3026_v39  ;;  %v6640_v39 = vld [vmem:[#allocation5 + $0x26c] ss:$16 sps:$4 sm:$0xff]  }
0x195a   :  { %7809 = vst [vmem:[#allocation55_spill] sm:$0xff] %v6640_v39 }
0x195b   :  { %3062 = vmatmul.mubr.bf16.vlgmr.msra.gmra.mxu1 %v3028_v33  ;;  %3103 = vmatmul.mubr.bf16.vlgmr.msra.gmra.mxu0 %v3028_v33 }
0x195c   :  { %3168 = vmatprep.mubr.bf16.mxu1 %v3028_v33  ;;  %3209 = vmatprep.mubr.bf16.mxu0 %v3028_v33  ;;  %v6643_v33 = vld [vmem:[#allocation5 + $0x260] ss:$16 sps:$4 sm:$0xff]  }
0x195d   :  { %3137 = vmatpush1.bf16.msra.mxu1 %v6595_v36  ;;  %3178 = vmatpush1.bf16.msra.mxu0 %v6598_v14  ;;  %7810 = vst [vmem:[#allocation56_spill] sm:$0xff] %v6643_v33 }
0x195e   :  { %3138 = vmatprep.subr.bf16.mxu1 %v6601_v10  ;;  %3179 = vmatprep.subr.bf16.mxu0 %v6604_v1 }
0x1961   :  { %3139 = vmatpush1.bf16.msra.mxu1 %v6607_v29  ;;  %3180 = vmatpush1.bf16.msra.mxu0 %v6610_v60 }
0x1962   :  { %3140 = vmatprep.subr.bf16.mxu1 %v6613_v51  ;;  %3181 = vmatprep.subr.bf16.mxu0 %v6616_v42 }
0x1965   :  { %3141 = vmatpush1.bf16.msra.mxu1 %v6619_v0  ;;  %3182 = vmatpush1.bf16.msra.mxu0 %v6622_v53 }
0x1966   :  { %3142 = vmatprep.subr.bf16.mxu1 %v6625_v41  ;;  %3183 = vmatprep.subr.bf16.mxu0 %v6628_v38  ;;  %v6646_v38 = vld [vmem:[#allocation5 + $0x268] ss:$16 sps:$4 sm:$0xff]  }
0x1967   :  { %7811 = vst [vmem:[#allocation57_spill] sm:$0xff] %v6646_v38 }
0x1969   :  { %3143 = vmatpush1.bf16.msra.mxu1 %v6631_v11  ;;  %3184 = vmatpush1.bf16.msra.mxu0 %v6634_v57  ;;  %v6649_v11 = vld [vmem:[#allocation5 + $0x244] ss:$16 sps:$4 sm:$0xff]   ;;  %v6652_v57 = vld [vmem:[#allocation5 + $0x24c] ss:$16 sps:$4 sm:$0xff]  }
0x196a   :  { %3144 = vmatprep.subr.bf16.mxu1 %v6637_v25  ;;  %3185 = vmatprep.subr.bf16.mxu0 %v6640_v39  ;;  %7812 = vst [vmem:[#allocation58_spill] sm:$0xff] %v6649_v11  ;;  %7813 = vst [vmem:[#allocation59_spill] sm:$0xff] %v6652_v57  ;;  %v6655_v25 = vld [vmem:[#allocation5 + $0x240] ss:$16 sps:$4 sm:$0xff]   ;;  %v6658_v39 = vld [vmem:[#allocation5 + $0x248] ss:$16 sps:$4 sm:$0xff]  }
0x196b   :  { %7814 = vst [vmem:[#allocation60_spill] sm:$0xff] %v6655_v25  ;;  %7815 = vst [vmem:[#allocation61_spill] sm:$0xff] %v6658_v39 }
0x196d   :  { %3145 = vmatpush1.bf16.msra.mxu1 %v6643_v33  ;;  %3186 = vmatpush1.bf16.msra.mxu0 %v6646_v38  ;;  %v6661_v33 = vld [vmem:[#allocation5 + $0x224] ss:$16 sps:$4 sm:$0xff]   ;;  %v6664_v38 = vld [vmem:[#allocation5 + $0x22c] ss:$16 sps:$4 sm:$0xff]  }
0x196e   :  { %3146 = vmatprep.subr.bf16.mxu1 %v6649_v11  ;;  %3187 = vmatprep.subr.bf16.mxu0 %v6652_v57  ;;  %7816 = vst [vmem:[#allocation62_spill] sm:$0xff] %v6661_v33  ;;  %7817 = vst [vmem:[#allocation63_spill] sm:$0xff] %v6664_v38  ;;  %v6667_v11 = vld [vmem:[#allocation5 + $0x220] ss:$16 sps:$4 sm:$0xff]   ;;  %v6670_v57 = vld [vmem:[#allocation5 + $0x228] ss:$16 sps:$4 sm:$0xff]  }
0x196f   :  { %7818 = vst [vmem:[#allocation64_spill] sm:$0xff] %v6667_v11  ;;  %7819 = vst [vmem:[#allocation65_spill] sm:$0xff] %v6670_v57 }
0x1971   :  { %3147 = vmatpush1.bf16.msra.mxu1 %v6655_v25  ;;  %3188 = vmatpush1.bf16.msra.mxu0 %v6658_v39  ;;  %v6673_v25 = vld [vmem:[#allocation5 + $0x204] ss:$16 sps:$4 sm:$0xff]   ;;  %v6676_v39 = vld [vmem:[#allocation5 + $0x20c] ss:$16 sps:$4 sm:$0xff]  }
0x1972   :  { %3148 = vmatprep.subr.bf16.mxu1 %v6661_v33  ;;  %3189 = vmatprep.subr.bf16.mxu0 %v6664_v38  ;;  %7820 = vst [vmem:[#allocation66_spill] sm:$0xff] %v6673_v25  ;;  %7821 = vst [vmem:[#allocation67_spill] sm:$0xff] %v6676_v39  ;;  %v6679_v33 = vld [vmem:[#allocation5 + $0x200] ss:$16 sps:$4 sm:$0xff]   ;;  %v6682_v38 = vld [vmem:[#allocation5 + $0x208] ss:$16 sps:$4 sm:$0xff]  }
0x1973   :  { %7822 = vst [vmem:[#allocation68_spill] sm:$0xff] %v6679_v33  ;;  %7823 = vst [vmem:[#allocation69_spill] sm:$0xff] %v6682_v38 }
0x1975   :  { %3149 = vmatpush1.bf16.msra.mxu1 %v6667_v11  ;;  %3190 = vmatpush1.bf16.msra.mxu0 %v6670_v57  ;;  %v6685_v11 = vld [vmem:[#allocation5 + $0x3e4] ss:$16 sps:$4 sm:$0xff]   ;;  %v6688_v57 = vld [vmem:[#allocation5 + $0x3ec] ss:$16 sps:$4 sm:$0xff]  }
0x1976   :  { %3150 = vmatprep.subr.bf16.mxu1 %v6673_v25  ;;  %3191 = vmatprep.subr.bf16.mxu0 %v6676_v39  ;;  %7824 = vst [vmem:[#allocation70_spill] sm:$0xff] %v6685_v11  ;;  %7825 = vst [vmem:[#allocation71_spill] sm:$0xff] %v6688_v57  ;;  %v6691_v25 = vld [vmem:[#allocation5 + $0x3e0] ss:$16 sps:$4 sm:$0xff]   ;;  %v6694_v39 = vld [vmem:[#allocation5 + $0x3e8] ss:$16 sps:$4 sm:$0xff]  }
0x1977   :  { %7826 = vst [vmem:[#allocation72_spill] sm:$0xff] %v6691_v25  ;;  %7827 = vst [vmem:[#allocation73_spill] sm:$0xff] %v6694_v39 }
0x1979   :  { %3151 = vmatpush1.bf16.msra.mxu1 %v6679_v33  ;;  %3192 = vmatpush1.bf16.msra.mxu0 %v6682_v38  ;;  %v6697_v33 = vld [vmem:[#allocation5 + $0x3c4] ss:$16 sps:$4 sm:$0xff]   ;;  %v6700_v38 = vld [vmem:[#allocation5 + $0x3cc] ss:$16 sps:$4 sm:$0xff]  }
0x197a   :  { %3152 = vmatprep.subr.bf16.mxu1 %v6685_v11  ;;  %3193 = vmatprep.subr.bf16.mxu0 %v6688_v57  ;;  %7828 = vst [vmem:[#allocation74_spill] sm:$0xff] %v6697_v33  ;;  %7829 = vst [vmem:[#allocation75_spill] sm:$0xff] %v6700_v38  ;;  %v6703_v11 = vld [vmem:[#allocation5 + $0x3c0] ss:$16 sps:$4 sm:$0xff]   ;;  %v6706_v57 = vld [vmem:[#allocation5 + $0x3c8] ss:$16 sps:$4 sm:$0xff]  }
0x197b   :  { %7830 = vst [vmem:[#allocation76_spill] sm:$0xff] %v6703_v11  ;;  %7831 = vst [vmem:[#allocation77_spill] sm:$0xff] %v6706_v57 }
0x197d   :  { %3153 = vmatpush2.bf16.msra.mxu1 %v6691_v25  ;;  %3194 = vmatpush2.bf16.msra.mxu0 %v6694_v39  ;;  %v6709_v25 = vld [vmem:[#allocation5 + $0x3a4] ss:$16 sps:$4 sm:$0xff]   ;;  %v6712_v39 = vld [vmem:[#allocation5 + $0x3ac] ss:$16 sps:$4 sm:$0xff]  }
0x197e   :  { %3154 = vmatprep.subr.bf16.mxu1 %v6697_v33  ;;  %3195 = vmatprep.subr.bf16.mxu0 %v6700_v38  ;;  %7832 = vst [vmem:[#allocation78_spill] sm:$0xff] %v6709_v25  ;;  %7833 = vst [vmem:[#allocation79_spill] sm:$0xff] %v6712_v39  ;;  %v6715_v33 = vld [vmem:[#allocation5 + $0x3a0] ss:$16 sps:$4 sm:$0xff]   ;;  %v6718_v38 = vld [vmem:[#allocation5 + $0x3a8] ss:$16 sps:$4 sm:$0xff]  }
0x197f   :  { %7834 = vst [vmem:[#allocation80_spill] sm:$0xff] %v6715_v33  ;;  %7835 = vst [vmem:[#allocation81_spill] sm:$0xff] %v6718_v38 }
0x1981   :  { %3155 = vmatpush2.bf16.msra.mxu1 %v6703_v11  ;;  %3196 = vmatpush2.bf16.msra.mxu0 %v6706_v57  ;;  %v6721_v11 = vld [vmem:[#allocation5 + $0x384] ss:$16 sps:$4 sm:$0xff]   ;;  %v6724_v57 = vld [vmem:[#allocation5 + $0x38c] ss:$16 sps:$4 sm:$0xff]  }
0x1982   :  { %3156 = vmatprep.subr.bf16.mxu1 %v6709_v25  ;;  %3197 = vmatprep.subr.bf16.mxu0 %v6712_v39  ;;  %7836 = vst [vmem:[#allocation82_spill] sm:$0xff] %v6721_v11  ;;  %7837 = vst [vmem:[#allocation83_spill] sm:$0xff] %v6724_v57  ;;  %v6727_v25 = vld [vmem:[#allocation5 + $0x380] ss:$16 sps:$4 sm:$0xff]   ;;  %v6730_v39 = vld [vmem:[#allocation5 + $0x388] ss:$16 sps:$4 sm:$0xff]  }
0x1983   :  { %7838 = vst [vmem:[#allocation84_spill] sm:$0xff] %v6727_v25  ;;  %7839 = vst [vmem:[#allocation85_spill] sm:$0xff] %v6730_v39 }
0x1985   :  { %3157 = vmatpush2.bf16.msra.mxu1 %v6715_v33  ;;  %3198 = vmatpush2.bf16.msra.mxu0 %v6718_v38  ;;  %v6733_v33 = vld [vmem:[#allocation5 + $0x364] ss:$16 sps:$4 sm:$0xff]   ;;  %v6736_v38 = vld [vmem:[#allocation5 + $0x36c] ss:$16 sps:$4 sm:$0xff]  }
0x1986   :  { %3158 = vmatprep.subr.bf16.mxu1 %v6721_v11  ;;  %3199 = vmatprep.subr.bf16.mxu0 %v6724_v57  ;;  %7840 = vst [vmem:[#allocation86_spill] sm:$0xff] %v6733_v33  ;;  %7841 = vst [vmem:[#allocation87_spill] sm:$0xff] %v6736_v38  ;;  %v6739_v11 = vld [vmem:[#allocation5 + $0x360] ss:$16 sps:$4 sm:$0xff]   ;;  %v6742_v57 = vld [vmem:[#allocation5 + $0x368] ss:$16 sps:$4 sm:$0xff]  }
0x1987   :  { %7842 = vst [vmem:[#allocation88_spill] sm:$0xff] %v6739_v11  ;;  %7843 = vst [vmem:[#allocation89_spill] sm:$0xff] %v6742_v57 }
0x1989   :  { %3159 = vmatpush2.bf16.msra.mxu1 %v6727_v25  ;;  %3200 = vmatpush2.bf16.msra.mxu0 %v6730_v39  ;;  %v6745_v25 = vld [vmem:[#allocation5 + $0x344] ss:$16 sps:$4 sm:$0xff]   ;;  %v6748_v39 = vld [vmem:[#allocation5 + $0x34c] ss:$16 sps:$4 sm:$0xff]  }
0x198a   :  { %3160 = vmatprep.subr.bf16.mxu1 %v6733_v33  ;;  %3201 = vmatprep.subr.bf16.mxu0 %v6736_v38  ;;  %7844 = vst [vmem:[#allocation90_spill] sm:$0xff] %v6745_v25  ;;  %7845 = vst [vmem:[#allocation91_spill] sm:$0xff] %v6748_v39  ;;  %v6751_v33 = vld [vmem:[#allocation5 + $0x340] ss:$16 sps:$4 sm:$0xff]   ;;  %v6754_v38 = vld [vmem:[#allocation5 + $0x348] ss:$16 sps:$4 sm:$0xff]  }
0x198b   :  { %7846 = vst [vmem:[#allocation92_spill] sm:$0xff] %v6751_v33  ;;  %7847 = vst [vmem:[#allocation93_spill] sm:$0xff] %v6754_v38 }
0x198d   :  { %3161 = vmatpush2.bf16.msra.mxu1 %v6739_v11  ;;  %3202 = vmatpush2.bf16.msra.mxu0 %v6742_v57  ;;  %v6757_v11 = vld [vmem:[#allocation5 + $0x324] ss:$16 sps:$4 sm:$0xff]   ;;  %v6760_v57 = vld [vmem:[#allocation5 + $0x32c] ss:$16 sps:$4 sm:$0xff]  }
0x198e   :  { %3162 = vmatprep.subr.bf16.mxu1 %v6745_v25  ;;  %3203 = vmatprep.subr.bf16.mxu0 %v6748_v39  ;;  %7848 = vst [vmem:[#allocation94_spill] sm:$0xff] %v6757_v11  ;;  %7849 = vst [vmem:[#allocation95_spill] sm:$0xff] %v6760_v57  ;;  %v6763_v25 = vld [vmem:[#allocation5 + $0x320] ss:$16 sps:$4 sm:$0xff]   ;;  %v6766_v39 = vld [vmem:[#allocation5 + $0x328] ss:$16 sps:$4 sm:$0xff]  }
0x198f   :  { %7850 = vst [vmem:[#allocation96_spill] sm:$0xff] %v6763_v25  ;;  %7851 = vst [vmem:[#allocation97_spill] sm:$0xff] %v6766_v39 }
0x1991   :  { %3163 = vmatpush2.bf16.msra.mxu1 %v6751_v33  ;;  %3204 = vmatpush2.bf16.msra.mxu0 %v6754_v38  ;;  %v6769_v33 = vld [vmem:[#allocation5 + $0x304] ss:$16 sps:$4 sm:$0xff]   ;;  %v6772_v38 = vld [vmem:[#allocation5 + $0x30c] ss:$16 sps:$4 sm:$0xff]  }
0x1992   :  { %3164 = vmatprep.subr.bf16.mxu1 %v6757_v11  ;;  %3205 = vmatprep.subr.bf16.mxu0 %v6760_v57  ;;  %7852 = vst [vmem:[#allocation98_spill] sm:$0xff] %v6769_v33  ;;  %7853 = vst [vmem:[#allocation99_spill] sm:$0xff] %v6772_v38 }
0x1995   :  { %3165 = vmatpush2.bf16.msra.mxu1 %v6763_v25  ;;  %3206 = vmatpush2.bf16.msra.mxu0 %v6766_v39 }
0x1996   :  { %3166 = vmatprep.subr.bf16.mxu1 %v6769_v33  ;;  %3207 = vmatprep.subr.bf16.mxu0 %v6772_v38 }
0x1999   :  { %3167 = vmatpush2.bf16.msra.mxu1 %v7765_v4  ;;  %3208 = vmatpush2.bf16.msra.mxu0 %v7766_v8 }
0x199a   :  { %3244 = vmatprep.subr.bf16.mxu1 %v6381_v22  ;;  %3285 = vmatprep.subr.bf16.mxu0 %v6384_v23 }
0x1a1b   :  { %v3063_v25 = vpop.f32.mrf.mxu1  ;;  %v3104_v57 = vpop.f32.mrf.mxu0 }
0x1a1c   :  { %v3064_v39 = vadd.f32 %v3063_v25, %v5520_v63  ;;  %v3105_v60 = vadd.f32 %v3104_v57, %v5528_v48 }
0x1a1d   :  { %v3065_v11 = vpop.f32.mrf.mxu1  ;;  %v3106_v41 = vpop.f32.mrf.mxu0 }
0x1a1e   :  { %v3894_v53 = vmul.f32 -1.442695, %v3064_v39  ;;  %v3066_v33 = vadd.f32 %v3065_v11, %v5524_v43  ;;  %v3107_v8 = vadd.f32 %v3106_v41, %v5532_v24 }
0x1a1f   :  { %v3067_v0 = vpop.f32.mrf.mxu1  ;;  %v3108_v42 = vpop.f32.mrf.mxu0 }
0x1a20   :  { %4474 = vpow2.f32 %v3894_v53  ;;  %v3895_v38 = vmul.f32 -1.442695, %v3066_v33  ;;  %v3896_v22 = vmul.f32 -1.442695, %v3107_v8 }
0x1a21   :  { %v3068_v4 = vpop.f32.mrf.mxu1  ;;  %v3109_v51 = vpop.f32.mrf.mxu0 }
0x1a22   :  { %4476 = vpow2.f32 %v3895_v38 }
0x1a23   :  { %4478 = vpow2.f32 %v3896_v22 }
0x1a2d   :  { %v4475_v23 = vpop.eup %4474 }
0x1a2e   :  { %v3114_v29 = vadd.f32 1.0, %v4475_v23 }
0x1a2f   :  { %v4477_v25 = vpop.eup %4476 }
0x1a30   :  { %4480 = vrcp.f32 %v3114_v29  ;;  %v3120_v39 = vadd.f32 1.0, %v4477_v25  ;;  %v4479_v0 = vpop.eup %4478 }
0x1a31   :  { %4482 = vtanh.f32 %v3105_v60  ;;  %v3127_v33 = vadd.f32 1.0, %v4479_v0 }
0x1a32   :  { %4484 = vrcp.f32 %v3120_v39 }
0x1a33   :  { %4486 = vrcp.f32 %v3127_v33 }
0x1a3d   :  { %v4481_v42 = vpop.eup %4480 }
0x1a3e   :  { %v4483_v53 = vpop.eup %4482 }
0x1a3f   :  { %v4485_v11 = vpop.eup %4484  ;;  %v3131_v51 = vmul.f32 %v4483_v53, %v4481_v42 }
0x1a40   :  { %v3130_v38 = vmul.f32 %v4485_v11, %v6392_v56  ;;  %v4487_v57 = vpop.eup %4486  ;;  %v7854_v56 = vld [vmem:[#allocation13_spill] sm:$0xff] }
0x1a42   :  { %v6784_v41 = vadd.f32 %v3131_v51, %v3130_v38 }
0x1a44   :  { %4488 = vtanh.f32 %v6784_v41 }
0x1a51   :  { %v4489_v4 = vpop.eup %4488 }
0x1a52   :  { %v3134_v8 = vmul.f32 %v4489_v4, %v4487_v57 }
0x1a54   :  { %v3135_v29 = vpack.c.bf16 %v3134_v8, %v3134_v8 }
0x1a56   :  { %3169 = vmatmul.mubr.bf16.vlgmr.msra.gmra.mxu1 %v3135_v29  ;;  %3210 = vmatmul.mubr.bf16.vlgmr.msra.gmra.mxu0 %v3135_v29 }
0x1a57   :  { %3276 = vmatprep.mubr.bf16.mxu1 %v3135_v29  ;;  %3317 = vmatprep.mubr.bf16.mxu0 %v3135_v29 }
0x1a58   :  { %3245 = vmatpush1.bf16.msra.mxu1 %v6395_v52  ;;  %3286 = vmatpush1.bf16.msra.mxu0 %v6398_v13  ;;  %v7855_v52 = vld [vmem:[#allocation14_spill] sm:$0xff]  ;;  %v7856_v13 = vld [vmem:[#allocation15_spill] sm:$0xff] }
0x1a59   :  { %3246 = vmatprep.subr.bf16.mxu1 %v6401_v46  ;;  %3287 = vmatprep.subr.bf16.mxu0 %v6404_v19  ;;  %v7857_v46 = vld [vmem:[#allocation16_spill] sm:$0xff]  ;;  %v7858_v19 = vld [vmem:[#allocation17_spill] sm:$0xff] }
0x1a5c   :  { %3247 = vmatpush1.bf16.msra.mxu1 %v6407_v44  ;;  %3288 = vmatpush1.bf16.msra.mxu0 %v6410_v32  ;;  %v7859_v44 = vld [vmem:[#allocation18_spill] sm:$0xff]  ;;  %v7860_v32 = vld [vmem:[#allocation19_spill] sm:$0xff] }
0x1a5d   :  { %3248 = vmatprep.subr.bf16.mxu1 %v6413_v59  ;;  %3289 = vmatprep.subr.bf16.mxu0 %v6416_v45  ;;  %v7861_v59 = vld [vmem:[#allocation20_spill] sm:$0xff]  ;;  %v7862_v45 = vld [vmem:[#allocation21_spill] sm:$0xff] }
0x1a60   :  { %3249 = vmatpush1.bf16.msra.mxu1 %v6419_v5  ;;  %3290 = vmatpush1.bf16.msra.mxu0 %v6422_v50  ;;  %v7863_v5 = vld [vmem:[#allocation22_spill] sm:$0xff]  ;;  %v7864_v50 = vld [vmem:[#allocation23_spill] sm:$0xff] }
0x1a61   :  { %3250 = vmatprep.subr.bf16.mxu1 %v6425_v54  ;;  %3291 = vmatprep.subr.bf16.mxu0 %v6428_v61  ;;  %v7865_v54 = vld [vmem:[#allocation24_spill] sm:$0xff]  ;;  %v7866_v61 = vld [vmem:[#allocation25_spill] sm:$0xff] }
0x1a64   :  { %3251 = vmatpush1.bf16.msra.mxu1 %v6431_v2  ;;  %3292 = vmatpush1.bf16.msra.mxu0 %v6434_v6  ;;  %v7867_v2 = vld [vmem:[#allocation26_spill] sm:$0xff]  ;;  %v7868_v6 = vld [vmem:[#allocation27_spill] sm:$0xff] }
0x1a65   :  { %3252 = vmatprep.subr.bf16.mxu1 %v6437_v12  ;;  %3293 = vmatprep.subr.bf16.mxu0 %v6440_v17  ;;  %v7869_v12 = vld [vmem:[#allocation28_spill] sm:$0xff]  ;;  %v7870_v17 = vld [vmem:[#allocation29_spill] sm:$0xff] }
0x1a68   :  { %3253 = vmatpush1.bf16.msra.mxu1 %v6443_v18  ;;  %3294 = vmatpush1.bf16.msra.mxu0 %v6446_v55  ;;  %v7871_v18 = vld [vmem:[#allocation30_spill] sm:$0xff]  ;;  %v7872_v55 = vld [vmem:[#allocation31_spill] sm:$0xff] }
0x1a69   :  { %3254 = vmatprep.subr.bf16.mxu1 %v6449_v47  ;;  %3295 = vmatprep.subr.bf16.mxu0 %v6452_v62  ;;  %v7873_v47 = vld [vmem:[#allocation32_spill] sm:$0xff]  ;;  %v7874_v62 = vld [vmem:[#allocation33_spill] sm:$0xff] }
0x1a6c   :  { %3255 = vmatpush1.bf16.msra.mxu1 %v6455_v9  ;;  %3296 = vmatpush1.bf16.msra.mxu0 %v6458_v21  ;;  %v7875_v9 = vld [vmem:[#allocation34_spill] sm:$0xff]  ;;  %v7876_v21 = vld [vmem:[#allocation35_spill] sm:$0xff] }
0x1a6d   :  { %3256 = vmatprep.subr.bf16.mxu1 %v6461_v37  ;;  %3297 = vmatprep.subr.bf16.mxu0 %v6464_v3  ;;  %v7877_v37 = vld [vmem:[#allocation36_spill] sm:$0xff]  ;;  %v7878_v3 = vld [vmem:[#allocation37_spill] sm:$0xff] }
0x1a70   :  { %3257 = vmatpush1.bf16.msra.mxu1 %v6467_v49  ;;  %3298 = vmatpush1.bf16.msra.mxu0 %v6470_v15  ;;  %v7879_v49 = vld [vmem:[#allocation38_spill] sm:$0xff]  ;;  %v7880_v15 = vld [vmem:[#allocation39_spill] sm:$0xff] }
0x1a71   :  { %3258 = vmatprep.subr.bf16.mxu1 %v6473_v26  ;;  %3299 = vmatprep.subr.bf16.mxu0 %v6476_v16  ;;  %v7881_v26 = vld [vmem:[#allocation40_spill] sm:$0xff]  ;;  %v7882_v16 = vld [vmem:[#allocation41_spill] sm:$0xff] }
0x1a74   :  { %3259 = vmatpush1.bf16.msra.mxu1 %v6479_v27  ;;  %3300 = vmatpush1.bf16.msra.mxu0 %v6482_v28  ;;  %v7883_v27 = vld [vmem:[#allocation42_spill] sm:$0xff]  ;;  %v7884_v28 = vld [vmem:[#allocation43_spill] sm:$0xff] }
0x1a75   :  { %3260 = vmatprep.subr.bf16.mxu1 %v6485_v7  ;;  %3301 = vmatprep.subr.bf16.mxu0 %v6488_v30 }
0x1a78   :  { %3261 = vmatpush2.bf16.msra.mxu1 %v6491_v35  ;;  %3302 = vmatpush2.bf16.msra.mxu0 %v7854_v56 }
0x1a79   :  { %3262 = vmatprep.subr.bf16.mxu1 %v7855_v52  ;;  %3303 = vmatprep.subr.bf16.mxu0 %v7856_v13 }
0x1a7c   :  { %3263 = vmatpush2.bf16.msra.mxu1 %v7857_v46  ;;  %3304 = vmatpush2.bf16.msra.mxu0 %v7858_v19 }
0x1a7d   :  { %3264 = vmatprep.subr.bf16.mxu1 %v7859_v44  ;;  %3305 = vmatprep.subr.bf16.mxu0 %v7860_v32 }
0x1a80   :  { %3265 = vmatpush2.bf16.msra.mxu1 %v7861_v59  ;;  %3306 = vmatpush2.bf16.msra.mxu0 %v7862_v45 }
0x1a81   :  { %3266 = vmatprep.subr.bf16.mxu1 %v7863_v5  ;;  %3307 = vmatprep.subr.bf16.mxu0 %v7864_v50 }
0x1a84   :  { %3267 = vmatpush2.bf16.msra.mxu1 %v7865_v54  ;;  %3308 = vmatpush2.bf16.msra.mxu0 %v7866_v61  ;;  %v7886_v61 = vld [vmem:[#allocation45_spill] sm:$0xff] }
0x1a85   :  { %3268 = vmatprep.subr.bf16.mxu1 %v7867_v2  ;;  %3309 = vmatprep.subr.bf16.mxu0 %v7868_v6  ;;  %v7887_v2 = vld [vmem:[#allocation46_spill] sm:$0xff]  ;;  %v7888_v6 = vld [vmem:[#allocation47_spill] sm:$0xff] }
0x1a88   :  { %3269 = vmatpush2.bf16.msra.mxu1 %v7869_v12  ;;  %3310 = vmatpush2.bf16.msra.mxu0 %v7870_v17  ;;  %v7889_v12 = vld [vmem:[#allocation48_spill] sm:$0xff]  ;;  %v7890_v17 = vld [vmem:[#allocation49_spill] sm:$0xff] }
0x1a89   :  { %3270 = vmatprep.subr.bf16.mxu1 %v7871_v18  ;;  %3311 = vmatprep.subr.bf16.mxu0 %v7872_v55  ;;  %v7891_v18 = vld [vmem:[#allocation50_spill] sm:$0xff]  ;;  %v7896_v55 = vld [vmem:[#allocation55_spill] sm:$0xff] }
0x1a8c   :  { %3271 = vmatpush2.bf16.msra.mxu1 %v7873_v47  ;;  %3312 = vmatpush2.bf16.msra.mxu0 %v7874_v62  ;;  %v7897_v47 = vld [vmem:[#allocation56_spill] sm:$0xff]  ;;  %v7898_v62 = vld [vmem:[#allocation57_spill] sm:$0xff] }
0x1a8d   :  { %3272 = vmatprep.subr.bf16.mxu1 %v7875_v9  ;;  %3313 = vmatprep.subr.bf16.mxu0 %v7876_v21  ;;  %v7899_v9 = vld [vmem:[#allocation58_spill] sm:$0xff]  ;;  %v7900_v21 = vld [vmem:[#allocation59_spill] sm:$0xff] }
0x1a90   :  { %3273 = vmatpush2.bf16.msra.mxu1 %v7877_v37  ;;  %3314 = vmatpush2.bf16.msra.mxu0 %v7878_v3  ;;  %v7901_v37 = vld [vmem:[#allocation60_spill] sm:$0xff]  ;;  %v7902_v3 = vld [vmem:[#allocation61_spill] sm:$0xff] }
0x1a91   :  { %3274 = vmatprep.subr.bf16.mxu1 %v7879_v49  ;;  %3315 = vmatprep.subr.bf16.mxu0 %v7880_v15  ;;  %v7903_v49 = vld [vmem:[#allocation62_spill] sm:$0xff]  ;;  %v7904_v15 = vld [vmem:[#allocation63_spill] sm:$0xff] }
0x1a94   :  { %3275 = vmatpush2.bf16.msra.mxu1 %v7881_v26  ;;  %3316 = vmatpush2.bf16.msra.mxu0 %v7882_v16  ;;  %v7905_v26 = vld [vmem:[#allocation64_spill] sm:$0xff]  ;;  %v7906_v16 = vld [vmem:[#allocation65_spill] sm:$0xff] }
0x1a95   :  { %3351 = vmatprep.subr.bf16.mxu1 %v7883_v27  ;;  %3392 = vmatprep.subr.bf16.mxu0 %v7884_v28  ;;  %v7907_v27 = vld [vmem:[#allocation66_spill] sm:$0xff]  ;;  %v7908_v28 = vld [vmem:[#allocation67_spill] sm:$0xff] }
0x1b16   :  { %v3170_v7 = vpop.f32.mrf.mxu1  ;;  %v3211_v30 = vpop.f32.mrf.mxu0 }
0x1b17   :  { %v3171_v35 = vadd.f32 %v3170_v7, %v5610_v34  ;;  %v3212_v57 = vadd.f32 %v3211_v30, %v5622_v40  ;;  %v7909_v7 = vld [vmem:[#allocation68_spill] sm:$0xff]  ;;  %v7910_v30 = vld [vmem:[#allocation69_spill] sm:$0xff] }
0x1b18   :  { %v3172_v60 = vpop.f32.mrf.mxu1  ;;  %v3213_v22 = vpop.f32.mrf.mxu0 }
0x1b19   :  { %v3897_v23 = vmul.f32 -1.442695, %v3171_v35  ;;  %v3173_v25 = vadd.f32 %v3172_v60, %v5613_v31  ;;  %v3214_v33 = vadd.f32 %v3213_v22, %v5618_v58  ;;  %v7911_v35 = vld [vmem:[#allocation70_spill] sm:$0xff]  ;;  %v7912_v60 = vld [vmem:[#allocation71_spill] sm:$0xff]  ;;  %v7913_v22 = vld [vmem:[#allocation72_spill] sm:$0xff] }
0x1b1a   :  { %v3174_v39 = vpop.f32.mrf.mxu1  ;;  %v3215_v0 = vpop.f32.mrf.mxu0 }
0x1b1b   :  { %4490 = vpow2.f32 %v3897_v23  ;;  %v3898_v42 = vmul.f32 -1.442695, %v3173_v25  ;;  %v3899_v51 = vmul.f32 -1.442695, %v3214_v33  ;;  %v7914_v23 = vld [vmem:[#allocation73_spill] sm:$0xff]  ;;  %v7915_v25 = vld [vmem:[#allocation74_spill] sm:$0xff] }
0x1b1c   :  { %v3175_v53 = vpop.f32.mrf.mxu1  ;;  %v3216_v11 = vpop.f32.mrf.mxu0  ;;  %v7916_v39 = vld [vmem:[#allocation75_spill] sm:$0xff]  ;;  %v7917_v0 = vld [vmem:[#allocation76_spill] sm:$0xff] }
0x1b1d   :  { %4492 = vpow2.f32 %v3898_v42  ;;  %v7918_v42 = vld [vmem:[#allocation77_spill] sm:$0xff]  ;;  %v7919_v53 = vld [vmem:[#allocation78_spill] sm:$0xff]  ;;  %v7920_v11 = vld [vmem:[#allocation79_spill] sm:$0xff] }
0x1b1e   :  { %4494 = vpow2.f32 %v3899_v51  ;;  %v7921_v33 = vld [vmem:[#allocation80_spill] sm:$0xff]  ;;  %v7922_v51 = vld [vmem:[#allocation81_spill] sm:$0xff] }
0x1b28   :  { %v4491_v38 = vpop.eup %4490 }
0x1b29   :  { %v3221_v4 = vadd.f32 1.0, %v4491_v38  ;;  %v7923_v38 = vld [vmem:[#allocation82_spill] sm:$0xff] }
0x1b2a   :  { %v4493_v8 = vpop.eup %4492 }
0x1b2b   :  { %4496 = vrcp.f32 %v3221_v4  ;;  %v3227_v29 = vadd.f32 1.0, %v4493_v8  ;;  %v4495_v56 = vpop.eup %4494  ;;  %v7925_v4 = vld [vmem:[#allocation84_spill] sm:$0xff]  ;;  %v7926_v8 = vld [vmem:[#allocation85_spill] sm:$0xff] }
0x1b2c   :  { %4498 = vtanh.f32 %v3212_v57  ;;  %v3234_v19 = vadd.f32 1.0, %v4495_v56  ;;  %v7924_v57 = vld [vmem:[#allocation83_spill] sm:$0xff] }
0x1b2d   :  { %4500 = vrcp.f32 %v3227_v29  ;;  %v7927_v29 = vld [vmem:[#allocation86_spill] sm:$0xff]  ;;  %v7928_v56 = vld [vmem:[#allocation87_spill] sm:$0xff] }
0x1b2e   :  { %4502 = vrcp.f32 %v3234_v19  ;;  %v7932_v19 = vld [vmem:[#allocation91_spill] sm:$0xff] }
0x1b38   :  { %v4497_v52 = vpop.eup %4496 }
0x1b39   :  { %v4499_v13 = vpop.eup %4498 }
0x1b3a   :  { %v4501_v46 = vpop.eup %4500  ;;  %v3238_v44 = vmul.f32 %v4499_v13, %v4497_v52  ;;  %v7929_v52 = vld [vmem:[#allocation88_spill] sm:$0xff]  ;;  %v7930_v13 = vld [vmem:[#allocation89_spill] sm:$0xff] }
0x1b3b   :  { %v3237_v32 = vmul.f32 %v4501_v46, %v6592_v20  ;;  %v4503_v45 = vpop.eup %4502  ;;  %v7885_v20 = vld [vmem:[#allocation44_spill] sm:$0xff]  ;;  %v7931_v46 = vld [vmem:[#allocation90_spill] sm:$0xff] }
0x1b3d   :  { %v6856_v59 = vadd.f32 %v3238_v44, %v3237_v32  ;;  %v7933_v44 = vld [vmem:[#allocation92_spill] sm:$0xff]  ;;  %v7934_v32 = vld [vmem:[#allocation93_spill] sm:$0xff] }
0x1b3f   :  { %4504 = vtanh.f32 %v6856_v59 }
0x1b4c   :  { %v4505_v5 = vpop.eup %4504 }
0x1b4d   :  { %v3241_v50 = vmul.f32 %v4505_v5, %v4503_v45  ;;  %v7935_v45 = vld [vmem:[#allocation94_spill] sm:$0xff]  ;;  %v7936_v5 = vld [vmem:[#allocation95_spill] sm:$0xff] }
0x1b4f   :  { %3242 = vst [vmem:[#allocation4 + $0xc] sm:$0x3] %v3241_v50  ;;  %v3243_v54 = vpack.c.bf16 %v3241_v50, %v3241_v50  ;;  %v7937_v50 = vld [vmem:[#allocation96_spill] sm:$0xff] }
0x1b51   :  { %3277 = vmatmul.mubr.bf16.vlgmr.msra.gmra.mxu1 %v3243_v54  ;;  %3318 = vmatmul.mubr.bf16.vlgmr.msra.gmra.mxu0 %v3243_v54 }
0x1b52   :  { %3383 = vmatprep.mubr.bf16.mxu1 %v3243_v54  ;;  %3424 = vmatprep.mubr.bf16.mxu0 %v3243_v54  ;;  %v7938_v54 = vld [vmem:[#allocation97_spill] sm:$0xff] }
0x1b53   :  { %3352 = vmatpush1.bf16.msra.mxu1 %v6595_v36  ;;  %3393 = vmatpush1.bf16.msra.mxu0 %v6598_v14  ;;  %v7892_v36 = vld [vmem:[#allocation51_spill] sm:$0xff]  ;;  %v7893_v14 = vld [vmem:[#allocation52_spill] sm:$0xff] }
0x1b54   :  { %3353 = vmatprep.subr.bf16.mxu1 %v6601_v10  ;;  %3394 = vmatprep.subr.bf16.mxu0 %v6604_v1  ;;  %v7894_v10 = vld [vmem:[#allocation53_spill] sm:$0xff]  ;;  %v7895_v1 = vld [vmem:[#allocation54_spill] sm:$0xff] }
0x1b57   :  { %3354 = vmatpush1.bf16.msra.mxu1 %v7885_v20  ;;  %3395 = vmatpush1.bf16.msra.mxu0 %v7886_v61  ;;  %v7939_v20 = vld [vmem:[#allocation98_spill] sm:$0xff]  ;;  %v7940_v61 = vld [vmem:[#allocation99_spill] sm:$0xff] }
0x1b58   :  { %3355 = vmatprep.subr.bf16.mxu1 %v7887_v2  ;;  %3396 = vmatprep.subr.bf16.mxu0 %v7888_v6  ;;  %v4800_v2 = vld [vmem:[#allocation5 + $0x300] ss:$16 sps:$4 sm:$0xff]   ;;  %v4801_v6 = vld [vmem:[#allocation5 + $0x308] ss:$16 sps:$4 sm:$0xff]  }
0x1b5b   :  { %3356 = vmatpush1.bf16.msra.mxu1 %v7889_v12  ;;  %3397 = vmatpush1.bf16.msra.mxu0 %v7890_v17 }
0x1b5c   :  { %3357 = vmatprep.subr.bf16.mxu1 %v7891_v18  ;;  %3398 = vmatprep.subr.bf16.mxu0 %v7892_v36 }
0x1b5f   :  { %3358 = vmatpush1.bf16.msra.mxu1 %v7893_v14  ;;  %3399 = vmatpush1.bf16.msra.mxu0 %v7894_v10 }
0x1b60   :  { %3359 = vmatprep.subr.bf16.mxu1 %v7895_v1  ;;  %3400 = vmatprep.subr.bf16.mxu0 %v7896_v55 }
0x1b63   :  { %3360 = vmatpush1.bf16.msra.mxu1 %v7897_v47  ;;  %3401 = vmatpush1.bf16.msra.mxu0 %v7898_v62 }
0x1b64   :  { %3361 = vmatprep.subr.bf16.mxu1 %v7899_v9  ;;  %3402 = vmatprep.subr.bf16.mxu0 %v7900_v21 }
0x1b67   :  { %3362 = vmatpush1.bf16.msra.mxu1 %v7901_v37  ;;  %3403 = vmatpush1.bf16.msra.mxu0 %v7902_v3 }
0x1b68   :  { %3363 = vmatprep.subr.bf16.mxu1 %v7903_v49  ;;  %3404 = vmatprep.subr.bf16.mxu0 %v7904_v15 }
0x1b6b   :  { %3364 = vmatpush1.bf16.msra.mxu1 %v7905_v26  ;;  %3405 = vmatpush1.bf16.msra.mxu0 %v7906_v16 }
0x1b6c   :  { %3365 = vmatprep.subr.bf16.mxu1 %v7907_v27  ;;  %3406 = vmatprep.subr.bf16.mxu0 %v7908_v28 }
0x1b6f   :  { %3366 = vmatpush1.bf16.msra.mxu1 %v7909_v7  ;;  %3407 = vmatpush1.bf16.msra.mxu0 %v7910_v30 }
0x1b70   :  { %3367 = vmatprep.subr.bf16.mxu1 %v7911_v35  ;;  %3408 = vmatprep.subr.bf16.mxu0 %v7912_v60 }
0x1b73   :  { %3368 = vmatpush2.bf16.msra.mxu1 %v7913_v22  ;;  %3409 = vmatpush2.bf16.msra.mxu0 %v7914_v23 }
0x1b74   :  { %3369 = vmatprep.subr.bf16.mxu1 %v7915_v25  ;;  %3410 = vmatprep.subr.bf16.mxu0 %v7916_v39  ;;  %v7941_v39 = vmov 0  }
0x1b77   :  { %3370 = vmatpush2.bf16.msra.mxu1 %v7917_v0  ;;  %3411 = vmatpush2.bf16.msra.mxu0 %v7918_v42  ;;  %v4188_v0 = vld [vmem:[#allocation7 + $0x74] ss:$8 sps:$4 sm:$0xff]   ;;  %v4186_v42 = vld [vmem:[#allocation7 + $0x70] ss:$8 sps:$4 sm:$0xff]  }
0x1b78   :  { %3371 = vmatprep.subr.bf16.mxu1 %v7919_v53  ;;  %3412 = vmatprep.subr.bf16.mxu0 %v7920_v11  ;;  %v4191_v53 = vld [vmem:[#allocation7 + $0x64] ss:$8 sps:$4 sm:$0xff]   ;;  %v4189_v11 = vld [vmem:[#allocation7 + $0x60] ss:$8 sps:$4 sm:$0xff]  }
0x1b7b   :  { %3372 = vmatpush2.bf16.msra.mxu1 %v7921_v33  ;;  %3413 = vmatpush2.bf16.msra.mxu0 %v7922_v51  ;;  %v4192_v33 = vld [vmem:[#allocation7 + $0x50] ss:$8 sps:$4 sm:$0xff]   ;;  %v4197_v51 = vld [vmem:[#allocation7 + $0x44] ss:$8 sps:$4 sm:$0xff]  }
0x1b7c   :  { %3373 = vmatprep.subr.bf16.mxu1 %v7923_v38  ;;  %3414 = vmatprep.subr.bf16.mxu0 %v7924_v57  ;;  %v4195_v38 = vld [vmem:[#allocation7 + $0x40] ss:$8 sps:$4 sm:$0xff]   ;;  %v4200_v57 = vld [vmem:[#allocation7 + $0x34] ss:$8 sps:$4 sm:$0xff]  }
0x1b7f   :  { %3374 = vmatpush2.bf16.msra.mxu1 %v7925_v4  ;;  %3415 = vmatpush2.bf16.msra.mxu0 %v7926_v8  ;;  %v4198_v4 = vld [vmem:[#allocation7 + $0x30] ss:$8 sps:$4 sm:$0xff]   ;;  %v4203_v8 = vld [vmem:[#allocation7 + $0x24] ss:$8 sps:$4 sm:$0xff]  }
0x1b80   :  { %3375 = vmatprep.subr.bf16.mxu1 %v7927_v29  ;;  %3416 = vmatprep.subr.bf16.mxu0 %v7928_v56  ;;  %v4201_v29 = vld [vmem:[#allocation7 + $0x20] ss:$8 sps:$4 sm:$0xff]   ;;  %v4204_v56 = vld [vmem:[#allocation7 + $0x10] ss:$8 sps:$4 sm:$0xff]  }
0x1b83   :  { %3376 = vmatpush2.bf16.msra.mxu1 %v7929_v52  ;;  %3417 = vmatpush2.bf16.msra.mxu0 %v7930_v13  ;;  %v4206_v52 = vld [vmem:[#allocation7 + $0x14] ss:$8 sps:$4 sm:$0xff]   ;;  %v4209_v13 = vld [vmem:[#allocation7 + $0x4] ss:$8 sps:$4 sm:$0xff]  }
0x1b84   :  { %3377 = vmatprep.subr.bf16.mxu1 %v7931_v46  ;;  %3418 = vmatprep.subr.bf16.mxu0 %v7932_v19  ;;  %v4207_v46 = vld [vmem:[#allocation7] ss:$8 sps:$4 sm:$0xff]  }
0x1b87   :  { %3378 = vmatpush2.bf16.msra.mxu1 %v7933_v44  ;;  %3419 = vmatpush2.bf16.msra.mxu0 %v7934_v32 }
0x1b88   :  { %3379 = vmatprep.subr.bf16.mxu1 %v7935_v45  ;;  %3420 = vmatprep.subr.bf16.mxu0 %v7936_v5 }
0x1b8b   :  { %3380 = vmatpush2.bf16.msra.mxu1 %v7937_v50  ;;  %3421 = vmatpush2.bf16.msra.mxu0 %v7938_v54 }
0x1b8c   :  { %3381 = vmatprep.subr.bf16.mxu1 %v7939_v20  ;;  %3422 = vmatprep.subr.bf16.mxu0 %v7940_v61 }
0x1b8f   :  { %3382 = vmatpush2.bf16.msra.mxu1 %v4800_v2  ;;  %3423 = vmatpush2.bf16.msra.mxu0 %v4801_v6 }
0x1b90   :  { %3552 = vmatprep.subr.bf16.mxu1 %v4188_v0 }
0x1c11   :  { %v3278_v12 = vpop.f32.mrf.mxu1  ;;  %v3319_v17 = vpop.f32.mrf.mxu0 }
0x1c12   :  { %v3279_v18 = vadd.f32 %v3278_v12, %v5520_v63  ;;  %v3320_v15 = vadd.f32 %v3319_v17, %v5528_v48 }
0x1c13   :  { %v3280_v36 = vpop.f32.mrf.mxu1  ;;  %v3321_v14 = vpop.f32.mrf.mxu0 }
0x1c14   :  { %v3900_v10 = vmul.f32 -1.442695, %v3279_v18  ;;  %v3281_v1 = vadd.f32 %v3280_v36, %v5524_v43  ;;  %v3322_v37 = vadd.f32 %v3321_v14, %v5532_v24 }
0x1c15   :  { %v3282_v55 = vpop.f32.mrf.mxu1  ;;  %v3323_v47 = vpop.f32.mrf.mxu0 }
0x1c16   :  { %4506 = vpow2.f32 %v3900_v10  ;;  %v3901_v62 = vmul.f32 -1.442695, %v3281_v1  ;;  %v3902_v3 = vmul.f32 -1.442695, %v3322_v37 }
0x1c17   :  { %v3283_v9 = vpop.f32.mrf.mxu1  ;;  %v3324_v21 = vpop.f32.mrf.mxu0 }
0x1c18   :  { %4508 = vpow2.f32 %v3901_v62 }
0x1c19   :  { %4510 = vpow2.f32 %v3902_v3 }
0x1c23   :  { %v4507_v49 = vpop.eup %4506 }
0x1c24   :  { %v3329_v26 = vadd.f32 1.0, %v4507_v49 }
0x1c25   :  { %v4509_v63 = vpop.eup %4508 }
0x1c26   :  { %4512 = vrcp.f32 %v3329_v26  ;;  %v3335_v16 = vadd.f32 1.0, %v4509_v63  ;;  %v4511_v43 = vpop.eup %4510 }
0x1c27   :  { %4514 = vtanh.f32 %v3320_v15  ;;  %v3342_v30 = vadd.f32 1.0, %v4511_v43  ;;  %v3458_v15 = vld [vmem:[#allocation4] sm:$0xff]  ;;  %v7942_v43 = vld [vmem:[#allocation11_spill] sm:$0xff] }
0x1c28   :  { %4516 = vrcp.f32 %v3335_v16  ;;  %v3679_v16 = vld [vmem:[%s6951_s4 + $0x2] ss:$4 sm:$0x3] }
0x1c29   :  { %4518 = vrcp.f32 %v3342_v30 }
0x1c33   :  { %v4513_v27 = vpop.eup %4512 }
0x1c34   :  { %v4515_v28 = vpop.eup %4514 }
0x1c35   :  { %v4517_v7 = vpop.eup %4516  ;;  %v3346_v35 = vmul.f32 %v4515_v28, %v4513_v27  ;;  %v3465_v27 = vrot.slane %v3679_v16, %v7942_v43  ;;  %v7943_v28 = vld [vmem:[#allocation12_spill] sm:$0xff] }
0x1c36   :  { %v3345_v60 = vmul.f32 %v4517_v7, %v6784_v41  ;;  %v4519_v22 = vpop.eup %4518  ;;  %v4194_v41 = vld [vmem:[#allocation7 + $0x54] ss:$8 sps:$4 sm:$0xff]   ;;  %v3469_v7 = vrot.slane %v3679_v16, %v7943_v28 }
0x1c38   :  { %v3347_v24 = vadd.f32 %v3346_v35, %v3345_v60 }
0x1c3a   :  { %4520 = vtanh.f32 %v3347_v24 }
0x1c47   :  { %v4521_v48 = vpop.eup %4520 }
0x1c48   :  { %v3349_v23 = vmul.f32 %v4521_v48, %v4519_v22 }
0x1c4a   :  { %v3350_v25 = vpack.c.bf16 %v3349_v23, %v3349_v23 }
0x1c4c   :  { %3384 = vmatmul.mubr.bf16.vlgmr.msra.gmra.mxu1 %v3350_v25  ;;  %3425 = vmatmul.mubr.bf16.vlgmr.msra.gmra.mxu0 %v3350_v25 }
0x1c4d   :  { %3584 = vmatprep.mubr.bf16.mxu1 %v7941_v39  ;;  %3553 = vmatpush1.bf16.msra.mxu1 %v4186_v42 }
0x1c4e   :  { %3554 = vmatprep.subr.bf16.mxu1 %v4191_v53 }
0x1c51   :  { %3555 = vmatpush1.bf16.msra.mxu1 %v4189_v11 }
0x1c52   :  { %3556 = vmatprep.subr.bf16.mxu1 %v4194_v41 }
0x1c55   :  { %3557 = vmatpush1.bf16.msra.mxu1 %v4192_v33 }
0x1c56   :  { %3558 = vmatprep.subr.bf16.mxu1 %v4197_v51 }
0x1c59   :  { %3559 = vmatpush1.bf16.msra.mxu1 %v4195_v38 }
0x1c5a   :  { %3560 = vmatprep.subr.bf16.mxu1 %v4200_v57 }
0x1c5d   :  { %3561 = vmatpush1.bf16.msra.mxu1 %v4198_v4 }
0x1c5e   :  { %3562 = vmatprep.subr.bf16.mxu1 %v4203_v8 }
0x1c61   :  { %3563 = vmatpush1.bf16.msra.mxu1 %v4201_v29 }
0x1c62   :  { %3564 = vmatprep.subr.bf16.mxu1 %v4206_v52 }
0x1c65   :  { %3565 = vmatpush1.bf16.msra.mxu1 %v4204_v56 }
0x1c66   :  { %3566 = vmatprep.subr.bf16.mxu1 %v4209_v13 }
0x1c69   :  { %3567 = vmatpush1.bf16.msra.mxu1 %v4207_v46 }
0x1d0c   :  { %v3385_v19 = vpop.f32.mrf.mxu1  ;;  %v3426_v44 = vpop.f32.mrf.mxu0 }
0x1d0d   :  { %v3386_v32 = vadd.f32 %v3385_v19, %v5610_v34  ;;  %v3427_v14 = vadd.f32 %v3426_v44, %v5622_v40 }
0x1d0e   :  { %v3387_v45 = vpop.f32.mrf.mxu1  ;;  %v3428_v5 = vpop.f32.mrf.mxu0 }
0x1d0f   :  { %v3903_v50 = vmul.f32 -1.442695, %v3386_v32  ;;  %v3388_v54 = vadd.f32 %v3387_v45, %v5613_v31  ;;  %v3429_v17 = vadd.f32 %v3428_v5, %v5618_v58 }
0x1d10   :  { %v3389_v20 = vpop.f32.mrf.mxu1  ;;  %v3430_v61 = vpop.f32.mrf.mxu0 }
0x1d11   :  { %4522 = vpow2.f32 %v3903_v50  ;;  %v3904_v2 = vmul.f32 -1.442695, %v3388_v54  ;;  %v3905_v18 = vmul.f32 -1.442695, %v3429_v17 }
0x1d12   :  { %v3390_v6 = vpop.f32.mrf.mxu1  ;;  %v3431_v12 = vpop.f32.mrf.mxu0 }
0x1d13   :  { %4524 = vpow2.f32 %v3904_v2 }
0x1d14   :  { %4526 = vpow2.f32 %v3905_v18 }
0x1d1e   :  { %v4523_v36 = vpop.eup %4522 }
0x1d1f   :  { %v3436_v10 = vadd.f32 1.0, %v4523_v36 }
0x1d20   :  { %v4525_v34 = vpop.eup %4524 }
0x1d21   :  { %4528 = vrcp.f32 %v3436_v10  ;;  %v3442_v1 = vadd.f32 1.0, %v4525_v34  ;;  %v4527_v31 = vpop.eup %4526 }
0x1d22   :  { %4530 = vtanh.f32 %v3427_v14  ;;  %v3449_v9 = vadd.f32 1.0, %v4527_v31 }
0x1d23   :  { %4532 = vrcp.f32 %v3442_v1 }
0x1d24   :  { %4534 = vrcp.f32 %v3449_v9 }
0x1d2e   :  { %v4529_v55 = vpop.eup %4528 }
0x1d2f   :  { %v4531_v47 = vpop.eup %4530 }
0x1d30   :  { %v4533_v62 = vpop.eup %4532  ;;  %v3453_v21 = vmul.f32 %v4531_v47, %v4529_v55 }
0x1d31   :  { %v3452_v37 = vmul.f32 %v4533_v62, %v6856_v59  ;;  %v4535_v3 = vpop.eup %4534 }
0x1d33   :  { %v3454_v58 = vadd.f32 %v3453_v21, %v3452_v37 }
0x1d35   :  { %4536 = vtanh.f32 %v3454_v58 }
0x1d42   :  { %v4537_v40 = vpop.eup %4536 }
0x1d43   :  { %v3456_v49 = vmul.f32 %v4537_v40, %v4535_v3 }
0x1d45   :  { %3457 = vst [vmem:[#allocation4 + $0xe] sm:$0x3] %v3456_v49 }
0x1d4c   :  { %v3459_v26 = vld [vmem:[#allocation4 + $0x8] sm:$0xff] }
0x1d4d   :  { %v3460_v63 = vpack.c.bf16 %v3459_v26, %v3458_v15 }
0x1d4f   :  { %3585 = vmatmul.mubr.bf16.vlgmr.msra.gmra.mxu1 %v3460_v63 }
0x1e0f   :  { %v3586_v59 = vpop.f32.mrf.mxu1 }
0x1e10   :  { %v3587_v30 = vadd.f32 %v3586_v59, %v3465_v27 }
0x1e11   :  { %v3588_v35 = vpop.f32.mrf.mxu1 }
0x1e12   :  { %3667 = vst [vmem:[%s6953_s6 + $0x8] sm:$0xff] %v3587_v30  ;;  %v3589_v60 = vadd.f32 %v3588_v35, %v3469_v7 }
0x1e13   :  { %v3590_v24 = vpop.f32.mrf.mxu1 }
0x1e14   :  { %v3603_v22 = vand.u32 2147483647, %v3589_v60  ;;  %v3591_v48 = vadd.f32 %v3590_v24, %v3465_v27  ;;  %v3599_v19 = vmax.f32 %v3589_v60, 0.0 }
0x1e15   :  { %v3592_v23 = vpop.f32.mrf.mxu1 }
0x1e16   :  { %v3607_v25 = vsub.f32 0.0, %v3603_v22  ;;  %3670 = vst [vmem:[%s6953_s6 + $0x20] sm:$0xff] %v3591_v48  ;;  %v3593_v39 = vadd.f32 %v3592_v23, %v3469_v7 }
0x1e18   :  { %v3612_v0 = vmul.f32 1.442695, %v3607_v25  ;;  %v3605_v42 = vand.u32 2147483647, %v3593_v39  ;;  %v3601_v61 = vmax.f32 %v3593_v39, 0.0 }
0x1e1a   :  { %4538 = vpow2.f32 %v3612_v0  ;;  %v3609_v53 = vsub.f32 0.0, %v3605_v42 }
0x1e1c   :  { %v3616_v11 = vmul.f32 1.442695, %v3609_v53 }
0x1e1e   :  { %4540 = vpow2.f32 %v3616_v11 }
0x1e27   :  { %v4539_v41 = vpop.eup %4538 }
0x1e28   :  { %v3627_v33 = vadd.f32 1.0, %v4539_v41  ;;  %v3630_v57 = vmul.f32 -0.5, %v4539_v41  ;;  %v3633_v29 = vand.u32 2147483647, %v4539_v41 }
0x1e2a   :  { %4542 = vlog2.f32 %v3627_v33  ;;  %v3631_v4 = vadd.f32 1.0, %v3630_v57  ;;  %vm3634_vm13 = vcmp.lt.f32.partialorder %v3633_v29, 0.0004427343 }
0x1e2b   :  { %v4541_v51 = vpop.eup %4540 }
0x1e2c   :  { %v3645_v38 = vadd.f32 1.0, %v4541_v51  ;;  %v3648_v8 = vmul.f32 -0.5, %v4541_v51  ;;  %v3632_v13 = vmul.f32 %v4539_v41, %v3631_v4  ;;  %v3651_v44 = vand.u32 2147483647, %v4541_v51 }
0x1e2e   :  { %4544 = vlog2.f32 %v3645_v38  ;;  %v3649_v46 = vadd.f32 1.0, %v3648_v8  ;;  %vm3652_vm14 = vcmp.lt.f32.partialorder %v3651_v44, 0.0004427343 }
0x1e30   :  { %v3650_v54 = vmul.f32 %v4541_v51, %v3649_v46 }
0x1e37   :  { %v4543_v56 = vpop.eup %4542 }
0x1e38   :  { %v3629_v52 = vmul.f32 0.6931472, %v4543_v56 }
0x1e3a   :  { %v3635_v32 = vsel %vm3634_vm13, %v3632_v13, %v3629_v52 }
0x1e3b   :  { %v4545_v45 = vpop.eup %4544  ;;  %v3655_v5 = vadd.f32 %v3635_v32, %v3599_v19 }
0x1e3c   :  { %v3647_v50 = vmul.f32 0.6931472, %v4545_v45 }
0x1e3d   :  { %v3659_v20 = vadd.f32 1.1920929e-07, %v3655_v5 }
0x1e3e   :  { %v3653_v2 = vsel %vm3652_vm14, %v3650_v54, %v3647_v50 }
0x1e3f   :  { %3668 = vst [vmem:[%s6953_s6 + $0x10] sm:$0xff] %v3659_v20  ;;  %v3657_v6 = vadd.f32 %v3653_v2, %v3601_v61 }
0x1e41   :  { %v3661_v12 = vadd.f32 1.1920929e-07, %v3657_v6 }
0x1e43   :  { %3671 = vst [vmem:[%s6953_s6 + $0x28] sm:$0xff] %v3661_v12 }
0x1e44   :  { %3676 = vsyncpa [#allocation6], 1 }
0x1e45   :  { %3677 = vsyncpa [#allocation8], 1 }

</bundles_post_ra>
